<compile_context>
chip_gen: v7x
topology: tpu7x:2x2x1
jax: 0.10.0
libtpu: 0.0.40
codegen_flags: <defaults>
</compile_context>

<pallas_src>
import functools

import jax
import jax.numpy as jnp
from jax import lax
from jax.experimental import pallas as pl
from jax.experimental.pallas import tpu as pltpu


# ------------------------------ helpers -------------------------------------


def _cout_tile(c):
    # TODO(synk): prefer 128 on v5e (128-wide MXU) when per-step VMEM is tight.
    if c % 256 == 0:
        return 256
    if c % 128 == 0:
        return 128
    return c


def _row_chunk(hp, wp, c, target_bytes=4 << 20):
    """Largest divisor of hp whose (rh, wp, c) f32 chunk stays under target."""
    best = 1
    for rh in range(1, hp + 1):
        if hp % rh == 0 and rh * wp * c * 4 <= target_bytes:
            best = rh
    return best


def _vmem_limit(block_bytes, live_bytes=0):
    """Double-buffered DMA blocks + live in-kernel intermediates + headroom."""
    need = 2 * sum(block_bytes) + live_bytes + (4 << 20)
    try:
        cap = int(getattr(pltpu.get_tpu_info(), "vmem_capacity_bytes", 128 << 20))
    except Exception:
        cap = 128 << 20
    return int(min(max(need, 16 << 20), (cap * 7) // 8))


def _gn_scale_shift(s, ss, gamma, beta, num_groups, count, eps):
    """Fold one-pass GN stats + affine into per-(batch, channel) scale/shift."""
    n = s.shape[0]
    c = s.shape[-1]
    gc = c // num_groups
    sg = s.reshape(n, num_groups, gc).sum(-1)
    ssg = ss.reshape(n, num_groups, gc).sum(-1)
    mean = sg / count
    var = jnp.maximum(ssg / count - mean * mean, 0.0)      # clamp: no NaN rsqrt
    r = lax.rsqrt(var + eps)                               # (N, G)
    mean_c = jnp.repeat(mean, gc, axis=-1)                 # (N, C)
    r_c = jnp.repeat(r, gc, axis=-1)
    scale = gamma[None, :] * r_c
    shift = beta[None, :] - mean_c * scale
    return (scale.reshape(n, 1, c).astype(jnp.float32),
            shift.reshape(n, 1, c).astype(jnp.float32))


# ----------------------------- Pallas kernels --------------------------------


def channel_sums_kernel(x_ref, s_ref, ss_ref):
    # Accumulate per-(batch, channel) sum / sum-of-squares across row chunks.
    @pl.when(pl.program_id(1) == 0)
    def _():
        s_ref[...] = jnp.zeros_like(s_ref)
        ss_ref[...] = jnp.zeros_like(ss_ref)

    c = x_ref.shape[-1]
    x = x_ref[0].astype(jnp.float32).reshape(-1, c)        # (RH*Wp, C)
    s_ref[0] += jnp.sum(x, axis=0, keepdims=True)
    ss_ref[0] += jnp.sum(x * x, axis=0, keepdims=True)


def _norm_act_conv3x3(x_ref, scale_ref, shift_ref, w_ref, b_ref, *, H, W):
    """GN-affine + SiLU + 3x3 SAME conv on one zero-padded (H+2, W+2, Cin) tile.

    Returns the (H*W, Cout_tile) float32 conv output (bias included)."""
    cin = x_ref.shape[-1]
    tc = w_ref.shape[-1]
    x = x_ref[0].astype(jnp.float32)                        # (H+2, W+2, Cin)
    a = scale_ref[0].reshape(1, 1, cin)                     # GN scale (per b,c)
    s = shift_ref[0].reshape(1, 1, cin)                     # GN shift (per b,c)
    y = x * a + s
    y = y * jax.nn.sigmoid(y)                               # SiLU
    # Conv zero-padding happens AFTER GN+SiLU in the reference module: re-zero
    # the halo ring with an in-kernel iota mask (NaN-safe select, no HBM mask).
    row = lax.broadcasted_iota(jnp.int32, y.shape, 0)
    col = lax.broadcasted_iota(jnp.int32, y.shape, 1)
    interior = (row >= 1) & (row <= H) & (col >= 1) & (col <= W)
    y = jnp.where(interior, y, 0.0).astype(jnp.bfloat16)    # bf16 MXU operand

    if cin < 256:
        # im2col: one K = 9*Cin dot -- fills the MXU for small Cin and removes
        # the 8 per-tap f32 accumulate adds on the VPU.
        patches = [y[dy:dy + H, dx:dx + W, :].reshape(H * W, cin)
                   for dy in range(3) for dx in range(3)]
        acc = lax.dot_general(jnp.concatenate(patches, axis=-1), w_ref[...],
                              (((1,), (0,)), ((), ())),
                              preferred_element_type=jnp.float32)
    else:
        # TODO(synk): use pltpu.roll for the dx=1,2 taps (XLU) instead of
        # unaligned sublane-start slices.
        acc = jnp.zeros((H * W, tc), jnp.float32)
        for t in range(9):
            dy, dx = divmod(t, 3)
            patch = y[dy:dy + H, dx:dx + W, :].reshape(H * W, cin)
            w_t = w_ref[t * cin:(t + 1) * cin, :]           # (Cin, tc) bf16
            acc = acc + lax.dot_general(patch, w_t, (((1,), (0,)), ((), ())),
                                        preferred_element_type=jnp.float32)
    return acc + b_ref[...].astype(jnp.float32)


def conv1_kernel(x_ref, scale_ref, shift_ref, w_ref, b_ref,
                 hp_ref, s_ref, ss_ref, *, H, W):
    h = _norm_act_conv3x3(x_ref, scale_ref, shift_ref, w_ref, b_ref, H=H, W=W)
    # Per-channel sums of the f32 h -> GroupNorm2 needs no extra tensor pass.
    s_ref[0] = jnp.sum(h, axis=0, keepdims=True)
    ss_ref[0] = jnp.sum(h * h, axis=0, keepdims=True)
    tc = hp_ref.shape[-1]
    # Single aligned full-block store of the zero-padded bf16 intermediate.
    hp_ref[0] = jnp.pad(h.reshape(H, W, tc).astype(hp_ref.dtype),
                        ((1, 1), (1, 1), (0, 0)))


def conv2_proj_kernel(hp_ref, scale_ref, shift_ref, w_ref, b_ref,
                      xp_ref, wr_ref, br_ref, o_ref, *, H, W):
    h = _norm_act_conv3x3(hp_ref, scale_ref, shift_ref, w_ref, b_ref, H=H, W=W)
    cres = xp_ref.shape[-1]
    tc = o_ref.shape[-1]
    # 1x1 residual conv fused into the epilogue (interior of the padded x tile).
    xr = xp_ref[0, 1:H + 1, 1:W + 1, :].reshape(H * W, cres).astype(jnp.bfloat16)
    res = lax.dot_general(xr, wr_ref[...], (((1,), (0,)), ((), ())),
                          preferred_element_type=jnp.float32)
    res = res + br_ref[...].astype(jnp.float32)
    o_ref[0] = (h + res).reshape(H, W, tc).astype(o_ref.dtype)


def conv2_id_kernel(hp_ref, scale_ref, shift_ref, w_ref, b_ref,
                    xp_ref, o_ref, *, H, W):
    h = _norm_act_conv3x3(hp_ref, scale_ref, shift_ref, w_ref, b_ref, H=H, W=W)
    tc = o_ref.shape[-1]
    xr = xp_ref[0, 1:H + 1, 1:W + 1, :].reshape(H * W, tc).astype(jnp.float32)
    o_ref[0] = (h + xr).reshape(H, W, tc).astype(o_ref.dtype)


# ------------------------------- wrappers ------------------------------------


def channel_sums(xp):
    """Per-(batch, channel) sum / sum-of-squares of a padded NHWC tensor,
    tiled over spatial row chunks (accumulated across the 'arbitrary' axis)."""
    N, Hp, Wp, C = xp.shape
    RH = _row_chunk(Hp, Wp, C)
    return pl.pallas_call(
        channel_sums_kernel,
        out_shape=(jax.ShapeDtypeStruct((N, 1, C), jnp.float32),
                   jax.ShapeDtypeStruct((N, 1, C), jnp.float32)),
        grid=(N, Hp // RH),
        in_specs=[pl.BlockSpec((1, RH, Wp, C), lambda n, r: (n, r, 0, 0))],
        out_specs=(pl.BlockSpec((1, 1, C), lambda n, r: (n, 0, 0)),
                   pl.BlockSpec((1, 1, C), lambda n, r: (n, 0, 0))),
        compiler_params=pltpu.CompilerParams(
            dimension_semantics=("parallel", "arbitrary"),
            vmem_limit_bytes=_vmem_limit([RH * Wp * C * 4, 2 * C * 4])),
    )(xp)


def gn_silu_conv3x3(xp, scale, shift, w_flat, b):
    """Fused GN-affine + SiLU + 3x3 conv on a zero-padded NHWC tensor.

    Returns (bf16 zero-padded h, per-channel sum of h, per-channel sum of h^2)."""
    N, Hp, Wp, Cin = xp.shape
    H, W = Hp - 2, Wp - 2
    Cout = w_flat.shape[-1]
    TC = _cout_tile(Cout)
    kern = functools.partial(conv1_kernel, H=H, W=W)
    blocks = [Hp * Wp * Cin * 4, 2 * Cin * 4, 9 * Cin * TC * 2, TC * 4,
              Hp * Wp * TC * 2, 2 * TC * 4]
    live = Hp * Wp * Cin * 2 + H * W * 9 * Cin * 2 + H * W * TC * 4
    return pl.pallas_call(
        kern,
        out_shape=(jax.ShapeDtypeStruct((N, Hp, Wp, Cout), jnp.bfloat16),
                   jax.ShapeDtypeStruct((N, 1, Cout), jnp.float32),
                   jax.ShapeDtypeStruct((N, 1, Cout), jnp.float32)),
        grid=(N, Cout // TC),          # N leading: megacore splits batch.
        in_specs=[
            pl.BlockSpec((1, Hp, Wp, Cin), lambda n, c: (n, 0, 0, 0)),
            pl.BlockSpec((1, 1, Cin), lambda n, c: (n, 0, 0)),
            pl.BlockSpec((1, 1, Cin), lambda n, c: (n, 0, 0)),
            pl.BlockSpec((9 * Cin, TC), lambda n, c: (0, c)),
            pl.BlockSpec((1, TC), lambda n, c: (0, c)),
        ],
        out_specs=(
            pl.BlockSpec((1, Hp, Wp, TC), lambda n, c: (n, 0, 0, c)),
            pl.BlockSpec((1, 1, TC), lambda n, c: (n, 0, c)),
            pl.BlockSpec((1, 1, TC), lambda n, c: (n, 0, c)),
        ),
        compiler_params=pltpu.CompilerParams(
            dimension_semantics=("parallel", "parallel"),
            vmem_limit_bytes=_vmem_limit(blocks, live)),
    )(xp, scale, shift, w_flat, b.reshape(1, Cout).astype(jnp.float32))


def gn_silu_conv3x3_residual(hp, scale, shift, w_flat, b, xp, wr, br, out_dtype):
    """Fused GN-affine + SiLU + 3x3 conv + (1x1 | identity) residual + add."""
    N, Hp, Wp, Cmid = hp.shape
    H, W = Hp - 2, Wp - 2
    Cout = w_flat.shape[-1]
    TC = _cout_tile(Cout)
    Cres = xp.shape[-1]
    in_specs = [
        pl.BlockSpec((1, Hp, Wp, Cmid), lambda n, c: (n, 0, 0, 0)),
        pl.BlockSpec((1, 1, Cmid), lambda n, c: (n, 0, 0)),
        pl.BlockSpec((1, 1, Cmid), lambda n, c: (n, 0, 0)),
        pl.BlockSpec((9 * Cmid, TC), lambda n, c: (0, c)),
        pl.BlockSpec((1, TC), lambda n, c: (0, c)),
    ]
    blocks = [Hp * Wp * Cmid * 2, 2 * Cmid * 4, 9 * Cmid * TC * 2, TC * 4,
              H * W * TC * 4]
    live = Hp * Wp * Cmid * 2 + H * W * 9 * Cmid * 2 + H * W * TC * 4
    if wr is not None:
        kern = functools.partial(conv2_proj_kernel, H=H, W=W)
        in_specs += [pl.BlockSpec((1, Hp, Wp, Cres), lambda n, c: (n, 0, 0, 0)),
                     pl.BlockSpec((Cres, TC), lambda n, c: (0, c)),
                     pl.BlockSpec((1, TC), lambda n, c: (0, c))]
        args = (hp, scale, shift, w_flat, b.reshape(1, Cout).astype(jnp.float32),
                xp, wr, br.reshape(1, Cout).astype(jnp.float32))
        blocks += [Hp * Wp * Cres * 4, Cres * TC * 2, TC * 4]
    else:
        kern = functools.partial(conv2_id_kernel, H=H, W=W)
        in_specs += [pl.BlockSpec((1, Hp, Wp, TC), lambda n, c: (n, 0, 0, c))]
        args = (hp, scale, shift, w_flat, b.reshape(1, Cout).astype(jnp.float32),
                xp)
        blocks += [Hp * Wp * TC * 4]
    return pl.pallas_call(
        kern,
        out_shape=jax.ShapeDtypeStruct((N, H, W, Cout), out_dtype),
        grid=(N, Cout // TC),          # N leading: megacore splits batch.
        in_specs=in_specs,
        out_specs=pl.BlockSpec((1, H, W, TC), lambda n, c: (n, 0, 0, c)),
        compiler_params=pltpu.CompilerParams(
            dimension_semantics=("parallel", "parallel"),
            vmem_limit_bytes=_vmem_limit(blocks, live)),
    )(*args)


def resnet_block_forward(x_nchw, params, *, num_groups, eps=1e-5):
    """Pallas ResnetBlock forward. Input/output NCHW, like PyTorch."""
    N, Cin, H, W = x_nchw.shape
    Cout = params["w1"].shape[-1]
    assert Cin % num_groups == 0 and Cout % num_groups == 0

    # NCHW -> NHWC plus the conv zero-padding in one XLA copy.
    # TODO(synk): if the surrounding model runs NHWC, keep activations NHWC
    # between blocks and drop this transpose + the final one (2 HBM passes).
    xp = jnp.pad(jnp.transpose(x_nchw, (0, 2, 3, 1)).astype(jnp.float32),
                 ((0, 0), (1, 1), (1, 1), (0, 0)))

    # GN1 statistics (the zero padding does not perturb sum / sum-of-squares).
    s1, ss1 = channel_sums(xp)
    scale1, shift1 = _gn_scale_shift(s1, ss1, params["gn1_g"], params["gn1_b"],
                                     num_groups, (Cin // num_groups) * H * W, eps)

    # Fused GN1 + SiLU + conv1 (+ per-channel sums of h for GN2); hp is bf16.
    w1 = params["w1"].reshape(9 * Cin, Cout).astype(jnp.bfloat16)
    hp, s2, ss2 = gn_silu_conv3x3(xp, scale1, shift1, w1, params["b1"])
    # TODO(synk): nn.Dropout(p=0) in eval mode is the identity; no RNG masking.

    scale2, shift2 = _gn_scale_shift(s2, ss2, params["gn2_g"], params["gn2_b"],
                                     num_groups, (Cout // num_groups) * H * W, eps)

    # Fused GN2 + SiLU + conv2 + residual(1x1 or identity) + add.
    w2 = params["w2"].reshape(9 * Cout, Cout).astype(jnp.bfloat16)
    wr = params.get("wr")
    wr = None if wr is None else wr.astype(jnp.bfloat16)
    out = gn_silu_conv3x3_residual(hp, scale2, shift2, w2, params["b2"],
                                   xp, wr, params.get("br"), x_nchw.dtype)
    return jnp.transpose(out, (0, 3, 1, 2))


# --------------------------- pure-JAX reference -------------------------------


def ref_forward(x_nchw, params, *, num_groups, eps=1e-5):
    # CPU/interpret-safe reference: conv operands rounded to bf16, convs in f32
    # (mirrors the kernel's bf16-operand / f32-accumulate MXU path without
    # emitting bf16 x bf16 dots that the CPU DotThunk rejects).
    def bf16_round(v):
        return v.astype(jnp.bfloat16).astype(jnp.float32)

    def gn_silu(x, g, b):
        N, C, H, W = x.shape
        xg = x.reshape(N, num_groups, -1)
        m = xg.mean(-1, keepdims=True)
        v = ((xg - m) ** 2).mean(-1, keepdims=True)
        xn = ((xg - m) / jnp.sqrt(v + eps)).reshape(N, C, H, W)
        y = xn * g[None, :, None, None] + b[None, :, None, None]
        return y * jax.nn.sigmoid(y)

    def conv(x, w_hwio, b):
        y = lax.conv_general_dilated(
            bf16_round(x), bf16_round(w_hwio), (1, 1), "SAME",
            dimension_numbers=("NCHW", "HWIO", "NCHW"))
        return y + b[None, :, None, None]

    h = conv(gn_silu(x_nchw, params["gn1_g"], params["gn1_b"]),
             params["w1"], params["b1"])
    h = conv(gn_silu(h, params["gn2_g"], params["gn2_b"]),
             params["w2"], params["b2"])
    if params.get("wr") is not None:
        res = jnp.einsum("nchw,co->nohw", bf16_round(x_nchw),
                         bf16_round(params["wr"]))
        res = res + params["br"][None, :, None, None]
    else:
        res = x_nchw
    return res + h


# ------------------------------------ main ------------------------------------


if __name__ == "__main__":
    N, Cin, Cout, H, W = 2, 8, 16, 16, 16
    num_groups = 4           # ResnetBlock(group_channel=4)
    eps = 1e-5

    key = jax.random.PRNGKey(0)
    ks = jax.random.split(key, 12)
    params = {
        "gn1_g": jax.random.normal(ks[0], (Cin,), jnp.float32) * 0.5 + 1.0,
        "gn1_b": jax.random.normal(ks[1], (Cin,), jnp.float32) * 0.1,
        "w1":    jax.random.normal(ks[2], (3, 3, Cin, Cout), jnp.float32) * 0.1,   # HWIO
        "b1":    jax.random.normal(ks[3], (Cout,), jnp.float32) * 0.1,
        "gn2_g": jax.random.normal(ks[4], (Cout,), jnp.float32) * 0.5 + 1.0,
        "gn2_b": jax.random.normal(ks[5], (Cout,), jnp.float32) * 0.1,
        "w2":    jax.random.normal(ks[6], (3, 3, Cout, Cout), jnp.float32) * 0.1,  # HWIO
        "b2":    jax.random.normal(ks[7], (Cout,), jnp.float32) * 0.1,
        "wr":    jax.random.normal(ks[8], (Cin, Cout), jnp.float32) * 0.1,         # 1x1 conv
        "br":    jax.random.normal(ks[9], (Cout,), jnp.float32) * 0.1,
    }
    x = jax.random.normal(ks[10], (N, Cin, H, W), jnp.float32)

    fwd = jax.jit(functools.partial(resnet_block_forward,
                                    num_groups=num_groups, eps=eps))
    ref = jax.jit(functools.partial(ref_forward, num_groups=num_groups, eps=eps))

    out = jax.block_until_ready(fwd(x, params))
    expect = jax.block_until_ready(ref(x, params))
    assert out.shape == (N, Cout, H, W), out.shape
    diff = jnp.abs(out - expect)
    assert float(jnp.max(diff)) < 5e-2, float(jnp.max(diff))
    assert float(jnp.mean(diff)) < 3e-3, float(jnp.mean(diff))

    # Identity-residual variant (in_channels == out_channels).
    params_id = {
        "gn1_g": params["gn2_g"], "gn1_b": params["gn2_b"],
        "w1": params["w2"], "b1": params["b2"],
        "gn2_g": params["gn2_g"], "gn2_b": params["gn2_b"],
        "w2": params["w2"], "b2": params["b2"],
    }
    x2 = jax.random.normal(ks[11], (N, Cout, H, W), jnp.float32)
    out2 = jax.block_until_ready(fwd(x2, params_id))
    expect2 = jax.block_until_ready(ref(x2, params_id))
    diff2 = jnp.abs(out2 - expect2)
    assert float(jnp.max(diff2)) < 5e-2, float(jnp.max(diff2))
    assert float(jnp.mean(diff2)) < 3e-3, float(jnp.mean(diff2))

    print("KERNEL_OK")
</pallas_src>

<mosaic_0001>
module attributes {stable_mosaic.version = 11 : i64} {
  func.func @channel_sums_kernel(%arg0: i32, %arg1: i32, %arg2: memref<1x18x18x8xf32, #tpu.memory_space<vmem>>, %arg3: memref<1x1x8xf32, #tpu.memory_space<vmem>>, %arg4: memref<1x1x8xf32, #tpu.memory_space<vmem>>) attributes {dimension_semantics = [#tpu.dimension_semantics<parallel>, #tpu.dimension_semantics<arbitrary>], iteration_bounds = array<i64: 2, 1>, scalar_prefetch = 0 : i64, scratch_operands = 0 : i64, tpu.core_type = #tpu.core_type<tc>, window_params = [{transform_indices = @transform_0, window_bounds = array<i64: 1, 18, 18, 8>}, {transform_indices = @transform_1, window_bounds = array<i64: 1, 1, 8>}, {transform_indices = @transform_2, window_bounds = array<i64: 1, 1, 8>}]} {
    %c0_i32 = arith.constant 0 : i32
    %0 = arith.cmpi eq, %arg1, %c0_i32 : i32
    %1 = arith.extui %0 : i1 to i32
    %c0_i32_0 = arith.constant 0 : i32
    %2 = arith.cmpi ne, %1, %c0_i32_0 : i32
    scf.if %2 {
      %cst_17 = arith.constant 0.000000e+00 : f32
      %23 = vector.broadcast %cst_17 : f32 to vector<1x1x8xf32>
      %c0_18 = arith.constant 0 : index
      %c0_19 = arith.constant 0 : index
      %c0_20 = arith.constant 0 : index
      %24 = vector.load %arg3[%c0_18, %c0_19, %c0_20] : memref<1x1x8xf32, #tpu.memory_space<vmem>>, vector<1x1x8xf32>
      tpu.vector_store %arg3[%c0_18, %c0_19, %c0_20], %23 {strides = array<i32>} : memref<1x1x8xf32, #tpu.memory_space<vmem>>, vector<1x1x8xf32>,
      %cst_21 = arith.constant 0.000000e+00 : f32
      %25 = vector.broadcast %cst_21 : f32 to vector<1x1x8xf32>
      %c0_22 = arith.constant 0 : index
      %c0_23 = arith.constant 0 : index
      %c0_24 = arith.constant 0 : index
      %26 = vector.load %arg4[%c0_22, %c0_23, %c0_24] : memref<1x1x8xf32, #tpu.memory_space<vmem>>, vector<1x1x8xf32>
      tpu.vector_store %arg4[%c0_22, %c0_23, %c0_24], %25 {strides = array<i32>} : memref<1x1x8xf32, #tpu.memory_space<vmem>>, vector<1x1x8xf32>,
    } else {
    }
    %c0 = arith.constant 0 : index
    %c0_1 = arith.constant 0 : index
    %c0_2 = arith.constant 0 : index
    %c0_3 = arith.constant 0 : index
    %3 = vector.load %arg2[%c0, %c0_1, %c0_2, %c0_3] : memref<1x18x18x8xf32, #tpu.memory_space<vmem>>, vector<1x18x18x8xf32>
    %4 = vector.shape_cast %3 : vector<1x18x18x8xf32> to vector<18x18x8xf32>
    %5 = vector.shape_cast %4 : vector<18x18x8xf32> to vector<324x8xf32>
    %c0_4 = arith.constant 0 : index
    %c0_5 = arith.constant 0 : index
    %c0_6 = arith.constant 0 : index
    %6 = vector.load %arg3[%c0_4, %c0_5, %c0_6] : memref<1x1x8xf32, #tpu.memory_space<vmem>>, vector<1x1x8xf32>
    %7 = vector.shape_cast %6 : vector<1x1x8xf32> to vector<1x8xf32>
    %cst = arith.constant dense<0.000000e+00> : vector<8xf32>
    %8 = vector.multi_reduction <add>, %5, %cst [0] : vector<324x8xf32> to vector<8xf32>
    %9 = vector.shape_cast %8 : vector<8xf32> to vector<1x8xf32>
    %10 = arith.addf %7, %9 : vector<1x8xf32>
    %c0_7 = arith.constant 0 : index
    %c0_8 = arith.constant 0 : index
    %c0_9 = arith.constant 0 : index
    %11 = vector.load %arg3[%c0_7, %c0_8, %c0_9] : memref<1x1x8xf32, #tpu.memory_space<vmem>>, vector<1x1x8xf32>
    %12 = vector.shape_cast %11 : vector<1x1x8xf32> to vector<1x8xf32>
    %13 = vector.shape_cast %10 : vector<1x8xf32> to vector<1x1x8xf32>
    tpu.vector_store %arg3[%c0_7, %c0_8, %c0_9], %13 {strides = array<i32>} : memref<1x1x8xf32, #tpu.memory_space<vmem>>, vector<1x1x8xf32>,
    %c0_10 = arith.constant 0 : index
    %c0_11 = arith.constant 0 : index
    %c0_12 = arith.constant 0 : index
    %14 = vector.load %arg4[%c0_10, %c0_11, %c0_12] : memref<1x1x8xf32, #tpu.memory_space<vmem>>, vector<1x1x8xf32>
    %15 = vector.shape_cast %14 : vector<1x1x8xf32> to vector<1x8xf32>
    %16 = arith.mulf %5, %5 : vector<324x8xf32>
    %cst_13 = arith.constant dense<0.000000e+00> : vector<8xf32>
    %17 = vector.multi_reduction <add>, %16, %cst_13 [0] : vector<324x8xf32> to vector<8xf32>
    %18 = vector.shape_cast %17 : vector<8xf32> to vector<1x8xf32>
    %19 = arith.addf %15, %18 : vector<1x8xf32>
    %c0_14 = arith.constant 0 : index
    %c0_15 = arith.constant 0 : index
    %c0_16 = arith.constant 0 : index
    %20 = vector.load %arg4[%c0_14, %c0_15, %c0_16] : memref<1x1x8xf32, #tpu.memory_space<vmem>>, vector<1x1x8xf32>
    %21 = vector.shape_cast %20 : vector<1x1x8xf32> to vector<1x8xf32>
    %22 = vector.shape_cast %19 : vector<1x8xf32> to vector<1x1x8xf32>
    tpu.vector_store %arg4[%c0_14, %c0_15, %c0_16], %22 {strides = array<i32>} : memref<1x1x8xf32, #tpu.memory_space<vmem>>, vector<1x1x8xf32>,
    return
  }
  func.func @transform_0(%arg0: i32, %arg1: i32) -> (i32, i32, i32, i32) {
    %c0_i32 = arith.constant 0 : i32
    %c0_i32_0 = arith.constant 0 : i32
    %c0_i32_1 = arith.constant 0 : i32
    return %arg0, %arg1, %c0_i32, %c0_i32_0 : i32, i32, i32, i32
  }
  func.func @transform_1(%arg0: i32, %arg1: i32) -> (i32, i32, i32) {
    %c0_i32 = arith.constant 0 : i32
    %c0_i32_0 = arith.constant 0 : i32
    %c0_i32_1 = arith.constant 0 : i32
    return %arg0, %c0_i32, %c0_i32_0 : i32, i32, i32
  }
  func.func @transform_2(%arg0: i32, %arg1: i32) -> (i32, i32, i32) {
    %c0_i32 = arith.constant 0 : i32
    %c0_i32_0 = arith.constant 0 : i32
    %c0_i32_1 = arith.constant 0 : i32
    return %arg0, %c0_i32, %c0_i32_0 : i32, i32, i32
  }
}

module attributes {stable_mosaic.version = 11 : i64} {
  func.func @conv1_kernel(%arg0: i32, %arg1: i32, %arg2: memref<1x18x18x8xf32, #tpu.memory_space<vmem>>, %arg3: memref<1x1x8xf32, #tpu.memory_space<vmem>>, %arg4: memref<1x1x8xf32, #tpu.memory_space<vmem>>, %arg5: memref<72x16xbf16, #tpu.memory_space<vmem>>, %arg6: memref<1x16xf32, #tpu.memory_space<vmem>>, %arg7: memref<1x18x18x16xbf16, #tpu.memory_space<vmem>>, %arg8: memref<1x1x16xf32, #tpu.memory_space<vmem>>, %arg9: memref<1x1x16xf32, #tpu.memory_space<vmem>>) attributes {dimension_semantics = [#tpu.dimension_semantics<parallel>, #tpu.dimension_semantics<parallel>], iteration_bounds = array<i64: 2, 1>, scalar_prefetch = 0 : i64, scratch_operands = 0 : i64, tpu.core_type = #tpu.core_type<tc>, window_params = [{transform_indices = @transform_0, window_bounds = array<i64: 1, 18, 18, 8>}, {transform_indices = @transform_1, window_bounds = array<i64: 1, 1, 8>}, {transform_indices = @transform_2, window_bounds = array<i64: 1, 1, 8>}, {transform_indices = @transform_3, window_bounds = array<i64: 72, 16>}, {transform_indices = @transform_4, window_bounds = array<i64: 1, 16>}, {transform_indices = @transform_5, window_bounds = array<i64: 1, 18, 18, 16>}, {transform_indices = @transform_6, window_bounds = array<i64: 1, 1, 16>}, {transform_indices = @transform_7, window_bounds = array<i64: 1, 1, 16>}]} {
    %c0 = arith.constant 0 : index
    %c0_0 = arith.constant 0 : index
    %c0_1 = arith.constant 0 : index
    %c0_2 = arith.constant 0 : index
    %0 = vector.load %arg2[%c0, %c0_0, %c0_1, %c0_2] : memref<1x18x18x8xf32, #tpu.memory_space<vmem>>, vector<1x18x18x8xf32>
    %1 = vector.shape_cast %0 : vector<1x18x18x8xf32> to vector<18x18x8xf32>
    %c0_3 = arith.constant 0 : index
    %c0_4 = arith.constant 0 : index
    %c0_5 = arith.constant 0 : index
    %2 = vector.load %arg3[%c0_3, %c0_4, %c0_5] : memref<1x1x8xf32, #tpu.memory_space<vmem>>, vector<1x1x8xf32>
    %3 = vector.shape_cast %2 : vector<1x1x8xf32> to vector<1x8xf32>
    %4 = vector.shape_cast %3 : vector<1x8xf32> to vector<1x1x8xf32>
    %c0_6 = arith.constant 0 : index
    %c0_7 = arith.constant 0 : index
    %c0_8 = arith.constant 0 : index
    %5 = vector.load %arg4[%c0_6, %c0_7, %c0_8] : memref<1x1x8xf32, #tpu.memory_space<vmem>>, vector<1x1x8xf32>
    %6 = vector.shape_cast %5 : vector<1x1x8xf32> to vector<1x8xf32>
    %7 = vector.shape_cast %6 : vector<1x8xf32> to vector<1x1x8xf32>
    %8 = vector.broadcast %4 : vector<1x1x8xf32> to vector<18x18x8xf32>
    %9 = arith.mulf %1, %8 : vector<18x18x8xf32>
    %10 = vector.broadcast %7 : vector<1x1x8xf32> to vector<18x18x8xf32>
    %11 = arith.addf %9, %10 : vector<18x18x8xf32>
    %12 = arith.negf %11 : vector<18x18x8xf32>
    %13 = math.exp %12 : vector<18x18x8xf32>
    %cst = arith.constant 1.000000e+00 : f32
    %14 = vector.broadcast %cst : f32 to vector<18x18x8xf32>
    %15 = arith.addf %14, %13 : vector<18x18x8xf32>
    %16 = arith.divf %14, %15 : vector<18x18x8xf32>
    %17 = arith.mulf %11, %16 : vector<18x18x8xf32>
    %18 = tpu.iota {dimensions = array<i32: 0>} : vector<18x18x8xi32>
    %19 = tpu.iota {dimensions = array<i32: 1>} : vector<18x18x8xi32>
    %c1_i32 = arith.constant 1 : i32
    %20 = vector.broadcast %c1_i32 : i32 to vector<18x18x8xi32>
    %21 = arith.cmpi sge, %18, %20 : vector<18x18x8xi32>
    %c16_i32 = arith.constant 16 : i32
    %22 = vector.broadcast %c16_i32 : i32 to vector<18x18x8xi32>
    %23 = arith.cmpi sle, %18, %22 : vector<18x18x8xi32>
    %24 = arith.andi %21, %23 : vector<18x18x8xi1>
    %c1_i32_9 = arith.constant 1 : i32
    %25 = vector.broadcast %c1_i32_9 : i32 to vector<18x18x8xi32>
    %26 = arith.cmpi sge, %19, %25 : vector<18x18x8xi32>
    %27 = arith.andi %24, %26 : vector<18x18x8xi1>
    %c16_i32_10 = arith.constant 16 : i32
    %28 = vector.broadcast %c16_i32_10 : i32 to vector<18x18x8xi32>
    %29 = arith.cmpi sle, %19, %28 : vector<18x18x8xi32>
    %30 = arith.andi %27, %29 : vector<18x18x8xi1>
    %cst_11 = arith.constant 0.000000e+00 : f32
    %31 = vector.broadcast %cst_11 : f32 to vector<18x18x8xf32>
    %32 = arith.select %30, %17, %31 : vector<18x18x8xi1>, vector<18x18x8xf32>
    %33 = arith.truncf %32 : vector<18x18x8xf32> to vector<18x18x8xbf16>
    %34 = vector.extract_strided_slice %33 {offsets = [0, 0, 0], sizes = [16, 16, 8], strides = [1, 1, 1]} : vector<18x18x8xbf16> to vector<16x16x8xbf16>
    %35 = vector.shape_cast %34 : vector<16x16x8xbf16> to vector<256x8xbf16>
    %36 = vector.extract_strided_slice %33 {offsets = [0, 1, 0], sizes = [16, 16, 8], strides = [1, 1, 1]} : vector<18x18x8xbf16> to vector<16x16x8xbf16>
    %37 = vector.shape_cast %36 : vector<16x16x8xbf16> to vector<256x8xbf16>
    %38 = vector.extract_strided_slice %33 {offsets = [0, 2, 0], sizes = [16, 16, 8], strides = [1, 1, 1]} : vector<18x18x8xbf16> to vector<16x16x8xbf16>
    %39 = vector.shape_cast %38 : vector<16x16x8xbf16> to vector<256x8xbf16>
    %40 = vector.extract_strided_slice %33 {offsets = [1, 0, 0], sizes = [16, 16, 8], strides = [1, 1, 1]} : vector<18x18x8xbf16> to vector<16x16x8xbf16>
    %41 = vector.shape_cast %40 : vector<16x16x8xbf16> to vector<256x8xbf16>
    %42 = vector.extract_strided_slice %33 {offsets = [1, 1, 0], sizes = [16, 16, 8], strides = [1, 1, 1]} : vector<18x18x8xbf16> to vector<16x16x8xbf16>
    %43 = vector.shape_cast %42 : vector<16x16x8xbf16> to vector<256x8xbf16>
    %44 = vector.extract_strided_slice %33 {offsets = [1, 2, 0], sizes = [16, 16, 8], strides = [1, 1, 1]} : vector<18x18x8xbf16> to vector<16x16x8xbf16>
    %45 = vector.shape_cast %44 : vector<16x16x8xbf16> to vector<256x8xbf16>
    %46 = vector.extract_strided_slice %33 {offsets = [2, 0, 0], sizes = [16, 16, 8], strides = [1, 1, 1]} : vector<18x18x8xbf16> to vector<16x16x8xbf16>
    %47 = vector.shape_cast %46 : vector<16x16x8xbf16> to vector<256x8xbf16>
    %48 = vector.extract_strided_slice %33 {offsets = [2, 1, 0], sizes = [16, 16, 8], strides = [1, 1, 1]} : vector<18x18x8xbf16> to vector<16x16x8xbf16>
    %49 = vector.shape_cast %48 : vector<16x16x8xbf16> to vector<256x8xbf16>
    %50 = vector.extract_strided_slice %33 {offsets = [2, 2, 0], sizes = [16, 16, 8], strides = [1, 1, 1]} : vector<18x18x8xbf16> to vector<16x16x8xbf16>
    %51 = vector.shape_cast %50 : vector<16x16x8xbf16> to vector<256x8xbf16>
    %52 = tpu.concatenate %35, %37, %39, %41, %43, %45, %47, %49, %51 in 1 : vector<256x8xbf16>, vector<256x8xbf16>, vector<256x8xbf16>, vector<256x8xbf16>, vector<256x8xbf16>, vector<256x8xbf16>, vector<256x8xbf16>, vector<256x8xbf16>, vector<256x8xbf16> -> vector<256x72xbf16>
    %c0_12 = arith.constant 0 : index
    %c0_13 = arith.constant 0 : index
    %53 = vector.load %arg5[%c0_12, %c0_13] : memref<72x16xbf16, #tpu.memory_space<vmem>>, vector<72x16xbf16>
    %cst_14 = arith.constant dense<0.000000e+00> : vector<256x16xf32>
    %54 = tpu.matmul %52, %53, %cst_14 {dimension_numbers = #tpu.dot_dimension_numbers<[1], [0], [0], [1], [0, 0, 1, 1], [], []>} : vector<256x72xbf16>, vector<72x16xbf16>, vector<256x16xf32> -> vector<256x16xf32>
    %c0_15 = arith.constant 0 : index
    %c0_16 = arith.constant 0 : index
    %55 = vector.load %arg6[%c0_15, %c0_16] : memref<1x16xf32, #tpu.memory_space<vmem>>, vector<1x16xf32>
    %56 = vector.broadcast %55 : vector<1x16xf32> to vector<256x16xf32>
    %57 = arith.addf %54, %56 : vector<256x16xf32>
    %cst_17 = arith.constant dense<0.000000e+00> : vector<16xf32>
    %58 = vector.multi_reduction <add>, %57, %cst_17 [0] : vector<256x16xf32> to vector<16xf32>
    %59 = vector.shape_cast %58 : vector<16xf32> to vector<1x16xf32>
    %c0_18 = arith.constant 0 : index
    %c0_19 = arith.constant 0 : index
    %c0_20 = arith.constant 0 : index
    %60 = vector.load %arg8[%c0_18, %c0_19, %c0_20] : memref<1x1x16xf32, #tpu.memory_space<vmem>>, vector<1x1x16xf32>
    %61 = vector.shape_cast %60 : vector<1x1x16xf32> to vector<1x16xf32>
    %62 = vector.shape_cast %59 : vector<1x16xf32> to vector<1x1x16xf32>
    tpu.vector_store %arg8[%c0_18, %c0_19, %c0_20], %62 {strides = array<i32>} : memref<1x1x16xf32, #tpu.memory_space<vmem>>, vector<1x1x16xf32>,
    %63 = arith.mulf %57, %57 : vector<256x16xf32>
    %cst_21 = arith.constant dense<0.000000e+00> : vector<16xf32>
    %64 = vector.multi_reduction <add>, %63, %cst_21 [0] : vector<256x16xf32> to vector<16xf32>
    %65 = vector.shape_cast %64 : vector<16xf32> to vector<1x16xf32>
    %c0_22 = arith.constant 0 : index
    %c0_23 = arith.constant 0 : index
    %c0_24 = arith.constant 0 : index
    %66 = vector.load %arg9[%c0_22, %c0_23, %c0_24] : memref<1x1x16xf32, #tpu.memory_space<vmem>>, vector<1x1x16xf32>
    %67 = vector.shape_cast %66 : vector<1x1x16xf32> to vector<1x16xf32>
    %68 = vector.shape_cast %65 : vector<1x16xf32> to vector<1x1x16xf32>
    tpu.vector_store %arg9[%c0_22, %c0_23, %c0_24], %68 {strides = array<i32>} : memref<1x1x16xf32, #tpu.memory_space<vmem>>, vector<1x1x16xf32>,
    %69 = vector.shape_cast %57 : vector<256x16xf32> to vector<16x16x16xf32>
    %70 = arith.truncf %69 : vector<16x16x16xf32> to vector<16x16x16xbf16>
    %c0_i32 = arith.constant 0 : i32
    %71 = arith.sitofp %c0_i32 : i32 to bf16
    %72 = vector.broadcast %71 : bf16 to vector<1x16x16xbf16>
    %73 = tpu.concatenate %72, %70 in 0 : vector<1x16x16xbf16>, vector<16x16x16xbf16> -> vector<17x16x16xbf16>
    %74 = vector.broadcast %71 : bf16 to vector<1x16x16xbf16>
    %75 = tpu.concatenate %73, %74 in 0 : vector<17x16x16xbf16>, vector<1x16x16xbf16> -> vector<18x16x16xbf16>
    %76 = vector.broadcast %71 : bf16 to vector<18x1x16xbf16>
    %77 = tpu.concatenate %76, %75 in 1 : vector<18x1x16xbf16>, vector<18x16x16xbf16> -> vector<18x17x16xbf16>
    %78 = vector.broadcast %71 : bf16 to vector<18x1x16xbf16>
    %79 = tpu.concatenate %77, %78 in 1 : vector<18x17x16xbf16>, vector<18x1x16xbf16> -> vector<18x18x16xbf16>
    %c0_25 = arith.constant 0 : index
    %c0_26 = arith.constant 0 : index
    %c0_27 = arith.constant 0 : index
    %c0_28 = arith.constant 0 : index
    %80 = vector.load %arg7[%c0_25, %c0_26, %c0_27, %c0_28] : memref<1x18x18x16xbf16, #tpu.memory_space<vmem>>, vector<1x18x18x16xbf16>
    %81 = vector.shape_cast %80 : vector<1x18x18x16xbf16> to vector<18x18x16xbf16>
    %82 = vector.shape_cast %79 : vector<18x18x16xbf16> to vector<1x18x18x16xbf16>
    tpu.vector_store %arg7[%c0_25, %c0_26, %c0_27, %c0_28], %82 {strides = array<i32>} : memref<1x18x18x16xbf16, #tpu.memory_space<vmem>>, vector<1x18x18x16xbf16>,
    return
  }
  func.func @transform_0(%arg0: i32, %arg1: i32) -> (i32, i32, i32, i32) {
    %c0_i32 = arith.constant 0 : i32
    %c0_i32_0 = arith.constant 0 : i32
    %c0_i32_1 = arith.constant 0 : i32
    %c0_i32_2 = arith.constant 0 : i32
    return %arg0, %c0_i32, %c0_i32_0, %c0_i32_1 : i32, i32, i32, i32
  }
  func.func @transform_1(%arg0: i32, %arg1: i32) -> (i32, i32, i32) {
    %c0_i32 = arith.constant 0 : i32
    %c0_i32_0 = arith.constant 0 : i32
    %c0_i32_1 = arith.constant 0 : i32
    return %arg0, %c0_i32, %c0_i32_0 : i32, i32, i32
  }
  func.func @transform_2(%arg0: i32, %arg1: i32) -> (i32, i32, i32) {
    %c0_i32 = arith.constant 0 : i32
    %c0_i32_0 = arith.constant 0 : i32
    %c0_i32_1 = arith.constant 0 : i32
    return %arg0, %c0_i32, %c0_i32_0 : i32, i32, i32
  }
  func.func @transform_3(%arg0: i32, %arg1: i32) -> (i32, i32) {
    %c0_i32 = arith.constant 0 : i32
    %c0_i32_0 = arith.constant 0 : i32
    return %c0_i32, %arg1 : i32, i32
  }
  func.func @transform_4(%arg0: i32, %arg1: i32) -> (i32, i32) {
    %c0_i32 = arith.constant 0 : i32
    %c0_i32_0 = arith.constant 0 : i32
    return %c0_i32, %arg1 : i32, i32
  }
  func.func @transform_5(%arg0: i32, %arg1: i32) -> (i32, i32, i32, i32) {
    %c0_i32 = arith.constant 0 : i32
    %c0_i32_0 = arith.constant 0 : i32
    %c0_i32_1 = arith.constant 0 : i32
    return %arg0, %c0_i32, %c0_i32_0, %arg1 : i32, i32, i32, i32
  }
  func.func @transform_6(%arg0: i32, %arg1: i32) -> (i32, i32, i32) {
    %c0_i32 = arith.constant 0 : i32
    %c0_i32_0 = arith.constant 0 : i32
    return %arg0, %c0_i32, %arg1 : i32, i32, i32
  }
  func.func @transform_7(%arg0: i32, %arg1: i32) -> (i32, i32, i32) {
    %c0_i32 = arith.constant 0 : i32
    %c0_i32_0 = arith.constant 0 : i32
    return %arg0, %c0_i32, %arg1 : i32, i32, i32
  }
}

module attributes {stable_mosaic.version = 11 : i64} {
  func.func @conv2_proj_kernel(%arg0: i32, %arg1: i32, %arg2: memref<1x18x18x16xbf16, #tpu.memory_space<vmem>>, %arg3: memref<1x1x16xf32, #tpu.memory_space<vmem>>, %arg4: memref<1x1x16xf32, #tpu.memory_space<vmem>>, %arg5: memref<144x16xbf16, #tpu.memory_space<vmem>>, %arg6: memref<1x16xf32, #tpu.memory_space<vmem>>, %arg7: memref<1x18x18x8xf32, #tpu.memory_space<vmem>>, %arg8: memref<8x16xbf16, #tpu.memory_space<vmem>>, %arg9: memref<1x16xf32, #tpu.memory_space<vmem>>, %arg10: memref<1x16x16x16xf32, #tpu.memory_space<vmem>>) attributes {dimension_semantics = [#tpu.dimension_semantics<parallel>, #tpu.dimension_semantics<parallel>], iteration_bounds = array<i64: 2, 1>, scalar_prefetch = 0 : i64, scratch_operands = 0 : i64, tpu.core_type = #tpu.core_type<tc>, window_params = [{transform_indices = @transform_0, window_bounds = array<i64: 1, 18, 18, 16>}, {transform_indices = @transform_1, window_bounds = array<i64: 1, 1, 16>}, {transform_indices = @transform_2, window_bounds = array<i64: 1, 1, 16>}, {transform_indices = @transform_3, window_bounds = array<i64: 144, 16>}, {transform_indices = @transform_4, window_bounds = array<i64: 1, 16>}, {transform_indices = @transform_5, window_bounds = array<i64: 1, 18, 18, 8>}, {transform_indices = @transform_6, window_bounds = array<i64: 8, 16>}, {transform_indices = @transform_7, window_bounds = array<i64: 1, 16>}, {transform_indices = @transform_8, window_bounds = array<i64: 1, 16, 16, 16>}]} {
    %c0 = arith.constant 0 : index
    %c0_0 = arith.constant 0 : index
    %c0_1 = arith.constant 0 : index
    %c0_2 = arith.constant 0 : index
    %0 = vector.load %arg2[%c0, %c0_0, %c0_1, %c0_2] : memref<1x18x18x16xbf16, #tpu.memory_space<vmem>>, vector<1x18x18x16xbf16>
    %1 = vector.shape_cast %0 : vector<1x18x18x16xbf16> to vector<18x18x16xbf16>
    %2 = arith.extf %1 : vector<18x18x16xbf16> to vector<18x18x16xf32>
    %c0_3 = arith.constant 0 : index
    %c0_4 = arith.constant 0 : index
    %c0_5 = arith.constant 0 : index
    %3 = vector.load %arg3[%c0_3, %c0_4, %c0_5] : memref<1x1x16xf32, #tpu.memory_space<vmem>>, vector<1x1x16xf32>
    %4 = vector.shape_cast %3 : vector<1x1x16xf32> to vector<1x16xf32>
    %5 = vector.shape_cast %4 : vector<1x16xf32> to vector<1x1x16xf32>
    %c0_6 = arith.constant 0 : index
    %c0_7 = arith.constant 0 : index
    %c0_8 = arith.constant 0 : index
    %6 = vector.load %arg4[%c0_6, %c0_7, %c0_8] : memref<1x1x16xf32, #tpu.memory_space<vmem>>, vector<1x1x16xf32>
    %7 = vector.shape_cast %6 : vector<1x1x16xf32> to vector<1x16xf32>
    %8 = vector.shape_cast %7 : vector<1x16xf32> to vector<1x1x16xf32>
    %9 = vector.broadcast %5 : vector<1x1x16xf32> to vector<18x18x16xf32>
    %10 = arith.mulf %2, %9 : vector<18x18x16xf32>
    %11 = vector.broadcast %8 : vector<1x1x16xf32> to vector<18x18x16xf32>
    %12 = arith.addf %10, %11 : vector<18x18x16xf32>
    %13 = arith.negf %12 : vector<18x18x16xf32>
    %14 = math.exp %13 : vector<18x18x16xf32>
    %cst = arith.constant 1.000000e+00 : f32
    %15 = vector.broadcast %cst : f32 to vector<18x18x16xf32>
    %16 = arith.addf %15, %14 : vector<18x18x16xf32>
    %17 = arith.divf %15, %16 : vector<18x18x16xf32>
    %18 = arith.mulf %12, %17 : vector<18x18x16xf32>
    %19 = tpu.iota {dimensions = array<i32: 0>} : vector<18x18x16xi32>
    %20 = tpu.iota {dimensions = array<i32: 1>} : vector<18x18x16xi32>
    %c1_i32 = arith.constant 1 : i32
    %21 = vector.broadcast %c1_i32 : i32 to vector<18x18x16xi32>
    %22 = arith.cmpi sge, %19, %21 : vector<18x18x16xi32>
    %c16_i32 = arith.constant 16 : i32
    %23 = vector.broadcast %c16_i32 : i32 to vector<18x18x16xi32>
    %24 = arith.cmpi sle, %19, %23 : vector<18x18x16xi32>
    %25 = arith.andi %22, %24 : vector<18x18x16xi1>
    %c1_i32_9 = arith.constant 1 : i32
    %26 = vector.broadcast %c1_i32_9 : i32 to vector<18x18x16xi32>
    %27 = arith.cmpi sge, %20, %26 : vector<18x18x16xi32>
    %28 = arith.andi %25, %27 : vector<18x18x16xi1>
    %c16_i32_10 = arith.constant 16 : i32
    %29 = vector.broadcast %c16_i32_10 : i32 to vector<18x18x16xi32>
    %30 = arith.cmpi sle, %20, %29 : vector<18x18x16xi32>
    %31 = arith.andi %28, %30 : vector<18x18x16xi1>
    %cst_11 = arith.constant 0.000000e+00 : f32
    %32 = vector.broadcast %cst_11 : f32 to vector<18x18x16xf32>
    %33 = arith.select %31, %18, %32 : vector<18x18x16xi1>, vector<18x18x16xf32>
    %34 = arith.truncf %33 : vector<18x18x16xf32> to vector<18x18x16xbf16>
    %35 = vector.extract_strided_slice %34 {offsets = [0, 0, 0], sizes = [16, 16, 16], strides = [1, 1, 1]} : vector<18x18x16xbf16> to vector<16x16x16xbf16>
    %36 = vector.shape_cast %35 : vector<16x16x16xbf16> to vector<256x16xbf16>
    %37 = vector.extract_strided_slice %34 {offsets = [0, 1, 0], sizes = [16, 16, 16], strides = [1, 1, 1]} : vector<18x18x16xbf16> to vector<16x16x16xbf16>
    %38 = vector.shape_cast %37 : vector<16x16x16xbf16> to vector<256x16xbf16>
    %39 = vector.extract_strided_slice %34 {offsets = [0, 2, 0], sizes = [16, 16, 16], strides = [1, 1, 1]} : vector<18x18x16xbf16> to vector<16x16x16xbf16>
    %40 = vector.shape_cast %39 : vector<16x16x16xbf16> to vector<256x16xbf16>
    %41 = vector.extract_strided_slice %34 {offsets = [1, 0, 0], sizes = [16, 16, 16], strides = [1, 1, 1]} : vector<18x18x16xbf16> to vector<16x16x16xbf16>
    %42 = vector.shape_cast %41 : vector<16x16x16xbf16> to vector<256x16xbf16>
    %43 = vector.extract_strided_slice %34 {offsets = [1, 1, 0], sizes = [16, 16, 16], strides = [1, 1, 1]} : vector<18x18x16xbf16> to vector<16x16x16xbf16>
    %44 = vector.shape_cast %43 : vector<16x16x16xbf16> to vector<256x16xbf16>
    %45 = vector.extract_strided_slice %34 {offsets = [1, 2, 0], sizes = [16, 16, 16], strides = [1, 1, 1]} : vector<18x18x16xbf16> to vector<16x16x16xbf16>
    %46 = vector.shape_cast %45 : vector<16x16x16xbf16> to vector<256x16xbf16>
    %47 = vector.extract_strided_slice %34 {offsets = [2, 0, 0], sizes = [16, 16, 16], strides = [1, 1, 1]} : vector<18x18x16xbf16> to vector<16x16x16xbf16>
    %48 = vector.shape_cast %47 : vector<16x16x16xbf16> to vector<256x16xbf16>
    %49 = vector.extract_strided_slice %34 {offsets = [2, 1, 0], sizes = [16, 16, 16], strides = [1, 1, 1]} : vector<18x18x16xbf16> to vector<16x16x16xbf16>
    %50 = vector.shape_cast %49 : vector<16x16x16xbf16> to vector<256x16xbf16>
    %51 = vector.extract_strided_slice %34 {offsets = [2, 2, 0], sizes = [16, 16, 16], strides = [1, 1, 1]} : vector<18x18x16xbf16> to vector<16x16x16xbf16>
    %52 = vector.shape_cast %51 : vector<16x16x16xbf16> to vector<256x16xbf16>
    %53 = tpu.concatenate %36, %38, %40, %42, %44, %46, %48, %50, %52 in 1 : vector<256x16xbf16>, vector<256x16xbf16>, vector<256x16xbf16>, vector<256x16xbf16>, vector<256x16xbf16>, vector<256x16xbf16>, vector<256x16xbf16>, vector<256x16xbf16>, vector<256x16xbf16> -> vector<256x144xbf16>
    %c0_12 = arith.constant 0 : index
    %c0_13 = arith.constant 0 : index
    %54 = vector.load %arg5[%c0_12, %c0_13] : memref<144x16xbf16, #tpu.memory_space<vmem>>, vector<144x16xbf16>
    %cst_14 = arith.constant dense<0.000000e+00> : vector<256x16xf32>
    %55 = tpu.matmul %53, %54, %cst_14 {dimension_numbers = #tpu.dot_dimension_numbers<[1], [0], [0], [1], [0, 0, 1, 1], [], []>} : vector<256x144xbf16>, vector<144x16xbf16>, vector<256x16xf32> -> vector<256x16xf32>
    %c0_15 = arith.constant 0 : index
    %c0_16 = arith.constant 0 : index
    %56 = vector.load %arg6[%c0_15, %c0_16] : memref<1x16xf32, #tpu.memory_space<vmem>>, vector<1x16xf32>
    %57 = vector.broadcast %56 : vector<1x16xf32> to vector<256x16xf32>
    %58 = arith.addf %55, %57 : vector<256x16xf32>
    %c0_17 = arith.constant 0 : index
    %c1 = arith.constant 1 : index
    %c1_18 = arith.constant 1 : index
    %c0_19 = arith.constant 0 : index
    %59 = vector.load %arg7[%c0_17, %c1, %c1_18, %c0_19] : memref<1x18x18x8xf32, #tpu.memory_space<vmem>>, vector<1x16x16x8xf32>
    %60 = vector.shape_cast %59 : vector<1x16x16x8xf32> to vector<16x16x8xf32>
    %61 = vector.shape_cast %60 : vector<16x16x8xf32> to vector<256x8xf32>
    %62 = arith.truncf %61 : vector<256x8xf32> to vector<256x8xbf16>
    %c0_20 = arith.constant 0 : index
    %c0_21 = arith.constant 0 : index
    %63 = vector.load %arg8[%c0_20, %c0_21] : memref<8x16xbf16, #tpu.memory_space<vmem>>, vector<8x16xbf16>
    %cst_22 = arith.constant dense<0.000000e+00> : vector<256x16xf32>
    %64 = tpu.matmul %62, %63, %cst_22 {dimension_numbers = #tpu.dot_dimension_numbers<[1], [0], [0], [1], [0, 0, 1, 1], [], []>} : vector<256x8xbf16>, vector<8x16xbf16>, vector<256x16xf32> -> vector<256x16xf32>
    %c0_23 = arith.constant 0 : index
    %c0_24 = arith.constant 0 : index
    %65 = vector.load %arg9[%c0_23, %c0_24] : memref<1x16xf32, #tpu.memory_space<vmem>>, vector<1x16xf32>
    %66 = vector.broadcast %65 : vector<1x16xf32> to vector<256x16xf32>
    %67 = arith.addf %64, %66 : vector<256x16xf32>
    %68 = arith.addf %58, %67 : vector<256x16xf32>
    %69 = vector.shape_cast %68 : vector<256x16xf32> to vector<16x16x16xf32>
    %c0_25 = arith.constant 0 : index
    %c0_26 = arith.constant 0 : index
    %c0_27 = arith.constant 0 : index
    %c0_28 = arith.constant 0 : index
    %70 = vector.load %arg10[%c0_25, %c0_26, %c0_27, %c0_28] : memref<1x16x16x16xf32, #tpu.memory_space<vmem>>, vector<1x16x16x16xf32>
    %71 = vector.shape_cast %70 : vector<1x16x16x16xf32> to vector<16x16x16xf32>
    %72 = vector.shape_cast %69 : vector<16x16x16xf32> to vector<1x16x16x16xf32>
    tpu.vector_store %arg10[%c0_25, %c0_26, %c0_27, %c0_28], %72 {strides = array<i32>} : memref<1x16x16x16xf32, #tpu.memory_space<vmem>>, vector<1x16x16x16xf32>,
    return
  }
  func.func @transform_0(%arg0: i32, %arg1: i32) -> (i32, i32, i32, i32) {
    %c0_i32 = arith.constant 0 : i32
    %c0_i32_0 = arith.constant 0 : i32
    %c0_i32_1 = arith.constant 0 : i32
    %c0_i32_2 = arith.constant 0 : i32
    return %arg0, %c0_i32, %c0_i32_0, %c0_i32_1 : i32, i32, i32, i32
  }
  func.func @transform_1(%arg0: i32, %arg1: i32) -> (i32, i32, i32) {
    %c0_i32 = arith.constant 0 : i32
    %c0_i32_0 = arith.constant 0 : i32
    %c0_i32_1 = arith.constant 0 : i32
    return %arg0, %c0_i32, %c0_i32_0 : i32, i32, i32
  }
  func.func @transform_2(%arg0: i32, %arg1: i32) -> (i32, i32, i32) {
    %c0_i32 = arith.constant 0 : i32
    %c0_i32_0 = arith.constant 0 : i32
    %c0_i32_1 = arith.constant 0 : i32
    return %arg0, %c0_i32, %c0_i32_0 : i32, i32, i32
  }
  func.func @transform_3(%arg0: i32, %arg1: i32) -> (i32, i32) {
    %c0_i32 = arith.constant 0 : i32
    %c0_i32_0 = arith.constant 0 : i32
    return %c0_i32, %arg1 : i32, i32
  }
  func.func @transform_4(%arg0: i32, %arg1: i32) -> (i32, i32) {
    %c0_i32 = arith.constant 0 : i32
    %c0_i32_0 = arith.constant 0 : i32
    return %c0_i32, %arg1 : i32, i32
  }
  func.func @transform_5(%arg0: i32, %arg1: i32) -> (i32, i32, i32, i32) {
    %c0_i32 = arith.constant 0 : i32
    %c0_i32_0 = arith.constant 0 : i32
    %c0_i32_1 = arith.constant 0 : i32
    %c0_i32_2 = arith.constant 0 : i32
    return %arg0, %c0_i32, %c0_i32_0, %c0_i32_1 : i32, i32, i32, i32
  }
  func.func @transform_6(%arg0: i32, %arg1: i32) -> (i32, i32) {
    %c0_i32 = arith.constant 0 : i32
    %c0_i32_0 = arith.constant 0 : i32
    return %c0_i32, %arg1 : i32, i32
  }
  func.func @transform_7(%arg0: i32, %arg1: i32) -> (i32, i32) {
    %c0_i32 = arith.constant 0 : i32
    %c0_i32_0 = arith.constant 0 : i32
    return %c0_i32, %arg1 : i32, i32
  }
  func.func @transform_8(%arg0: i32, %arg1: i32) -> (i32, i32, i32, i32) {
    %c0_i32 = arith.constant 0 : i32
    %c0_i32_0 = arith.constant 0 : i32
    %c0_i32_1 = arith.constant 0 : i32
    return %arg0, %c0_i32, %c0_i32_0, %arg1 : i32, i32, i32, i32
  }
}

</mosaic_0001>

<bundles_post_ra>
// kernel: resnet_block_forward.3
= control target key start
LH: loop header
LB: loop body
LE: loop exit
PB: predicated region body
PF: predicated region fallthrough
CT: control target
= control target key end

     0   :  { %s3379_s9 = smov 0   ;;  %s3381_s10 = smov 0   ;;  %s6017_s0 = inlined_call_operand.vmem [shape: f32[2,18,18,8], index: 0, kind: input, shape index: {}]   ;;  %s6018_s1 = inlined_call_operand.vmem [shape: f32[2,1,8], index: 1, kind: output, shape index: {0}]   ;;  %s6019_s2 = inlined_call_operand.vmem [shape: f32[2,1,8], index: 2, kind: output, shape index: {1}]  }
   0x1   :  { %s3383_s11 = smov 0  }
   0x2 LB: > { %s25_s12 = sadd.s32 1, %s3356_s10  ;;  %p3253_p0 = scmp.ge.s32.totalorder %s3360_s11, 1  ;;  %s3360_s11 = sphi %s3383_s11, %s13_s11   ;;  %s3356_s10 = sphi %s3381_s10, %s7118_s10   ;;  %s3352_s9 = sphi %s3379_s9, %s7117_s9  }
   0x3   : > { %p27_p1 = scmp.ge.s32.totalorder %s25_s12, 2  ;;  %p135_p2 = scmp.lt.s32.totalorder %s3360_s11, 3 }
   0x5   : > { %s7120_s12 = smov (%p27_p1, %s25_s12), 0  ;;  %p136_p3 = pnand %p3253_p0, %p135_p2 }
   0x7   : > { %139 = sbr.rel (%p136_p3) target bundleno = 383 (0x17f), region = 24 }
   0xe   : > { %p164_p4 = scmp.lt.s32.totalorder %s3352_s9, 1  ;;  %v299_v0 = vlaneseq  ;;  %v3362_v1 = vmov 1983009808   ;;  %vm184_vm0 = vcmask 57344   ;;  %v3363_v5 = vmov 0.0  }
   0xf   : > { %v297_v2 = vunpack.c.l.s4 %v3362_v1  ;;  %vm1925_vm1 = vcmask 64512   ;;  %vm2005_vm2 = vcmask 60416  }
  0x10   : > { %s7122_s9 = smov (!%p164_p4, %s3352_s9), 1  ;;  %v300_v3 = vshrl.u32 %v299_v0, 7 }
  0x11   : > { %v298_v4 = vunpack.c.0.s8 %v297_v2  ;;  %s3275_s13 = smul.u32 432, %s7122_s9  ;;  %s3400_s16 = scalar_lea.vmem %s6018_s1, %s7122_s9 }
  0x12   : > { %s3405_s19 = scalar_lea.vmem %s6019_s2, %s7122_s9  ;;  %185 = vst.msk [vmem:[%s3400_s16] sm:$0x1] %vm184_vm0, %v3363_v5 }
  0x13   : > { %v3409_v6 = vsub.s32 %v298_v4, %v300_v3  ;;  %s3414_s22 = scalar_lea.vmem %s6017_s0, %s3275_s13  ;;  %186 = vst.msk [vmem:[%s3405_s19] sm:$0x1] %vm184_vm0, %v3363_v5 }
  0x14   : > { %v187_v7 = vld [vmem:[%s3414_s22] sm:$0xff]  ;;  %v188_v8 = vld [vmem:[%s3414_s22 + $0x8] sm:$0xff]  ;;  %v190_v9 = vld [vmem:[%s3414_s22 + $0x18] sm:$0xff] }
  0x15   : > { %v191_v10 = vld [vmem:[%s3414_s22 + $0x20] sm:$0xff]  ;;  %v295_v11 = vcombine.high %v187_v7, %v187_v7  ;;  %v3423_v12 = vrot.slane %v187_v7, %v3409_v6  ;;  %v312_v13 = vcombine.high %v188_v8, %v188_v8  ;;  %v3426_v14 = vrot.slane %v188_v8, %v3409_v6  ;;  %v193_v15 = vld [vmem:[%s3414_s22 + $0x30] sm:$0xff]  ;;  %v194_v20 = vld [vmem:[%s3414_s22 + $0x38] sm:$0xff] }
  0x16   : > { %v336_v16 = vcombine.high %v190_v9, %v190_v9  ;;  %v3430_v17 = vrot.slane %v190_v9, %v3409_v6  ;;  %v353_v18 = vcombine.high %v191_v10, %v191_v10  ;;  %v3433_v19 = vrot.slane %v191_v10, %v3409_v6  ;;  %v196_v25 = vld [vmem:[%s3414_s22 + $0x48] sm:$0xff]  ;;  %v197_v30 = vld [vmem:[%s3414_s22 + $0x50] sm:$0xff]  ;;  %v199_v35 = vld [vmem:[%s3414_s22 + $0x60] sm:$0xff] }
  0x17   : > { %6284 = vst [vmem:[#allocation2_spill] sm:$0xff] %v3423_v12  ;;  %6285 = vst [vmem:[#allocation3_spill] sm:$0xff] %v3426_v14  ;;  %v3437_v21 = vrot.slane %v295_v11, %v3409_v6  ;;  %v3441_v22 = vcombine.high %v3423_v12, %v3423_v12  ;;  %v3444_v23 = vrot.slane %v312_v13, %v3409_v6  ;;  %v200_v44 = vld [vmem:[%s3414_s22 + $0x68] sm:$0xff]  ;;  %v202_v49 = vld [vmem:[%s3414_s22 + $0x78] sm:$0xff] }
  0x18   : > { %6286 = vst [vmem:[#allocation4_spill] sm:$0xff] %v3430_v17  ;;  %6287 = vst [vmem:[#allocation5_spill] sm:$0xff] %v3433_v19  ;;  %v3448_v24 = vcombine.high %v3426_v14, %v3426_v14  ;;  %v3452_v26 = vrot.slane %v336_v16, %v3409_v6  ;;  %v3456_v27 = vcombine.high %v3430_v17, %v3430_v17  ;;  %v203_v54 = vld [vmem:[%s3414_s22 + $0x80] sm:$0xff]  ;;  %v205_v59 = vld [vmem:[%s3414_s22 + $0x90] sm:$0xff] }
  0x19   : > { %6288 = vst [vmem:[#allocation6_spill] sm:$0xff] %v3437_v21  ;;  %6289 = vst [vmem:[#allocation7_spill] sm:$0xff] %v3441_v22  ;;  %v3459_v28 = vrot.slane %v353_v18, %v3409_v6  ;;  %v3463_v29 = vcombine.high %v3433_v19, %v3433_v19  ;;  %v3468_v31 = vcombine.high %v3437_v21, %v3437_v21  ;;  %v206_v0 = vld [vmem:[%s3414_s22 + $0x98] sm:$0xff]  ;;  %v208_v10 = vld [vmem:[%s3414_s22 + $0xa8] sm:$0xff] }
  0x1a   : > { %6290 = vst [vmem:[#allocation8_spill] sm:$0xff] %v3444_v23  ;;  %6291 = vst [vmem:[#allocation9_spill] sm:$0xff] %v3448_v24  ;;  %v3472_v32 = vcombine.high %v3444_v23, %v3444_v23  ;;  %v377_v33 = vcombine.high %v193_v15, %v193_v15  ;;  %v3475_v34 = vrot.slane %v193_v15, %v3409_v6  ;;  %v209_v18 = vld [vmem:[%s3414_s22 + $0xb0] sm:$0xff] }
  0x1b   : > { %6292 = vst [vmem:[#allocation10_spill] sm:$0xff] %v3452_v26  ;;  %6293 = vst [vmem:[#allocation11_spill] sm:$0xff] %v3456_v27  ;;  %v3480_v36 = vcombine.high %v3452_v26, %v3452_v26  ;;  %v3484_v37 = vcombine.high %v3459_v28, %v3459_v28  ;;  %v394_v38 = vcombine.high %v194_v20, %v194_v20 }
  0x1c   : > { %6294 = vst [vmem:[#allocation12_spill] sm:$0xff] %v3459_v28  ;;  %6295 = vst [vmem:[#allocation13_spill] sm:$0xff] %v3463_v29  ;;  %v3487_v39 = vrot.slane %v194_v20, %v3409_v6  ;;  %v3490_v40 = vrot.slane %v377_v33, %v3409_v6  ;;  %v3494_v41 = vcombine.high %v3475_v34, %v3475_v34 }
  0x1d   : > { %6296 = vst [vmem:[#allocation14_spill] sm:$0xff] %v3468_v31  ;;  %6297 = vst [vmem:[#allocation15_spill] sm:$0xff] %v3472_v32  ;;  %v418_v42 = vcombine.high %v196_v25, %v196_v25  ;;  %v3497_v43 = vrot.slane %v196_v25, %v3409_v6  ;;  %v3501_v45 = vrot.slane %v394_v38, %v3409_v6 }
  0x1e   : > { %6298 = vst [vmem:[#allocation16_spill] sm:$0xff] %v3475_v34  ;;  %6299 = vst [vmem:[#allocation17_spill] sm:$0xff] %v3480_v36  ;;  %v3505_v46 = vcombine.high %v3487_v39, %v3487_v39  ;;  %v435_v47 = vcombine.high %v197_v30, %v197_v30  ;;  %v3508_v48 = vrot.slane %v197_v30, %v3409_v6 }
  0x1f   : > { %6300 = vst [vmem:[#allocation18_spill] sm:$0xff] %v3484_v37  ;;  %6301 = vst [vmem:[#allocation19_spill] sm:$0xff] %v3487_v39  ;;  %v3513_v50 = vcombine.high %v3490_v40, %v3490_v40  ;;  %v3516_v51 = vrot.slane %v418_v42, %v3409_v6  ;;  %v3520_v52 = vcombine.high %v3497_v43, %v3497_v43 }
  0x20   : > { %6302 = vst [vmem:[#allocation20_spill] sm:$0xff] %v3490_v40  ;;  %6303 = vst [vmem:[#allocation21_spill] sm:$0xff] %v3494_v41  ;;  %v459_v53 = vcombine.high %v199_v35, %v199_v35  ;;  %v3525_v55 = vcombine.high %v3501_v45, %v3501_v45  ;;  %v3528_v56 = vrot.slane %v435_v47, %v3409_v6 }
  0x21   : > { %6304 = vst [vmem:[#allocation22_spill] sm:$0xff] %v3497_v43  ;;  %6305 = vst [vmem:[#allocation23_spill] sm:$0xff] %v3501_v45  ;;  %v3532_v57 = vcombine.high %v3508_v48, %v3508_v48  ;;  %v3535_v58 = vrot.slane %v199_v35, %v3409_v6  ;;  %v3540_v60 = vcombine.high %v3516_v51, %v3516_v51  ;;  %v211_v35 = vld [vmem:[%s3414_s22 + $0xc0] sm:$0xff] }
  0x22   : > { %6306 = vst [vmem:[#allocation24_spill] sm:$0xff] %v3505_v46  ;;  %6307 = vst [vmem:[#allocation25_spill] sm:$0xff] %v3508_v48  ;;  %v3543_v61 = vrot.slane %v459_v53, %v3409_v6  ;;  %v476_v62 = vcombine.high %v200_v44, %v200_v44  ;;  %v3546_v63 = vrot.slane %v200_v44, %v3409_v6 }
  0x23   : > { %6308 = vst [vmem:[#allocation26_spill] sm:$0xff] %v3513_v50  ;;  %6309 = vst [vmem:[#allocation27_spill] sm:$0xff] %v3516_v51  ;;  %v3551_v1 = vcombine.high %v3528_v56, %v3528_v56  ;;  %v3555_v2 = vcombine.high %v3535_v58, %v3535_v58  ;;  %v500_v3 = vcombine.high %v202_v49, %v202_v49 }
  0x24   : > { %6310 = vst [vmem:[#allocation28_spill] sm:$0xff] %v3520_v52  ;;  %6311 = vst [vmem:[#allocation29_spill] sm:$0xff] %v3525_v55  ;;  %v3558_v4 = vrot.slane %v202_v49, %v3409_v6  ;;  %v3562_v5 = vcombine.high %v3543_v61, %v3543_v61  ;;  %v3565_v7 = vrot.slane %v476_v62, %v3409_v6  ;;  %v212_v49 = vld [vmem:[%s3414_s22 + $0xc8] sm:$0xff] }
  0x25   : > { %6312 = vst [vmem:[#allocation30_spill] sm:$0xff] %v3528_v56  ;;  %6313 = vst [vmem:[#allocation31_spill] sm:$0xff] %v3532_v57  ;;  %v3569_v8 = vcombine.high %v3546_v63, %v3546_v63  ;;  %v517_v9 = vcombine.high %v203_v54, %v203_v54  ;;  %v3573_v11 = vrot.slane %v500_v3, %v3409_v6 }
  0x26   : > { %6314 = vst [vmem:[#allocation32_spill] sm:$0xff] %v3535_v58  ;;  %6315 = vst [vmem:[#allocation33_spill] sm:$0xff] %v3540_v60  ;;  %v3577_v13 = vcombine.high %v3558_v4, %v3558_v4  ;;  %v3580_v15 = vrot.slane %v203_v54, %v3409_v6  ;;  %v541_v16 = vcombine.high %v205_v59, %v205_v59 }
  0x27   : > { %6316 = vst [vmem:[#allocation34_spill] sm:$0xff] %v3543_v61  ;;  %6317 = vst [vmem:[#allocation35_spill] sm:$0xff] %v3546_v63  ;;  %v3585_v20 = vcombine.high %v3565_v7, %v3565_v7  ;;  %v3588_v25 = vrot.slane %v517_v9, %v3409_v6  ;;  %v3591_v30 = vrot.slane %v205_v59, %v3409_v6 }
  0x28   : > { %6318 = vst [vmem:[#allocation36_spill] sm:$0xff] %v3551_v1  ;;  %6319 = vst [vmem:[#allocation37_spill] sm:$0xff] %v3555_v2  ;;  %v558_v33 = vcombine.high %v206_v0, %v206_v0  ;;  %v3596_v38 = vcombine.high %v3573_v11, %v3573_v11  ;;  %v3600_v42 = vcombine.high %v3580_v15, %v3580_v15 }
  0x29   : > { %6320 = vst [vmem:[#allocation38_spill] sm:$0xff] %v3558_v4  ;;  %6321 = vst [vmem:[#allocation39_spill] sm:$0xff] %v3562_v5  ;;  %v3603_v44 = vrot.slane %v541_v16, %v3409_v6  ;;  %v3606_v47 = vrot.slane %v206_v0, %v3409_v6  ;;  %v3611_v53 = vcombine.high %v3588_v25, %v3588_v25 }
  0x2a   : > { %6322 = vst [vmem:[#allocation40_spill] sm:$0xff] %v3565_v7  ;;  %6323 = vst [vmem:[#allocation41_spill] sm:$0xff] %v3569_v8  ;;  %v3615_v54 = vcombine.high %v3591_v30, %v3591_v30  ;;  %v3618_v59 = vrot.slane %v558_v33, %v3409_v6  ;;  %v582_v62 = vcombine.high %v208_v10, %v208_v10 }
  0x2b   : > { %6324 = vst [vmem:[#allocation42_spill] sm:$0xff] %v3573_v11  ;;  %6325 = vst [vmem:[#allocation43_spill] sm:$0xff] %v3577_v13  ;;  %v3622_v3 = vcombine.high %v3603_v44, %v3603_v44  ;;  %v3626_v0 = vcombine.high %v3606_v47, %v3606_v47  ;;  %v3629_v9 = vrot.slane %v208_v10, %v3409_v6 }
  0x2c   : > { %6326 = vst [vmem:[#allocation44_spill] sm:$0xff] %v3580_v15  ;;  %6327 = vst [vmem:[#allocation45_spill] sm:$0xff] %v3585_v20  ;;  %v599_v16 = vcombine.high %v209_v18, %v209_v18  ;;  %v3634_v33 = vcombine.high %v3618_v59, %v3618_v59 }
  0x2d   : > { %6328 = vst [vmem:[#allocation46_spill] sm:$0xff] %v3588_v25  ;;  %6329 = vst [vmem:[#allocation47_spill] sm:$0xff] %v3591_v30  ;;  %v214_v30 = vld [vmem:[%s3414_s22 + $0xd8] sm:$0xff] }
  0x2e   : > { %6330 = vst [vmem:[#allocation48_spill] sm:$0xff] %v3596_v38  ;;  %6331 = vst [vmem:[#allocation49_spill] sm:$0xff] %v3600_v42  ;;  %v3648_v10 = vrot.slane %v599_v16, %v3409_v6  ;;  %v3666_v16 = vrot.slane %v212_v49, %v3409_v6 }
  0x2f   : > { %6332 = vst [vmem:[#allocation50_spill] sm:$0xff] %v3603_v44  ;;  %6333 = vst [vmem:[#allocation51_spill] sm:$0xff] %v3606_v47  ;;  %v3640_v44 = vrot.slane %v209_v18, %v3409_v6  ;;  %v3645_v47 = vcombine.high %v3629_v9, %v3629_v9 }
  0x30   : > { %6334 = vst [vmem:[#allocation52_spill] sm:$0xff] %v3611_v53  ;;  %6335 = vst [vmem:[#allocation53_spill] sm:$0xff] %v3615_v54  ;;  %v3637_v54 = vrot.slane %v582_v62, %v3409_v6  ;;  %v215_v53 = vld [vmem:[%s3414_s22 + $0xe0] sm:$0xff] }
  0x31   : > { %6336 = vst [vmem:[#allocation54_spill] sm:$0xff] %v3618_v59  ;;  %6337 = vst [vmem:[#allocation55_spill] sm:$0xff] %v3622_v3  ;;  %v623_v3 = vcombine.high %v211_v35, %v211_v35  ;;  %v640_v59 = vcombine.high %v212_v49, %v212_v49  ;;  %v3660_v18 = vcombine.high %v3640_v44, %v3640_v44 }
  0x32   : > { %6338 = vst [vmem:[#allocation56_spill] sm:$0xff] %v3626_v0  ;;  %6339 = vst [vmem:[#allocation57_spill] sm:$0xff] %v3629_v9  ;;  %v3651_v0 = vrot.slane %v211_v35, %v3409_v6  ;;  %v3656_v62 = vcombine.high %v3637_v54, %v3637_v54  ;;  %v218_v35 = vld [vmem:[%s3414_s22 + $0xf8] sm:$0xff]  ;;  %v3686_v49 = vcombine.high %v3666_v16, %v3666_v16 }
  0x33   : > { %6340 = vst [vmem:[#allocation58_spill] sm:$0xff] %v3634_v33  ;;  %6341 = vst [vmem:[#allocation59_spill] sm:$0xff] %v3637_v54  ;;  %v217_v33 = vld [vmem:[%s3414_s22 + $0xf0] sm:$0xff]  ;;  %v3663_v9 = vrot.slane %v623_v3, %v3409_v6 }
  0x34   : > { %6342 = vst [vmem:[#allocation60_spill] sm:$0xff] %v3640_v44  ;;  %6343 = vst [vmem:[#allocation61_spill] sm:$0xff] %v3645_v47  ;;  %v3671_v47 = vcombine.high %v3648_v10, %v3648_v10  ;;  %v3675_v54 = vcombine.high %v3651_v0, %v3651_v0  ;;  %v221_v44 = vld [vmem:[%s3414_s22 + $0x110] sm:$0xff] }
  0x35   : > { %6344 = vst [vmem:[#allocation62_spill] sm:$0xff] %v3648_v10  ;;  %6345 = vst [vmem:[#allocation63_spill] sm:$0xff] %v3651_v0  ;;  %v3682_v3 = vcombine.high %v3663_v9, %v3663_v9  ;;  %v3689_v10 = vrot.slane %v214_v30, %v3409_v6  ;;  %v220_v0 = vld [vmem:[%s3414_s22 + $0x108] sm:$0xff] }
  0x36   : > { %6346 = vst [vmem:[#allocation64_spill] sm:$0xff] %v3656_v62  ;;  %6347 = vst [vmem:[#allocation65_spill] sm:$0xff] %v3660_v18  ;;  %v3678_v62 = vrot.slane %v640_v59, %v3409_v6  ;;  %v664_v18 = vcombine.high %v214_v30, %v214_v30 }
  0x37   : > { %6348 = vst [vmem:[#allocation66_spill] sm:$0xff] %v3663_v9  ;;  %6349 = vst [vmem:[#allocation67_spill] sm:$0xff] %v3666_v16  ;;  %v3700_v9 = vrot.slane %v215_v53, %v3409_v6  ;;  %v3705_v16 = vcombine.high %v3689_v10, %v3689_v10 }
  0x38   : > { %6350 = vst [vmem:[#allocation68_spill] sm:$0xff] %v3671_v47  ;;  %6351 = vst [vmem:[#allocation69_spill] sm:$0xff] %v3675_v54  ;;  %v681_v47 = vcombine.high %v215_v53, %v215_v53  ;;  %v3694_v59 = vcombine.high %v3678_v62, %v3678_v62  ;;  %v3697_v54 = vrot.slane %v664_v18, %v3409_v6 }
  0x39   : > { %6352 = vst [vmem:[#allocation70_spill] sm:$0xff] %v3678_v62  ;;  %6353 = vst [vmem:[#allocation71_spill] sm:$0xff] %v3682_v3  ;;  %v705_v3 = vcombine.high %v217_v33, %v217_v33  ;;  %v722_v62 = vcombine.high %v218_v35, %v218_v35  ;;  %v3720_v53 = vcombine.high %v3700_v9, %v3700_v9 }
  0x3a   : > { %6354 = vst [vmem:[#allocation72_spill] sm:$0xff] %v3686_v49  ;;  %6355 = vst [vmem:[#allocation73_spill] sm:$0xff] %v3689_v10  ;;  %v3708_v30 = vrot.slane %v681_v47, %v3409_v6  ;;  %v3711_v49 = vrot.slane %v217_v33, %v3409_v6  ;;  %v3716_v18 = vcombine.high %v3697_v54, %v3697_v54  ;;  %v224_v33 = vld [vmem:[%s3414_s22 + $0x128] sm:$0xff] }
  0x3b   : > { %6356 = vst [vmem:[#allocation74_spill] sm:$0xff] %v3694_v59  ;;  %6357 = vst [vmem:[#allocation75_spill] sm:$0xff] %v3697_v54  ;;  %v223_v59 = vld [vmem:[%s3414_s22 + $0x120] sm:$0xff]  ;;  %v3723_v10 = vrot.slane %v705_v3, %v3409_v6  ;;  %v3726_v47 = vrot.slane %v218_v35, %v3409_v6 }
  0x3c   : > { %6358 = vst [vmem:[#allocation76_spill] sm:$0xff] %v3700_v9  ;;  %6359 = vst [vmem:[#allocation77_spill] sm:$0xff] %v3705_v16  ;;  %v3731_v16 = vcombine.high %v3708_v30, %v3708_v30  ;;  %v3735_v54 = vcombine.high %v3711_v49, %v3711_v49  ;;  %v227_v9 = vld [vmem:[%s3414_s22 + $0x140] sm:$0xff] }
  0x3d   : > { %6360 = vst [vmem:[#allocation78_spill] sm:$0xff] %v3708_v30  ;;  %6361 = vst [vmem:[#allocation79_spill] sm:$0xff] %v3711_v49  ;;  %v3742_v3 = vcombine.high %v3723_v10, %v3723_v10  ;;  %v3746_v35 = vcombine.high %v3726_v47, %v3726_v47  ;;  %v3749_v30 = vrot.slane %v220_v0, %v3409_v6  ;;  %v226_v49 = vld [vmem:[%s3414_s22 + $0x138] sm:$0xff] }
  0x3e   : > { %6362 = vst [vmem:[#allocation80_spill] sm:$0xff] %v3716_v18  ;;  %6363 = vst [vmem:[#allocation81_spill] sm:$0xff] %v3720_v53  ;;  %v3738_v18 = vrot.slane %v722_v62, %v3409_v6  ;;  %v746_v53 = vcombine.high %v220_v0, %v220_v0 }
  0x3f   : > { %6364 = vst [vmem:[#allocation82_spill] sm:$0xff] %v3723_v10  ;;  %6365 = vst [vmem:[#allocation83_spill] sm:$0xff] %v3726_v47  ;;  %v3760_v10 = vrot.slane %v221_v44, %v3409_v6  ;;  %v3765_v47 = vcombine.high %v3749_v30, %v3749_v30 }
  0x40   : > { %6366 = vst [vmem:[#allocation84_spill] sm:$0xff] %v3731_v16  ;;  %6367 = vst [vmem:[#allocation85_spill] sm:$0xff] %v3735_v54  ;;  %v763_v16 = vcombine.high %v221_v44, %v221_v44  ;;  %v3754_v62 = vcombine.high %v3738_v18, %v3738_v18  ;;  %v3757_v54 = vrot.slane %v746_v53, %v3409_v6 }
  0x41   : > { %6368 = vst [vmem:[#allocation86_spill] sm:$0xff] %v3738_v18  ;;  %6369 = vst [vmem:[#allocation87_spill] sm:$0xff] %v3742_v3  ;;  %v787_v3 = vcombine.high %v223_v59, %v223_v59  ;;  %v804_v18 = vcombine.high %v224_v33, %v224_v33  ;;  %v3780_v44 = vcombine.high %v3760_v10, %v3760_v10 }
  0x42   : > { %6370 = vst [vmem:[#allocation88_spill] sm:$0xff] %v3746_v35  ;;  %6371 = vst [vmem:[#allocation89_spill] sm:$0xff] %v3749_v30  ;;  %v3768_v0 = vrot.slane %v763_v16, %v3409_v6  ;;  %v3771_v35 = vrot.slane %v223_v59, %v3409_v6  ;;  %v3776_v53 = vcombine.high %v3757_v54, %v3757_v54  ;;  %v230_v59 = vld [vmem:[%s3414_s22 + $0x158] sm:$0xff] }
  0x43   : > { %6372 = vst [vmem:[#allocation90_spill] sm:$0xff] %v3754_v62  ;;  %6373 = vst [vmem:[#allocation91_spill] sm:$0xff] %v3757_v54  ;;  %v229_v62 = vld [vmem:[%s3414_s22 + $0x150] sm:$0xff]  ;;  %v3783_v30 = vrot.slane %v787_v3, %v3409_v6  ;;  %v3786_v16 = vrot.slane %v224_v33, %v3409_v6 }
  0x44   : > { %6374 = vst [vmem:[#allocation92_spill] sm:$0xff] %v3760_v10  ;;  %6375 = vst [vmem:[#allocation93_spill] sm:$0xff] %v3765_v47  ;;  %v3791_v47 = vcombine.high %v3768_v0, %v3768_v0  ;;  %v3795_v54 = vcombine.high %v3771_v35, %v3771_v35  ;;  %v233_v10 = vld [vmem:[%s3414_s22 + $0x170] sm:$0xff] }
  0x45   : > { %6376 = vst [vmem:[#allocation94_spill] sm:$0xff] %v3768_v0  ;;  %6377 = vst [vmem:[#allocation95_spill] sm:$0xff] %v3771_v35  ;;  %v3802_v3 = vcombine.high %v3783_v30, %v3783_v30  ;;  %v3806_v33 = vcombine.high %v3786_v16, %v3786_v16  ;;  %v3809_v0 = vrot.slane %v226_v49, %v3409_v6  ;;  %v232_v35 = vld [vmem:[%s3414_s22 + $0x168] sm:$0xff] }
  0x46   : > { %6378 = vst [vmem:[#allocation96_spill] sm:$0xff] %v3776_v53  ;;  %6379 = vst [vmem:[#allocation97_spill] sm:$0xff] %v3780_v44  ;;  %v3798_v53 = vrot.slane %v804_v18, %v3409_v6  ;;  %v828_v44 = vcombine.high %v226_v49, %v226_v49 }
  0x47   : > { %6380 = vst [vmem:[#allocation98_spill] sm:$0xff] %v3783_v30  ;;  %6381 = vst [vmem:[#allocation99_spill] sm:$0xff] %v3786_v16  ;;  %v3820_v30 = vrot.slane %v227_v9, %v3409_v6  ;;  %v3825_v16 = vcombine.high %v3809_v0, %v3809_v0 }
  0x48   : > { %6382 = vst [vmem:[#allocation100_spill] sm:$0xff] %v3791_v47  ;;  %6383 = vst [vmem:[#allocation101_spill] sm:$0xff] %v3795_v54  ;;  %v845_v47 = vcombine.high %v227_v9, %v227_v9  ;;  %v3814_v18 = vcombine.high %v3798_v53, %v3798_v53  ;;  %v3817_v54 = vrot.slane %v828_v44, %v3409_v6 }
  0x49   : > { %6384 = vst [vmem:[#allocation102_spill] sm:$0xff] %v3798_v53  ;;  %6385 = vst [vmem:[#allocation103_spill] sm:$0xff] %v3802_v3  ;;  %v869_v3 = vcombine.high %v229_v62, %v229_v62  ;;  %v886_v53 = vcombine.high %v230_v59, %v230_v59  ;;  %v3840_v9 = vcombine.high %v3820_v30, %v3820_v30 }
  0x4a   : > { %6386 = vst [vmem:[#allocation104_spill] sm:$0xff] %v3806_v33  ;;  %6387 = vst [vmem:[#allocation105_spill] sm:$0xff] %v3809_v0  ;;  %v3828_v49 = vrot.slane %v845_v47, %v3409_v6  ;;  %v3831_v33 = vrot.slane %v229_v62, %v3409_v6  ;;  %v3836_v44 = vcombine.high %v3817_v54, %v3817_v54  ;;  %v236_v62 = vld [vmem:[%s3414_s22 + $0x188] sm:$0xff] }
  0x4b   : > { %6388 = vst [vmem:[#allocation106_spill] sm:$0xff] %v3814_v18  ;;  %6389 = vst [vmem:[#allocation107_spill] sm:$0xff] %v3817_v54  ;;  %v235_v18 = vld [vmem:[%s3414_s22 + $0x180] sm:$0xff]  ;;  %v3843_v0 = vrot.slane %v869_v3, %v3409_v6  ;;  %v3846_v47 = vrot.slane %v230_v59, %v3409_v6 }
  0x4c   : > { %6390 = vst [vmem:[#allocation108_spill] sm:$0xff] %v3820_v30  ;;  %6391 = vst [vmem:[#allocation109_spill] sm:$0xff] %v3825_v16  ;;  %v3851_v16 = vcombine.high %v3828_v49, %v3828_v49  ;;  %v3855_v54 = vcombine.high %v3831_v33, %v3831_v33  ;;  %v3869_v30 = vrot.slane %v232_v35, %v3409_v6 }
  0x4d   : > { %6392 = vst [vmem:[#allocation110_spill] sm:$0xff] %v3828_v49  ;;  %6393 = vst [vmem:[#allocation111_spill] sm:$0xff] %v3831_v33  ;;  %v3862_v3 = vcombine.high %v3843_v0, %v3843_v0  ;;  %v3866_v59 = vcombine.high %v3846_v47, %v3846_v47  ;;  %v238_v49 = vld [vmem:[%s3414_s22 + $0x198] sm:$0xff] }
  0x4e   : > { %6394 = vst [vmem:[#allocation112_spill] sm:$0xff] %v3836_v44  ;;  %6395 = vst [vmem:[#allocation113_spill] sm:$0xff] %v3840_v9  ;;  %v3858_v44 = vrot.slane %v886_v53, %v3409_v6  ;;  %v910_v9 = vcombine.high %v232_v35, %v232_v35 }
  0x4f   : > { %6396 = vst [vmem:[#allocation114_spill] sm:$0xff] %v3843_v0  ;;  %6397 = vst [vmem:[#allocation115_spill] sm:$0xff] %v3846_v47  ;;  %v951_v0 = vcombine.high %v235_v18, %v235_v18  ;;  %v3885_v47 = vcombine.high %v3869_v30, %v3869_v30 }
  0x50   : > { %6398 = vst [vmem:[#allocation116_spill] sm:$0xff] %v3851_v16  ;;  %6399 = vst [vmem:[#allocation117_spill] sm:$0xff] %v3855_v54  ;;  %v927_v16 = vcombine.high %v233_v10, %v233_v10  ;;  %v3874_v33 = vcombine.high %v3858_v44, %v3858_v44  ;;  %v3877_v53 = vrot.slane %v910_v9, %v3409_v6 }
  0x51   : > { %6400 = vst [vmem:[#allocation118_spill] sm:$0xff] %v3858_v44  ;;  %6401 = vst [vmem:[#allocation119_spill] sm:$0xff] %v3862_v3  ;;  %v3880_v54 = vrot.slane %v233_v10, %v3409_v6  ;;  %v239_v3 = vld [vmem:[%s3414_s22 + $0x1a0] sm:$0xff]  ;;  %v968_v44 = vcombine.high %v236_v62, %v236_v62 }
  0x52   : > { %6402 = vst [vmem:[#allocation120_spill] sm:$0xff] %v3866_v59  ;;  %6403 = vst [vmem:[#allocation121_spill] sm:$0xff] %v3869_v30  ;;  %v3888_v35 = vrot.slane %v927_v16, %v3409_v6  ;;  %v3891_v59 = vrot.slane %v235_v18, %v3409_v6  ;;  %v3895_v9 = vcombine.high %v3877_v53, %v3877_v53 }
  0x53   : > { %6404 = vst [vmem:[#allocation122_spill] sm:$0xff] %v3874_v33  ;;  %6405 = vst [vmem:[#allocation123_spill] sm:$0xff] %v3877_v53  ;;  %v3899_v10 = vcombine.high %v3880_v54, %v3880_v54  ;;  %v3902_v33 = vrot.slane %v951_v0, %v3409_v6 }
  0x54   : > { %6406 = vst [vmem:[#allocation124_spill] sm:$0xff] %v3880_v54  ;;  %6407 = vst [vmem:[#allocation125_spill] sm:$0xff] %v3885_v47  ;;  %v3905_v47 = vrot.slane %v236_v62, %v3409_v6  ;;  %v3909_v16 = vcombine.high %v3888_v35, %v3888_v35  ;;  %v3913_v18 = vcombine.high %v3891_v59, %v3891_v59 }
  0x55   : > { %6408 = vst [vmem:[#allocation126_spill] sm:$0xff] %v3888_v35  ;;  %6409 = vst [vmem:[#allocation127_spill] sm:$0xff] %v3891_v59  ;;  %v992_v54 = vcombine.high %v238_v49, %v238_v49  ;;  %v3920_v0 = vcombine.high %v3902_v33, %v3902_v33 }
  0x56   : > { %6410 = vst [vmem:[#allocation128_spill] sm:$0xff] %v3895_v9  ;;  %6411 = vst [vmem:[#allocation129_spill] sm:$0xff] %v3899_v10  ;;  %v3916_v9 = vrot.slane %v968_v44, %v3409_v6  ;;  %v3924_v62 = vcombine.high %v3905_v47, %v3905_v47  ;;  %v3927_v10 = vrot.slane %v238_v49, %v3409_v6 }
  0x57   : > { %6412 = vst [vmem:[#allocation130_spill] sm:$0xff] %v3902_v33  ;;  %6413 = vst [vmem:[#allocation131_spill] sm:$0xff] %v3905_v47  ;;  %v3934_v44 = vrot.slane %v992_v54, %v3409_v6  ;;  %v1196_v33 = vcombine.low %v3423_v12, %v3441_v22  ;;  %v1213_v54 = vcombine.low %v3426_v14, %v3448_v24 }
  0x58   : > { %6414 = vst [vmem:[#allocation132_spill] sm:$0xff] %v3909_v16  ;;  %6415 = vst [vmem:[#allocation133_spill] sm:$0xff] %v3913_v18  ;;  %v1009_v16 = vcombine.high %v239_v3, %v239_v3  ;;  %v3931_v59 = vcombine.high %v3916_v9, %v3916_v9  ;;  %v3937_v18 = vrot.slane %v239_v3, %v3409_v6 }
  0x59   : > { %6416 = vst [vmem:[#allocation134_spill] sm:$0xff] %v3916_v9  ;;  %6417 = vst [vmem:[#allocation135_spill] sm:$0xff] %v3920_v0  ;;  %v3943_v47 = vcombine.high %v3927_v10, %v3927_v10  ;;  %v1197_v9 = vcombine.low %v3437_v21, %v3468_v31  ;;  %v3957_v3 = vcombine.high %v3934_v44, %v3934_v44 }
  0x5a   : > { %6418 = vst [vmem:[#allocation136_spill] sm:$0xff] %v3924_v62  ;;  %6419 = vst [vmem:[#allocation137_spill] sm:$0xff] %v3927_v10  ;;  %v3946_v49 = vrot.slane %v1009_v16, %v3409_v6  ;;  %v3961_v22 = vcombine.high %v3937_v18, %v3937_v18  ;;  %v3964_v12 = vrot.slane %v1196_v33, %v3409_v6 }
  0x5b   : > { %6420 = vst [vmem:[#allocation138_spill] sm:$0xff] %v3931_v59  ;;  %6421 = vst [vmem:[#allocation139_spill] sm:$0xff] %v3934_v44  ;;  %v3953_v59 = vld.sshfl [vmem:[%s3414_s22 + $0x10] sm:$0x3 pattern:$0x76325410]  ;;  %v1214_v16 = vcombine.low %v3444_v23, %v3472_v32  ;;  %v3973_v24 = vrot.slane %v1197_v9, %v3409_v6  ;;  %v3976_v14 = vrot.slane %v1213_v54, %v3409_v6 }
  0x5c   : > { %6422 = vst [vmem:[#allocation140_spill] sm:$0xff] %v3937_v18  ;;  %6423 = vst [vmem:[#allocation141_spill] sm:$0xff] %v3943_v47  ;;  %v3970_v31 = vcombine.high %v3946_v49, %v3946_v49  ;;  %v1230_v21 = vcombine.low %v3953_v59, %v3430_v17  ;;  %v1231_v32 = vcombine.low %v3456_v27, %v3452_v26 }
  0x5d   : > { %6424 = vst [vmem:[#allocation142_spill] sm:$0xff] %v3946_v49  ;;  %6425 = vst [vmem:[#allocation143_spill] sm:$0xff] %v3953_v59  ;;  %v3984_v33 = vrot.slane %v1214_v16, %v3409_v6  ;;  %v1247_v23 = vcombine.low %v3480_v36, %v3433_v19  ;;  %v1248_v9 = vcombine.low %v3463_v29, %v3459_v28  ;;  %v4193_v29 = vld.sshfl [vmem:[%s3414_s22 + $0xd0] sm:$0x3 pattern:$0x76325410] }
  0x5e   : > { %6426 = vst [vmem:[#allocation144_spill] sm:$0xff] %v3957_v3  ;;  %6427 = vst [vmem:[#allocation145_spill] sm:$0xff] %v3961_v22  ;;  %v3981_v22 = vld.sshfl [vmem:[%s3414_s22 + $0x28] sm:$0x3 pattern:$0x76325410]  ;;  %v1265_v16 = vcombine.low %v3475_v34, %v3494_v41  ;;  %v4004_v19 = vrot.slane %v1231_v32, %v3409_v6  ;;  %v1281_v26 = vcombine.low %v3490_v40, %v3513_v50 }
  0x5f   : > { %6428 = vst [vmem:[#allocation146_spill] sm:$0xff] %v3970_v31  ;;  %6429 = vst [vmem:[#allocation147_spill] sm:$0xff] %v3981_v22  ;;  %v3995_v31 = vrot.slane %v1230_v21, %v3409_v6  ;;  %v1264_v17 = vcombine.low %v3484_v37, %v3981_v22  ;;  %v4007_v28 = vrot.slane %v1247_v23, %v3409_v6  ;;  %v4013_v21 = vld.sshfl [vmem:[%s3414_s22 + $0x40] sm:$0x3 pattern:$0x76325410] }
  0x60   : > { %v4010_v54 = vrot.slane %v1248_v9, %v3409_v6  ;;  %6430 = vst [vmem:[#allocation148_spill] sm:$0xff] %v4013_v21  ;;  %v4019_v41 = vrot.slane %v1265_v16, %v3409_v6  ;;  %v1282_v32 = vcombine.low %v3487_v39, %v3505_v46  ;;  %v1298_v34 = vcombine.low %v3501_v45, %v3525_v55  ;;  %v4044_v9 = vld.sshfl [vmem:[%s3414_s22 + $0x58] sm:$0x3 pattern:$0x76325410]  ;;  %v6458_v37 = vld [vmem:[#allocation66_spill] sm:$0xff] }
  0x61   : > { %v4016_v22 = vrot.slane %v1264_v17, %v3409_v6  ;;  %v1299_v17 = vcombine.low %v4013_v21, %v3497_v43  ;;  %v4036_v50 = vrot.slane %v1281_v26, %v3409_v6  ;;  %v1315_v23 = vcombine.low %v3520_v52, %v3516_v51  ;;  %6431 = vst [vmem:[#allocation149_spill] sm:$0xff] %v4044_v9  ;;  %v6455_v40 = vld [vmem:[#allocation69_spill] sm:$0xff]  ;;  %v6465_v36 = vld [vmem:[#allocation70_spill] sm:$0xff] }
  0x62   : > { %v4039_v46 = vrot.slane %v1282_v32, %v3409_v6  ;;  %v4047_v55 = vrot.slane %v1298_v34, %v3409_v6  ;;  %v1316_v16 = vcombine.low %v3540_v60, %v3508_v48  ;;  %v1332_v26 = vcombine.low %v3532_v57, %v3528_v56  ;;  %v4076_v32 = vld.sshfl [vmem:[%s3414_s22 + $0x70] sm:$0x3 pattern:$0x76325410]  ;;  %v6444_v60 = vld [vmem:[#allocation57_spill] sm:$0xff]  ;;  %6459 = vst [vmem:[#allocation156_spill] sm:$0xff] %v4193_v29 }
  0x63   : > { %v4050_v43 = vrot.slane %v1299_v17, %v3409_v6  ;;  %v4059_v21 = vrot.slane %v1315_v23, %v3409_v6  ;;  %v1333_v51 = vcombine.low %v3551_v1, %v4044_v9  ;;  %v1349_v34 = vcombine.low %v3535_v58, %v3555_v2  ;;  %6432 = vst [vmem:[#allocation150_spill] sm:$0xff] %v4076_v32 }
  0x64   : > { %v4068_v48 = vrot.slane %v1316_v16, %v3409_v6  ;;  %v4071_v56 = vrot.slane %v1332_v26, %v3409_v6  ;;  %v1350_v23 = vcombine.low %v3543_v61, %v3562_v5  ;;  %v1366_v17 = vcombine.low %v3546_v63, %v3569_v8  ;;  %v4108_v26 = vld.sshfl [vmem:[%s3414_s22 + $0x88] sm:$0x3 pattern:$0x76325410] }
  0x65   : > { %v4079_v9 = vrot.slane %v1333_v51, %v3409_v6  ;;  %v4082_v2 = vrot.slane %v1349_v34, %v3409_v6  ;;  %v1367_v16 = vcombine.low %v3565_v7, %v3585_v20  ;;  %v1383_v51 = vcombine.low %v4076_v32, %v3558_v4  ;;  %6433 = vst [vmem:[#allocation151_spill] sm:$0xff] %v4108_v26  ;;  %v6435_v4 = vld [vmem:[#allocation53_spill] sm:$0xff]  ;;  %v4130_v7 = vld.sshfl [vmem:[%s3414_s22 + $0xa0] sm:$0x3 pattern:$0x76325410] }
  0x66   : > { %v4091_v58 = vrot.slane %v1350_v23, %v3409_v6  ;;  %v1384_v34 = vcombine.low %v3577_v13, %v3573_v11  ;;  %v4100_v8 = vrot.slane %v1366_v17, %v3409_v6  ;;  %v1400_v23 = vcombine.low %v3596_v38, %v3580_v15  ;;  %v6434_v15 = vld [vmem:[#allocation52_spill] sm:$0xff]  ;;  %v6436_v13 = vld [vmem:[#allocation47_spill] sm:$0xff]  ;;  %6437 = vst [vmem:[#allocation152_spill] sm:$0xff] %v4130_v7 }
  0x67   : > { %v4103_v20 = vrot.slane %v1367_v16, %v3409_v6  ;;  %v4113_v32 = vrot.slane %v1383_v51, %v3409_v6  ;;  %v1401_v17 = vcombine.low %v3600_v42, %v3588_v25  ;;  %v1417_v38 = vcombine.low %v6434_v15, %v4108_v26  ;;  %v6438_v42 = vld [vmem:[#allocation55_spill] sm:$0xff]  ;;  %v6439_v16 = vld [vmem:[#allocation50_spill] sm:$0xff] }
  0x68   : > { %v4116_v11 = vrot.slane %v1384_v34, %v3409_v6  ;;  %v4123_v5 = vrot.slane %v1400_v23, %v3409_v6  ;;  %v1418_v51 = vcombine.low %v6436_v13, %v6435_v4  ;;  %v1434_v63 = vcombine.low %v6439_v16, %v6438_v42  ;;  %v6440_v23 = vld [vmem:[#allocation56_spill] sm:$0xff]  ;;  %v6441_v61 = vld [vmem:[#allocation51_spill] sm:$0xff]  ;;  %v6442_v4 = vld [vmem:[#allocation58_spill] sm:$0xff] }
  0x69   : > { %v4135_v25 = vrot.slane %v1401_v17, %v3409_v6  ;;  %v1435_v1 = vcombine.low %v6441_v61, %v6440_v23  ;;  %v4142_v57 = vrot.slane %v1417_v38, %v3409_v6  ;;  %v6443_v13 = vld [vmem:[#allocation54_spill] sm:$0xff]  ;;  %v1452_v34 = vcombine.low %v4130_v7, %v6444_v60  ;;  %v6445_v38 = vld [vmem:[#allocation59_spill] sm:$0xff]  ;;  %v6446_v61 = vld [vmem:[#allocation61_spill] sm:$0xff] }
  0x6a   : > { %v4145_v26 = vrot.slane %v1418_v51, %v3409_v6  ;;  %v1451_v15 = vcombine.low %v6443_v13, %v6442_v4  ;;  %v4154_v42 = vrot.slane %v1434_v63, %v3409_v6  ;;  %v1468_v51 = vcombine.low %v6446_v61, %v6445_v38  ;;  %v4162_v16 = vld.sshfl [vmem:[%s3414_s22 + $0xb8] sm:$0x3 pattern:$0x76325410]  ;;  %v6448_v63 = vld [vmem:[#allocation60_spill] sm:$0xff]  ;;  %v6451_v38 = vld [vmem:[#allocation62_spill] sm:$0xff] }
  0x6b   : > { %v4157_v23 = vrot.slane %v1435_v1, %v3409_v6  ;;  %6447 = vst [vmem:[#allocation153_spill] sm:$0xff] %v4162_v16  ;;  %v4170_v17 = vrot.slane %v1452_v34, %v3409_v6  ;;  %v6449_v7 = vld [vmem:[#allocation64_spill] sm:$0xff]  ;;  %v6452_v61 = vld [vmem:[#allocation65_spill] sm:$0xff]  ;;  %v6457_v1 = vld [vmem:[#allocation71_spill] sm:$0xff] }
  0x6c   : > { %v4167_v60 = vrot.slane %v1451_v15, %v3409_v6  ;;  %v1469_v13 = vcombine.low %v6449_v7, %v6448_v63  ;;  %v4177_v52 = vrot.slane %v1468_v51, %v3409_v6  ;;  %v1485_v45 = vcombine.low %v6452_v61, %v6451_v38  ;;  %v6453_v4 = vld [vmem:[#allocation68_spill] sm:$0xff]  ;;  %v6456_v63 = vld [vmem:[#allocation63_spill] sm:$0xff] }
  0x6d   : > { %v1486_v39 = vcombine.low %v6453_v4, %v4162_v16  ;;  %v1502_v7 = vcombine.low %v6456_v63, %v6455_v40  ;;  %v1503_v51 = vcombine.low %v6458_v37, %v6457_v1  ;;  %v6462_v4 = vld [vmem:[#allocation72_spill] sm:$0xff]  ;;  %v6463_v15 = vld [vmem:[#allocation67_spill] sm:$0xff] }
  0x6e   : > { %6450 = vst [vmem:[#allocation154_spill] sm:$0xff] %v4177_v52  ;;  %v4186_v34 = vrot.slane %v1469_v13, %v3409_v6  ;;  %v4196_v38 = vrot.slane %v1485_v45, %v3409_v6  ;;  %v1519_v61 = vcombine.low %v6463_v15, %v6462_v4  ;;  %v6464_v13 = vld [vmem:[#allocation74_spill] sm:$0xff]  ;;  %v6468_v45 = vld [vmem:[#allocation73_spill] sm:$0xff]  ;;  %v6471_v40 = vld [vmem:[#allocation75_spill] sm:$0xff] }
  0x6f   : > { %v4199_v16 = vrot.slane %v1486_v39, %v3409_v6  ;;  %v1520_v27 = vcombine.low %v6465_v36, %v6464_v13  ;;  %v4208_v63 = vrot.slane %v1502_v7, %v3409_v6  ;;  %v4211_v1 = vrot.slane %v1503_v51, %v3409_v6  ;;  %v6472_v36 = vld [vmem:[#allocation77_spill] sm:$0xff]  ;;  %v4226_v15 = vld.sshfl [vmem:[%s3414_s22 + $0xe8] sm:$0x3 pattern:$0x76325410]  ;;  %v6476_v39 = vld [vmem:[#allocation80_spill] sm:$0xff] }
  0x70   : > { %6454 = vst [vmem:[#allocation155_spill] sm:$0xff] %v4186_v34  ;;  %6460 = vst [vmem:[#allocation157_spill] sm:$0xff] %v4196_v38  ;;  %v1536_v37 = vcombine.low %v4193_v29, %v6468_v45  ;;  %v4218_v4 = vrot.slane %v1519_v61, %v3409_v6  ;;  %v1537_v7 = vcombine.low %v6472_v36, %v6471_v40  ;;  %v6475_v29 = vld [vmem:[#allocation76_spill] sm:$0xff]  ;;  %v6477_v61 = vld [vmem:[#allocation78_spill] sm:$0xff] }
  0x71   : > { %6461 = vst [vmem:[#allocation158_spill] sm:$0xff] %v4199_v16  ;;  %6466 = vst [vmem:[#allocation159_spill] sm:$0xff] %v4208_v63  ;;  %v4221_v13 = vrot.slane %v1520_v27, %v3409_v6  ;;  %v1553_v59 = vcombine.low %v6476_v39, %v6475_v29  ;;  %v6478_v16 = vld [vmem:[#allocation81_spill] sm:$0xff]  ;;  %v6480_v40 = vld [vmem:[#allocation84_spill] sm:$0xff] }
  0x72   : > { %6467 = vst [vmem:[#allocation160_spill] sm:$0xff] %v4211_v1  ;;  %6469 = vst [vmem:[#allocation161_spill] sm:$0xff] %v4218_v4  ;;  %v4231_v45 = vrot.slane %v1536_v37, %v3409_v6  ;;  %v1554_v38 = vcombine.low %v6478_v16, %v6477_v61  ;;  %v4240_v34 = vrot.slane %v1537_v7, %v3409_v6  ;;  %v6481_v51 = vld [vmem:[#allocation85_spill] sm:$0xff]  ;;  %v6482_v1 = vld [vmem:[#allocation79_spill] sm:$0xff] }
  0x73   : > { %6470 = vst [vmem:[#allocation162_spill] sm:$0xff] %v4221_v13  ;;  %6473 = vst [vmem:[#allocation163_spill] sm:$0xff] %v4226_v15  ;;  %v1570_v36 = vcombine.low %v6480_v40, %v4226_v15  ;;  %v1571_v37 = vcombine.low %v6482_v1, %v6481_v51  ;;  %v4247_v63 = vrot.slane %v1553_v59, %v3409_v6  ;;  %v6485_v61 = vld [vmem:[#allocation87_spill] sm:$0xff]  ;;  %v6486_v16 = vld [vmem:[#allocation82_spill] sm:$0xff] }
  0x74   : > { %6474 = vst [vmem:[#allocation164_spill] sm:$0xff] %v4231_v45  ;;  %6479 = vst [vmem:[#allocation165_spill] sm:$0xff] %v4240_v34  ;;  %v4250_v29 = vrot.slane %v1554_v38, %v3409_v6  ;;  %v1587_v39 = vcombine.low %v6486_v16, %v6485_v61  ;;  %v6487_v27 = vld [vmem:[#allocation88_spill] sm:$0xff]  ;;  %v6488_v13 = vld [vmem:[#allocation83_spill] sm:$0xff] }
  0x75   : > { %6483 = vst [vmem:[#allocation166_spill] sm:$0xff] %v4247_v63  ;;  %v1588_v7 = vcombine.low %v6488_v13, %v6487_v27  ;;  %v4257_v4 = vld.sshfl [vmem:[%s3414_s22 + $0x100] sm:$0x3 pattern:$0x76325410]  ;;  %v4262_v40 = vrot.slane %v1570_v36, %v3409_v6  ;;  %v4265_v59 = vrot.slane %v1571_v37, %v3409_v6  ;;  %v6496_v13 = vld [vmem:[#allocation89_spill] sm:$0xff] }
  0x76   : > { %6484 = vst [vmem:[#allocation167_spill] sm:$0xff] %v4250_v29  ;;  %6489 = vst [vmem:[#allocation168_spill] sm:$0xff] %v4257_v4  ;;  %v6492_v51 = vld [vmem:[#allocation90_spill] sm:$0xff]  ;;  %v4272_v16 = vrot.slane %v1587_v39, %v3409_v6  ;;  %v1605_v15 = vcombine.low %v4257_v4, %v6496_v13  ;;  %v6500_v61 = vld [vmem:[#allocation93_spill] sm:$0xff] }
  0x77   : > { %6490 = vst [vmem:[#allocation169_spill] sm:$0xff] %v4262_v40  ;;  %6491 = vst [vmem:[#allocation170_spill] sm:$0xff] %v4265_v59  ;;  %v6493_v38 = vld [vmem:[#allocation86_spill] sm:$0xff]  ;;  %v4275_v27 = vrot.slane %v1588_v7, %v3409_v6  ;;  %v6501_v39 = vld [vmem:[#allocation92_spill] sm:$0xff] }
  0x78   : > { %v1604_v1 = vcombine.low %v6493_v38, %v6492_v51  ;;  %6494 = vst [vmem:[#allocation171_spill] sm:$0xff] %v4272_v16  ;;  %v4280_v36 = vld.sshfl [vmem:[%s3414_s22 + $0x118] sm:$0x3 pattern:$0x76325410]  ;;  %v6499_v38 = vld [vmem:[#allocation91_spill] sm:$0xff]  ;;  %v4294_v13 = vrot.slane %v1605_v15, %v3409_v6 }
  0x79   : > { %6495 = vst [vmem:[#allocation172_spill] sm:$0xff] %v4275_v27  ;;  %6497 = vst [vmem:[#allocation173_spill] sm:$0xff] %v4280_v36  ;;  %v1621_v29 = vcombine.low %v6500_v61, %v6499_v38  ;;  %v6502_v63 = vld [vmem:[#allocation96_spill] sm:$0xff]  ;;  %v6504_v4 = vld [vmem:[#allocation94_spill] sm:$0xff] }
  0x7a   : > { %v4285_v51 = vrot.slane %v1604_v1, %v3409_v6  ;;  %v1622_v34 = vcombine.low %v6502_v63, %v6501_v39  ;;  %6503 = vst [vmem:[#allocation175_spill] sm:$0xff] %v4294_v13  ;;  %v6505_v45 = vld [vmem:[#allocation97_spill] sm:$0xff]  ;;  %v6506_v37 = vld [vmem:[#allocation100_spill] sm:$0xff]  ;;  %v6510_v39 = vld [vmem:[#allocation95_spill] sm:$0xff] }
  0x7b   : > { %v1638_v52 = vcombine.low %v6505_v45, %v6504_v4  ;;  %v1639_v59 = vcombine.low %v6506_v37, %v4280_v36  ;;  %v4301_v1 = vrot.slane %v1621_v29, %v3409_v6  ;;  %v6509_v61 = vld [vmem:[#allocation101_spill] sm:$0xff]  ;;  %v6511_v7 = vld [vmem:[#allocation103_spill] sm:$0xff]  ;;  %v6512_v27 = vld [vmem:[#allocation98_spill] sm:$0xff] }
  0x7c   : > { %6498 = vst [vmem:[#allocation174_spill] sm:$0xff] %v4285_v51  ;;  %v4304_v38 = vrot.slane %v1622_v34, %v3409_v6  ;;  %v1655_v63 = vcombine.low %v6510_v39, %v6509_v61  ;;  %v1656_v15 = vcombine.low %v6512_v27, %v6511_v7  ;;  %v6515_v29 = vld [vmem:[#allocation104_spill] sm:$0xff]  ;;  %v6516_v37 = vld [vmem:[#allocation99_spill] sm:$0xff]  ;;  %v6519_v16 = vld [vmem:[#allocation106_spill] sm:$0xff] }
  0x7d   : > { %6507 = vst [vmem:[#allocation176_spill] sm:$0xff] %v4301_v1  ;;  %v4313_v4 = vrot.slane %v1638_v52, %v3409_v6  ;;  %v4316_v36 = vrot.slane %v1639_v59, %v3409_v6  ;;  %v1672_v34 = vcombine.low %v6516_v37, %v6515_v29  ;;  %v4321_v45 = vld.sshfl [vmem:[%s3414_s22 + $0x130] sm:$0x3 pattern:$0x76325410]  ;;  %v6520_v52 = vld [vmem:[#allocation102_spill] sm:$0xff] }
  0x7e   : > { %6508 = vst [vmem:[#allocation177_spill] sm:$0xff] %v4304_v38  ;;  %6517 = vst [vmem:[#allocation180_spill] sm:$0xff] %v4321_v45  ;;  %v4326_v39 = vrot.slane %v1655_v63, %v3409_v6  ;;  %v4329_v7 = vrot.slane %v1656_v15, %v3409_v6  ;;  %v1673_v27 = vcombine.low %v6520_v52, %v6519_v16  ;;  %v6522_v29 = vld [vmem:[#allocation105_spill] sm:$0xff]  ;;  %v6523_v51 = vld [vmem:[#allocation107_spill] sm:$0xff] }
  0x7f   : > { %6513 = vst [vmem:[#allocation178_spill] sm:$0xff] %v4313_v4  ;;  %6514 = vst [vmem:[#allocation179_spill] sm:$0xff] %v4316_v36  ;;  %v4336_v13 = vrot.slane %v1672_v34, %v3409_v6  ;;  %v1689_v37 = vcombine.low %v4321_v45, %v6522_v29  ;;  %v6524_v61 = vld [vmem:[#allocation109_spill] sm:$0xff]  ;;  %v6527_v52 = vld [vmem:[#allocation108_spill] sm:$0xff] }
  0x80   : > { %6518 = vst [vmem:[#allocation181_spill] sm:$0xff] %v4329_v7  ;;  %v1690_v63 = vcombine.low %v6524_v61, %v6523_v51  ;;  %v4343_v38 = vld.sshfl [vmem:[%s3414_s22 + $0x148] sm:$0x3 pattern:$0x76325410]  ;;  %v4348_v16 = vrot.slane %v1673_v27, %v3409_v6  ;;  %v6528_v59 = vld [vmem:[#allocation112_spill] sm:$0xff] }
  0x81   : > { %6521 = vst [vmem:[#allocation182_spill] sm:$0xff] %v4336_v13  ;;  %6525 = vst [vmem:[#allocation183_spill] sm:$0xff] %v4343_v38  ;;  %v1706_v36 = vcombine.low %v6528_v59, %v6527_v52  ;;  %v6529_v34 = vld [vmem:[#allocation110_spill] sm:$0xff]  ;;  %v6530_v4 = vld [vmem:[#allocation113_spill] sm:$0xff]  ;;  %v4355_v29 = vrot.slane %v1689_v37, %v3409_v6 }
  0x82   : > { %6526 = vst [vmem:[#allocation184_spill] sm:$0xff] %v4348_v16  ;;  %v1707_v1 = vcombine.low %v6530_v4, %v6529_v34  ;;  %v4358_v45 = vrot.slane %v1690_v63, %v3409_v6  ;;  %v6531_v51 = vld [vmem:[#allocation116_spill] sm:$0xff]  ;;  %v6532_v40 = vld [vmem:[#allocation117_spill] sm:$0xff]  ;;  %v6533_v15 = vld [vmem:[#allocation111_spill] sm:$0xff] }
  0x83   : > { %v1723_v61 = vcombine.low %v6531_v51, %v4343_v38  ;;  %v1724_v27 = vcombine.low %v6533_v15, %v6532_v40  ;;  %v4367_v52 = vrot.slane %v1706_v36, %v3409_v6  ;;  %v6536_v37 = vld [vmem:[#allocation119_spill] sm:$0xff]  ;;  %v6537_v4 = vld [vmem:[#allocation114_spill] sm:$0xff]  ;;  %v6540_v36 = vld [vmem:[#allocation120_spill] sm:$0xff] }
  0x84   : > { %v4370_v34 = vrot.slane %v1707_v1, %v3409_v6  ;;  %v1740_v63 = vcombine.low %v6537_v4, %v6536_v37  ;;  %v4375_v59 = vld.sshfl [vmem:[%s3414_s22 + $0x160] sm:$0x3 pattern:$0x76325410]  ;;  %v6541_v15 = vld [vmem:[#allocation115_spill] sm:$0xff]  ;;  %v6545_v1 = vld [vmem:[#allocation125_spill] sm:$0xff] }
  0x85   : > { %6534 = vst [vmem:[#allocation185_spill] sm:$0xff] %v4367_v52  ;;  %6538 = vst [vmem:[#allocation187_spill] sm:$0xff] %v4375_v59  ;;  %v4380_v40 = vrot.slane %v1723_v61, %v3409_v6  ;;  %v4383_v7 = vrot.slane %v1724_v27, %v3409_v6  ;;  %v1741_v51 = vcombine.low %v6541_v15, %v6540_v36  ;;  %v6542_v4 = vld [vmem:[#allocation122_spill] sm:$0xff]  ;;  %v6551_v27 = vld [vmem:[#allocation132_spill] sm:$0xff] }
  0x86   : > { %6535 = vst [vmem:[#allocation186_spill] sm:$0xff] %v4370_v34  ;;  %v4390_v37 = vrot.slane %v1740_v63, %v3409_v6  ;;  %v6543_v16 = vld [vmem:[#allocation118_spill] sm:$0xff]  ;;  %v1758_v38 = vcombine.low %v4375_v59, %v3869_v30  ;;  %v4397_v61 = vld.sshfl [vmem:[%s3414_s22 + $0x178] sm:$0x3 pattern:$0x76325410]  ;;  %v1774_v15 = vcombine.low %v6545_v1, %v3877_v53 }
  0x87   : > { %6539 = vst [vmem:[#allocation188_spill] sm:$0xff] %v4383_v7  ;;  %v1757_v13 = vcombine.low %v6543_v16, %v6542_v4  ;;  %6544 = vst [vmem:[#allocation189_spill] sm:$0xff] %v4397_v61  ;;  %v4402_v36 = vrot.slane %v1741_v51, %v3409_v6  ;;  %v6546_v63 = vld [vmem:[#allocation124_spill] sm:$0xff]  ;;  %v6550_v59 = vld [vmem:[#allocation129_spill] sm:$0xff]  ;;  %v1792_v7 = vcombine.low %v6551_v27, %v4397_v61 }
  0x88   : > { %v6547_v34 = vld [vmem:[#allocation128_spill] sm:$0xff]  ;;  %v4412_v30 = vrot.slane %v1758_v38, %v3409_v6  ;;  %v1791_v16 = vcombine.low %v6550_v59, %v3888_v35  ;;  %v4421_v53 = vrot.slane %v1774_v15, %v3409_v6  ;;  %v6554_v51 = vld [vmem:[#allocation130_spill] sm:$0xff] }
  0x89   : > { %v1775_v52 = vcombine.low %v6547_v34, %v6546_v63  ;;  %v4409_v4 = vrot.slane %v1757_v13, %v3409_v6  ;;  %v6552_v13 = vld [vmem:[#allocation133_spill] sm:$0xff]  ;;  %v6553_v34 = vld [vmem:[#allocation127_spill] sm:$0xff]  ;;  %v4434_v61 = vrot.slane %v1792_v7, %v3409_v6  ;;  %v1809_v15 = vcombine.low %v6554_v51, %v3920_v0  ;;  %v4439_v27 = vld.sshfl [vmem:[%s3414_s22 + $0x190] sm:$0x3 pattern:$0x76325410] }
  0x8a   : > { %6549 = vst [vmem:[#allocation191_spill] sm:$0xff] %v4412_v30  ;;  %v1808_v38 = vcombine.low %v6553_v34, %v6552_v13  ;;  %v4431_v35 = vrot.slane %v1791_v16, %v3409_v6  ;;  %6555 = vst [vmem:[#allocation130_spill] sm:$0xff] %v4439_v27  ;;  %v6556_v13 = vld [vmem:[#allocation131_spill] sm:$0xff]  ;;  %v6557_v34 = vld [vmem:[#allocation138_spill] sm:$0xff]  ;;  %v1842_v0 = vcombine.low %v4439_v27, %v3927_v10 }
  0x8b   : > { %6548 = vst [vmem:[#allocation190_spill] sm:$0xff] %v4409_v4  ;;  %v4424_v63 = vrot.slane %v1775_v52, %v3409_v6  ;;  %v1825_v1 = vcombine.low %v6556_v13, %v3924_v62  ;;  %v6558_v16 = vld [vmem:[#allocation134_spill] sm:$0xff]  ;;  %v1823_v4 = vrot.slane %v1809_v15, %v3409_v6 }
  0x8c   : > { %v4444_v59 = vrot.slane %v1808_v38, %v3409_v6  ;;  %v1826_v30 = vcombine.low %v6558_v16, %v6557_v34  ;;  %v1807_v7 = vcombine.low %v4431_v35, %v4434_v61  ;;  %v1859_v34 = vcombine.low %v3957_v3, %v3937_v18  ;;  %v6559_v16 = vld [vmem:[#allocation145_spill] sm:$0xff] }
  0x8d   : > { %v1790_v52 = vcombine.low %v4421_v53, %v4424_v63  ;;  %v1843_v53 = vcombine.low %v3943_v47, %v3934_v44  ;;  %v4458_v63 = vld.sshfl [vmem:[%s3414_s22 + $0x1a8] sm:$0x3 pattern:$0x76325410]  ;;  %v1833_v38 = vrot.slane %v1825_v1, %v3409_v6  ;;  %v1860_v35 = vcombine.low %v6559_v16, %v3946_v49  ;;  %v6560_v44 = vld [vmem:[#allocation146_spill] sm:$0xff] }
  0x8e   : > { %v1840_v62 = vrot.slane %v1826_v30, %v3409_v6  ;;  %v1824_v61 = vcombine.low %v4444_v59, %v1823_v4  ;;  %v1850_v15 = vrot.slane %v1842_v0, %v3409_v6  ;;  %v1876_v47 = vcombine.low %v6560_v44, %v4458_v63 }
  0x8f   : > { %v1857_v10 = vrot.slane %v1843_v53, %v3409_v6  ;;  %v1867_v1 = vrot.slane %v1859_v34, %v3409_v6  ;;  %v1874_v30 = vrot.slane %v1860_v35, %v3409_v6  ;;  %v6561_v18 = vcombine.low %v3964_v12, %v3973_v24 }
  0x90   : > { %v1841_v27 = vcombine.low %v1833_v38, %v1840_v62  ;;  %v1883_v4 = vrot.slane %v1876_v47, %v3409_v6  ;;  %v6562_v0 = vcombine.low %v3976_v14, %v3984_v33  ;;  %v6563_v62 = vcombine.low %v3995_v31, %v4004_v19 }
  0x91   : > { %v1926_v3 = vsel %vm1925_vm1, %v6561_v18, 0.0  ;;  %v1858_v49 = vcombine.low %v1850_v15, %v1857_v10  ;;  %v1875_v53 = vcombine.low %v1867_v1, %v1874_v30  ;;  %v6564_v12 = vcombine.low %v4007_v28, %v4010_v54  ;;  %v6581_v15 = vld [vmem:[#allocation158_spill] sm:$0xff]  ;;  %v6584_v30 = vld [vmem:[#allocation160_spill] sm:$0xff] }
  0x92   : > { %v1927_v59 = vsel %vm1925_vm1, %v6562_v0, 0.0  ;;  %v1929_v34 = vsel %vm1925_vm1, %v6563_v62, 0.0  ;;  %v6565_v47 = vcombine.low %v4016_v22, %v4019_v41  ;;  %v6566_v14 = vcombine.low %v4036_v50, %v4039_v46 }
  0x93   : > { %v1928_v38 = vadd.f32 %v1927_v59, %v1926_v3  ;;  %v1931_v24 = vsel %vm1925_vm1, %v6564_v12, 0.0  ;;  %v6567_v19 = vcombine.low %v4047_v55, %v4050_v43  ;;  %v6568_v28 = vcombine.low %v4059_v21, %v4068_v48  ;;  %v6587_v59 = vld [vmem:[#allocation162_spill] sm:$0xff]  ;;  %v6590_v12 = vld [vmem:[#allocation165_spill] sm:$0xff] }
  0x94   : > { %v1933_v10 = vsel %vm1925_vm1, %v6565_v47, 0.0  ;;  %v1935_v18 = vsel %vm1925_vm1, %v6566_v14, 0.0  ;;  %v6569_v22 = vcombine.low %v4071_v56, %v4079_v9  ;;  %v6570_v46 = vcombine.low %v4082_v2, %v4091_v58  ;;  %v6577_v9 = vld [vmem:[#allocation154_spill] sm:$0xff] }
  0x95   : > { %v1937_v31 = vsel %vm1925_vm1, %v6567_v19, 0.0  ;;  %v1939_v3 = vsel %vm1925_vm1, %v6568_v28, 0.0  ;;  %v1930_v33 = vadd.f32 %v1929_v34, %v1928_v38  ;;  %v6571_v43 = vcombine.low %v4100_v8, %v4103_v20  ;;  %v6589_v38 = vld [vmem:[#allocation164_spill] sm:$0xff]  ;;  %v6592_v14 = vld [vmem:[#allocation166_spill] sm:$0xff]  ;;  %v6593_v19 = vld [vmem:[#allocation167_spill] sm:$0xff] }
  0x96   : > { %v1941_v41 = vsel %vm1925_vm1, %v6569_v22, 0.0  ;;  %v1943_v50 = vsel %vm1925_vm1, %v6570_v46, 0.0  ;;  %v6572_v48 = vcombine.low %v4113_v32, %v4116_v11  ;;  %v6573_v56 = vcombine.low %v4123_v5, %v4135_v25  ;;  %v6578_v32 = vld [vmem:[#allocation155_spill] sm:$0xff]  ;;  %v6596_v46 = vld [vmem:[#allocation170_spill] sm:$0xff] }
  0x97   : > { %v1945_v55 = vsel %vm1925_vm1, %v6571_v43, 0.0  ;;  %v6574_v58 = vcombine.low %v4142_v57, %v4145_v26  ;;  %v6575_v8 = vcombine.low %v4154_v42, %v4157_v23  ;;  %v6576_v20 = vcombine.low %v4167_v60, %v4170_v17  ;;  %v6580_v26 = vld [vmem:[#allocation157_spill] sm:$0xff]  ;;  %v6583_v23 = vld [vmem:[#allocation159_spill] sm:$0xff] }
  0x98   : > { %v4522_v54 = vsel %vm1925_vm1, %v6572_v48, 0.0  ;;  %v4528_v21 = vsel %vm1925_vm1, %v6573_v56, 0.0  ;;  %v1932_v25 = vadd.f32 %v1931_v24, %v1930_v33  ;;  %v6579_v35 = vcombine.low %v6577_v9, %v6578_v32  ;;  %v6586_v17 = vld [vmem:[#allocation161_spill] sm:$0xff]  ;;  %v6601_v32 = vld [vmem:[#allocation174_spill] sm:$0xff] }
  0x99   : > { %v4534_v2 = vsel %vm1925_vm1, %v6574_v58, 0.0  ;;  %v4540_v11 = vsel %vm1925_vm1, %v6575_v8, 0.0  ;;  %v4546_v5 = vsel %vm1925_vm1, %v6576_v20, 0.0  ;;  %v6582_v1 = vcombine.low %v6580_v26, %v6581_v15  ;;  %v6595_v33 = vld [vmem:[#allocation169_spill] sm:$0xff]  ;;  %v6598_v58 = vld [vmem:[#allocation171_spill] sm:$0xff]  ;;  %v6599_v8 = vld [vmem:[#allocation172_spill] sm:$0xff] }
  0x9a   : > { %v4552_v57 = vsel %vm1925_vm1, %v6579_v35, 0.0  ;;  %v6585_v0 = vcombine.low %v6583_v23, %v6584_v30  ;;  %v6588_v62 = vcombine.low %v6586_v17, %v6587_v59  ;;  %v6591_v24 = vcombine.low %v6589_v38, %v6590_v12  ;;  %v6602_v35 = vld [vmem:[#allocation175_spill] sm:$0xff]  ;;  %v6605_v23 = vld [vmem:[#allocation177_spill] sm:$0xff]  ;;  %v6607_v17 = vld [vmem:[#allocation178_spill] sm:$0xff] }
  0x9b   : > { %v4558_v42 = vsel %vm1925_vm1, %v6582_v1, 0.0  ;;  %v6594_v28 = vcombine.low %v6592_v14, %v6593_v19  ;;  %v6597_v43 = vcombine.low %v6595_v33, %v6596_v46  ;;  %v1934_v56 = vadd.f32 %v1933_v10, %v1932_v25  ;;  %v6604_v1 = vld [vmem:[#allocation176_spill] sm:$0xff]  ;;  %v6608_v10 = vld [vmem:[#allocation179_spill] sm:$0xff] }
  0x9c   : > { %v4564_v60 = vsel %vm1925_vm1, %v6585_v0, 0.0  ;;  %v4570_v34 = vsel %vm1925_vm1, %v6588_v62, 0.0  ;;  %v4576_v47 = vsel %vm1925_vm1, %v6591_v24, 0.0  ;;  %v6600_v20 = vcombine.low %v6598_v58, %v6599_v8  ;;  %v6610_v62 = vld [vmem:[#allocation181_spill] sm:$0xff]  ;;  %v6612_v24 = vld [vmem:[#allocation182_spill] sm:$0xff]  ;;  %v6613_v14 = vld [vmem:[#allocation184_spill] sm:$0xff] }
  0x9d   : > { %v4582_v22 = vsel %vm1925_vm1, %v6594_v28, 0.0  ;;  %v4588_v48 = vsel %vm1925_vm1, %v6597_v43, 0.0  ;;  %v6603_v26 = vcombine.low %v6601_v32, %v6602_v35  ;;  %v6606_v30 = vcombine.low %v6604_v1, %v6605_v23  ;;  %v6616_v58 = vld [vmem:[#allocation185_spill] sm:$0xff]  ;;  %v6617_v8 = vld [vmem:[#allocation186_spill] sm:$0xff]  ;;  %v6619_v32 = vld [vmem:[#allocation188_spill] sm:$0xff] }
  0x9e   : > { %v4594_v9 = vsel %vm1925_vm1, %v6600_v20, 0.0  ;;  %v6609_v25 = vcombine.low %v6607_v17, %v6608_v10  ;;  %v6611_v38 = vcombine.low %v4326_v39, %v6610_v62  ;;  %v6614_v19 = vcombine.low %v6612_v24, %v6613_v14  ;;  %v6632_v62 = vld [vmem:[#allocation2_spill] sm:$0xff]  ;;  %v6637_v14 = vld [vmem:[#allocation3_spill] sm:$0xff] }
  0x9f   : > { %v4600_v15 = vsel %vm1925_vm1, %v6603_v26, 0.0  ;;  %v4606_v0 = vsel %vm1925_vm1, %v6606_v30, 0.0  ;;  %v6615_v33 = vcombine.low %v4355_v29, %v4358_v45  ;;  %v1936_v43 = vadd.f32 %v1935_v18, %v1934_v56  ;;  %v6622_v29 = vld [vmem:[#allocation190_spill] sm:$0xff]  ;;  %v6623_v18 = vld [vmem:[#allocation191_spill] sm:$0xff] }
  0xa0   : > { %v4612_v59 = vsel %vm1925_vm1, %v6609_v25, 0.0  ;;  %v4618_v12 = vsel %vm1925_vm1, %v6611_v38, 0.0  ;;  %v4624_v28 = vsel %vm1925_vm1, %v6614_v19, 0.0  ;;  %v6618_v20 = vcombine.low %v6616_v58, %v6617_v8  ;;  %v6636_v24 = vld [vmem:[#allocation14_spill] sm:$0xff]  ;;  %v6639_v58 = vld [vmem:[#allocation8_spill] sm:$0xff] }
  0xa1   : > { %v4630_v46 = vsel %vm1925_vm1, %v6615_v33, 0.0  ;;  %v6620_v35 = vcombine.low %v4380_v40, %v6619_v32  ;;  %v6621_v1 = vcombine.low %v4390_v37, %v4402_v36  ;;  %v6624_v56 = vcombine.low %v6622_v29, %v6623_v18  ;;  %v6638_v33 = vld [vmem:[#allocation9_spill] sm:$0xff]  ;;  %v6643_v18 = vld [vmem:[#allocation11_spill] sm:$0xff] }
  0xa2   : > { %v4636_v39 = vsel %vm1925_vm1, %v6618_v20, 0.0  ;;  %v4657_v30 = vsel %vm1925_vm1, %v1790_v52, 0.0  ;;  %v4660_v40 = vsel %vm1925_vm1, %v1807_v7, 0.0  ;;  %v4663_v17 = vsel %vm1925_vm1, %v1824_v61, 0.0  ;;  %v6633_v7 = vld [vmem:[#allocation7_spill] sm:$0xff]  ;;  %v6634_v61 = vld [vmem:[#allocation6_spill] sm:$0xff] }
  0xa3   : > { %v4642_v26 = vsel %vm1925_vm1, %v6620_v35, 0.0  ;;  %v4648_v45 = vsel %vm1925_vm1, %v6621_v1, 0.0  ;;  %v4654_v23 = vsel %vm1925_vm1, %v6624_v56, 0.0  ;;  %6626 = vst [vmem:[#allocation145_spill] sm:$0xff] %v4657_v30  ;;  %6627 = vst [vmem:[#allocation146_spill] sm:$0xff] %v4660_v40  ;;  %v1938_v10 = vadd.f32 %v1937_v31, %v1936_v43  ;;  %v6641_v20 = vld [vmem:[#allocation143_spill] sm:$0xff] }
  0xa4   : > { %6625 = vst [vmem:[#allocation131_spill] sm:$0xff] %v4654_v23  ;;  %6628 = vst [vmem:[#allocation154_spill] sm:$0xff] %v4663_v17  ;;  %v4666_v37 = vsel %vm1925_vm1, %v1841_v27, 0.0  ;;  %v4669_v36 = vsel %vm1925_vm1, %v1858_v49, 0.0  ;;  %v4672_v25 = vsel %vm1925_vm1, %v1875_v53, 0.0  ;;  %v4676_v52 = vmul.f32 %v6632_v62, %v6632_v62  ;;  %v6642_v1 = vld [vmem:[#allocation4_spill] sm:$0xff] }
  0xa5   : > { %6629 = vst [vmem:[#allocation155_spill] sm:$0xff] %v4666_v37  ;;  %6630 = vst [vmem:[#allocation157_spill] sm:$0xff] %v4669_v36  ;;  %v4680_v38 = vmul.f32 %v6633_v7, %v6633_v7  ;;  %v4684_v31 = vmul.f32 %v6634_v61, %v6634_v61  ;;  %v1940_v27 = vadd.f32 %v1939_v3, %v1938_v10  ;;  %v4687_v49 = vsel %vm2005_vm2, %v1883_v4, 0.0  ;;  %v6640_v3 = vld [vmem:[#allocation15_spill] sm:$0xff]  ;;  %v6644_v10 = vld [vmem:[#allocation10_spill] sm:$0xff] }
  0xa6   : > { %6631 = vst [vmem:[#allocation158_spill] sm:$0xff] %v4672_v25  ;;  %6635 = vst [vmem:[#allocation159_spill] sm:$0xff] %v4687_v49  ;;  %v4691_v53 = vmul.f32 %v6636_v24, %v6636_v24  ;;  %v4695_v19 = vmul.f32 %v6637_v14, %v6637_v14  ;;  %v4699_v43 = vmul.f32 %v6638_v33, %v6638_v33  ;;  %v6645_v7 = vld [vmem:[#allocation17_spill] sm:$0xff]  ;;  %v6648_v33 = vld [vmem:[#allocation12_spill] sm:$0xff] }
  0xa7   : > { %v4703_v8 = vmul.f32 %v6639_v58, %v6639_v58  ;;  %v4707_v4 = vmul.f32 %v6640_v3, %v6640_v3  ;;  %v4711_v32 = vmul.f32 %v6641_v20, %v6641_v20  ;;  %v1942_v35 = vadd.f32 %v1941_v41, %v1940_v27  ;;  %v6646_v24 = vld [vmem:[#allocation5_spill] sm:$0xff]  ;;  %v6649_v20 = vld [vmem:[#allocation18_spill] sm:$0xff]  ;;  %v6653_v25 = vld [vmem:[#allocation20_spill] sm:$0xff] }
  0xa8   : > { %v4715_v29 = vmul.f32 %v6642_v1, %v6642_v1  ;;  %v4719_v56 = vmul.f32 %v6643_v18, %v6643_v18  ;;  %v4723_v62 = vmul.f32 %v6644_v10, %v6644_v10  ;;  %v4727_v61 = vmul.f32 %v6645_v7, %v6645_v7  ;;  %v6647_v41 = vld [vmem:[#allocation13_spill] sm:$0xff]  ;;  %v6650_v18 = vld [vmem:[#allocation147_spill] sm:$0xff]  ;;  %v6651_v7 = vld [vmem:[#allocation16_spill] sm:$0xff] }
  0xa9   : > { %v4731_v14 = vmul.f32 %v6646_v24, %v6646_v24  ;;  %v4735_v27 = vmul.f32 %v6647_v41, %v6647_v41  ;;  %v4739_v58 = vmul.f32 %v6648_v33, %v6648_v33  ;;  %v1944_v3 = vadd.f32 %v1943_v50, %v1942_v35  ;;  %v6652_v49 = vld [vmem:[#allocation21_spill] sm:$0xff]  ;;  %v6654_v50 = vld [vmem:[#allocation26_spill] sm:$0xff]  ;;  %v6656_v37 = vld [vmem:[#allocation24_spill] sm:$0xff] }
  0xaa   : > { %v4743_v1 = vmul.f32 %v6649_v20, %v6649_v20  ;;  %v4747_v10 = vmul.f32 %v6650_v18, %v6650_v18  ;;  %v4751_v24 = vmul.f32 %v6651_v7, %v6651_v7  ;;  %v4755_v41 = vmul.f32 %v6652_v49, %v6652_v49  ;;  %v6655_v20 = vld [vmem:[#allocation19_spill] sm:$0xff]  ;;  %v6659_v40 = vld [vmem:[#allocation29_spill] sm:$0xff]  ;;  %v6661_v30 = vld [vmem:[#allocation148_spill] sm:$0xff] }
  0xab   : > { %v4759_v33 = vmul.f32 %v6653_v25, %v6653_v25  ;;  %v4763_v35 = vmul.f32 %v6654_v50, %v6654_v50  ;;  %v4767_v18 = vmul.f32 %v6655_v20, %v6655_v20  ;;  %v1946_v36 = vadd.f32 %v1945_v55, %v1944_v3  ;;  %v6657_v17 = vld [vmem:[#allocation23_spill] sm:$0xff]  ;;  %v6663_v23 = vld [vmem:[#allocation22_spill] sm:$0xff]  ;;  %v6665_v55 = vld [vmem:[#allocation28_spill] sm:$0xff] }
  0xac   : > { %v4771_v7 = vmul.f32 %v6656_v37, %v6656_v37  ;;  %v4775_v49 = vmul.f32 %v6657_v17, %v6657_v17  ;;  %v4779_v25 = vmul.f32 %v6659_v40, %v6659_v40  ;;  %v4783_v50 = vmul.f32 %v6661_v30, %v6661_v30  ;;  %v6667_v3 = vld [vmem:[#allocation27_spill] sm:$0xff]  ;;  %v6669_v40 = vld [vmem:[#allocation33_spill] sm:$0xff] }
  0xad   : > { %v4787_v20 = vmul.f32 %v6663_v23, %v6663_v23  ;;  %v4791_v37 = vmul.f32 %v6665_v55, %v6665_v55  ;;  %v4795_v17 = vmul.f32 %v6667_v3, %v6667_v3  ;;  %v6671_v30 = vld [vmem:[#allocation25_spill] sm:$0xff]  ;;  %v6672_v23 = vld [vmem:[#allocation31_spill] sm:$0xff]  ;;  %v6674_v55 = vld [vmem:[#allocation30_spill] sm:$0xff] }
  0xae   : > { %6658 = vst [vmem:[#allocation160_spill] sm:$0xff] %v4775_v49  ;;  %6660 = vst [vmem:[#allocation161_spill] sm:$0xff] %v4779_v25  ;;  %v1948_v49 = vadd.f32 %v4522_v54, %v1946_v36  ;;  %v4800_v25 = vmul.f32 %v6669_v40, %v6669_v40  ;;  %v6676_v3 = vld [vmem:[#allocation36_spill] sm:$0xff]  ;;  %v6678_v54 = vld [vmem:[#allocation149_spill] sm:$0xff] }
  0xaf   : > { %6662 = vst [vmem:[#allocation162_spill] sm:$0xff] %v4783_v50  ;;  %6664 = vst [vmem:[#allocation164_spill] sm:$0xff] %v4787_v20  ;;  %v4804_v50 = vmul.f32 %v6671_v30, %v6671_v30  ;;  %v4808_v20 = vmul.f32 %v6672_v23, %v6672_v23  ;;  %v4820_v36 = vmul.f32 %v6678_v54, %v6678_v54  ;;  %v6680_v40 = vld [vmem:[#allocation32_spill] sm:$0xff]  ;;  %v6682_v23 = vld [vmem:[#allocation37_spill] sm:$0xff] }
  0xb0   : > { %6666 = vst [vmem:[#allocation165_spill] sm:$0xff] %v4791_v37  ;;  %6668 = vst [vmem:[#allocation166_spill] sm:$0xff] %v4795_v17  ;;  %v4812_v37 = vmul.f32 %v6674_v55, %v6674_v55  ;;  %v4816_v17 = vmul.f32 %v6676_v3, %v6676_v3  ;;  %v4824_v30 = vmul.f32 %v6680_v40, %v6680_v40  ;;  %v6683_v55 = vld [vmem:[#allocation34_spill] sm:$0xff]  ;;  %v6685_v3 = vld [vmem:[#allocation39_spill] sm:$0xff] }
  0xb1   : > { %6670 = vst [vmem:[#allocation167_spill] sm:$0xff] %v4800_v25  ;;  %6673 = vst [vmem:[#allocation169_spill] sm:$0xff] %v4808_v20  ;;  %v1950_v25 = vadd.f32 %v4528_v21, %v1948_v49  ;;  %v4829_v20 = vmul.f32 %v6682_v23, %v6682_v23  ;;  %v6687_v54 = vld [vmem:[#allocation35_spill] sm:$0xff]  ;;  %v6689_v40 = vld [vmem:[#allocation41_spill] sm:$0xff] }
  0xb2   : > { %6675 = vst [vmem:[#allocation170_spill] sm:$0xff] %v4812_v37  ;;  %6677 = vst [vmem:[#allocation171_spill] sm:$0xff] %v4816_v17  ;;  %v4833_v37 = vmul.f32 %v6683_v55, %v6683_v55  ;;  %v4837_v17 = vmul.f32 %v6685_v3, %v6685_v3  ;;  %v6691_v21 = vld [vmem:[#allocation40_spill] sm:$0xff]  ;;  %v6693_v23 = vld [vmem:[#allocation45_spill] sm:$0xff] }
  0xb3   : > { %6679 = vst [vmem:[#allocation172_spill] sm:$0xff] %v4820_v36  ;;  %6681 = vst [vmem:[#allocation174_spill] sm:$0xff] %v4824_v30  ;;  %v4841_v36 = vmul.f32 %v6687_v54, %v6687_v54  ;;  %v4845_v30 = vmul.f32 %v6689_v40, %v6689_v40  ;;  %v4849_v49 = vmul.f32 %v6691_v21, %v6691_v21  ;;  %v6695_v3 = vld [vmem:[#allocation150_spill] sm:$0xff]  ;;  %v6698_v40 = vld [vmem:[#allocation43_spill] sm:$0xff] }
  0xb4   : > { %6684 = vst [vmem:[#allocation175_spill] sm:$0xff] %v4833_v37  ;;  %6686 = vst [vmem:[#allocation176_spill] sm:$0xff] %v4837_v17  ;;  %v4853_v55 = vmul.f32 %v6693_v23, %v6693_v23  ;;  %v1952_v37 = vadd.f32 %v4534_v2, %v1950_v25  ;;  %v4858_v17 = vmul.f32 %v6695_v3, %v6695_v3  ;;  %v6697_v54 = vld [vmem:[#allocation38_spill] sm:$0xff]  ;;  %v6702_v23 = vld [vmem:[#allocation48_spill] sm:$0xff] }
  0xb5   : > { %6688 = vst [vmem:[#allocation177_spill] sm:$0xff] %v4841_v36  ;;  %6690 = vst [vmem:[#allocation178_spill] sm:$0xff] %v4845_v30  ;;  %v4862_v36 = vmul.f32 %v6697_v54, %v6697_v54  ;;  %v4866_v30 = vmul.f32 %v6698_v40, %v6698_v40  ;;  %v6700_v21 = vld [vmem:[#allocation42_spill] sm:$0xff]  ;;  %v6704_v2 = vld [vmem:[#allocation44_spill] sm:$0xff] }
  0xb6   : > { %6692 = vst [vmem:[#allocation179_spill] sm:$0xff] %v4849_v49  ;;  %6694 = vst [vmem:[#allocation181_spill] sm:$0xff] %v4853_v55  ;;  %v4870_v49 = vmul.f32 %v6700_v21, %v6700_v21  ;;  %v4874_v55 = vmul.f32 %v6702_v23, %v6702_v23  ;;  %v4878_v25 = vmul.f32 %v6704_v2, %v6704_v2  ;;  %v6706_v3 = vld [vmem:[#allocation49_spill] sm:$0xff]  ;;  %v6708_v40 = vld [vmem:[#allocation46_spill] sm:$0xff] }
  0xb7   : > { %6696 = vst [vmem:[#allocation182_spill] sm:$0xff] %v4858_v17  ;;  %6699 = vst [vmem:[#allocation184_spill] sm:$0xff] %v4866_v30  ;;  %v4882_v54 = vmul.f32 %v6706_v3, %v6706_v3  ;;  %v1954_v17 = vadd.f32 %v4540_v11, %v1952_v37  ;;  %v4887_v30 = vmul.f32 %v6708_v40, %v6708_v40  ;;  %v6709_v21 = vld [vmem:[#allocation52_spill] sm:$0xff]  ;;  %v6711_v23 = vld [vmem:[#allocation151_spill] sm:$0xff] }
  0xb8   : > { %6701 = vst [vmem:[#allocation185_spill] sm:$0xff] %v4870_v49  ;;  %6703 = vst [vmem:[#allocation186_spill] sm:$0xff] %v4874_v55  ;;  %v4891_v49 = vmul.f32 %v6709_v21, %v6709_v21  ;;  %v4895_v55 = vmul.f32 %v6711_v23, %v6711_v23  ;;  %v6713_v2 = vld [vmem:[#allocation47_spill] sm:$0xff]  ;;  %v6715_v3 = vld [vmem:[#allocation53_spill] sm:$0xff] }
  0xb9   : > { %6705 = vst [vmem:[#allocation188_spill] sm:$0xff] %v4878_v25  ;;  %6707 = vst [vmem:[#allocation190_spill] sm:$0xff] %v4882_v54  ;;  %v4899_v25 = vmul.f32 %v6713_v2, %v6713_v2  ;;  %v4903_v54 = vmul.f32 %v6715_v3, %v6715_v3  ;;  %v6717_v11 = vld [vmem:[#allocation50_spill] sm:$0xff]  ;;  %v6719_v40 = vld [vmem:[#allocation55_spill] sm:$0xff] }
  0xba   : > { %6710 = vst [vmem:[#allocation191_spill] sm:$0xff] %v4891_v49  ;;  %6712 = vst [vmem:[#allocation2_spill] sm:$0xff] %v4895_v55  ;;  %v4907_v37 = vmul.f32 %v6717_v11, %v6717_v11  ;;  %v4911_v21 = vmul.f32 %v6719_v40, %v6719_v40  ;;  %v1956_v49 = vadd.f32 %v4546_v5, %v1954_v17  ;;  %v6721_v23 = vld [vmem:[#allocation51_spill] sm:$0xff]  ;;  %v6723_v2 = vld [vmem:[#allocation56_spill] sm:$0xff] }
  0xbb   : > { %6714 = vst [vmem:[#allocation7_spill] sm:$0xff] %v4899_v25  ;;  %6716 = vst [vmem:[#allocation6_spill] sm:$0xff] %v4903_v54  ;;  %v4916_v55 = vmul.f32 %v6721_v23, %v6721_v23  ;;  %v4920_v25 = vmul.f32 %v6723_v2, %v6723_v2  ;;  %v6724_v3 = vld [vmem:[#allocation54_spill] sm:$0xff]  ;;  %v6728_v40 = vld [vmem:[#allocation152_spill] sm:$0xff] }
  0xbc   : > { %6718 = vst [vmem:[#allocation14_spill] sm:$0xff] %v4907_v37  ;;  %6720 = vst [vmem:[#allocation3_spill] sm:$0xff] %v4911_v21  ;;  %v4924_v54 = vmul.f32 %v6724_v3, %v6724_v3  ;;  %v6726_v11 = vld [vmem:[#allocation58_spill] sm:$0xff]  ;;  %v4932_v21 = vmul.f32 %v6728_v40, %v6728_v40  ;;  %v6730_v5 = vld [vmem:[#allocation57_spill] sm:$0xff] }
  0xbd   : > { %6722 = vst [vmem:[#allocation9_spill] sm:$0xff] %v4916_v55  ;;  %v4928_v37 = vmul.f32 %v6726_v11, %v6726_v11  ;;  %v4936_v17 = vmul.f32 %v6730_v5, %v6730_v5  ;;  %v6732_v23 = vld [vmem:[#allocation61_spill] sm:$0xff]  ;;  %v1958_v55 = vadd.f32 %v4552_v57, %v1956_v49  ;;  %v6734_v3 = vld [vmem:[#allocation59_spill] sm:$0xff]  ;;  %v6735_v11 = vld [vmem:[#allocation64_spill] sm:$0xff] }
  0xbe   : > { %6725 = vst [vmem:[#allocation8_spill] sm:$0xff] %v4924_v54  ;;  %6729 = vst [vmem:[#allocation143_spill] sm:$0xff] %v4932_v21  ;;  %v4940_v2 = vmul.f32 %v6732_v23, %v6732_v23  ;;  %v4945_v54 = vmul.f32 %v6734_v3, %v6734_v3  ;;  %v6737_v40 = vld [vmem:[#allocation60_spill] sm:$0xff]  ;;  %v6739_v5 = vld [vmem:[#allocation65_spill] sm:$0xff] }
  0xbf   : > { %6727 = vst [vmem:[#allocation15_spill] sm:$0xff] %v4928_v37  ;;  %6731 = vst [vmem:[#allocation4_spill] sm:$0xff] %v4936_v17  ;;  %v4949_v37 = vmul.f32 %v6735_v11, %v6735_v11  ;;  %v4953_v21 = vmul.f32 %v6737_v40, %v6737_v40  ;;  %v4957_v17 = vmul.f32 %v6739_v5, %v6739_v5  ;;  %v6741_v23 = vld [vmem:[#allocation62_spill] sm:$0xff]  ;;  %v6743_v57 = vld [vmem:[#allocation68_spill] sm:$0xff] }
  0xc0   : > { %6733 = vst [vmem:[#allocation11_spill] sm:$0xff] %v4940_v2  ;;  %v4961_v2 = vmul.f32 %v6741_v23, %v6741_v23  ;;  %v4965_v49 = vmul.f32 %v6743_v57, %v6743_v57  ;;  %v6745_v3 = vld [vmem:[#allocation153_spill] sm:$0xff]  ;;  %v6747_v40 = vld [vmem:[#allocation63_spill] sm:$0xff]  ;;  %v6750_v23 = vld [vmem:[#allocation66_spill] sm:$0xff] }
  0xc1   : > { %6736 = vst [vmem:[#allocation10_spill] sm:$0xff] %v4949_v37  ;;  %6738 = vst [vmem:[#allocation17_spill] sm:$0xff] %v4953_v21  ;;  %v4969_v11 = vmul.f32 %v6745_v3, %v6745_v3  ;;  %v1960_v37 = vadd.f32 %v4558_v42, %v1958_v55  ;;  %v4974_v21 = vmul.f32 %v6747_v40, %v6747_v40  ;;  %v6749_v5 = vld [vmem:[#allocation69_spill] sm:$0xff]  ;;  %v6752_v57 = vld [vmem:[#allocation71_spill] sm:$0xff] }
  0xc2   : > { %6740 = vst [vmem:[#allocation5_spill] sm:$0xff] %v4957_v17  ;;  %6742 = vst [vmem:[#allocation13_spill] sm:$0xff] %v4961_v2  ;;  %v4978_v17 = vmul.f32 %v6749_v5, %v6749_v5  ;;  %v4982_v2 = vmul.f32 %v6750_v23, %v6750_v23  ;;  %v6754_v3 = vld [vmem:[#allocation67_spill] sm:$0xff]  ;;  %v6756_v42 = vld [vmem:[#allocation72_spill] sm:$0xff] }
  0xc3   : > { %6744 = vst [vmem:[#allocation12_spill] sm:$0xff] %v4965_v49  ;;  %6746 = vst [vmem:[#allocation18_spill] sm:$0xff] %v4969_v11  ;;  %v4986_v49 = vmul.f32 %v6752_v57, %v6752_v57  ;;  %v4990_v11 = vmul.f32 %v6754_v3, %v6754_v3  ;;  %v4994_v55 = vmul.f32 %v6756_v42, %v6756_v42  ;;  %v6758_v40 = vld [vmem:[#allocation70_spill] sm:$0xff]  ;;  %v6761_v57 = vld [vmem:[#allocation156_spill] sm:$0xff] }
  0xc4   : > { %6748 = vst [vmem:[#allocation147_spill] sm:$0xff] %v4974_v21  ;;  %6751 = vst [vmem:[#allocation16_spill] sm:$0xff] %v4982_v2  ;;  %v4998_v5 = vmul.f32 %v6758_v40, %v6758_v40  ;;  %v1962_v21 = vadd.f32 %v4564_v60, %v1960_v37  ;;  %v6760_v23 = vld [vmem:[#allocation74_spill] sm:$0xff]  ;;  %v6763_v3 = vld [vmem:[#allocation73_spill] sm:$0xff] }
  0xc5   : > { %6753 = vst [vmem:[#allocation21_spill] sm:$0xff] %v4986_v49  ;;  %6755 = vst [vmem:[#allocation20_spill] sm:$0xff] %v4990_v11  ;;  %v5003_v2 = vmul.f32 %v6760_v23, %v6760_v23  ;;  %v5007_v49 = vmul.f32 %v6761_v57, %v6761_v57  ;;  %v5011_v11 = vmul.f32 %v6763_v3, %v6763_v3  ;;  %v6765_v42 = vld [vmem:[#allocation77_spill] sm:$0xff]  ;;  %v6767_v40 = vld [vmem:[#allocation75_spill] sm:$0xff] }
  0xc6   : > { %6757 = vst [vmem:[#allocation26_spill] sm:$0xff] %v4994_v55  ;;  %6759 = vst [vmem:[#allocation19_spill] sm:$0xff] %v4998_v5  ;;  %v5015_v55 = vmul.f32 %v6765_v42, %v6765_v42  ;;  %v5019_v5 = vmul.f32 %v6767_v40, %v6767_v40  ;;  %v6769_v60 = vld [vmem:[#allocation80_spill] sm:$0xff]  ;;  %v6773_v3 = vld [vmem:[#allocation81_spill] sm:$0xff] }
  0xc7   : > { %6762 = vst [vmem:[#allocation24_spill] sm:$0xff] %v5007_v49  ;;  %6764 = vst [vmem:[#allocation23_spill] sm:$0xff] %v5011_v11  ;;  %v5023_v37 = vmul.f32 %v6769_v60, %v6769_v60  ;;  %v6771_v23 = vld [vmem:[#allocation76_spill] sm:$0xff]  ;;  %v1964_v49 = vadd.f32 %v4570_v34, %v1962_v21  ;;  %v5032_v11 = vmul.f32 %v6773_v3, %v6773_v3  ;;  %v6775_v42 = vld [vmem:[#allocation78_spill] sm:$0xff] }
  0xc8   : > { %6766 = vst [vmem:[#allocation29_spill] sm:$0xff] %v5015_v55  ;;  %6768 = vst [vmem:[#allocation148_spill] sm:$0xff] %v5019_v5  ;;  %v5027_v57 = vmul.f32 %v6771_v23, %v6771_v23  ;;  %v5036_v55 = vmul.f32 %v6775_v42, %v6775_v42  ;;  %v6776_v40 = vld [vmem:[#allocation84_spill] sm:$0xff]  ;;  %v6778_v60 = vld [vmem:[#allocation163_spill] sm:$0xff] }
  0xc9   : > { %6770 = vst [vmem:[#allocation22_spill] sm:$0xff] %v5023_v37  ;;  %6774 = vst [vmem:[#allocation27_spill] sm:$0xff] %v5032_v11  ;;  %v5040_v5 = vmul.f32 %v6776_v40, %v6776_v40  ;;  %v5044_v37 = vmul.f32 %v6778_v60, %v6778_v60  ;;  %v6780_v23 = vld [vmem:[#allocation79_spill] sm:$0xff]  ;;  %v6782_v34 = vld [vmem:[#allocation85_spill] sm:$0xff]  ;;  %v1966_v11 = vadd.f32 %v4576_v47, %v1964_v49 }
  0xca   : > { %6772 = vst [vmem:[#allocation28_spill] sm:$0xff] %v5027_v57  ;;  %v5048_v57 = vmul.f32 %v6780_v23, %v6780_v23  ;;  %v5052_v21 = vmul.f32 %v6782_v34, %v6782_v34  ;;  %v6784_v3 = vld [vmem:[#allocation82_spill] sm:$0xff]  ;;  %v6786_v40 = vld [vmem:[#allocation87_spill] sm:$0xff]  ;;  %v6789_v23 = vld [vmem:[#allocation88_spill] sm:$0xff] }
  0xcb   : > { %6777 = vst [vmem:[#allocation33_spill] sm:$0xff] %v5040_v5  ;;  %6779 = vst [vmem:[#allocation25_spill] sm:$0xff] %v5044_v37  ;;  %v5056_v42 = vmul.f32 %v6784_v3, %v6784_v3  ;;  %v5061_v5 = vmul.f32 %v6786_v40, %v6786_v40  ;;  %v6787_v60 = vld [vmem:[#allocation83_spill] sm:$0xff]  ;;  %v6791_v34 = vld [vmem:[#allocation86_spill] sm:$0xff] }
  0xcc   : > { %6781 = vst [vmem:[#allocation31_spill] sm:$0xff] %v5048_v57  ;;  %6783 = vst [vmem:[#allocation30_spill] sm:$0xff] %v5052_v21  ;;  %v5065_v37 = vmul.f32 %v6787_v60, %v6787_v60  ;;  %v5069_v57 = vmul.f32 %v6789_v23, %v6789_v23  ;;  %v5073_v21 = vmul.f32 %v6791_v34, %v6791_v34  ;;  %v6793_v3 = vld [vmem:[#allocation90_spill] sm:$0xff]  ;;  %v6795_v47 = vld [vmem:[#allocation168_spill] sm:$0xff] }
  0xcd   : > { %6785 = vst [vmem:[#allocation36_spill] sm:$0xff] %v5056_v42  ;;  %v5077_v42 = vmul.f32 %v6793_v3, %v6793_v3  ;;  %v5081_v49 = vmul.f32 %v6795_v47, %v6795_v47  ;;  %v6797_v40 = vld [vmem:[#allocation89_spill] sm:$0xff]  ;;  %v6801_v34 = vld [vmem:[#allocation91_spill] sm:$0xff]  ;;  %v6802_v3 = vld [vmem:[#allocation96_spill] sm:$0xff] }
  0xce   : > { %6788 = vst [vmem:[#allocation149_spill] sm:$0xff] %v5065_v37  ;;  %6790 = vst [vmem:[#allocation32_spill] sm:$0xff] %v5069_v57  ;;  %v5085_v60 = vmul.f32 %v6797_v40, %v6797_v40  ;;  %v1968_v37 = vadd.f32 %v4582_v22, %v1966_v11  ;;  %v6799_v23 = vld [vmem:[#allocation93_spill] sm:$0xff]  ;;  %v6804_v47 = vld [vmem:[#allocation92_spill] sm:$0xff] }
  0xcf   : > { %6792 = vst [vmem:[#allocation37_spill] sm:$0xff] %v5073_v21  ;;  %6794 = vst [vmem:[#allocation34_spill] sm:$0xff] %v5077_v42  ;;  %v5090_v57 = vmul.f32 %v6799_v23, %v6799_v23  ;;  %v5094_v21 = vmul.f32 %v6801_v34, %v6801_v34  ;;  %v5098_v42 = vmul.f32 %v6802_v3, %v6802_v3  ;;  %v6806_v40 = vld [vmem:[#allocation97_spill] sm:$0xff]  ;;  %v6808_v22 = vld [vmem:[#allocation94_spill] sm:$0xff] }
  0xd0   : > { %6796 = vst [vmem:[#allocation39_spill] sm:$0xff] %v5081_v49  ;;  %6798 = vst [vmem:[#allocation35_spill] sm:$0xff] %v5085_v60  ;;  %v5102_v49 = vmul.f32 %v6804_v47, %v6804_v47  ;;  %v5106_v60 = vmul.f32 %v6806_v40, %v6806_v40  ;;  %v5110_v11 = vmul.f32 %v6808_v22, %v6808_v22  ;;  %v6810_v23 = vld [vmem:[#allocation100_spill] sm:$0xff]  ;;  %v6812_v3 = vld [vmem:[#allocation173_spill] sm:$0xff] }
  0xd1   : > { %6800 = vst [vmem:[#allocation41_spill] sm:$0xff] %v5090_v57  ;;  %6803 = vst [vmem:[#allocation40_spill] sm:$0xff] %v5098_v42  ;;  %v5114_v34 = vmul.f32 %v6810_v23, %v6810_v23  ;;  %v1970_v57 = vadd.f32 %v4588_v48, %v1968_v37  ;;  %v5119_v42 = vmul.f32 %v6812_v3, %v6812_v3  ;;  %v6813_v47 = vld [vmem:[#allocation95_spill] sm:$0xff]  ;;  %v6815_v40 = vld [vmem:[#allocation101_spill] sm:$0xff] }
  0xd2   : > { %6805 = vst [vmem:[#allocation45_spill] sm:$0xff] %v5102_v49  ;;  %6807 = vst [vmem:[#allocation150_spill] sm:$0xff] %v5106_v60  ;;  %v5123_v49 = vmul.f32 %v6813_v47, %v6813_v47  ;;  %v5127_v60 = vmul.f32 %v6815_v40, %v6815_v40  ;;  %v6817_v22 = vld [vmem:[#allocation98_spill] sm:$0xff]  ;;  %v6819_v23 = vld [vmem:[#allocation103_spill] sm:$0xff] }
  0xd3   : > { %6809 = vst [vmem:[#allocation38_spill] sm:$0xff] %v5110_v11  ;;  %6811 = vst [vmem:[#allocation43_spill] sm:$0xff] %v5114_v34  ;;  %v5131_v11 = vmul.f32 %v6817_v22, %v6817_v22  ;;  %v5135_v34 = vmul.f32 %v6819_v23, %v6819_v23  ;;  %v6821_v48 = vld [vmem:[#allocation99_spill] sm:$0xff]  ;;  %v6823_v3 = vld [vmem:[#allocation104_spill] sm:$0xff] }
  0xd4   : > { %6814 = vst [vmem:[#allocation42_spill] sm:$0xff] %v5123_v49  ;;  %6816 = vst [vmem:[#allocation48_spill] sm:$0xff] %v5127_v60  ;;  %v5139_v37 = vmul.f32 %v6821_v48, %v6821_v48  ;;  %v5143_v47 = vmul.f32 %v6823_v3, %v6823_v3  ;;  %v1972_v49 = vadd.f32 %v4594_v9, %v1970_v57  ;;  %v6825_v40 = vld [vmem:[#allocation102_spill] sm:$0xff]  ;;  %v6828_v23 = vld [vmem:[#allocation180_spill] sm:$0xff] }
  0xd5   : > { %6818 = vst [vmem:[#allocation44_spill] sm:$0xff] %v5131_v11  ;;  %6820 = vst [vmem:[#allocation49_spill] sm:$0xff] %v5135_v34  ;;  %v5148_v60 = vmul.f32 %v6825_v40, %v6825_v40  ;;  %v6827_v22 = vld [vmem:[#allocation106_spill] sm:$0xff]  ;;  %v5156_v34 = vmul.f32 %v6828_v23, %v6828_v23  ;;  %v6830_v48 = vld [vmem:[#allocation105_spill] sm:$0xff] }
  0xd6   : > { %6822 = vst [vmem:[#allocation46_spill] sm:$0xff] %v5139_v37  ;;  %6824 = vst [vmem:[#allocation52_spill] sm:$0xff] %v5143_v47  ;;  %v5152_v11 = vmul.f32 %v6827_v22, %v6827_v22  ;;  %v5160_v37 = vmul.f32 %v6830_v48, %v6830_v48  ;;  %v6832_v3 = vld [vmem:[#allocation109_spill] sm:$0xff]  ;;  %v6834_v9 = vld [vmem:[#allocation107_spill] sm:$0xff] }
  0xd7   : > { %6826 = vst [vmem:[#allocation151_spill] sm:$0xff] %v5148_v60  ;;  %6829 = vst [vmem:[#allocation47_spill] sm:$0xff] %v5156_v34  ;;  %v5164_v47 = vmul.f32 %v6832_v3, %v6832_v3  ;;  %v5168_v57 = vmul.f32 %v6834_v9, %v6834_v9  ;;  %v6836_v40 = vld [vmem:[#allocation112_spill] sm:$0xff]  ;;  %v1974_v60 = vadd.f32 %v4600_v15, %v1972_v49  ;;  %v6839_v48 = vld [vmem:[#allocation113_spill] sm:$0xff] }
  0xd8   : > { %6831 = vst [vmem:[#allocation53_spill] sm:$0xff] %v5160_v37  ;;  %v5172_v22 = vmul.f32 %v6836_v40, %v6836_v40  ;;  %v6838_v23 = vld [vmem:[#allocation108_spill] sm:$0xff]  ;;  %v5181_v37 = vmul.f32 %v6839_v48, %v6839_v48  ;;  %v6841_v3 = vld [vmem:[#allocation110_spill] sm:$0xff]  ;;  %v6845_v40 = vld [vmem:[#allocation183_spill] sm:$0xff] }
  0xd9   : > { %6833 = vst [vmem:[#allocation50_spill] sm:$0xff] %v5164_v47  ;;  %6835 = vst [vmem:[#allocation55_spill] sm:$0xff] %v5168_v57  ;;  %v5177_v34 = vmul.f32 %v6838_v23, %v6838_v23  ;;  %v5185_v47 = vmul.f32 %v6841_v3, %v6841_v3  ;;  %v6843_v9 = vld [vmem:[#allocation116_spill] sm:$0xff]  ;;  %v6847_v15 = vld [vmem:[#allocation111_spill] sm:$0xff] }
  0xda   : > { %6837 = vst [vmem:[#allocation51_spill] sm:$0xff] %v5172_v22  ;;  %6840 = vst [vmem:[#allocation56_spill] sm:$0xff] %v5181_v37  ;;  %v5189_v57 = vmul.f32 %v6843_v9, %v6843_v9  ;;  %v5193_v22 = vmul.f32 %v6845_v40, %v6845_v40  ;;  %v5197_v49 = vmul.f32 %v6847_v15, %v6847_v15  ;;  %v6849_v23 = vld [vmem:[#allocation117_spill] sm:$0xff]  ;;  %v6851_v3 = vld [vmem:[#allocation114_spill] sm:$0xff] }
  0xdb   : > { %6842 = vst [vmem:[#allocation54_spill] sm:$0xff] %v5185_v47  ;;  %v5201_v48 = vmul.f32 %v6849_v23, %v6849_v23  ;;  %v1976_v37 = vadd.f32 %v4606_v0, %v1974_v60  ;;  %v5206_v47 = vmul.f32 %v6851_v3, %v6851_v3  ;;  %v6853_v9 = vld [vmem:[#allocation119_spill] sm:$0xff]  ;;  %v6856_v15 = vld [vmem:[#allocation120_spill] sm:$0xff]  ;;  %v6858_v23 = vld [vmem:[#allocation118_spill] sm:$0xff] }
  0xdc   : > { %6844 = vst [vmem:[#allocation58_spill] sm:$0xff] %v5189_v57  ;;  %6846 = vst [vmem:[#allocation152_spill] sm:$0xff] %v5193_v22  ;;  %v5210_v57 = vmul.f32 %v6853_v9, %v6853_v9  ;;  %v6854_v40 = vld [vmem:[#allocation115_spill] sm:$0xff]  ;;  %v6860_v0 = vld [vmem:[#allocation122_spill] sm:$0xff] }
  0xdd   : > { %6848 = vst [vmem:[#allocation57_spill] sm:$0xff] %v5197_v49  ;;  %6850 = vst [vmem:[#allocation61_spill] sm:$0xff] %v5201_v48  ;;  %v5214_v22 = vmul.f32 %v6854_v40, %v6854_v40  ;;  %v5218_v49 = vmul.f32 %v6856_v15, %v6856_v15  ;;  %v5222_v48 = vmul.f32 %v6858_v23, %v6858_v23  ;;  %v6862_v3 = vld [vmem:[#allocation187_spill] sm:$0xff]  ;;  %v6864_v40 = vld [vmem:[#allocation121_spill] sm:$0xff] }
  0xde   : > { %6852 = vst [vmem:[#allocation59_spill] sm:$0xff] %v5206_v47  ;;  %v5226_v60 = vmul.f32 %v6860_v0, %v6860_v0  ;;  %v5230_v9 = vmul.f32 %v6862_v3, %v6862_v3  ;;  %v1978_v47 = vadd.f32 %v4612_v59, %v1976_v37  ;;  %v6865_v15 = vld [vmem:[#allocation125_spill] sm:$0xff]  ;;  %v6867_v23 = vld [vmem:[#allocation123_spill] sm:$0xff]  ;;  %v6869_v0 = vld [vmem:[#allocation128_spill] sm:$0xff] }
  0xdf   : > { %6855 = vst [vmem:[#allocation64_spill] sm:$0xff] %v5214_v22  ;;  %6857 = vst [vmem:[#allocation60_spill] sm:$0xff] %v5218_v49  ;;  %v5235_v22 = vmul.f32 %v6864_v40, %v6864_v40  ;;  %v5239_v49 = vmul.f32 %v6865_v15, %v6865_v15  ;;  %v6871_v3 = vld [vmem:[#allocation124_spill] sm:$0xff]  ;;  %v6873_v59 = vld [vmem:[#allocation129_spill] sm:$0xff] }
  0xe0   : > { %6859 = vst [vmem:[#allocation65_spill] sm:$0xff] %v5222_v48  ;;  %6861 = vst [vmem:[#allocation62_spill] sm:$0xff] %v5226_v60  ;;  %v5243_v48 = vmul.f32 %v6867_v23, %v6867_v23  ;;  %v5247_v60 = vmul.f32 %v6869_v0, %v6869_v0  ;;  %v5255_v37 = vmul.f32 %v6873_v59, %v6873_v59  ;;  %v6875_v40 = vld [vmem:[#allocation126_spill] sm:$0xff]  ;;  %v6876_v23 = vld [vmem:[#allocation132_spill] sm:$0xff] }
  0xe1   : > { %6863 = vst [vmem:[#allocation68_spill] sm:$0xff] %v5230_v9  ;;  %6866 = vst [vmem:[#allocation153_spill] sm:$0xff] %v5239_v49  ;;  %v5251_v9 = vmul.f32 %v6871_v3, %v6871_v3  ;;  %v5259_v15 = vmul.f32 %v6875_v40, %v6875_v40  ;;  %v1980_v49 = vadd.f32 %v4618_v12, %v1978_v47  ;;  %v6877_v0 = vld [vmem:[#allocation189_spill] sm:$0xff]  ;;  %v6878_v3 = vld [vmem:[#allocation127_spill] sm:$0xff] }
  0xe2   : > { %6868 = vst [vmem:[#allocation63_spill] sm:$0xff] %v5243_v48  ;;  %6870 = vst [vmem:[#allocation69_spill] sm:$0xff] %v5247_v60  ;;  %v5264_v48 = vmul.f32 %v6876_v23, %v6876_v23  ;;  %v5268_v60 = vmul.f32 %v6877_v0, %v6877_v0  ;;  %v6880_v59 = vld [vmem:[#allocation133_spill] sm:$0xff]  ;;  %v5280_v40 = vmul.f32 %v6554_v51, %v6554_v51  ;;  %v6883_v12 = vld [vmem:[#allocation135_spill] sm:$0xff] }
  0xe3   : > { %6872 = vst [vmem:[#allocation66_spill] sm:$0xff] %v5251_v9  ;;  %6874 = vst [vmem:[#allocation71_spill] sm:$0xff] %v5255_v37  ;;  %v5272_v9 = vmul.f32 %v6878_v3, %v6878_v3  ;;  %v5276_v37 = vmul.f32 %v6880_v59, %v6880_v59  ;;  %v5284_v47 = vmul.f32 %v6883_v12, %v6883_v12  ;;  %v6886_v3 = vld [vmem:[#allocation136_spill] sm:$0xff]  ;;  %v6887_v59 = vld [vmem:[#allocation134_spill] sm:$0xff] }
  0xe4   : > { %6882 = vst [vmem:[#allocation70_spill] sm:$0xff] %v5280_v40  ;;  %v5288_v23 = vmul.f32 %v6556_v13, %v6556_v13  ;;  %v1982_v0 = vadd.f32 %v4624_v28, %v1980_v49  ;;  %v6889_v51 = vld [vmem:[#allocation138_spill] sm:$0xff]  ;;  %v6893_v13 = vld [vmem:[#allocation137_spill] sm:$0xff] }
  0xe5   : > { %6879 = vst [vmem:[#allocation67_spill] sm:$0xff] %v5272_v9  ;;  %6881 = vst [vmem:[#allocation72_spill] sm:$0xff] %v5276_v37  ;;  %v5293_v9 = vmul.f32 %v6886_v3, %v6886_v3  ;;  %v5297_v37 = vmul.f32 %v6887_v59, %v6887_v59  ;;  %v5301_v40 = vmul.f32 %v6889_v51, %v6889_v51  ;;  %v6891_v12 = vld [vmem:[#allocation130_spill] sm:$0xff]  ;;  %v6894_v28 = vld [vmem:[#allocation141_spill] sm:$0xff] }
  0xe6   : > { %6884 = vst [vmem:[#allocation74_spill] sm:$0xff] %v5284_v47  ;;  %6885 = vst [vmem:[#allocation156_spill] sm:$0xff] %v5288_v23  ;;  %v5305_v47 = vmul.f32 %v6891_v12, %v6891_v12  ;;  %v5309_v23 = vmul.f32 %v6893_v13, %v6893_v13  ;;  %v5313_v49 = vmul.f32 %v6894_v28, %v6894_v28  ;;  %v6896_v3 = vld [vmem:[#allocation139_spill] sm:$0xff]  ;;  %v6897_v51 = vld [vmem:[#allocation144_spill] sm:$0xff] }
  0xe7   : > { %6888 = vst [vmem:[#allocation73_spill] sm:$0xff] %v5297_v37  ;;  %6890 = vst [vmem:[#allocation77_spill] sm:$0xff] %v5301_v40  ;;  %v5317_v59 = vmul.f32 %v6896_v3, %v6896_v3  ;;  %v1984_v37 = vadd.f32 %v4630_v46, %v1982_v0  ;;  %v5322_v40 = vmul.f32 %v6897_v51, %v6897_v51  ;;  %v6898_v12 = vld [vmem:[#allocation140_spill] sm:$0xff]  ;;  %v6899_v28 = vld [vmem:[#allocation142_spill] sm:$0xff] }
  0xe8   : > { %6892 = vst [vmem:[#allocation75_spill] sm:$0xff] %v5305_v47  ;;  %6895 = vst [vmem:[#allocation80_spill] sm:$0xff] %v5313_v49  ;;  %v5326_v47 = vmul.f32 %v6898_v12, %v6898_v12  ;;  %v5330_v13 = vmul.f32 %v6559_v16, %v6559_v16  ;;  %v5334_v49 = vmul.f32 %v6899_v28, %v6899_v28 }
  0xe9   : > { %v5338_v3 = vmul.f32 %v6560_v44, %v6560_v44  ;;  %v5342_v46 = vmul.f32 %v4458_v63, %v4458_v63  ;;  %v2342_v0 = vcombine.low %v4676_v52, %v4680_v38  ;;  %v1986_v51 = vadd.f32 %v4636_v39, %v1984_v37 }
  0xea   : > { %v2343_v16 = vcombine.low %v4684_v31, %v4691_v53  ;;  %v2359_v12 = vcombine.low %v4695_v19, %v4699_v43  ;;  %v2360_v28 = vcombine.low %v4703_v8, %v4707_v4  ;;  %v2376_v63 = vcombine.low %v4711_v32, %v4715_v29  ;;  %v6934_v29 = vld [vmem:[#allocation2_spill] sm:$0xff] }
  0xeb   : > { %v5354_v44 = vrot.slane %v2342_v0, %v3409_v6  ;;  %v2377_v52 = vcombine.low %v4719_v56, %v4723_v62  ;;  %v2393_v39 = vcombine.low %v4727_v61, %v4731_v14  ;;  %v1988_v38 = vadd.f32 %v4642_v26, %v1986_v51  ;;  %v6902_v51 = vld [vmem:[#allocation160_spill] sm:$0xff]  ;;  %v6922_v61 = vld [vmem:[#allocation179_spill] sm:$0xff] }
  0xec   : > { %v5364_v31 = vrot.slane %v2343_v16, %v3409_v6  ;;  %v5367_v53 = vrot.slane %v2359_v12, %v3409_v6  ;;  %v5370_v19 = vrot.slane %v2360_v28, %v3409_v6  ;;  %v5373_v43 = vrot.slane %v2376_v63, %v3409_v6  ;;  %v6905_v63 = vld [vmem:[#allocation145_spill] sm:$0xff] }
  0xed   : > { %v5376_v8 = vrot.slane %v2377_v52, %v3409_v6  ;;  %v2394_v4 = vcombine.low %v4735_v27, %v4739_v58  ;;  %v5381_v26 = vrot.slane %v2393_v39, %v3409_v6  ;;  %v1990_v32 = vadd.f32 %v4648_v45, %v1988_v38  ;;  %v6900_v58 = vld [vmem:[#allocation131_spill] sm:$0xff]  ;;  %v6907_v38 = vld [vmem:[#allocation165_spill] sm:$0xff] }
  0xee   : > { %v2410_v62 = vcombine.low %v4743_v1, %v4747_v10  ;;  %v2411_v27 = vcombine.low %v4751_v24, %v4755_v41  ;;  %v2427_v45 = vcombine.low %v4759_v33, %v4763_v35  ;;  %v2428_v1 = vcombine.low %v4767_v18, %v4771_v7  ;;  %v6901_v10 = vld [vmem:[#allocation161_spill] sm:$0xff]  ;;  %v6903_v41 = vld [vmem:[#allocation164_spill] sm:$0xff]  ;;  %v6904_v33 = vld [vmem:[#allocation162_spill] sm:$0xff] }
  0xef   : > { %v5393_v14 = vrot.slane %v2394_v4, %v3409_v6  ;;  %v1992_v37 = vadd.f32 %v6900_v58, %v1990_v32  ;;  %v2444_v16 = vcombine.low %v6902_v51, %v6901_v10  ;;  %v2445_v35 = vcombine.low %v6904_v33, %v6903_v41  ;;  %v6906_v7 = vld [vmem:[#allocation166_spill] sm:$0xff]  ;;  %v6912_v33 = vld [vmem:[#allocation172_spill] sm:$0xff]  ;;  %v6920_v32 = vld [vmem:[#allocation177_spill] sm:$0xff] }
  0xf0   : > { %v5401_v0 = vrot.slane %v2410_v62, %v3409_v6  ;;  %v5410_v28 = vrot.slane %v2411_v27, %v3409_v6  ;;  %v5413_v24 = vrot.slane %v2427_v45, %v3409_v6  ;;  %v5419_v39 = vrot.slane %v2428_v1, %v3409_v6  ;;  %v6908_v27 = vld [vmem:[#allocation167_spill] sm:$0xff]  ;;  %v6909_v58 = vld [vmem:[#allocation170_spill] sm:$0xff]  ;;  %v6921_v12 = vld [vmem:[#allocation181_spill] sm:$0xff] }
  0xf1   : > { %v1994_v52 = vadd.f32 %v6905_v63, %v1992_v37  ;;  %v5422_v18 = vrot.slane %v2444_v16, %v3409_v6  ;;  %v2461_v4 = vcombine.low %v6907_v38, %v6906_v7  ;;  %v5429_v62 = vrot.slane %v2445_v35, %v3409_v6  ;;  %v6910_v37 = vld [vmem:[#allocation169_spill] sm:$0xff]  ;;  %v6911_v1 = vld [vmem:[#allocation146_spill] sm:$0xff]  ;;  %v6913_v63 = vld [vmem:[#allocation171_spill] sm:$0xff] }
  0xf2   : > { %v2462_v45 = vcombine.low %v6908_v27, %v4804_v50  ;;  %v2478_v10 = vcombine.low %v6910_v37, %v6909_v58  ;;  %v2479_v7 = vcombine.low %v6913_v63, %v6912_v33  ;;  %v6915_v58 = vld [vmem:[#allocation154_spill] sm:$0xff]  ;;  %v6918_v16 = vld [vmem:[#allocation175_spill] sm:$0xff] }
  0xf3   : > { %v1996_v51 = vadd.f32 %v6911_v1, %v1994_v52  ;;  %v5439_v41 = vrot.slane %v2461_v4, %v3409_v6  ;;  %v6914_v52 = vld [vmem:[#allocation174_spill] sm:$0xff]  ;;  %v6917_v1 = vld [vmem:[#allocation176_spill] sm:$0xff] }
  0xf4   : > { %v5446_v38 = vrot.slane %v2462_v45, %v3409_v6  ;;  %v5449_v50 = vrot.slane %v2478_v10, %v3409_v6  ;;  %v2495_v27 = vcombine.low %v6914_v52, %v4829_v20  ;;  %v5455_v4 = vrot.slane %v2479_v7, %v3409_v6  ;;  %v6919_v63 = vld [vmem:[#allocation178_spill] sm:$0xff]  ;;  %v6924_v7 = vld [vmem:[#allocation155_spill] sm:$0xff]  ;;  %v6929_v45 = vld [vmem:[#allocation184_spill] sm:$0xff] }
  0xf5   : > { %v1998_v37 = vadd.f32 %v6915_v58, %v1996_v51  ;;  %v2496_v33 = vcombine.low %v6918_v16, %v6917_v1  ;;  %v2512_v35 = vcombine.low %v6920_v32, %v6919_v63  ;;  %v2513_v20 = vcombine.low %v6922_v61, %v6921_v12  ;;  %v6923_v51 = vld [vmem:[#allocation182_spill] sm:$0xff]  ;;  %v6928_v63 = vld [vmem:[#allocation185_spill] sm:$0xff] }
  0xf6   : > { %6916 = vst [vmem:[#allocation76_spill] sm:$0xff] %v5455_v4  ;;  %v5464_v10 = vrot.slane %v2495_v27, %v3409_v6  ;;  %v2529_v52 = vcombine.low %v6923_v51, %v4862_v36  ;;  %v2530_v61 = vcombine.low %v6929_v45, %v6928_v63  ;;  %v6930_v36 = vld [vmem:[#allocation188_spill] sm:$0xff]  ;;  %v6946_v45 = vld [vmem:[#allocation9_spill] sm:$0xff] }
  0xf7   : > { %v2000_v58 = vadd.f32 %v6924_v7, %v1998_v37  ;;  %v5474_v1 = vrot.slane %v2496_v33, %v3409_v6  ;;  %v5477_v32 = vrot.slane %v2512_v35, %v3409_v6  ;;  %v5480_v27 = vrot.slane %v2513_v20, %v3409_v6  ;;  %v6931_v37 = vld [vmem:[#allocation186_spill] sm:$0xff]  ;;  %v6932_v7 = vld [vmem:[#allocation157_spill] sm:$0xff]  ;;  %v6935_v20 = vld [vmem:[#allocation191_spill] sm:$0xff] }
  0xf8   : > { %v5485_v12 = vrot.slane %v2529_v52, %v3409_v6  ;;  %v2546_v51 = vcombine.low %v6931_v37, %v6930_v36  ;;  %v6933_v35 = vld [vmem:[#allocation190_spill] sm:$0xff]  ;;  %v2563_v4 = vcombine.low %v6935_v20, %v6934_v29  ;;  %v5499_v52 = vrot.slane %v2530_v61, %v3409_v6  ;;  %v6943_v29 = vld [vmem:[#allocation3_spill] sm:$0xff] }
  0xf9   : > { %6925 = vst [vmem:[#allocation81_spill] sm:$0xff] %v5474_v1  ;;  %6926 = vst [vmem:[#allocation78_spill] sm:$0xff] %v5477_v32  ;;  %v2002_v16 = vadd.f32 %v6932_v7, %v2000_v58  ;;  %v2547_v56 = vcombine.low %v6933_v35, %v4887_v30  ;;  %v6938_v36 = vld [vmem:[#allocation6_spill] sm:$0xff]  ;;  %v6939_v58 = vld [vmem:[#allocation7_spill] sm:$0xff] }
  0xfa   : > { %6927 = vst [vmem:[#allocation84_spill] sm:$0xff] %v5480_v27  ;;  %6936 = vst [vmem:[#allocation163_spill] sm:$0xff] %v5499_v52  ;;  %v5502_v63 = vrot.slane %v2546_v51, %v3409_v6  ;;  %v2564_v37 = vcombine.low %v6939_v58, %v6938_v36  ;;  %v6940_v7 = vld [vmem:[#allocation158_spill] sm:$0xff]  ;;  %v5511_v30 = vrot.slane %v2563_v4, %v3409_v6  ;;  %v6947_v58 = vld [vmem:[#allocation15_spill] sm:$0xff] }
  0xfb   : > { %v2004_v33 = vadd.f32 %v6940_v7, %v2002_v16  ;;  %v5508_v1 = vrot.slane %v2547_v56, %v3409_v6  ;;  %v6944_v35 = vld [vmem:[#allocation14_spill] sm:$0xff]  ;;  %v2581_v36 = vcombine.low %v6946_v45, %v4920_v25  ;;  %v6948_v16 = vld [vmem:[#allocation8_spill] sm:$0xff]  ;;  %v6949_v56 = vld [vmem:[#allocation159_spill] sm:$0xff] }
  0xfc   : > { %6937 = vst [vmem:[#allocation79_spill] sm:$0xff] %v5502_v63  ;;  %6942 = vst [vmem:[#allocation82_spill] sm:$0xff] %v5511_v30  ;;  %v2580_v20 = vcombine.low %v6944_v35, %v6943_v29  ;;  %v5518_v51 = vrot.slane %v2564_v37, %v3409_v6  ;;  %v2597_v7 = vcombine.low %v6948_v16, %v6947_v58  ;;  %v6950_v29 = vld [vmem:[#allocation4_spill] sm:$0xff]  ;;  %v6951_v35 = vld [vmem:[#allocation143_spill] sm:$0xff] }
  0xfd   : > { %6941 = vst [vmem:[#allocation85_spill] sm:$0xff] %v5508_v1  ;;  %v2007_v27 = vadd.f32 %v6949_v56, %v2004_v33  ;;  %v2598_v61 = vcombine.low %v6951_v35, %v6950_v29  ;;  %v5535_v52 = vrot.slane %v2581_v36, %v3409_v6  ;;  %v6953_v33 = vld [vmem:[#allocation11_spill] sm:$0xff]  ;;  %v6956_v56 = vld [vmem:[#allocation10_spill] sm:$0xff]  ;;  %v6957_v29 = vld [vmem:[#allocation13_spill] sm:$0xff] }
  0xfe   : > { %6945 = vst [vmem:[#allocation87_spill] sm:$0xff] %v5518_v51  ;;  %v5528_v32 = vrot.slane %v2580_v20, %v3409_v6  ;;  %v5538_v25 = vrot.slane %v2597_v7, %v3409_v6  ;;  %v2614_v45 = vcombine.low %v6953_v33, %v4945_v54  ;;  %v6955_v20 = vld [vmem:[#allocation17_spill] sm:$0xff]  ;;  %v6959_v7 = vld [vmem:[#allocation18_spill] sm:$0xff]  ;;  %v6960_v51 = vld [vmem:[#allocation12_spill] sm:$0xff] }
  0xff   : > { %v2008_v58 = vrot.slane %v2007_v27, 4  ;;  %v5543_v16 = vrot.slane %v2598_v61, %v3409_v6  ;;  %v2615_v4 = vcombine.low %v6956_v56, %v6955_v20  ;;  %v6958_v35 = vld [vmem:[#allocation5_spill] sm:$0xff]  ;;  %v2632_v30 = vcombine.low %v6960_v51, %v6959_v7  ;;  %v6961_v54 = vld [vmem:[#allocation147_spill] sm:$0xff] }
 0x100   : > { %6952 = vst [vmem:[#allocation83_spill] sm:$0xff] %v5538_v25  ;;  %v2631_v1 = vcombine.low %v6958_v35, %v6957_v29  ;;  %v5552_v37 = vrot.slane %v2614_v45, %v3409_v6  ;;  %v2648_v33 = vcombine.low %v6961_v54, %v4978_v17  ;;  %v6965_v45 = vld [vmem:[#allocation21_spill] sm:$0xff]  ;;  %v6966_v35 = vld [vmem:[#allocation16_spill] sm:$0xff]  ;;  %v6967_v17 = vld [vmem:[#allocation26_spill] sm:$0xff] }
 0x101   : > { %6954 = vst [vmem:[#allocation88_spill] sm:$0xff] %v5543_v16  ;;  %v2009_v61 = vadd.f32 %v2008_v58, %v2007_v27  ;;  %v5561_v20 = vrot.slane %v2615_v4, %v3409_v6  ;;  %v5567_v29 = vrot.slane %v2632_v30, %v3409_v6  ;;  %v2649_v36 = vcombine.low %v6966_v35, %v6965_v45  ;;  %v6968_v27 = vld [vmem:[#allocation20_spill] sm:$0xff]  ;;  %v6969_v54 = vld [vmem:[#allocation19_spill] sm:$0xff] }
 0x102   : > { %v5564_v56 = vrot.slane %v2631_v1, %v3409_v6  ;;  %v5572_v51 = vrot.slane %v2648_v33, %v3409_v6  ;;  %v2665_v58 = vcombine.low %v6968_v27, %v6967_v17  ;;  %v2666_v1 = vcombine.low %v6969_v54, %v5003_v2  ;;  %v6970_v63 = vld [vmem:[#allocation23_spill] sm:$0xff]  ;;  %v6971_v16 = vld [vmem:[#allocation24_spill] sm:$0xff]  ;;  %v6975_v17 = vld [vmem:[#allocation29_spill] sm:$0xff] }
 0x103   : > { %6962 = vst [vmem:[#allocation86_spill] sm:$0xff] %v5561_v20  ;;  %6964 = vst [vmem:[#allocation168_spill] sm:$0xff] %v5567_v29  ;;  %v2010_v7 = vrot.slane %v2009_v61, 2  ;;  %v2682_v30 = vcombine.low %v6971_v16, %v6970_v63  ;;  %v5585_v33 = vrot.slane %v2649_v36, %v3409_v6  ;;  %v6974_v35 = vld [vmem:[#allocation148_spill] sm:$0xff]  ;;  %v6979_v16 = vld [vmem:[#allocation22_spill] sm:$0xff] }
 0x104   : > { %6963 = vst [vmem:[#allocation90_spill] sm:$0xff] %v5564_v56  ;;  %v5588_v45 = vrot.slane %v2665_v58, %v3409_v6  ;;  %v2683_v27 = vcombine.low %v6975_v17, %v6974_v35  ;;  %v5593_v20 = vrot.slane %v2666_v1, %v3409_v6  ;;  %v6978_v63 = vld [vmem:[#allocation28_spill] sm:$0xff]  ;;  %v6981_v58 = vld [vmem:[#allocation27_spill] sm:$0xff]  ;;  %v6982_v35 = vld [vmem:[#allocation25_spill] sm:$0xff] }
 0x105   : > { %6972 = vst [vmem:[#allocation89_spill] sm:$0xff] %v5585_v33  ;;  %v2011_v4 = vadd.f32 %v2010_v7, %v2009_v61  ;;  %v5596_v2 = vrot.slane %v2682_v30, %v3409_v6  ;;  %v2699_v54 = vcombine.low %v6979_v16, %v6978_v63  ;;  %v2700_v29 = vcombine.low %v6981_v58, %v5036_v55  ;;  %v6983_v61 = vld [vmem:[#allocation33_spill] sm:$0xff]  ;;  %v6984_v63 = vld [vmem:[#allocation30_spill] sm:$0xff]  ;;  %v6985_v16 = vld [vmem:[#allocation31_spill] sm:$0xff] }
 0x106   : > { %6973 = vst [vmem:[#allocation93_spill] sm:$0xff] %v5588_v45  ;;  %6976 = vst [vmem:[#allocation91_spill] sm:$0xff] %v5593_v20  ;;  %v5603_v25 = vrot.slane %v2683_v27, %v3409_v6  ;;  %v2716_v7 = vcombine.low %v6983_v61, %v6982_v35  ;;  %v2717_v56 = vcombine.low %v6985_v16, %v6984_v63  ;;  %v1195_v36 = vld [vmem:[%s3400_s16] sm:$0x1]  ;;  %v6987_v58 = vld [vmem:[#allocation36_spill] sm:$0xff] }
 0x107   : > { %6977 = vst [vmem:[#allocation96_spill] sm:$0xff] %v5596_v2  ;;  %v2012_v1 = vrot.slane %v2011_v4, 1  ;;  %v5612_v17 = vrot.slane %v2699_v54, %v3409_v6  ;;  %v5620_v33 = vrot.slane %v2700_v29, %v3409_v6  ;;  %v2733_v35 = vcombine.low %v6987_v58, %v5061_v5  ;;  %v6989_v30 = vld [vmem:[#allocation32_spill] sm:$0xff]  ;;  %v6990_v63 = vld [vmem:[#allocation149_spill] sm:$0xff]  ;;  %v6991_v20 = vld [vmem:[#allocation34_spill] sm:$0xff] }
 0x108   : > { %6980 = vst [vmem:[#allocation92_spill] sm:$0xff] %v5603_v25  ;;  %v5623_v55 = vrot.slane %v2716_v7, %v3409_v6  ;;  %v5628_v54 = vrot.slane %v2717_v56, %v3409_v6  ;;  %v2734_v16 = vcombine.low %v6990_v63, %v6989_v30  ;;  %v6992_v45 = vld [vmem:[#allocation37_spill] sm:$0xff]  ;;  %v6993_v25 = vld [vmem:[#allocation35_spill] sm:$0xff]  ;;  %v6998_v63 = vld [vmem:[#allocation40_spill] sm:$0xff] }
 0x109   : > { %v2013_v61 = vadd.f32 %v2012_v1, %v2011_v4  ;;  %v2750_v27 = vcombine.low %v6992_v45, %v6991_v20  ;;  %v5637_v7 = vrot.slane %v2733_v35, %v3409_v6  ;;  %v6994_v2 = vld [vmem:[#allocation39_spill] sm:$0xff]  ;;  %v6995_v4 = vld [vmem:[#allocation41_spill] sm:$0xff] }
 0x10a   : > { %6986 = vst [vmem:[#allocation97_spill] sm:$0xff] %v5623_v55  ;;  %6988 = vst [vmem:[#allocation94_spill] sm:$0xff] %v5628_v54  ;;  %v2751_v5 = vcombine.low %v6994_v2, %v6993_v25  ;;  %v2767_v1 = vcombine.low %v6995_v4, %v5094_v21  ;;  %v5646_v30 = vrot.slane %v2734_v16, %v3409_v6  ;;  %v6997_v35 = vld [vmem:[#allocation45_spill] sm:$0xff]  ;;  %v6999_v21 = vld [vmem:[#allocation38_spill] sm:$0xff] }
 0x10b   : > { %v2014_v56 = vadd.f32 %v2013_v61, %v1195_v36  ;;  %v5649_v20 = vrot.slane %v2750_v27, %v3409_v6  ;;  %v2768_v29 = vcombine.low %v6998_v63, %v6997_v35  ;;  %v7000_v2 = vld [vmem:[#allocation150_spill] sm:$0xff]  ;;  %v7001_v27 = vld [vmem:[#allocation43_spill] sm:$0xff]  ;;  %v7002_v4 = vld [vmem:[#allocation48_spill] sm:$0xff] }
 0x10c   : > { %v5652_v45 = vrot.slane %v2751_v5, %v3409_v6  ;;  %v5657_v25 = vrot.slane %v2767_v1, %v3409_v6  ;;  %v2784_v36 = vcombine.low %v7000_v2, %v6999_v21  ;;  %v2785_v16 = vcombine.low %v7001_v27, %v5119_v42  ;;  %v7003_v5 = vld [vmem:[#allocation42_spill] sm:$0xff]  ;;  %v7004_v54 = vld [vmem:[#allocation49_spill] sm:$0xff]  ;;  %v7005_v55 = vld [vmem:[#allocation44_spill] sm:$0xff] }
 0x10d   : > { %2016 = vst.msk [vmem:[%s3400_s16] sm:$0x1] %vm184_vm0, %v2014_v56  ;;  %v2801_v58 = vcombine.low %v7003_v5, %v7002_v4  ;;  %v2802_v35 = vcombine.low %v7005_v55, %v7004_v54  ;;  %v5674_v63 = vrot.slane %v2768_v29, %v3409_v6  ;;  %v7007_v21 = vld [vmem:[#allocation52_spill] sm:$0xff]  ;;  %v7008_v2 = vld [vmem:[#allocation46_spill] sm:$0xff]  ;;  %v7012_v54 = vld [vmem:[#allocation151_spill] sm:$0xff] }
 0x10e   : > { %6996 = vst [vmem:[#allocation100_spill] sm:$0xff] %v5652_v45  ;;  %v5677_v56 = vrot.slane %v2784_v36, %v3409_v6  ;;  %v2818_v61 = vcombine.low %v7008_v2, %v7007_v21  ;;  %v5682_v42 = vrot.slane %v2785_v16, %v3409_v6  ;;  %v2819_v4 = vcombine.low %v7012_v54, %v5152_v11  ;;  %v7014_v5 = vld [vmem:[#allocation53_spill] sm:$0xff]  ;;  %v7015_v21 = vld [vmem:[#allocation47_spill] sm:$0xff]  ;;  %v7017_v1 = vld [vmem:[#allocation50_spill] sm:$0xff] }
 0x10f   : > { %7006 = vst [vmem:[#allocation173_spill] sm:$0xff] %v5674_v63  ;;  %v5685_v27 = vrot.slane %v2801_v58, %v3409_v6  ;;  %v5688_v55 = vrot.slane %v2802_v35, %v3409_v6  ;;  %v2835_v2 = vcombine.low %v7015_v21, %v7014_v5  ;;  %v7016_v16 = vld [vmem:[#allocation55_spill] sm:$0xff]  ;;  %v7022_v21 = vld [vmem:[#allocation54_spill] sm:$0xff]  ;;  %v7024_v63 = vld [vmem:[#allocation152_spill] sm:$0xff] }
 0x110   : > { %7009 = vst [vmem:[#allocation95_spill] sm:$0xff] %v5682_v42  ;;  %v5695_v36 = vrot.slane %v2818_v61, %v3409_v6  ;;  %v2836_v45 = vcombine.low %v7017_v1, %v7016_v16  ;;  %v5706_v11 = vrot.slane %v2819_v4, %v3409_v6  ;;  %v7019_v54 = vld [vmem:[#allocation51_spill] sm:$0xff]  ;;  %v7023_v1 = vld [vmem:[#allocation56_spill] sm:$0xff]  ;;  %v7025_v58 = vld [vmem:[#allocation58_spill] sm:$0xff] }
 0x111   : > { %7010 = vst [vmem:[#allocation101_spill] sm:$0xff] %v5685_v27  ;;  %7011 = vst [vmem:[#allocation98_spill] sm:$0xff] %v5688_v55  ;;  %v2852_v29 = vcombine.low %v7019_v54, %v5177_v34  ;;  %v5711_v61 = vrot.slane %v2835_v2, %v3409_v6  ;;  %v2853_v16 = vcombine.low %v7023_v1, %v7022_v21  ;;  %v7026_v55 = vld [vmem:[#allocation61_spill] sm:$0xff]  ;;  %v7028_v2 = vld [vmem:[#allocation59_spill] sm:$0xff] }
 0x112   : > { %7013 = vst [vmem:[#allocation103_spill] sm:$0xff] %v5695_v36  ;;  %7018 = vst [vmem:[#allocation99_spill] sm:$0xff] %v5706_v11  ;;  %v5714_v5 = vrot.slane %v2836_v45, %v3409_v6  ;;  %v2869_v42 = vcombine.low %v7025_v58, %v7024_v63  ;;  %v7027_v34 = vld [vmem:[#allocation57_spill] sm:$0xff]  ;;  %v2886_v27 = vcombine.low %v7028_v2, %v5210_v57  ;;  %v7029_v58 = vld [vmem:[#allocation60_spill] sm:$0xff] }
 0x113   : > { %7020 = vst [vmem:[#allocation104_spill] sm:$0xff] %v5711_v61  ;;  %v5723_v4 = vrot.slane %v2852_v29, %v3409_v6  ;;  %v2870_v54 = vcombine.low %v7027_v34, %v7026_v55  ;;  %v5732_v21 = vrot.slane %v2853_v16, %v3409_v6  ;;  %v7030_v1 = vld [vmem:[#allocation64_spill] sm:$0xff]  ;;  %v7031_v34 = vld [vmem:[#allocation62_spill] sm:$0xff]  ;;  %v7032_v57 = vld [vmem:[#allocation65_spill] sm:$0xff] }
 0x114   : > { %7021 = vst [vmem:[#allocation102_spill] sm:$0xff] %v5714_v5  ;;  %v5735_v63 = vrot.slane %v2869_v42, %v3409_v6  ;;  %v2887_v35 = vcombine.low %v7030_v1, %v7029_v58  ;;  %v5743_v55 = vrot.slane %v2886_v27, %v3409_v6  ;;  %v2903_v2 = vcombine.low %v7032_v57, %v7031_v34  ;;  %v7033_v45 = vld [vmem:[#allocation68_spill] sm:$0xff]  ;;  %v7035_v61 = vld [vmem:[#allocation63_spill] sm:$0xff]  ;;  %v7036_v58 = vld [vmem:[#allocation153_spill] sm:$0xff] }
 0x115   : > { %v5740_v29 = vrot.slane %v2870_v54, %v3409_v6  ;;  %v2904_v5 = vcombine.low %v7033_v45, %v5235_v22  ;;  %v2920_v1 = vcombine.low %v7036_v58, %v7035_v61  ;;  %v7037_v54 = vld [vmem:[#allocation66_spill] sm:$0xff]  ;;  %v7038_v11 = vld [vmem:[#allocation69_spill] sm:$0xff]  ;;  %v7040_v45 = vld [vmem:[#allocation71_spill] sm:$0xff]  ;;  %v2938_v58 = vcombine.low %v5264_v48, %v5268_v60 }
 0x116   : > { %v5752_v42 = vrot.slane %v2887_v35, %v3409_v6  ;;  %v2921_v36 = vcombine.low %v7038_v11, %v7037_v54  ;;  %v5761_v34 = vrot.slane %v2903_v2, %v3409_v6  ;;  %v2937_v57 = vcombine.low %v7040_v45, %v5259_v15  ;;  %v7041_v54 = vld [vmem:[#allocation72_spill] sm:$0xff]  ;;  %v7042_v15 = vld [vmem:[#allocation67_spill] sm:$0xff]  ;;  %v7043_v27 = vld [vmem:[#allocation74_spill] sm:$0xff] }
 0x117   : > { %v5764_v22 = vrot.slane %v2904_v5, %v3409_v6  ;;  %v5771_v61 = vrot.slane %v2920_v1, %v3409_v6  ;;  %v2954_v45 = vcombine.low %v7042_v15, %v7041_v54  ;;  %v7044_v35 = vld [vmem:[#allocation70_spill] sm:$0xff]  ;;  %v7045_v48 = vld [vmem:[#allocation156_spill] sm:$0xff]  ;;  %v7047_v2 = vld [vmem:[#allocation73_spill] sm:$0xff] }
 0x118   : > { %7034 = vst [vmem:[#allocation106_spill] sm:$0xff] %v5752_v42  ;;  %v5774_v11 = vrot.slane %v2921_v36, %v3409_v6  ;;  %v5781_v5 = vrot.slane %v2937_v57, %v3409_v6  ;;  %v2955_v16 = vcombine.low %v7044_v35, %v7043_v27  ;;  %v5790_v36 = vrot.slane %v2938_v58, %v3409_v6  ;;  %v7046_v42 = vld [vmem:[#allocation77_spill] sm:$0xff]  ;;  %v7048_v27 = vld [vmem:[#allocation75_spill] sm:$0xff]  ;;  %v7049_v15 = vld [vmem:[#allocation80_spill] sm:$0xff] }
 0x119   : > { %7039 = vst [vmem:[#allocation180_spill] sm:$0xff] %v5764_v22  ;;  %v2971_v60 = vcombine.low %v7045_v48, %v5293_v9  ;;  %v2972_v22 = vcombine.low %v7047_v2, %v7046_v42  ;;  %v5797_v57 = vrot.slane %v2954_v45, %v3409_v6  ;;  %v2988_v35 = vcombine.low %v7048_v27, %v5309_v23 }
 0x11a   : > { %v5800_v54 = vrot.slane %v2955_v16, %v3409_v6  ;;  %v2989_v1 = vcombine.low %v7049_v15, %v5317_v59  ;;  %v2953_v58 = vcombine.low %v5781_v5, %v5790_v36  ;;  %v3005_v2 = vcombine.low %v5322_v40, %v5326_v47 }
 0x11b   : > { %v5809_v9 = vrot.slane %v2971_v60, %v3409_v6  ;;  %v5812_v42 = vrot.slane %v2972_v22, %v3409_v6  ;;  %v5819_v23 = vrot.slane %v2988_v35, %v3409_v6  ;;  %v3006_v45 = vcombine.low %v5330_v13, %v5334_v49 }
 0x11c   : > { %v2970_v16 = vcombine.low %v5797_v57, %v5800_v54  ;;  %v5822_v59 = vrot.slane %v2989_v1, %v3409_v6  ;;  %v5829_v22 = vrot.slane %v3005_v2, %v3409_v6  ;;  %v3022_v40 = vcombine.low %v5338_v3, %v5342_v46 }
 0x11d   : > { %v2987_v48 = vcombine.low %v5809_v9, %v5812_v42  ;;  %v7050_v47 = vcombine.low %v5354_v44, %v5364_v31  ;;  %v5840_v27 = vrot.slane %v3006_v45, %v3409_v6  ;;  %v7051_v49 = vcombine.low %v5367_v53, %v5370_v19 }
 0x11e   : > { %v3004_v1 = vcombine.low %v5819_v23, %v5822_v59  ;;  %v7052_v35 = vcombine.low %v5373_v43, %v5376_v8  ;;  %v7053_v31 = vcombine.low %v5381_v26, %v5393_v14  ;;  %v7054_v53 = vcombine.low %v5401_v0, %v5410_v28  ;;  %v2017_v23 = vld [vmem:[%s3405_s19] sm:$0x1] }
 0x11f   : > { %v3071_v60 = vsel %vm1925_vm1, %v7050_v47, 0.0  ;;  %v3072_v13 = vsel %vm1925_vm1, %v7051_v49, 0.0  ;;  %v3021_v44 = vcombine.low %v5829_v22, %v5840_v27  ;;  %v7055_v43 = vcombine.low %v5413_v24, %v5419_v39 }
 0x120   : > { %v3074_v15 = vsel %vm1925_vm1, %v7052_v35, 0.0  ;;  %v3073_v2 = vadd.f32 %v3072_v13, %v3071_v60  ;;  %v3076_v45 = vsel %vm1925_vm1, %v7053_v31, 0.0  ;;  %v3078_v19 = vsel %vm1925_vm1, %v7054_v53, 0.0  ;;  %v7060_v31 = vld [vmem:[#allocation81_spill] sm:$0xff]  ;;  %v7063_v53 = vld [vmem:[#allocation84_spill] sm:$0xff] }
 0x121   : > { %v3080_v8 = vsel %vm1925_vm1, %v7055_v43, 0.0  ;;  %v7056_v13 = vcombine.low %v5422_v18, %v5429_v62  ;;  %v7057_v35 = vcombine.low %v5439_v41, %v5446_v38  ;;  %v3029_v5 = vrot.slane %v3022_v40, %v3409_v6 }
 0x122   : > { %v3075_v47 = vadd.f32 %v3074_v15, %v3073_v2  ;;  %v7058_v15 = vld [vmem:[#allocation76_spill] sm:$0xff]  ;;  %v3146_v36 = vsel %vm1925_vm1, %v3004_v1, 0.0  ;;  %v3148_v54 = vsel %vm1925_vm1, %v3021_v44, 0.0 }
 0x123   : > { %v3082_v26 = vsel %vm1925_vm1, %v7056_v13, 0.0  ;;  %v3084_v0 = vsel %vm1925_vm1, %v7057_v35, 0.0  ;;  %v7059_v2 = vcombine.low %v5449_v50, %v7058_v15  ;;  %v7068_v13 = vld [vmem:[#allocation85_spill] sm:$0xff]  ;;  %v7070_v35 = vld [vmem:[#allocation82_spill] sm:$0xff]  ;;  %v3150_v9 = vsel %vm2005_vm2, %v3029_v5, 0.0 }
 0x124   : > { %v3077_v49 = vadd.f32 %v3076_v45, %v3075_v47  ;;  %v7061_v45 = vcombine.low %v5464_v10, %v7060_v31  ;;  %v7062_v47 = vld [vmem:[#allocation78_spill] sm:$0xff]  ;;  %v7074_v31 = vld [vmem:[#allocation83_spill] sm:$0xff] }
 0x125   : > { %v3086_v24 = vsel %vm1925_vm1, %v7059_v2, 0.0 }
 0x126   : > { %v3079_v60 = vadd.f32 %v3078_v19, %v3077_v49  ;;  %v3088_v18 = vsel %vm1925_vm1, %v7061_v45, 0.0  ;;  %v7064_v19 = vcombine.low %v7062_v47, %v7063_v53  ;;  %v7065_v49 = vld [vmem:[#allocation163_spill] sm:$0xff]  ;;  %v7075_v45 = vld [vmem:[#allocation88_spill] sm:$0xff]  ;;  %v7077_v53 = vld [vmem:[#allocation86_spill] sm:$0xff] }
 0x127   : > { %v7066_v43 = vcombine.low %v5485_v12, %v7065_v49  ;;  %v7079_v49 = vld [vmem:[#allocation90_spill] sm:$0xff] }
 0x128   : > { %v3081_v14 = vadd.f32 %v3080_v8, %v3079_v60  ;;  %v3090_v41 = vsel %vm1925_vm1, %v7064_v19, 0.0  ;;  %v7067_v60 = vld [vmem:[#allocation79_spill] sm:$0xff]  ;;  %v7078_v19 = vcombine.low %v5552_v37, %v7077_v53 }
 0x129   : > { %v3092_v50 = vsel %vm1925_vm1, %v7066_v43, 0.0  ;;  %v7080_v43 = vld [vmem:[#allocation168_spill] sm:$0xff] }
 0x12a   : > { %v3083_v28 = vadd.f32 %v3082_v26, %v3081_v14  ;;  %v7069_v26 = vcombine.low %v7067_v60, %v7068_v13 }
 0x12c   : > { %v3085_v39 = vadd.f32 %v3084_v0, %v3083_v28  ;;  %v3094_v10 = vsel %vm1925_vm1, %v7069_v26, 0.0  ;;  %v7071_v0 = vld [vmem:[#allocation87_spill] sm:$0xff] }
 0x12d   : > { %v7072_v28 = vcombine.low %v7070_v35, %v7071_v0 }
 0x12e   : > { %v3087_v62 = vadd.f32 %v3086_v24, %v3085_v39  ;;  %v7073_v24 = vcombine.low %v5528_v32, %v5535_v52 }
 0x12f   : > { %v3096_v15 = vsel %vm1925_vm1, %v7072_v28, 0.0  ;;  %v7087_v28 = vld [vmem:[#allocation96_spill] sm:$0xff] }
 0x130   : > { %v3089_v38 = vadd.f32 %v3088_v18, %v3087_v62  ;;  %v3098_v12 = vsel %vm1925_vm1, %v7073_v24, 0.0  ;;  %v7076_v18 = vcombine.low %v7074_v31, %v7075_v45  ;;  %v7091_v45 = vld [vmem:[#allocation97_spill] sm:$0xff] }
 0x132   : > { %v3091_v8 = vadd.f32 %v3090_v41, %v3089_v38  ;;  %v3100_v62 = vsel %vm1925_vm1, %v7076_v18, 0.0  ;;  %v3102_v41 = vsel %vm1925_vm1, %v7078_v19, 0.0  ;;  %v7092_v18 = vld [vmem:[#allocation94_spill] sm:$0xff]  ;;  %v7094_v19 = vcombine.low %v5637_v7, %v5646_v30 }
 0x134   : > { %v3093_v14 = vadd.f32 %v3092_v50, %v3091_v8  ;;  %v7081_v50 = vcombine.low %v7079_v49, %v7080_v43  ;;  %v7082_v8 = vld [vmem:[#allocation89_spill] sm:$0xff]  ;;  %v7095_v49 = vld [vmem:[#allocation100_spill] sm:$0xff] }
 0x135   : > { %v7083_v60 = vcombine.low %v5572_v51, %v7082_v8  ;;  %v7096_v43 = vcombine.low %v5649_v20, %v7095_v49  ;;  %v7114_v49 = vld [vmem:[#allocation180_spill] sm:$0xff] }
 0x136   : > { %v3095_v2 = vadd.f32 %v3094_v10, %v3093_v14  ;;  %v3104_v32 = vsel %vm1925_vm1, %v7081_v50, 0.0  ;;  %v7084_v10 = vld [vmem:[#allocation93_spill] sm:$0xff]  ;;  %v7085_v14 = vld [vmem:[#allocation91_spill] sm:$0xff] }
 0x137   : > { %v3106_v13 = vsel %vm1925_vm1, %v7083_v60, 0.0  ;;  %v7086_v35 = vcombine.low %v7084_v10, %v7085_v14  ;;  %v7097_v50 = vld [vmem:[#allocation173_spill] sm:$0xff]  ;;  %v7099_v60 = vld [vmem:[#allocation95_spill] sm:$0xff]  ;;  %v7102_v10 = vld [vmem:[#allocation98_spill] sm:$0xff] }
 0x138   : > { %v3097_v39 = vadd.f32 %v3096_v15, %v3095_v2  ;;  %v7088_v15 = vld [vmem:[#allocation92_spill] sm:$0xff] }
 0x139   : > { %v3108_v37 = vsel %vm1925_vm1, %v7086_v35, 0.0  ;;  %v7089_v2 = vcombine.low %v7087_v28, %v7088_v15 }
 0x13a   : > { %v3099_v47 = vadd.f32 %v3098_v12, %v3097_v39  ;;  %v7090_v39 = vcombine.low %v5612_v17, %v5620_v33  ;;  %v3118_v33 = vsel %vm1925_vm1, %v7096_v43, 0.0  ;;  %v7115_v43 = vcombine.low %v5761_v34, %v7114_v49 }
 0x13b   : > { %v3110_v24 = vsel %vm1925_vm1, %v7089_v2, 0.0  ;;  %v7107_v2 = vld [vmem:[#allocation104_spill] sm:$0xff]  ;;  %v3142_v34 = vsel %vm1925_vm1, %v2970_v16, 0.0 }
 0x13c   : > { %v3101_v38 = vadd.f32 %v3100_v62, %v3099_v47  ;;  %v3112_v51 = vsel %vm1925_vm1, %v7090_v39, 0.0  ;;  %v7093_v62 = vcombine.low %v7091_v45, %v7092_v18  ;;  %v7111_v18 = vcombine.low %v5735_v63, %v5740_v29 }
 0x13e   : > { %v3103_v52 = vadd.f32 %v3102_v41, %v3101_v38  ;;  %v3114_v47 = vsel %vm1925_vm1, %v7093_v62, 0.0  ;;  %v3116_v41 = vsel %vm1925_vm1, %v7094_v19, 0.0  ;;  %v3132_v62 = vsel %vm1925_vm1, %v7111_v18, 0.0 }
 0x140   : > { %v3105_v26 = vadd.f32 %v3104_v32, %v3103_v52  ;;  %v7098_v32 = vcombine.low %v5657_v25, %v7097_v50 }
 0x142   : > { %v3107_v0 = vadd.f32 %v3106_v13, %v3105_v26  ;;  %v3120_v52 = vsel %vm1925_vm1, %v7098_v32, 0.0  ;;  %v7100_v13 = vcombine.low %v5677_v56, %v7099_v60  ;;  %v7101_v26 = vld [vmem:[#allocation101_spill] sm:$0xff] }
 0x143   : > { %v7103_v14 = vcombine.low %v7101_v26, %v7102_v10 }
 0x144   : > { %v3109_v12 = vadd.f32 %v3108_v37, %v3107_v0  ;;  %v3122_v7 = vsel %vm1925_vm1, %v7100_v13, 0.0  ;;  %v7104_v37 = vld [vmem:[#allocation103_spill] sm:$0xff] }
 0x145   : > { %v3124_v20 = vsel %vm1925_vm1, %v7103_v14, 0.0  ;;  %v7105_v0 = vld [vmem:[#allocation99_spill] sm:$0xff] }
 0x146   : > { %v3111_v31 = vadd.f32 %v3110_v24, %v3109_v12  ;;  %v7106_v28 = vcombine.low %v7104_v37, %v7105_v0  ;;  %v7108_v24 = vld [vmem:[#allocation102_spill] sm:$0xff] }
 0x147   : > { %v7109_v12 = vcombine.low %v7107_v2, %v7108_v24 }
 0x148   : > { %v3113_v53 = vadd.f32 %v3112_v51, %v3111_v31  ;;  %v3126_v25 = vsel %vm1925_vm1, %v7106_v28, 0.0  ;;  %v7110_v51 = vcombine.low %v5723_v4, %v5732_v21  ;;  %v3136_v4 = vsel %vm1925_vm1, %v7115_v43, 0.0 }
 0x149   : > { %v3128_v56 = vsel %vm1925_vm1, %v7109_v12, 0.0 }
 0x14a   : > { %v3115_v38 = vadd.f32 %v3114_v47, %v3113_v53  ;;  %v3130_v31 = vsel %vm1925_vm1, %v7110_v51, 0.0  ;;  %v7112_v53 = vld [vmem:[#allocation106_spill] sm:$0xff] }
 0x14b   : > { %v7113_v19 = vcombine.low %v5743_v55, %v7112_v53  ;;  %v3140_v55 = vsel %vm1925_vm1, %v2953_v58, 0.0 }
 0x14c   : > { %v3117_v17 = vadd.f32 %v3116_v41, %v3115_v38 }
 0x14d   : > { %v3134_v41 = vsel %vm1925_vm1, %v7113_v19, 0.0 }
 0x14e   : > { %v3119_v8 = vadd.f32 %v3118_v33, %v3117_v17  ;;  %v7116_v33 = vcombine.low %v5771_v61, %v5774_v11  ;;  %v3144_v61 = vsel %vm1925_vm1, %v2987_v48, 0.0 }
 0x150   : > { %v3121_v30 = vadd.f32 %v3120_v52, %v3119_v8  ;;  %v3138_v63 = vsel %vm1925_vm1, %v7116_v33, 0.0 }
 0x152   : > { %v3123_v35 = vadd.f32 %v3122_v7, %v3121_v30 }
 0x154   : > { %v3125_v15 = vadd.f32 %v3124_v20, %v3123_v35 }
 0x156   : > { %v3127_v39 = vadd.f32 %v3126_v25, %v3125_v15 }
 0x158   : > { %v3129_v45 = vadd.f32 %v3128_v56, %v3127_v39 }
 0x15a   : > { %v3131_v47 = vadd.f32 %v3130_v31, %v3129_v45 }
 0x15c   : > { %v3133_v38 = vadd.f32 %v3132_v62, %v3131_v47 }
 0x15e   : > { %v3135_v21 = vadd.f32 %v3134_v41, %v3133_v38 }
 0x160   : > { %v3137_v29 = vadd.f32 %v3136_v4, %v3135_v21 }
 0x162   : > { %v3139_v17 = vadd.f32 %v3138_v63, %v3137_v29 }
 0x164   : > { %v3141_v50 = vadd.f32 %v3140_v55, %v3139_v17 }
 0x166   : > { %v3143_v11 = vadd.f32 %v3142_v34, %v3141_v50 }
 0x168   : > { %v3145_v57 = vadd.f32 %v3144_v61, %v3143_v11 }
 0x16a   : > { %v3147_v58 = vadd.f32 %v3146_v36, %v3145_v57 }
 0x16c   : > { %v3149_v42 = vadd.f32 %v3148_v54, %v3147_v58 }
 0x16e   : > { %v3151_v16 = vadd.f32 %v3150_v9, %v3149_v42 }
 0x170   : > { %v3152_v48 = vrot.slane %v3151_v16, 4 }
 0x172   : > { %v3153_v3 = vadd.f32 %v3152_v48, %v3151_v16 }
 0x174   : > { %v3154_v6 = vrot.slane %v3153_v3, 2 }
 0x176   : > { %v3155_v46 = vadd.f32 %v3154_v6, %v3153_v3 }
 0x178   : > { %v3156_v40 = vrot.slane %v3155_v46, 1 }
 0x17a   : > { %v3157_v59 = vadd.f32 %v3156_v40, %v3155_v46 }
 0x17c   : > { %v3158_v32 = vadd.f32 %v3157_v59, %v2017_v23 }
 0x17e   : > { %3159 = vst.msk [vmem:[%s3405_s19] sm:$0x1] %vm184_vm0, %v3158_v32 }
 0x17f PF: > { %s13_s11 = sadd.s32 1, %s3360_s11   ;;  %s7117_s9 = smov %s3356_s10 }
 0x180   : > { %p10_p5 = scmp.ge.s32.totalorder %s13_s11, 4   ;;  %s7118_s10 = smov %s7120_s12 }
 0x182   :  { %12 = sbr.rel (!%p10_p5) target bundleno = 2 (0x2), region = 70 }

// kernel: resnet_block_forward.5
= control target key start
LH: loop header
LB: loop body
LE: loop exit
PB: predicated region body
PF: predicated region fallthrough
CT: control target
= control target key end

     0   :  { %s3294_s27 = smov 0   ;;  %s3296_s28 = smov 0   ;;  %s4701_s0 = inlined_call_operand.vmem [shape: bf16[2,18,18,16], index: 0, kind: input, shape index: {}]   ;;  %s4702_s1 = inlined_call_operand.vmem [shape: f32[2,1,16], index: 1, kind: input, shape index: {}]   ;;  %s4703_s2 = inlined_call_operand.vmem [shape: f32[2,1,16], index: 2, kind: input, shape index: {}]   ;;  %s4704_s3 = inlined_call_operand.vmem [shape: bf16[144,16], index: 3, kind: input, shape index: {}]   ;;  %s4705_s4 = inlined_call_operand.vmem [shape: f32[1,16], index: 4, kind: input, shape index: {}]   ;;  %s4706_s5 = inlined_call_operand.vmem [shape: f32[2,18,18,8], index: 5, kind: input, shape index: {}]   ;;  %s4707_s6 = inlined_call_operand.vmem [shape: bf16[8,16], index: 6, kind: input, shape index: {}]   ;;  %s4708_s7 = inlined_call_operand.vmem [shape: f32[1,16], index: 7, kind: input, shape index: {}]   ;;  %s4709_s8 = inlined_call_operand.vmem [shape: f32[2,16,16,16], index: 8, kind: output, shape index: {}]  }
   0x1   :  { %s3298_s29 = smov 0  }
   0x2 LB: > { %s30_s30 = sadd.s32 1, %s3234_s28  ;;  %p2729_p0 = scmp.ge.s32.totalorder %s3238_s29, 1  ;;  %s3238_s29 = sphi %s3298_s29, %s18_s29   ;;  %s3234_s28 = sphi %s3296_s28, %s4726_s28   ;;  %s3230_s27 = sphi %s3294_s27, %s4725_s27  }
   0x3   : > { %p32_p1 = scmp.ge.s32.totalorder %s30_s30, 2  ;;  %p336_p2 = scmp.lt.s32.totalorder %s3238_s29, 3 }
   0x5   : > { %s4728_s30 = smov (%p32_p1, %s30_s30), 0  ;;  %p337_p3 = pnand %p2729_p0, %p336_p2 }
   0x7   : > { %340 = sbr.rel (%p337_p3) target bundleno = 624 (0x270), region = 52 }
   0xe   : > { %v3240_v0 = vmov 0.0|0.0   ;;  %v3241_v2 = vmov 0   ;;  %p398_p4 = scmp.lt.s32.totalorder %s3230_s27, 1  ;;  %s3242_s9 = smov 32   ;;  %vm1382_vm2 = vcmask 1046528   ;;  %vm1689_vm4 = vcmask 130048  }
   0xf   : > { %v3313_v1 = vrot.slane %v3240_v0, 1  ;;  %v3316_v3 = vrot.slane %v3241_v2, 1  ;;  %2063 = vmatprep.subr.bf16.mxu0 %v3241_v2  ;;  %2959 = vmatprep.subr.bf16.mxu1 %v3241_v2  ;;  %s3243_s10 = smov 16   ;;  %s3244_s23 = smov 48   ;;  %vm1157_vm3 = vsmask.f32 7424 }
  0x10   : > { %s4730_s27 = smov (!%p398_p4, %s3230_s27), 1  ;;  %s3245_s26 = smov 96   ;;  %vm2330_vm5 = vcmask 1043456   ;;  %vm1722_vm6 = vcmask 261120   ;;  %vm1755_vm7 = vcmask 392192   ;;  %vm1788_vm8 = vcmask 523264  }
  0x11   : > { %1497 = vrot.lane.b32.xlu1 %v3313_v1, %s3242_s9  ;;  %1465 = vrot.lane.b32.xlu0 %v3316_v3, %s3243_s10  ;;  %s2978_s11 = smul.u32 216, %s4730_s27  ;;  %s3331_s14 = scalar_lea.vmem %s4702_s1, %s4730_s27  ;;  %vm1821_vm9 = vcmask 654336   ;;  %vm1854_vm10 = vcmask 785408   ;;  %vm1887_vm11 = vcmask 916480   ;;  %vm2281_vm12 = vcmask 64512  }
  0x12   : > { %s3342_s20 = scalar_lea.vmem %s4703_s2, %s4730_s27  ;;  %v3345_v4 = vld [vmem:[%s3331_s14] ss:$0 sm:$0xff]  ;;  %s3246_s16 = smov 80  }
  0x13   : > { %s3336_s17 = scalar_lea.vmem %s4701_s0, %s2978_s11  ;;  %v3352_v13 = vld [vmem:[%s3342_s20] ss:$0 sm:$0xff]  ;;  %s3247_s18 = smov 64  }
  0x14   : > { %v476_v5 = vld [vmem:[%s3336_s17 + $0x9c] sm:$0xff]   ;;  %v440_v6 = vld [vmem:[%s3336_s17 + $0xc] sm:$0xff]   ;;  %v482_v26 = vld [vmem:[%s3336_s17 + $0xb4] sm:$0xff]   ;;  %s3248_s19 = smov 112  }
  0x15   : > { %v2906_v7 = vld [vmem:[%s3336_s17 + $0xa8] sm:$0xff]   ;;  %v530_v8 = vunpack.c.l.bf16 %v476_v5  ;;  %v531_v9 = vunpack.c.h.bf16 %v476_v5  ;;  %v494_v10 = vunpack.c.l.bf16 %v440_v6  ;;  %v495_v11 = vunpack.c.h.bf16 %v440_v6  ;;  %v2900_v12 = vld [vmem:[%s3336_s17 + $0x18] sm:$0xff]   ;;  %v478_v36 = vld [vmem:[%s3336_s17 + $0xa4] sm:$0x1] }
  0x16   : > { %v2894_v14 = vunpack.c.l.bf16 %v2906_v7  ;;  %v2895_v15 = vunpack.c.h.bf16 %v2906_v7  ;;  %v2870_v16 = vunpack.c.l.bf16 %v2900_v12  ;;  %v2871_v17 = vunpack.c.h.bf16 %v2900_v12  ;;  %v446_v35 = vld [vmem:[%s3336_s17 + $0x24] sm:$0xff]   ;;  %v2905_v5 = vld [vmem:[%s3336_s17 + $0x90] sm:$0xff]   ;;  %v475_v7 = vld [vmem:[%s3336_s17 + $0x98] sm:$0x1] }
  0x17   : > { %v592_v18 = vmul.f32 %v3345_v4, %v530_v8  ;;  %v593_v19 = vmul.f32 %v3345_v4, %v531_v9  ;;  %v556_v20 = vmul.f32 %v3345_v4, %v494_v10  ;;  %v557_v21 = vmul.f32 %v3345_v4, %v495_v11  ;;  %v442_v10 = vld [vmem:[%s3336_s17 + $0x14] sm:$0x1] }
  0x18   : > { %v595_v22 = vmul.f32 %v2894_v14, %v3345_v4  ;;  %v596_v23 = vmul.f32 %v2895_v15, %v3345_v4  ;;  %v559_v24 = vmul.f32 %v2870_v16, %v3345_v4  ;;  %v560_v25 = vmul.f32 %v2871_v17, %v3345_v4  ;;  %v481_v15 = vld [vmem:[%s3336_s17 + $0xb0] sm:$0x1] }
  0x19   : > { %v3364_v27 = vadd.f32 %v3352_v13, %v592_v18  ;;  %v3367_v28 = vadd.f32 %v3352_v13, %v593_v19  ;;  %v3370_v29 = vadd.f32 %v3352_v13, %v556_v20  ;;  %v3373_v30 = vadd.f32 %v3352_v13, %v557_v21  ;;  %v445_v19 = vld [vmem:[%s3336_s17 + $0x20] sm:$0x1] }
  0x1a   : > { %v3376_v31 = vadd.f32 %v3352_v13, %v595_v22  ;;  %v3379_v32 = vadd.f32 %v3352_v13, %v596_v23  ;;  %v3382_v33 = vadd.f32 %v3352_v13, %v559_v24  ;;  %v3385_v34 = vadd.f32 %v3352_v13, %v560_v25 }
  0x1b   : > { %v2775_v37 = vmul.f32 -1.442695, %v3364_v27  ;;  %v2776_v38 = vmul.f32 -1.442695, %v3367_v28  ;;  %v2739_v39 = vmul.f32 -1.442695, %v3370_v29  ;;  %v536_v40 = vunpack.c.l.bf16 %v482_v26 }
  0x1c   : > { %v2740_v41 = vmul.f32 -1.442695, %v3373_v30  ;;  %v2778_v42 = vmul.f32 -1.442695, %v3376_v31  ;;  %v2779_v43 = vmul.f32 -1.442695, %v3379_v32  ;;  %v537_v44 = vunpack.c.h.bf16 %v482_v26 }
  0x1d   : > { %3022 = vpow2.f32 %v2775_v37  ;;  %v2742_v45 = vmul.f32 -1.442695, %v3382_v33  ;;  %v2743_v46 = vmul.f32 -1.442695, %v3385_v34  ;;  %v598_v47 = vmul.f32 %v3345_v4, %v536_v40 }
  0x1e   : > { %3024 = vpow2.f32 %v2776_v38  ;;  %v599_v48 = vmul.f32 %v3345_v4, %v537_v44  ;;  %v500_v49 = vunpack.c.l.bf16 %v446_v35  ;;  %v501_v50 = vunpack.c.h.bf16 %v446_v35 }
  0x1f   : > { %3026 = vpow2.f32 %v2739_v39  ;;  %v3400_v51 = vadd.f32 %v3352_v13, %v598_v47  ;;  %v532_v52 = vunpack.c.l.bf16 %v478_v36  ;;  %v2890_v9 = vunpack.c.l.bf16 %v2905_v5 }
  0x20   : > { %3028 = vpow2.f32 %v2740_v41  ;;  %v3403_v53 = vadd.f32 %v3352_v13, %v599_v48  ;;  %v562_v54 = vmul.f32 %v3345_v4, %v500_v49  ;;  %v563_v55 = vmul.f32 %v3345_v4, %v501_v50 }
  0x21   : > { %3030 = vpow2.f32 %v2778_v42  ;;  %v2781_v56 = vmul.f32 -1.442695, %v3400_v51  ;;  %v594_v57 = vmul.f32 %v3345_v4, %v532_v52  ;;  %v2891_v14 = vunpack.c.h.bf16 %v2905_v5 }
  0x22   : > { %3032 = vpow2.f32 %v2779_v43  ;;  %v2782_v58 = vmul.f32 -1.442695, %v3403_v53  ;;  %v3411_v59 = vadd.f32 %v3352_v13, %v562_v54  ;;  %v3414_v60 = vadd.f32 %v3352_v13, %v563_v55 }
  0x23   : > { %3034 = vpow2.f32 %v2742_v45  ;;  %v3417_v61 = vadd.f32 %v3352_v13, %v594_v57  ;;  %v529_v18 = vunpack.c.l.bf16 %v475_v7  ;;  %v1045_v21 = vlaneseq }
  0x24   : > { %3036 = vpow2.f32 %v2743_v46  ;;  %v2745_v62 = vmul.f32 -1.442695, %v3411_v59  ;;  %v2746_v63 = vmul.f32 -1.442695, %v3414_v60  ;;  %v496_v23 = vunpack.c.l.bf16 %v442_v10 }
  0x25   : > { %3038 = vpow2.f32 %v2781_v56  ;;  %v2777_v6 = vmul.f32 -1.442695, %v3417_v61  ;;  %v589_v26 = vmul.f32 %v2890_v9, %v3345_v4  ;;  %v535_v35 = vunpack.c.l.bf16 %v481_v15 }
  0x26   : > { %3040 = vpow2.f32 %v2782_v58  ;;  %v590_v38 = vmul.f32 %v2891_v14, %v3345_v4  ;;  %v499_v39 = vunpack.c.l.bf16 %v445_v19  ;;  %v591_v42 = vmul.f32 %v3345_v4, %v529_v18 }
  0x27   : > { %v3023_v8 = vpop.eup %3022  ;;  %3042 = vpow2.f32 %v2745_v62  ;;  %v3430_v44 = vshrl.u32 %v1045_v21, 7  ;;  %v558_v46 = vmul.f32 %v3345_v4, %v496_v23  ;;  %v3434_v49 = vadd.f32 %v3352_v13, %v589_v26 }
  0x28   : > { %v3025_v11 = vpop.eup %3024  ;;  %v868_v12 = vadd.f32 1.0, %v3023_v8  ;;  %3044 = vpow2.f32 %v2746_v63  ;;  %v597_v50 = vmul.f32 %v3345_v4, %v535_v35  ;;  %v3438_v55 = vadd.f32 %v3352_v13, %v590_v38  ;;  %v448_v38 = vld [vmem:[%s3336_s17 + $0x2c] sm:$0x1] }
  0x29   : > { %v3027_v16 = vpop.eup %3026  ;;  %v869_v17 = vadd.f32 1.0, %v3025_v11  ;;  %3046 = vpow2.f32 %v2777_v6  ;;  %v561_v56 = vmul.f32 %v3345_v4, %v499_v39  ;;  %v3442_v62 = vadd.f32 %v3352_v13, %v591_v42  ;;  %v484_v11 = vld [vmem:[%s3336_s17 + $0xbc] sm:$0x1] }
  0x2a   : > { %v3029_v20 = vpop.eup %3028  ;;  %3048 = vrcp.f32 %v868_v12  ;;  %v832_v22 = vadd.f32 1.0, %v3027_v16  ;;  %vm1049_vm0 = vcmp.ge.s32.totalorder %v3430_v44, 1  ;;  %v3446_v6 = vadd.f32 %v3352_v13, %v558_v46 }
  0x2b   : > { %v3031_v24 = vpop.eup %3030  ;;  %3050 = vrcp.f32 %v869_v17  ;;  %v833_v25 = vadd.f32 1.0, %v3029_v20  ;;  %v2772_v9 = vmul.f32 -1.442695, %v3434_v49  ;;  %v3450_v10 = vadd.f32 %v3352_v13, %v597_v50  ;;  %v3486_v50 = vld [vmem:[%s3336_s17 + $0xc0] sm:$0xff]  }
  0x2c   : > { %v3033_v36 = vpop.eup %3032  ;;  %3052 = vrcp.f32 %v832_v22  ;;  %v871_v37 = vadd.f32 1.0, %v3031_v24  ;;  %v2773_v15 = vmul.f32 -1.442695, %v3438_v55  ;;  %v3455_v16 = vadd.f32 %v3352_v13, %v561_v56 }
  0x2d   : > { %v3035_v40 = vpop.eup %3034  ;;  %3054 = vrcp.f32 %v833_v25  ;;  %v872_v41 = vadd.f32 1.0, %v3033_v36  ;;  %v2774_v19 = vmul.f32 -1.442695, %v3442_v62  ;;  %v2741_v22 = vmul.f32 -1.442695, %v3446_v6 }
  0x2e   : > { %v3037_v43 = vpop.eup %3036  ;;  %3056 = vrcp.f32 %v871_v37  ;;  %v835_v45 = vadd.f32 1.0, %v3035_v40  ;;  %v538_v23 = vunpack.c.l.bf16 %v484_v11  ;;  %v3494_v56 = vadd.s32 16, %v3430_v44 }
  0x2f   : > { %v3039_v47 = vpop.eup %3038  ;;  %3058 = vrcp.f32 %v872_v41  ;;  %v836_v48 = vadd.f32 1.0, %v3037_v43 }
  0x30   : > { %v3041_v52 = vpop.eup %3040  ;;  %3060 = vrcp.f32 %v835_v45  ;;  %v874_v54 = vadd.f32 1.0, %v3039_v47  ;;  %v600_v45 = vmul.f32 %v3345_v4, %v538_v23  ;;  %vm1060_vm1 = vcmp.le.s32.totalorder %v3494_v56, 16 }
  0x31   : > { %v3043_v57 = vpop.eup %3042  ;;  %3062 = vrcp.f32 %v836_v48  ;;  %v875_v58 = vadd.f32 1.0, %v3041_v52  ;;  %v502_v48 = vunpack.c.l.bf16 %v448_v38 }
  0x32   : > { %v3045_v63 = vpop.eup %3044  ;;  %3064 = vrcp.f32 %v874_v54  ;;  %v838_v5 = vadd.f32 1.0, %v3043_v57 }
  0x33   : > { %v3047_v7 = vpop.eup %3046  ;;  %3066 = vrcp.f32 %v875_v58  ;;  %v839_v8 = vadd.f32 1.0, %v3045_v63  ;;  %v3014_v63 = vld [vmem:[%s4704_s3 + $0x8] sm:$0xff]  }
  0x34   : > { %v3049_v12 = vpop.eup %3048  ;;  %3068 = vrcp.f32 %v838_v5  ;;  %v870_v14 = vadd.f32 1.0, %v3047_v7 }
  0x35   : > { %v3051_v17 = vpop.eup %3050  ;;  %v1030_v18 = vmul.f32 %v3049_v12, %v3364_v27  ;;  %3070 = vrcp.f32 %v839_v8  ;;  %v2780_v27 = vmul.f32 -1.442695, %v3450_v10  ;;  %v3510_v8 = vadd.f32 %v3352_v13, %v600_v45  ;;  %v3016_v45 = vld [vmem:[%s4704_s3 + $0x18] sm:$0xff]  }
  0x36   : > { %v3053_v20 = vpop.eup %3052  ;;  %v1031_v21 = vmul.f32 %v3051_v17, %v3367_v28  ;;  %3072 = vrcp.f32 %v870_v14  ;;  %v2744_v28 = vmul.f32 -1.442695, %v3455_v16  ;;  %v564_v14 = vmul.f32 %v3345_v4, %v502_v48 }
  0x37   : > { %v3055_v24 = vpop.eup %3054  ;;  %v1106_v25 = vsel %vm1049_vm0, %v1030_v18, 0.0  ;;  %v994_v26 = vmul.f32 %v3053_v20, %v3370_v29  ;;  %3074 = vpow2.f32 %v2772_v9  ;;  %v3013_v29 = vld [vmem:[%s4704_s3] sm:$0xff]   ;;  %v2783_v23 = vmul.f32 -1.442695, %v3510_v8 }
  0x38   : > { %v3057_v35 = vpop.eup %3056  ;;  %v3465_v36 = vpack.c.bf16 %v1031_v21, %v1106_v25  ;;  %v995_v37 = vmul.f32 %v3055_v24, %v3373_v30  ;;  %3076 = vpow2.f32 %v2773_v15  ;;  %2064 = vmatpush1.bf16.msra.mxu0 %v3013_v29  ;;  %2968 = vmatpush1.bf16.msra.mxu1 %v3013_v29  ;;  %v2901_v24 = vld [vmem:[%s3336_s17 + $0x30] sm:$0xff]  }
  0x39   : > { %v3059_v39 = vpop.eup %3058  ;;  %v1070_v40 = vsel %vm1049_vm0, %v994_v26, 0.0  ;;  %v1033_v41 = vmul.f32 %v3057_v35, %v3376_v31  ;;  %3078 = vpow2.f32 %v2774_v19  ;;  %2065 = vmatprep.subr.bf16.mxu0 %v3241_v2  ;;  %2960 = vmatprep.subr.bf16.mxu1 %v3241_v2  ;;  %v2899_v19 = vunpack.c.h.bf16 %v3486_v50 }
  0x3a   : > { %v3061_v42 = vpop.eup %3060  ;;  %1553 = vrot.lane.b32.xlu0 %v3465_v36, %s3244_s23  ;;  %v3478_v30 = vpack.c.bf16 %v995_v37, %v1070_v40  ;;  %v1034_v43 = vmul.f32 %v3059_v39, %v3379_v32  ;;  %3080 = vpow2.f32 %v2741_v22  ;;  %v3541_v37 = vadd.f32 %v3352_v13, %v564_v14 }
  0x3b   : > { %v3063_v46 = vpop.eup %3062  ;;  %v1109_v31 = vsel %vm1049_vm0, %v1033_v41, 0.0  ;;  %v997_v47 = vmul.f32 %v3061_v42, %v3382_v33  ;;  %3082 = vpow2.f32 %v2780_v27  ;;  %v1422_v27 = vrot.slane %v3465_v36, 1 }
  0x3c   : > { %v3065_v52 = vpop.eup %3064  ;;  %1529 = vrot.lane.b32.xlu1 %v3478_v30, %s3244_s23  ;;  %v3490_v32 = vpack.c.bf16 %v1034_v43, %v1109_v31  ;;  %v998_v54 = vmul.f32 %v3063_v46, %v3385_v34  ;;  %3084 = vpow2.f32 %v2744_v28  ;;  %2066 = vmatpush1.bf16.msra.mxu0 %v3014_v63  ;;  %v602_v42 = vmul.f32 %v2899_v19, %v3345_v4 }
  0x3d   : > { %v3067_v33 = vpop.eup %3066  ;;  %v1073_v57 = vsel %vm1049_vm0, %v997_v47, 0.0  ;;  %v1036_v58 = vmul.f32 %v3065_v52, %v3400_v51  ;;  %v2898_v51 = vunpack.c.l.bf16 %v3486_v50  ;;  %2969 = vmatpush1.bf16.msra.mxu1 %v3014_v63  ;;  %2067 = vmatprep.subr.bf16.mxu0 %v3241_v2  ;;  %v2874_v43 = vunpack.c.l.bf16 %v2901_v24 }
  0x3e   : > { %v3069_v5 = vpop.eup %3068  ;;  %1649 = vrot.lane.b32.xlu0 %v3490_v32, %s3245_s26  ;;  %v3506_v34 = vpack.c.bf16 %v998_v54, %v1073_v57  ;;  %v1037_v7 = vmul.f32 %v3067_v33, %v3403_v53  ;;  %2961 = vmatprep.subr.bf16.mxu1 %v3241_v2  ;;  %v2875_v48 = vunpack.c.h.bf16 %v2901_v24  ;;  %v3568_v33 = vadd.f32 %v3352_v13, %v602_v42 }
  0x3f   : > { %v3071_v9 = vpop.eup %3070  ;;  %v1112_v11 = vsel %vm1049_vm0, %v1036_v58, 0.0  ;;  %v1000_v12 = vmul.f32 %v3069_v5, %v3411_v59  ;;  %v565_v57 = vmul.f32 %v2874_v43, %v3345_v4  ;;  %v2747_v58 = vmul.f32 -1.442695, %v3541_v37  ;;  %v3017_v5 = vld [vmem:[%s4704_s3 + $0x20] sm:$0xff]  }
  0x40   : > { %v3073_v15 = vpop.eup %3072  ;;  %1625 = vrot.lane.b32.xlu1 %v3506_v34, %s3245_s26  ;;  %v1001_v53 = vmul.f32 %v3071_v9, %v3414_v60  ;;  %v3015_v60 = vld [vmem:[%s4704_s3 + $0x10] sm:$0xff]   ;;  %v3532_v21 = vpack.c.bf16 %v1037_v7, %v1112_v11  ;;  %v566_v63 = vmul.f32 %v2875_v48, %v3345_v4  ;;  %v1317_v7 = vshll.u32 %v3465_v36, 16 }
  0x41   : > { %v3075_v17 = vpop.eup %3074  ;;  %v1076_v18 = vsel %vm1049_vm0, %v1000_v12, 0.0  ;;  %v1032_v59 = vmul.f32 %v3073_v15, %v3417_v61  ;;  %v601_v61 = vmul.f32 %v2898_v51, %v3345_v4  ;;  %2068 = vmatpush1.bf16.msra.mxu0 %v3015_v60  ;;  %2970 = vmatpush1.bf16.msra.mxu1 %v3015_v60  ;;  %v487_v51 = vld [vmem:[%s3336_s17 + $0xc8] sm:$0x1]  ;;  %v3583_v11 = vmul.f32 -1.442695, %v3568_v33 }
  0x42   : > { %v3077_v20 = vpop.eup %3076  ;;  %1555 = vrot.lane.b32.xlu0 %v3490_v32, %s3244_s23  ;;  %v865_v22 = vadd.f32 1.0, %v3075_v17  ;;  %v3545_v38 = vpack.c.bf16 %v1001_v53, %v1076_v18  ;;  %2069 = vmatprep.subr.bf16.mxu0 %v3241_v2  ;;  %v3586_v12 = vadd.f32 %v3352_v13, %v565_v57  ;;  %v1386_v15 = vrot.slane %v3478_v30, 1 }
  0x43   : > { %v3079_v25 = vpop.eup %3078  ;;  %v1108_v26 = vsel %vm1060_vm1, %v1032_v59, 0.0  ;;  %v866_v35 = vadd.f32 1.0, %v3077_v20  ;;  %2962 = vmatprep.subr.bf16.mxu1 %v3241_v2  ;;  %v3565_v54 = vadd.f32 %v3352_v13, %v601_v61  ;;  %v1315_v53 = vshrl.u32 %v3465_v36, 16 }
  0x44   : > { %v3081_v28 = vpop.eup %3080  ;;  %1531 = vrot.lane.b32.xlu1 %v3506_v34, %s3244_s23  ;;  %v3547_v39 = vpack.c.bf16 %v1108_v26, %v1108_v26  ;;  %v867_v40 = vadd.f32 1.0, %v3079_v25  ;;  %3086 = vrcp.f32 %v865_v22  ;;  %v3593_v17 = vadd.f32 %v3352_v13, %v566_v63  ;;  %v3018_v22 = vld [vmem:[%s4704_s3 + $0x28] sm:$0xff]  }
  0x45   : > { %v3083_v41 = vpop.eup %3082  ;;  %3088 = vrcp.f32 %v866_v35  ;;  %v834_v29 = vadd.f32 1.0, %v3081_v28  ;;  %2070 = vmatpush1.bf16.msra.mxu0 %v3016_v45  ;;  %2971 = vmatpush1.bf16.msra.mxu1 %v3016_v45  ;;  %v2784_v9 = vmul.f32 -1.442695, %v3565_v54  ;;  %v1425_v19 = vrot.slane %v3490_v32, 1 }
  0x46   : > { %v3085_v46 = vpop.eup %3084  ;;  %1651 = vrot.lane.b32.xlu0 %v3532_v21, %s3245_s26  ;;  %v1423_v31 = vrot.slane %v3547_v39, 1  ;;  %3090 = vrcp.f32 %v867_v40  ;;  %v873_v47 = vadd.f32 1.0, %v3083_v41  ;;  %2071 = vmatprep.subr.bf16.mxu0 %v3241_v2  ;;  %v1173_v60 = vshll.u32 %v3478_v30, 16 }
  0x47   : > { %3092 = vrcp.f32 %v834_v29  ;;  %v837_v50 = vadd.f32 1.0, %v3085_v46  ;;  %2963 = vmatprep.subr.bf16.mxu1 %v3241_v2  ;;  %v541_v20 = vunpack.c.l.bf16 %v487_v51  ;;  %v1389_v24 = vrot.slane %v3506_v34, 1 }
  0x48   : > { %1627 = vrot.lane.b32.xlu1 %v3545_v38, %s3245_s26  ;;  %v3561_v52 = vsel %vm1382_vm2, %v1422_v27, %v1423_v31  ;;  %3094 = vrcp.f32 %v873_v47  ;;  %v1319_v25 = vrot.slane %v1317_v7, 1  ;;  %v1327_v26 = vshrl.u32 %v3490_v32, 16 }
  0x49   : > { %4715 = vst [vmem:[#allocation2_spill] sm:$0xff] %v3561_v52  ;;  %3096 = vrcp.f32 %v837_v50  ;;  %2072 = vmatpush1.bf16.msra.mxu0 %v3017_v5  ;;  %2972 = vmatpush1.bf16.msra.mxu1 %v3017_v5  ;;  %v1322_v40 = vshll.u32 %v3547_v39, 16  ;;  %v1329_v41 = vshll.u32 %v3490_v32, 16  ;;  %v2748_v43 = vmul.f32 -1.442695, %v3586_v12 }
  0x4a   : > { %1617 = vrot.lane.b32.xlu0 %v3561_v52, %s3246_s16  ;;  %3098 = vpow2.f32 %v2783_v23  ;;  %2073 = vmatprep.subr.bf16.mxu0 %v3241_v2  ;;  %v603_v46 = vmul.f32 %v3345_v4, %v541_v20 }
  0x4b   : > { %3100 = vpow2.f32 %v2747_v58  ;;  %2964 = vmatprep.subr.bf16.mxu1 %v3241_v2 }
  0x4c   : > { %3102 = vpow2.f32 %v2784_v9 }
  0x4d   : > { %2074 = vmatpush1.bf16.msra.mxu0 %v3018_v22  ;;  %2973 = vmatpush1.bf16.msra.mxu1 %v3018_v22  ;;  %3104 = vpow2.f32 %v3583_v11  ;;  %v1324_v11 = vrot.slane %v1322_v40, 1  ;;  %v1171_v40 = vshrl.u32 %v3478_v30, 16 }
  0x4e   : > { %v3087_v14 = vpop.eup %3086  ;;  %1523 = vrot.lane.b32.xlu0 %v3561_v52, %s3242_s9  ;;  %2075 = vmatprep.subr.bf16.mxu0 %v3241_v2 }
  0x4f   : > { %v3089_v18 = vpop.eup %3088  ;;  %v1027_v59 = vmul.f32 %v3087_v14, %v3434_v49  ;;  %v451_v49 = vld [vmem:[%s3336_s17 + $0x38] sm:$0x1]  ;;  %2965 = vmatprep.subr.bf16.mxu1 %v3241_v2 }
  0x50   : > { %v3091_v23 = vpop.eup %3090  ;;  %v1028_v61 = vmul.f32 %v3089_v18, %v3438_v55  ;;  %v505_v31 = vunpack.c.l.bf16 %v451_v49 }
  0x51   : > { %v3093_v27 = vpop.eup %3092  ;;  %v1029_v35 = vmul.f32 %v3091_v23, %v3442_v62  ;;  %v1103_v28 = vsel %vm1049_vm0, %v1027_v59, 0.0 }
  0x52   : > { %v3095_v55 = vpop.eup %3094  ;;  %v3612_v29 = vpack.c.bf16 %v1028_v61, %v1103_v28  ;;  %v996_v42 = vmul.f32 %v3093_v27, %v3446_v6  ;;  %v3019_v6 = vld [vmem:[%s4704_s3 + $0x30] sm:$0xff]   ;;  %v567_v23 = vmul.f32 %v3345_v4, %v505_v31 }
  0x53   : > { %v3097_v62 = vpop.eup %3096  ;;  %v1105_v39 = vsel %vm1060_vm1, %v1029_v35, 0.0  ;;  %v1035_v45 = vmul.f32 %v3095_v55, %v3450_v10  ;;  %2076 = vmatpush1.bf16.msra.mxu0 %v3019_v6  ;;  %2974 = vmatpush1.bf16.msra.mxu1 %v3019_v6 }
  0x54   : > { %v3099_v47 = vpop.eup %3098  ;;  %v1146_v48 = vpack.c.bf16 %v1105_v39, %v1105_v39  ;;  %v1419_v50 = vrot.slane %v3612_v29, 1  ;;  %v1072_v57 = vsel %vm1060_vm1, %v996_v42, 0.0  ;;  %v1303_v58 = vshrl.u32 %v3612_v29, 16  ;;  %2077 = vmatprep.subr.bf16.mxu0 %v3241_v2  ;;  %2966 = vmatprep.subr.bf16.mxu1 %v3241_v2 }
  0x55   : > { %v3629_v63 = vpack.c.bf16 %v1072_v57, %v1072_v57  ;;  %v1111_v10 = vsel %vm1060_vm1, %v1035_v45, 0.0  ;;  %v1305_v5 = vshll.u32 %v3612_v29, 16  ;;  %v999_v7 = vmul.f32 %v3097_v62, %v3455_v16  ;;  %v3020_v16 = vld [vmem:[%s4704_s3 + $0x38] sm:$0xff]   ;;  %v3101_v61 = vpop.eup %3100 }
  0x56   : > { %v1420_v51 = vrot.slane %v1146_v48, 1  ;;  %v1150_v9 = vpack.c.bf16 %v1111_v10, %v1111_v10  ;;  %v1310_v14 = vshll.u32 %v1146_v48, 16  ;;  %v876_v18 = vadd.f32 1.0, %v3099_v47  ;;  %v3021_v48 = vld [vmem:[%s4704_s3 + $0x40] sm:$0xff]  }
  0x57   : > { %v1387_v59 = vrot.slane %v3629_v63, 1  ;;  %v1307_v20 = vrot.slane %v1305_v5, 1  ;;  %v1075_v22 = vsel %vm1060_vm1, %v999_v7, 0.0  ;;  %v1320_v42 = vor.u32 %v1319_v25, %v1315_v53  ;;  %2078 = vmatpush1.bf16.msra.mxu0 %v3020_v16  ;;  %2975 = vmatpush1.bf16.msra.mxu1 %v3020_v16 }
  0x58   : > { %v3645_v49 = vsel %vm1382_vm2, %v1419_v50, %v1420_v51  ;;  %v1426_v27 = vrot.slane %v1150_v9, 1  ;;  %v1312_v35 = vrot.slane %v1310_v14, 1  ;;  %v3647_v28 = vpack.c.bf16 %v1075_v22, %v1075_v22  ;;  %2079 = vmatprep.subr.bf16.mxu0 %v3241_v2  ;;  %2967 = vmatprep.subr.bf16.mxu1 %v3241_v2 }
  0x59   : > { %1521 = vrot.lane.b32.xlu1 %v3645_v49, %s3242_s9  ;;  %v1308_v55 = vor.u32 %v1307_v20, %v1303_v58  ;;  %v3655_v62 = vadd.f32 %v3352_v13, %v603_v46  ;;  %v1388_v39 = vsel %vm1382_vm2, %v1386_v15, %v1387_v59  ;;  %3106 = vrcp.f32 %v876_v18  ;;  %v3103_v15 = vpop.eup %3102 }
  0x5a   : > { %v3663_v45 = vsel %vm1382_vm2, %v1425_v19, %v1426_v27  ;;  %v1390_v31 = vrot.slane %v3647_v28, 1  ;;  %v1331_v53 = vrot.slane %v1329_v41, 1  ;;  %v840_v25 = vadd.f32 1.0, %v3101_v61  ;;  %v3105_v14 = vpop.eup %3104 }
  0x5b   : > { %1619 = vrot.lane.b32.xlu0 %v3663_v45, %s3246_s16  ;;  %v3670_v46 = vadd.f32 %v3352_v13, %v567_v23  ;;  %v3674_v19 = vsel %vm1157_vm3, %v1308_v55, %v1312_v35  ;;  %v1334_v6 = vshll.u32 %v1150_v9, 16  ;;  %3108 = vpow2.f32 %v2748_v43  ;;  %2080 = vmatpush1.bf16.msra.mxu0 %v3021_v48  ;;  %v452_v35 = vld [vmem:[%s3336_s17 + $0x3c] sm:$0xff]  }
  0x5c   : > { %v2749_v47 = vmul.f32 -1.442695, %v3593_v17  ;;  %v1175_v41 = vrot.slane %v1173_v60, 1  ;;  %v1185_v2 = vshll.u32 %v3506_v34, 16  ;;  %3110 = vrcp.f32 %v840_v25  ;;  %2976 = vmatpush1.bf16.msra.mxu1 %v3021_v48  ;;  %2812 = vmatprep.mubr.msk.bf16.mxu1 %vm1689_vm4, %v3663_v45 }
  0x5d   : > { %1593 = vrot.lane.b32.xlu1 %v1388_v39, %s3246_s16  ;;  %v3688_v43 = vsel %vm1382_vm2, %v1389_v24, %v1390_v31  ;;  %v1178_v50 = vshll.u32 %v3629_v63, 16  ;;  %v2786_v57 = vmul.f32 -1.442695, %v3655_v62  ;;  %v2750_v60 = vmul.f32 -1.442695, %v3670_v46 }
  0x5e   : > { %2800 = vmatprep.mubr.msk.bf16.mxu0 %vm1689_vm4, %v3688_v43  ;;  %v3698_v58 = vsel %vm1157_vm3, %v1320_v42, %v1324_v11  ;;  %v1332_v24 = vor.u32 %v1331_v53, %v1327_v26  ;;  %v1336_v63 = vrot.slane %v1334_v6, 1  ;;  %3112 = vpow2.f32 %v2749_v47 }
  0x5f   : > { %1489 = vrot.lane.b32.xlu0 %v3674_v19, %s3243_s10  ;;  %4716 = vst [vmem:[#allocation3_spill] sm:$0xff] %v3698_v58  ;;  %v1176_v10 = vor.u32 %v1175_v41, %v1171_v40  ;;  %v1183_v5 = vshrl.u32 %v3506_v34, 16  ;;  %v1180_v7 = vrot.slane %v1178_v50, 1  ;;  %v1187_v51 = vrot.slane %v1185_v2, 1  ;;  %v454_v41 = vld [vmem:[%s3336_s17 + $0x44] sm:$0x1] }
  0x60   : > { %v1190_v9 = vshll.u32 %v3647_v28, 16  ;;  %3114 = vpow2.f32 %v2786_v57  ;;  %v3710_v18 = vsel %vm1157_vm3, %v1332_v24, %v1336_v63  ;;  %v1341_v59 = vshll.u32 %v3532_v21, 16 }
  0x61   : > { %1499 = vrot.lane.b32.xlu1 %v1388_v39, %s3242_s9  ;;  %3116 = vpow2.f32 %v2750_v60  ;;  %v877_v20 = vadd.f32 1.0, %v3103_v15  ;;  %v1181_v16 = vsel %vm1157_vm3, %v1176_v10, %v1180_v7  ;;  %v1188_v61 = vor.u32 %v1187_v51, %v1183_v5 }
  0x62   : > { %v1192_v27 = vrot.slane %v1190_v9, 1  ;;  %v1339_v42 = vshrl.u32 %v3532_v21, 16  ;;  %v878_v39 = vadd.f32 1.0, %v3105_v14  ;;  %v1197_v53 = vshll.u32 %v3545_v38, 16 }
  0x63   : > { %1585 = vrot.lane.b32.xlu0 %v3698_v58, %s3247_s18  ;;  %v3107_v26 = vpop.eup %3106  ;;  %3118 = vrcp.f32 %v877_v20  ;;  %v506_v25 = vunpack.c.l.bf16 %v452_v35  ;;  %v507_v60 = vunpack.c.h.bf16 %v452_v35  ;;  %v508_v7 = vunpack.c.l.bf16 %v454_v41 }
  0x64   : > { %v1038_v22 = vmul.f32 %v3107_v26, %v3510_v8  ;;  %v1343_v8 = vrot.slane %v1341_v59, 1  ;;  %v3729_v6 = vsel %vm1157_vm3, %v1188_v61, %v1192_v27  ;;  %3120 = vrcp.f32 %v878_v39 }
  0x65   : > { %1595 = vrot.lane.b32.xlu1 %v3688_v43, %s3246_s16  ;;  %v3109_v23 = vpop.eup %3108  ;;  %v568_v5 = vmul.f32 %v3345_v4, %v506_v25  ;;  %v1195_v51 = vshrl.u32 %v3545_v38, 16  ;;  %v1199_v9 = vrot.slane %v1197_v53, 1  ;;  %v569_v20 = vmul.f32 %v3345_v4, %v507_v60 }
  0x66   : > { %v3111_v28 = vpop.eup %3110  ;;  %v1114_v55 = vsel %vm1060_vm1, %v1038_v22, 0.0  ;;  %v841_v40 = vadd.f32 1.0, %v3109_v23  ;;  %v1344_v50 = vor.u32 %v1343_v8, %v1339_v42  ;;  %v2902_v22 = vld [vmem:[%s3336_s17 + $0x48] sm:$0xff]   ;;  %v570_v61 = vmul.f32 %v3345_v4, %v508_v7  ;;  %v457_v42 = vld [vmem:[%s3336_s17 + $0x50] sm:$0x1] }
  0x67   : > { %1681 = vrot.lane.b32.xlu0 %v3710_v18, %s3248_s19  ;;  %v3723_v31 = vpack.c.bf16 %v1114_v55, %v1114_v55  ;;  %v1002_v11 = vmul.f32 %v3111_v28, %v3541_v37  ;;  %v3753_v23 = vadd.f32 %v3352_v13, %v568_v5  ;;  %v1200_v35 = vor.u32 %v1199_v9, %v1195_v51 }
  0x68   : > { %v3113_v15 = vpop.eup %3112  ;;  %3122 = vrcp.f32 %v841_v40  ;;  %v2878_v55 = vunpack.c.l.bf16 %v2902_v22  ;;  %v3760_v39 = vadd.f32 %v3352_v13, %v569_v20  ;;  %v3767_v53 = vadd.f32 %v3352_v13, %v570_v61 }
  0x69   : > { %1561 = vrot.lane.b32.xlu1 %v1181_v16, %s3247_s18  ;;  %v1346_v47 = vshll.u32 %v3723_v31, 16  ;;  %v1078_v48 = vsel %vm1060_vm1, %v1002_v11, 0.0  ;;  %v842_v63 = vadd.f32 1.0, %v3113_v15  ;;  %v2751_v11 = vmul.f32 -1.442695, %v3753_v23 }
  0x6a   : > { %v3737_v37 = vpack.c.bf16 %v1078_v48, %v1078_v48  ;;  %v3115_v2 = vpop.eup %3114  ;;  %v2879_v25 = vunpack.c.h.bf16 %v2902_v22  ;;  %v571_v48 = vmul.f32 %v2878_v55, %v3345_v4 }
  0x6b   : > { %1491 = vrot.lane.b32.xlu0 %v3698_v58, %s3243_s10  ;;  %v1348_v57 = vrot.slane %v1346_v47, 1  ;;  %v3117_v24 = vpop.eup %3116  ;;  %v879_v10 = vadd.f32 1.0, %v3115_v2  ;;  %v511_v47 = vunpack.c.l.bf16 %v457_v42 }
  0x6c   : > { %v1202_v14 = vshll.u32 %v3737_v37, 16  ;;  %v843_v26 = vadd.f32 1.0, %v3117_v24  ;;  %v572_v60 = vmul.f32 %v2879_v25, %v3345_v4 }
  0x6d   : > { %1657 = vrot.lane.b32.xlu1 %v3729_v6, %s3248_s19  ;;  %3124 = vrcp.f32 %v879_v10  ;;  %v3747_v59 = vsel %vm1157_vm3, %v1344_v50, %v1348_v57  ;;  %v3119_v27 = vpop.eup %3118  ;;  %v2753_v57 = vmul.f32 -1.442695, %v3767_v53  ;;  %v573_v24 = vmul.f32 %v3345_v4, %v511_v47 }
  0x6e   : > { %3126 = vrcp.f32 %v842_v63  ;;  %v1204_v28 = vrot.slane %v1202_v14, 1  ;;  %v3121_v8 = vpop.eup %3120  ;;  %v3789_v10 = vadd.f32 %v3352_v13, %v571_v48  ;;  %v1428_v14 = vrot.slane %v3532_v21, 1 }
  0x6f   : > { %1587 = vrot.lane.b32.xlu0 %v3710_v18, %s3247_s18  ;;  %3128 = vrcp.f32 %v843_v26  ;;  %v1040_v41 = vmul.f32 %v3121_v8, %v3568_v33  ;;  %v1429_v26 = vrot.slane %v3723_v31, 1  ;;  %v1392_v8 = vrot.slane %v3545_v38, 1 }
  0x70   : > { %v3770_v15 = vsel %vm1157_vm3, %v1200_v35, %v1204_v28  ;;  %3130 = vpow2.f32 %v2751_v11  ;;  %v2754_v9 = vmul.f32 -1.442695, %v3789_v10 }
  0x71   : > { %1467 = vrot.lane.b32.xlu1 %v1181_v16, %s3243_s10  ;;  %v1039_v16 = vmul.f32 %v3119_v27, %v3565_v54  ;;  %v2752_v54 = vmul.f32 -1.442695, %v3760_v39  ;;  %v3827_v28 = vsel %vm1382_vm2, %v1428_v14, %v1429_v26  ;;  %v2903_v14 = vld [vmem:[%s3336_s17 + $0x60] sm:$0xff]  }
  0x72   : > { %v3123_v40 = vpop.eup %3122 }
  0x73   : > { %1683 = vrot.lane.b32.xlu0 %v3747_v59, %s3248_s19  ;;  %v1115_v50 = vsel %vm1049_vm0, %v1039_v16, 0.0  ;;  %v1003_v33 = vmul.f32 %v3123_v40, %v3586_v12  ;;  %3132 = vpow2.f32 %v2752_v54  ;;  %v1393_v16 = vrot.slane %v3737_v37, 1  ;;  %v460_v40 = vld [vmem:[%s3336_s17 + $0x5c] sm:$0x1]  ;;  %v3842_v54 = vld [vmem:[%s3331_s14] ss:$0 sm:$0xff] }
  0x74   : > { %v3791_v7 = vpack.c.bf16 %v1040_v41, %v1115_v50  ;;  %3134 = vpow2.f32 %v2753_v57 }
  0x75   : > { %1563 = vrot.lane.b32.xlu1 %v3729_v6, %s3247_s18  ;;  %v1079_v51 = vsel %vm1049_vm0, %v1003_v33, 0.0  ;;  %3136 = vpow2.f32 %v2754_v9 }
  0x77   : > { %1493 = vrot.lane.b32.xlu0 %v3710_v18, %s3243_s10  ;;  %v3125_v2 = vpop.eup %3124 }
  0x78   : > { %v1041_v18 = vmul.f32 %v3125_v2, %v3655_v62  ;;  %v3127_v63 = vpop.eup %3126  ;;  %v3798_v62 = vadd.f32 %v3352_v13, %v572_v60  ;;  %v3848_v60 = vsel %vm1382_vm2, %v1392_v8, %v1393_v16  ;;  %v2883_v16 = vunpack.c.h.bf16 %v2903_v14 }
  0x79   : > { %1659 = vrot.lane.b32.xlu1 %v3770_v15, %s3248_s19  ;;  %v3129_v5 = vpop.eup %3128  ;;  %v1004_v12 = vmul.f32 %v3127_v63, %v3593_v17  ;;  %v1434_v17 = vshll.u32 %v3791_v7, 16  ;;  %v514_v63 = vunpack.c.l.bf16 %v460_v40 }
  0x7a   : > { %v1117_v4 = vsel %vm1060_vm1, %v1041_v18, 0.0  ;;  %v2755_v22 = vmul.f32 -1.442695, %v3798_v62  ;;  %v3131_v27 = vpop.eup %3130 }
  0x7b   : > { %1525 = vrot.lane.b32.xlu0 %v3663_v45, %s3242_s9  ;;  %v3802_v45 = vadd.f32 %v3352_v13, %v573_v24  ;;  %v3812_v20 = vpack.c.bf16 %v1117_v4, %v1117_v4  ;;  %v458_v13 = vld [vmem:[%s3336_s17 + $0x54] sm:$0xff]   ;;  %v3819_v61 = vpack.c.bf16 %v1004_v12, %v1079_v51  ;;  %v1436_v55 = vrot.slane %v1434_v17, 1  ;;  %v3855_v12 = vld [vmem:[%s3342_s20] ss:$0 sm:$0xff] }
  0x7c   : > { %v512_v35 = vunpack.c.l.bf16 %v458_v13  ;;  %3138 = vpow2.f32 %v2755_v22  ;;  %v844_v48 = vadd.f32 1.0, %v3131_v27  ;;  %v513_v57 = vunpack.c.h.bf16 %v458_v13 }
  0x7d   : > { %1469 = vrot.lane.b32.xlu1 %v3729_v6, %s3243_s10  ;;  %v1005_v6 = vmul.f32 %v3129_v5, %v3670_v46  ;;  %4717 = vst [vmem:[#allocation4_spill] sm:$0xff] %v3819_v61  ;;  %v2756_v46 = vmul.f32 -1.442695, %v3802_v45  ;;  %v1439_v42 = vshll.u32 %v3812_v20, 16  ;;  %v3133_v11 = vpop.eup %3132  ;;  %v1209_v47 = vshll.u32 %v3819_v61, 16 }
  0x7e   : > { %v3135_v41 = vpop.eup %3134  ;;  %v574_v2 = vmul.f32 %v3842_v54, %v512_v35  ;;  %v1207_v18 = vshrl.u32 %v3819_v61, 16  ;;  %v845_v24 = vadd.f32 1.0, %v3133_v11  ;;  %v575_v9 = vmul.f32 %v3842_v54, %v513_v57  ;;  %v463_v35 = vld [vmem:[%s3336_s17 + $0x68] sm:$0x1] }
  0x7f   : > { %1557 = vrot.lane.b32.xlu0 %v3532_v21, %s3244_s23  ;;  %v1081_v31 = vsel %vm1060_vm1, %v1005_v6, 0.0  ;;  %3140 = vpow2.f32 %v2756_v46  ;;  %v1441_v37 = vrot.slane %v1439_v42, 1  ;;  %v1211_v33 = vrot.slane %v1209_v47, 1  ;;  %v3137_v26 = vpop.eup %3136 }
  0x80   : > { %v3835_v25 = vpack.c.bf16 %v1081_v31, %v1081_v31  ;;  %3142 = vrcp.f32 %v844_v48  ;;  %v846_v4 = vadd.f32 1.0, %v3135_v41  ;;  %v3858_v51 = vadd.f32 %v3855_v12, %v574_v2 }
  0x81   : > { %1501 = vrot.lane.b32.xlu1 %v3688_v43, %s3242_s9  ;;  %v1432_v43 = vshrl.u32 %v3791_v7, 16  ;;  %3144 = vrcp.f32 %v845_v24  ;;  %v576_v17 = vmul.f32 %v3842_v54, %v514_v63  ;;  %v1212_v13 = vor.u32 %v1211_v33, %v1207_v18 }
  0x82   : > { %v1214_v5 = vshll.u32 %v3835_v25, 16  ;;  %3146 = vrcp.f32 %v846_v4  ;;  %v2757_v27 = vmul.f32 -1.442695, %v3858_v51  ;;  %v2882_v31 = vunpack.c.l.bf16 %v2903_v14 }
  0x83   : > { %1589 = vrot.lane.b32.xlu0 %v3747_v59, %s3247_s18  ;;  %v1437_v50 = vor.u32 %v1436_v55, %v1432_v43  ;;  %v847_v55 = vadd.f32 1.0, %v3137_v26  ;;  %v3870_v42 = vadd.f32 %v3855_v12, %v575_v9  ;;  %v3875_v8 = vadd.f32 %v3855_v12, %v576_v17 }
  0x84   : > { %v1216_v22 = vrot.slane %v1214_v5, 1  ;;  %v517_v48 = vunpack.c.l.bf16 %v463_v35  ;;  %3148 = vpow2.f32 %v2757_v27  ;;  %v577_v41 = vmul.f32 %v3842_v54, %v2882_v31 }
  0x85   : > { %1533 = vrot.lane.b32.xlu1 %v3545_v38, %s3244_s23  ;;  %v1442_v6 = vsel %vm1157_vm3, %v1437_v50, %v1441_v37  ;;  %3150 = vrcp.f32 %v847_v55  ;;  %v2758_v50 = vmul.f32 -1.442695, %v3870_v42  ;;  %v2759_v37 = vmul.f32 -1.442695, %v3875_v8 }
  0x86   : > { %v3139_v46 = vpop.eup %3138  ;;  %v3878_v11 = vsel %vm1157_vm3, %v1212_v13, %v1216_v22  ;;  %v578_v57 = vmul.f32 %v3842_v54, %v2883_v16  ;;  %v579_v18 = vmul.f32 %v3842_v54, %v517_v48  ;;  %v3893_v63 = vadd.f32 %v3855_v12, %v577_v41  ;;  %v464_v22 = vld [vmem:[%s3336_s17 + $0x6c] sm:$0xff]   ;;  %v466_v16 = vld [vmem:[%s3336_s17 + $0x74] sm:$0x1] }
  0x87   : > { %1621 = vrot.lane.b32.xlu0 %v3827_v28, %s3246_s16  ;;  %v848_v47 = vadd.f32 1.0, %v3139_v46  ;;  %v1446_v17 = vrot.slane %v3812_v20, 1  ;;  %v519_v55 = vunpack.c.h.bf16 %v464_v22  ;;  %v1395_v48 = vrot.slane %v3819_v61, 1 }
  0x88   : > { %v3898_v5 = vadd.f32 %v3855_v12, %v578_v57  ;;  %v3902_v9 = vadd.f32 %v3855_v12, %v579_v18  ;;  %v2760_v26 = vmul.f32 -1.442695, %v3893_v63  ;;  %v520_v57 = vunpack.c.l.bf16 %v466_v16 }
  0x89   : > { %1565 = vrot.lane.b32.xlu1 %v3770_v15, %s3247_s18  ;;  %v3141_v43 = vpop.eup %3140  ;;  %3152 = vrcp.f32 %v848_v47 }
  0x8a   : > { %v849_v40 = vadd.f32 1.0, %v3141_v43  ;;  %v3143_v2 = vpop.eup %3142  ;;  %v2762_v31 = vmul.f32 -1.442695, %v3902_v9  ;;  %v518_v43 = vunpack.c.l.bf16 %v464_v22 }
  0x8b   : > { %1653 = vrot.lane.b32.xlu0 %v3791_v7, %s3245_s26  ;;  %v3145_v24 = vpop.eup %3144 }
  0x8c   : > { %3154 = vrcp.f32 %v849_v40  ;;  %v3147_v33 = vpop.eup %3146  ;;  %v1007_v4 = vmul.f32 %v3145_v24, %v3760_v39  ;;  %v2761_v39 = vmul.f32 -1.442695, %v3898_v5 }
  0x8d   : > { %1597 = vrot.lane.b32.xlu1 %v3848_v60, %s3246_s16  ;;  %3156 = vpow2.f32 %v2758_v50  ;;  %v1008_v14 = vmul.f32 %v3147_v33, %v3767_v53 }
  0x8e   : > { %3158 = vpow2.f32 %v2759_v37  ;;  %v3149_v13 = vpop.eup %3148 }
  0x8f   : > { %1685 = vrot.lane.b32.xlu0 %v1442_v6, %s3248_s19  ;;  %v3151_v46 = vpop.eup %3150  ;;  %v1084_v53 = vsel %vm1060_vm1, %v1008_v14, 0.0  ;;  %3160 = vpow2.f32 %v2760_v26  ;;  %v850_v35 = vadd.f32 1.0, %v3149_v13  ;;  %v3949_v26 = vpop.permute.xlu0 %1465  ;;  %v2904_v13 = vld [vmem:[%s3336_s17 + $0x78] sm:$0xff]  }
  0x90   : > { %v1009_v40 = vmul.f32 %v3151_v46, %v3789_v10  ;;  %3162 = vpow2.f32 %v2761_v39  ;;  %v581_v10 = vmul.f32 %v3842_v54, %v519_v55  ;;  %v3959_v39 = vld [vmem:[%s4707_s6] sm:$0xf]  ;;  %v582_v46 = vmul.f32 %v3842_v54, %v520_v57 }
  0x91   : > { %1629 = vrot.lane.b32.xlu1 %v3819_v61, %s3245_s26  ;;  %3164 = vpow2.f32 %v2762_v31  ;;  %2977 = vmatprep.subr.msk.bf16.mxu1 %vm2330_vm5, %v3959_v39 }
  0x92   : > { %3166 = vrcp.f32 %v850_v35 }
  0x93   : > { %1495 = vrot.lane.b32.xlu0 %v3747_v59, %s3243_s10  ;;  %v1006_v59 = vmul.f32 %v3143_v2, %v3753_v23  ;;  %v3931_v2 = vpack.c.bf16 %v1084_v53, %v1084_v53 }
  0x95   : > { %1661 = vrot.lane.b32.xlu1 %v3878_v11, %s3248_s19  ;;  %v1082_v23 = vsel %vm1049_vm0, %v1006_v59, 0.0  ;;  %v1085_v59 = vsel %vm1049_vm0, %v1009_v40, 0.0  ;;  %v1226_v14 = vshll.u32 %v3931_v2, 16  ;;  %v469_v40 = vld [vmem:[%s3336_s17 + $0x80] sm:$0x1] }
  0x96   : > { %v3916_v27 = vpack.c.bf16 %v1007_v4, %v1082_v23 }
  0x97   : > { %1527 = vrot.lane.b32.xlu0 %v3827_v28, %s3242_s9  ;;  %v1228_v53 = vrot.slane %v1226_v14, 1 }
  0x98   : > { %4718 = vst [vmem:[#allocation5_spill] sm:$0xff] %v3916_v27  ;;  %v1221_v50 = vshll.u32 %v3916_v27, 16 }
  0x99   : > { %1471 = vrot.lane.b32.xlu1 %v3770_v15, %s3243_s10  ;;  %v1445_v15 = vrot.slane %v3791_v7, 1 }
  0x9a   : > { %v1223_v23 = vrot.slane %v1221_v50, 1 }
  0x9b   : > { %1559 = vrot.lane.b32.xlu0 %v3791_v7, %s3244_s23  ;;  %v3153_v7 = vpop.eup %3152  ;;  %v3923_v20 = vsel %vm1382_vm2, %v1445_v15, %v1446_v17 }
  0x9c   : > { %v3155_v47 = vpop.eup %3154  ;;  %v1010_v18 = vmul.f32 %v3153_v7, %v3798_v62  ;;  %v1219_v62 = vshrl.u32 %v3916_v27, 16  ;;  %v3972_v7 = vadd.f32 %v3855_v12, %v581_v10 }
  0x9d   : > { %1503 = vrot.lane.b32.xlu1 %v3848_v60, %s3242_s9  ;;  %v3157_v41 = vpop.eup %3156  ;;  %v1011_v33 = vmul.f32 %v3155_v47, %v3802_v45 }
  0x9e   : > { %v3159_v37 = vpop.eup %3158  ;;  %v851_v4 = vadd.f32 1.0, %v3157_v41  ;;  %v3953_v17 = vpack.c.bf16 %v1010_v18, %v1085_v59  ;;  %v1224_v31 = vor.u32 %v1223_v23, %v1219_v62  ;;  %v3984_v41 = vpop.permute.xlu1 %1497  ;;  %v2764_v59 = vmul.f32 -1.442695, %v3972_v7 }
  0x9f   : > { %1591 = vrot.lane.b32.xlu0 %v1442_v6, %s3247_s18  ;;  %v1396_v6 = vrot.slane %v3835_v25, 1  ;;  %v580_v25 = vmul.f32 %v3842_v54, %v518_v43  ;;  %v852_v15 = vadd.f32 1.0, %v3159_v37  ;;  %v3161_v45 = vpop.eup %3160  ;;  %v1087_v22 = vsel %vm1060_vm1, %v1011_v33, 0.0 }
  0xa0   : > { %4719 = vst [vmem:[#allocation6_spill] sm:$0xff] %v3953_v17  ;;  %3168 = vrcp.f32 %v851_v4  ;;  %v3163_v35 = vpop.eup %3162  ;;  %v2886_v43 = vunpack.c.l.bf16 %v2904_v13  ;;  %v3978_v47 = vpack.c.bf16 %v1087_v22, %v1087_v22  ;;  %v3988_v37 = vadd.f32 %v3855_v12, %v582_v46 }
  0xa1   : > { %1535 = vrot.lane.b32.xlu1 %v3819_v61, %s3244_s23  ;;  %v3942_v24 = vsel %vm1382_vm2, %v1395_v48, %v1396_v6  ;;  %3170 = vrcp.f32 %v852_v15  ;;  %v3165_v55 = vpop.eup %3164  ;;  %v1233_v48 = vshll.u32 %v3953_v17, 16  ;;  %v853_v6 = vadd.f32 1.0, %v3161_v45 }
  0xa2   : > { %v3167_v57 = vpop.eup %3166  ;;  %v3991_v18 = vsel %vm1157_vm3, %v1224_v31, %v1228_v53  ;;  %v854_v10 = vadd.f32 1.0, %v3163_v35  ;;  %v1399_v33 = vrot.slane %v3931_v2, 1  ;;  %v855_v4 = vadd.f32 1.0, %v3165_v55 }
  0xa3   : > { %1623 = vrot.lane.b32.xlu0 %v3923_v20, %s3246_s16  ;;  %v583_v62 = vmul.f32 %v3842_v54, %v2886_v43  ;;  %v523_v23 = vunpack.c.l.bf16 %v469_v40  ;;  %v1231_v15 = vshrl.u32 %v3953_v17, 16  ;;  %v1238_v45 = vshll.u32 %v3978_v47, 16 }
  0xa4   : > { %3172 = vrcp.f32 %v853_v6  ;;  %v1012_v31 = vmul.f32 %v3167_v57, %v3858_v51 }
  0xa5   : > { %1567 = vrot.lane.b32.xlu1 %v3878_v11, %s3247_s18  ;;  %v4013_v53 = vadd.f32 %v3855_v12, %v583_v62  ;;  %v585_v35 = vmul.f32 %v3842_v54, %v523_v23  ;;  %v1240_v6 = vrot.slane %v1238_v45, 1 }
  0xa7   : > { %1655 = vrot.lane.b32.xlu0 %v3240_v0, %s3245_s26  ;;  %v3966_v0 = vadd.f32 %v3855_v12, %v580_v25  ;;  %v1398_v25 = vrot.slane %v3916_v27, 1 }
  0xa9   : > { %1599 = vrot.lane.b32.xlu1 %v3942_v24, %s3246_s16  ;;  %v2763_v50 = vmul.f32 -1.442695, %v3966_v0  ;;  %v4017_v55 = vsel %vm1382_vm2, %v1398_v25, %v1399_v33  ;;  %v2766_v25 = vmul.f32 -1.442695, %v4013_v53 }
  0xaa   : > { %v3169_v22 = vpop.eup %3168 }
  0xab   : > { %1687 = vrot.lane.b32.xlu0 %v3316_v3, %s3248_s19  ;;  %v2887_v3 = vunpack.c.h.bf16 %v2904_v13  ;;  %v1235_v13 = vrot.slane %v1233_v48, 1  ;;  %3174 = vpow2.f32 %v2763_v50  ;;  %v3171_v43 = vpop.eup %3170  ;;  %v1013_v51 = vmul.f32 %v3169_v22, %v3870_v42  ;;  %v470_v42 = vld [vmem:[%s3336_s17 + $0x84] sm:$0xff]  }
  0xac   : > { %v3976_v16 = vpop.permute.xlu0 %1553  ;;  %3176 = vrcp.f32 %v854_v10  ;;  %v1014_v57 = vmul.f32 %v3171_v43, %v3875_v8  ;;  %v4034_v10 = vadd.f32 %v3855_v12, %v585_v35 }
  0xad   : > { %1631 = vrot.lane.b32.xlu1 %v3916_v27, %s3245_s26  ;;  %v584_v2 = vmul.f32 %v3842_v54, %v2887_v3  ;;  %3178 = vrcp.f32 %v855_v4  ;;  %v1236_v48 = vor.u32 %v1235_v13, %v1231_v15  ;;  %v1088_v3 = vsel %vm1049_vm0, %v1012_v31, 0.0  ;;  %v472_v4 = vld [vmem:[%s3336_s17 + $0x8c] sm:$0x1]  ;;  %s2979_s17 = smul.u32 432, %s4730_s27 }
  0xae   : > { %v4009_v46 = vpop.permute.xlu1 %1529  ;;  %3180 = vpow2.f32 %v2764_v59  ;;  %v3173_v62 = vpop.eup %3172  ;;  %v4045_v23 = vpack.c.bf16 %v1013_v51, %v1088_v3  ;;  %v1090_v45 = vsel %vm1060_vm1, %v1014_v57, 0.0  ;;  %v525_v31 = vunpack.c.h.bf16 %v470_v42 }
  0xaf   : > { %1473 = vrot.lane.b32.xlu0 %v3878_v11, %s3243_s10  ;;  %v2765_v11 = vmul.f32 -1.442695, %v3988_v37  ;;  %v4025_v50 = vadd.f32 %v3855_v12, %v584_v2  ;;  %v4037_v59 = vsel %vm1157_vm3, %v1236_v48, %v1240_v6  ;;  %v524_v2 = vunpack.c.l.bf16 %v470_v42  ;;  %s4344_s24 = scalar_lea.vmem %s4706_s5, %s2979_s17 }
  0xb0   : > { %v3999_v14 = vpop.permute.xlu0 %1649  ;;  %v526_v35 = vunpack.c.l.bf16 %v472_v4  ;;  %v1015_v48 = vmul.f32 %v3173_v62, %v3893_v63  ;;  %v4058_v51 = vpack.c.bf16 %v1090_v45, %v1090_v45  ;;  %v1245_v3 = vshll.u32 %v4045_v23, 16 }
  0xb1   : > { %1663 = vrot.lane.b32.xlu1 %v3991_v18, %s3248_s19  ;;  %3182 = vpow2.f32 %v2765_v11  ;;  %v2767_v8 = vmul.f32 -1.442695, %v4025_v50  ;;  %v2768_v11 = vmul.f32 -1.442695, %v4034_v10  ;;  %v1401_v42 = vrot.slane %v3953_v17, 1 }
  0xb2   : > { %v4042_v33 = vpop.permute.xlu1 %1625  ;;  %3184 = vpow2.f32 %v2766_v25  ;;  %v586_v4 = vmul.f32 %v3842_v54, %v524_v2  ;;  %v1402_v63 = vrot.slane %v3978_v47, 1  ;;  %v587_v45 = vmul.f32 %v3842_v54, %v525_v31 }
  0xb3   : > { %1537 = vrot.lane.b32.xlu0 %v3916_v27, %s3244_s23  ;;  %3186 = vpow2.f32 %v2767_v8  ;;  %v1243_v27 = vshrl.u32 %v4045_v23, 16  ;;  %v1247_v47 = vrot.slane %v1245_v3, 1 }
  0xb4   : > { %v4021_v40 = vpop.permute.xlu0 %1555  ;;  %3188 = vpow2.f32 %v2768_v11  ;;  %v1091_v11 = vsel %vm1049_vm0, %v1015_v48, 0.0 }
  0xb5   : > { %1505 = vrot.lane.b32.xlu1 %v3942_v24, %s3242_s9  ;;  %v3175_v15 = vpop.eup %3174  ;;  %v1248_v48 = vor.u32 %v1247_v47, %v1243_v27  ;;  %v1405_v47 = vrot.slane %v4058_v51, 1 }
  0xb6   : > { %v3177_v22 = vpop.eup %3176  ;;  %v856_v52 = vadd.f32 1.0, %v3175_v15  ;;  %v4061_v25 = vpop.permute.xlu1 %1531  ;;  %v588_v15 = vmul.f32 %v3842_v54, %v526_v35  ;;  %v4083_v54 = vadd.f32 %v3855_v12, %v586_v4 }
  0xb7   : > { %1601 = vrot.lane.b32.xlu0 %v4017_v55, %s3246_s16  ;;  %v3179_v43 = vpop.eup %3178  ;;  %v1016_v62 = vmul.f32 %v3177_v22, %v3898_v5  ;;  %v1250_v5 = vshll.u32 %v4058_v51, 16 }
  0xb8   : > { %v4050_v13 = vpop.permute.xlu0 %1651  ;;  %v3181_v6 = vpop.eup %3180  ;;  %v1017_v2 = vmul.f32 %v3179_v43, %v3902_v9  ;;  %3190 = vrcp.f32 %v856_v52  ;;  %v4092_v9 = vsel %vm1382_vm2, %v1401_v42, %v1402_v63  ;;  %v4097_v43 = vadd.f32 %v3855_v12, %v587_v45 }
  0xb9   : > { %1569 = vrot.lane.b32.xlu1 %v3991_v18, %s3247_s18  ;;  %v857_v61 = vadd.f32 1.0, %v3181_v6  ;;  %v1252_v6 = vrot.slane %v1250_v5, 1  ;;  %v4100_v3 = vadd.f32 %v3855_v12, %v588_v15  ;;  %v2769_v42 = vmul.f32 -1.442695, %v4083_v54 }
  0xba   : > { %v4089_v35 = vpop.permute.xlu1 %1627  ;;  %v1093_v52 = vsel %vm1060_vm1, %v1017_v2, 0.0  ;;  %v2770_v12 = vmul.f32 -1.442695, %v4097_v43  ;;  %v1404_v15 = vrot.slane %v4045_v23, 1 }
  0xbb   : > { %1665 = vrot.lane.b32.xlu0 %v4037_v59, %s3248_s19  ;;  %v3183_v57 = vpop.eup %3182  ;;  %3192 = vrcp.f32 %v857_v61  ;;  %v4107_v63 = vpack.c.bf16 %v1093_v52, %v1093_v52  ;;  %v4114_v27 = vsel %vm1157_vm3, %v1248_v48, %v1252_v6 }
  0xbc   : > { %v4073_v8 = vpop.permute.xlu0 %1617  ;;  %v858_v22 = vadd.f32 1.0, %v3183_v57  ;;  %v3185_v31 = vpop.eup %3184 }
  0xbd   : > { %1633 = vrot.lane.b32.xlu1 %v3953_v17, %s3245_s26  ;;  %v3187_v4 = vpop.eup %3186 }
  0xbe   : > { %3194 = vrcp.f32 %v858_v22  ;;  %v3189_v45 = vpop.eup %3188  ;;  %v860_v22 = vadd.f32 1.0, %v3187_v4  ;;  %v4133_v4 = vsel %vm1382_vm2, %v1404_v15, %v1405_v47 }
  0xbf   : > { %1507 = vrot.lane.b32.xlu0 %v4017_v55, %s3242_s9  ;;  %3196 = vpow2.f32 %v2769_v42  ;;  %v861_v48 = vadd.f32 1.0, %v3189_v45 }
  0xc0   : > { %v4104_v57 = vpop.permute.xlu0 %1523 }
  0xc1   : > { %1475 = vrot.lane.b32.xlu1 %v3991_v18, %s3243_s10  ;;  %v4085_v18 = vpack.c.bf16 %v1016_v62, %v1091_v11  ;;  %v859_v62 = vadd.f32 1.0, %v3185_v31  ;;  %v2771_v11 = vmul.f32 -1.442695, %v4100_v3 }
  0xc2   : > { %v3191_v31 = vpop.eup %3190 }
  0xc3   : > { %1571 = vrot.lane.b32.xlu0 %v4037_v59, %s3247_s18  ;;  %v1257_v61 = vshll.u32 %v4085_v18, 16  ;;  %v1255_v5 = vshrl.u32 %v4085_v18, 16  ;;  %3198 = vrcp.f32 %v859_v62  ;;  %v1018_v51 = vmul.f32 %v3191_v31, %v3966_v0 }
  0xc4   : > { %3200 = vpow2.f32 %v2770_v12 }
  0xc5   : > { %1539 = vrot.lane.b32.xlu1 %v3953_v17, %s3244_s23  ;;  %v1259_v52 = vrot.slane %v1257_v61, 1  ;;  %v1262_v17 = vshll.u32 %v4107_v63, 16  ;;  %3202 = vpow2.f32 %v2771_v11 }
  0xc6   : > { %3204 = vrcp.f32 %v860_v22 }
  0xc7   : > { %1635 = vrot.lane.b32.xlu0 %v4045_v23, %s3245_s26  ;;  %v1260_v61 = vor.u32 %v1259_v52, %v1255_v5  ;;  %v1264_v62 = vrot.slane %v1262_v17, 1  ;;  %3206 = vrcp.f32 %v861_v48  ;;  %v1094_v17 = vsel %vm1049_vm0, %v1018_v51, 0.0 }
  0xc9   : > { %1603 = vrot.lane.b32.xlu1 %v4092_v9, %s3246_s16  ;;  %v4151_v5 = vsel %vm1157_vm3, %v1260_v61, %v1264_v62 }
  0xcb   : > { %v1522_v2 = vpop.permute.xlu1 %1521  ;;  %1477 = vrot.lane.b32.xlu0 %v4037_v59, %s3243_s10  ;;  %v3193_v59 = vpop.eup %3192 }
  0xcc   : > { %v3195_v42 = vpop.eup %3194  ;;  %v1019_v11 = vmul.f32 %v3193_v59, %v3972_v7 }
  0xcd   : > { %1667 = vrot.lane.b32.xlu1 %v4114_v27, %s3248_s19  ;;  %v4125_v6 = vpop.permute.xlu0 %1619  ;;  %v1020_v15 = vmul.f32 %v3195_v42, %v3988_v37  ;;  %v3197_v7 = vpop.eup %3196  ;;  %v1691_v37 = vsel %vm1689_vm4, 0.0|0.0, %v3949_v26 }
  0xce   : > { %v3199_v31 = vpop.eup %3198  ;;  %v4156_v48 = vpack.c.bf16 %v1019_v11, %v1094_v17  ;;  %v1724_v17 = vsel %vm1722_vm6, %v1691_v37, %v3984_v41 }
  0xcf   : > { %v4127_v58 = vpop.permute.xlu1 %1593  ;;  %1541 = vrot.lane.b32.xlu0 %v4045_v23, %s3244_s23  ;;  %v3201_v59 = vpop.eup %3200  ;;  %v1096_v42 = vsel %vm1060_vm1, %v1020_v15, 0.0  ;;  %v1021_v11 = vmul.f32 %v3199_v31, %v4013_v53  ;;  %v1408_v53 = vrot.slane %v4107_v63, 1 }
  0xd0   : > { %v3203_v61 = vpop.eup %3202  ;;  %v863_v31 = vadd.f32 1.0, %v3201_v59  ;;  %v1267_v63 = vshrl.u32 %v4156_v48, 16 }
  0xd1   : > { %1509 = vrot.lane.b32.xlu1 %v4092_v9, %s3242_s9  ;;  %v1490_v45 = vpop.permute.xlu0 %1489  ;;  %v864_v37 = vadd.f32 1.0, %v3203_v61  ;;  %v1097_v59 = vsel %vm1049_vm0, %v1021_v11, 0.0 }
  0xd2   : > { %v1715_v12 = vsel %vm1689_vm4, %v3612_v29, %v1490_v45  ;;  %v862_v45 = vadd.f32 1.0, %v3197_v7  ;;  %v1757_v7 = vsel %vm1755_vm7, %v1724_v17, %v4009_v46 }
  0xd3   : > { %v4140_v0 = vpop.permute.xlu1 %1499  ;;  %v1748_v22 = vsel %vm1722_vm6, %v1715_v12, %v1522_v2  ;;  %1605 = vrot.lane.b32.xlu0 %v4133_v4, %s3246_s16  ;;  %v3205_v12 = vpop.eup %3204 }
  0xd4   : > { %v1781_v47 = vsel %vm1755_vm7, %v1748_v22, %v3976_v16  ;;  %v3207_v22 = vpop.eup %3206  ;;  %3208 = vrcp.f32 %v862_v45 }
  0xd5   : > { %1573 = vrot.lane.b32.xlu1 %v4114_v27, %s3247_s18  ;;  %v1586_v2 = vpop.permute.xlu0 %1585  ;;  %3210 = vrcp.f32 %v863_v31 }
  0xd6   : > { %v1814_v52 = vsel %vm1788_vm8, %v1781_v47, %v1586_v2  ;;  %v4178_v47 = vpack.c.bf16 %v1096_v42, %v1096_v42  ;;  %v1023_v42 = vmul.f32 %v3207_v22, %v4034_v10  ;;  %3212 = vrcp.f32 %v864_v37 }
  0xd7   : > { %v4160_v51 = vpop.permute.xlu1 %1595  ;;  %v1847_v16 = vsel %vm1821_vm9, %v1814_v52, %v4073_v8  ;;  %1669 = vrot.lane.b32.xlu0 %v4151_v5, %s3248_s19  ;;  %v2332_v8 = vsel %vm2330_vm5, %v3959_v39, 0  ;;  %v1407_v39 = vrot.slane %v4085_v18, 1  ;;  %v1022_v52 = vmul.f32 %v3205_v12, %v4025_v50 }
  0xd8   : > { %v1880_v62 = vsel %vm1854_vm10, %v1847_v16, %v3999_v14  ;;  %v1269_v14 = vshll.u32 %v4156_v48, 16 }
  0xd9   : > { %1637 = vrot.lane.b32.xlu1 %v4085_v18, %s3245_s26  ;;  %v1682_v26 = vpop.permute.xlu0 %1681  ;;  %v4211_v12 = vpack.c.bf16 %v1022_v52, %v1097_v59 }
  0xda   : > { %v1925_v15 = vsel %vm1887_vm11, %v1880_v62, %v1682_v26  ;;  %v1271_v61 = vrot.slane %v1269_v14, 1 }
  0xdb   : > { %v1562_v2 = vpop.permute.xlu1 %1561  ;;  %1511 = vrot.lane.b32.xlu0 %v4133_v4, %s3242_s9  ;;  %2192 = vmatmul.mubr.bf16.vlgmr.msra.gmra.mrb[0].mxu1 %v1925_v15  ;;  %v1279_v37 = vshrl.u32 %v4211_v12, 16 }
  0xdc   : > { %v1790_v41 = vsel %vm1788_vm8, %v1757_v7, %v1562_v2  ;;  %2813 = vmatprep.mubr.msk.bf16.mxu1 %vm1689_vm4, %v3827_v28  ;;  %2926 = vmatpush3.bf16.msra.mxu1 %v2332_v8  ;;  %v1272_v8 = vor.u32 %v1271_v61, %v1267_v63  ;;  %v1281_v2 = vshll.u32 %v4211_v12, 16 }
  0xdd   : > { %v1823_v46 = vsel %vm1821_vm9, %v1790_v41, %v4127_v58  ;;  %1479 = vrot.lane.b32.xlu1 %v4114_v27, %s3243_s10  ;;  %v1492_v16 = vpop.permute.xlu0 %1491  ;;  %v1274_v58 = vshll.u32 %v4178_v47, 16  ;;  %v1410_v41 = vrot.slane %v4156_v48, 1 }
  0xde   : > { %v1856_v28 = vsel %vm1854_vm10, %v1823_v46, %v4042_v33  ;;  %v1717_v50 = vsel %vm1689_vm4, %v3465_v36, %v1492_v16  ;;  %v4216_v33 = vsel %vm1382_vm2, %v1407_v39, %v1408_v53  ;;  %v3209_v39 = vpop.eup %3208  ;;  %v1283_v46 = vrot.slane %v1281_v2, 1 }
  0xdf   : > { %v1658_v62 = vpop.permute.xlu1 %1657  ;;  %v1750_v27 = vsel %vm1722_vm6, %v1717_v50, %v4104_v57  ;;  %1575 = vrot.lane.b32.xlu0 %v4151_v5, %s3247_s18  ;;  %v1099_v57 = vsel %vm1060_vm1, %v1023_v42, 0.0  ;;  %v1276_v22 = vrot.slane %v1274_v58, 1  ;;  %v1024_v42 = vmul.f32 %v3209_v39, %v4083_v54 }
  0xe0   : > { %v1889_v45 = vsel %vm1887_vm11, %v1856_v28, %v1658_v62  ;;  %v1783_v10 = vsel %vm1755_vm7, %v1750_v27, %v4021_v40  ;;  %v4231_v7 = vpack.c.bf16 %v1099_v57, %v1099_v57 }
  0xe1   : > { %2096 = vmatmul.mubr.bf16.vlgmr.msra.gmra.mrb[0].mxu0 %v1889_v45  ;;  %1543 = vrot.lane.b32.xlu1 %v4085_v18, %s3244_s23  ;;  %v1588_v26 = vpop.permute.xlu0 %1587  ;;  %v1100_v54 = vsel %vm1049_vm0, %v1024_v42, 0.0 }
  0xe2   : > { %v1816_v11 = vsel %vm1788_vm8, %v1783_v10, %v1588_v26  ;;  %2801 = vmatprep.mubr.msk.bf16.mxu0 %vm1689_vm4, %v3848_v60 }
  0xe3   : > { %v1468_v40 = vpop.permute.xlu1 %1467  ;;  %v1849_v17 = vsel %vm1821_vm9, %v1816_v11, %v4125_v6  ;;  %1639 = vrot.lane.b32.xlu0 %v4156_v48, %s3245_s26 }
  0xe4   : > { %v1693_v15 = vsel %vm1689_vm4, %v3478_v30, %v1468_v40  ;;  %v1882_v14 = vsel %vm1854_vm10, %v1849_v17, %v4050_v13  ;;  %v1277_v30 = vsel %vm1157_vm3, %v1272_v8, %v1276_v22  ;;  %v1413_v22 = vrot.slane %v4211_v12, 1 }
  0xe5   : > { %v1726_v60 = vsel %vm1722_vm6, %v1693_v15, %v4140_v0  ;;  %1607 = vrot.lane.b32.xlu1 %v4216_v33, %s3246_s16  ;;  %v1684_v6 = vpop.permute.xlu0 %1683  ;;  %v1411_v0 = vrot.slane %v4178_v47, 1  ;;  %v3211_v47 = vpop.eup %3210  ;;  %v1414_v40 = vrot.slane %v4231_v7, 1 }
  0xe6   : > { %v1759_v53 = vsel %vm1755_vm7, %v1726_v60, %v4061_v25  ;;  %v1928_v31 = vsel %vm1887_vm11, %v1882_v14, %v1684_v6  ;;  %v1286_v25 = vshll.u32 %v4231_v7, 16  ;;  %v3213_v28 = vpop.eup %3212  ;;  %v1025_v58 = vmul.f32 %v3211_v47, %v4097_v43 }
  0xe7   : > { %v1564_v13 = vpop.permute.xlu1 %1563  ;;  %1481 = vrot.lane.b32.xlu0 %v4151_v5, %s3243_s10  ;;  %2200 = vmatmul.mubr.bf16.gmra.mrb[4].mxu1 %v1928_v31  ;;  %v1026_v27 = vmul.f32 %v3213_v28, %v4100_v3  ;;  %v4297_v7 = vsel %vm1382_vm2, %v1413_v22, %v1414_v40 }
  0xe8   : > { %v1792_v52 = vsel %vm1788_vm8, %v1759_v53, %v1564_v13  ;;  %2814 = vmatprep.mubr.msk.bf16.mxu1 %vm1689_vm4, %v3923_v20  ;;  %v4261_v20 = vsel %vm1382_vm2, %v1410_v41, %v1411_v0  ;;  %v1288_v61 = vrot.slane %v1286_v25, 1  ;;  %v4275_v26 = vpack.c.bf16 %v1025_v58, %v1100_v54 }
  0xe9   : > { %v1825_v16 = vsel %vm1821_vm9, %v1792_v52, %v4160_v51  ;;  %1671 = vrot.lane.b32.xlu1 %v1277_v30, %s3248_s19  ;;  %v1494_v5 = vpop.permute.xlu0 %1493  ;;  %v1284_v51 = vor.u32 %v1283_v46, %v1279_v37 }
  0xea   : > { %v1858_v63 = vsel %vm1854_vm10, %v1825_v16, %v4089_v35  ;;  %v1293_v3 = vshll.u32 %v4275_v26, 16  ;;  %v1291_v56 = vshrl.u32 %v4275_v26, 16  ;;  %v1719_v2 = vsel %vm1689_vm4, %v3490_v32, %v1494_v5 }
  0xeb   : > { %v1660_v59 = vpop.permute.xlu1 %1659  ;;  %1545 = vrot.lane.b32.xlu0 %v4156_v48, %s3244_s23  ;;  %v1289_v45 = vsel %vm1157_vm3, %v1284_v51, %v1288_v61 }
  0xec   : > { %v1892_v50 = vsel %vm1887_vm11, %v1858_v63, %v1660_v59  ;;  %v1295_v17 = vrot.slane %v1293_v3, 1  ;;  %v1416_v63 = vrot.slane %v4275_v26, 1 }
  0xed   : > { %2104 = vmatmul.mubr.bf16.gmra.mrb[4].mxu0 %v1892_v50  ;;  %1513 = vrot.lane.b32.xlu1 %v4216_v33, %s3242_s9  ;;  %v1526_v35 = vpop.permute.xlu0 %1525 }
  0xee   : > { %2802 = vmatprep.mubr.msk.bf16.mxu0 %vm1689_vm4, %v3942_v24  ;;  %v1102_v24 = vsel %vm1060_vm1, %v1026_v27, 0.0  ;;  %v1752_v60 = vsel %vm1722_vm6, %v1719_v2, %v1526_v35  ;;  %v1296_v53 = vor.u32 %v1295_v17, %v1291_v56  ;;  %v2819_v2 = vld [vmem:[%s4344_s24 + $0x39] sm:$0xff] }
  0xef   : > { %v1470_v62 = vpop.permute.xlu1 %1469  ;;  %1609 = vrot.lane.b32.xlu0 %v4261_v20, %s3246_s16  ;;  %v1144_v57 = vpack.c.bf16 %v1102_v24, %v1102_v24 }
  0xf0   : > { %v1695_v52 = vsel %vm1689_vm4, %v3506_v34, %v1470_v62 }
  0xf1   : > { %1577 = vrot.lane.b32.xlu1 %v1277_v30, %s3247_s18  ;;  %v1558_v10 = vpop.permute.xlu0 %1557  ;;  %v1298_v15 = vshll.u32 %v1144_v57, 16  ;;  %v1417_v47 = vrot.slane %v1144_v57, 1  ;;  %v2817_v57 = vld [vmem:[%s4344_s24 + $0x21] sm:$0xff] }
  0xf2   : > { %v1785_v39 = vsel %vm1755_vm7, %v1752_v60, %v1558_v10 }
  0xf3   : > { %v1502_v43 = vpop.permute.xlu1 %1501  ;;  %1673 = vrot.lane.b32.xlu0 %v1289_v45, %s3248_s19  ;;  %v4324_v61 = vsel %vm1382_vm2, %v1416_v63, %v1417_v47  ;;  %v2823_v63 = vld [vmem:[%s4344_s24 + $0x69] sm:$0xff] }
  0xf4   : > { %v1728_v25 = vsel %vm1722_vm6, %v1695_v52, %v1502_v43  ;;  %v4721_v52 = vld [vmem:[#allocation4_spill] sm:$0xff] }
  0xf5   : > { %1641 = vrot.lane.b32.xlu1 %v4211_v12, %s3245_s26  ;;  %v1590_v44 = vpop.permute.xlu0 %1589 }
  0xf6   : > { %v1818_v31 = vsel %vm1788_vm8, %v1785_v39, %v1590_v44  ;;  %v2816_v44 = vld [vmem:[%s4344_s24 + $0x19] sm:$0xff] }
  0xf7   : > { %v1534_v11 = vpop.permute.xlu1 %1533  ;;  %1515 = vrot.lane.b32.xlu0 %v4261_v20, %s3242_s9 }
  0xf8   : > { %v1761_v5 = vsel %vm1755_vm7, %v1728_v25, %v1534_v11 }
  0xf9   : > { %1483 = vrot.lane.b32.xlu1 %v1277_v30, %s3243_s10  ;;  %v1622_v8 = vpop.permute.xlu0 %1621  ;;  %v1300_v30 = vrot.slane %v1298_v15, 1 }
  0xfa   : > { %v1851_v32 = vsel %vm1821_vm9, %v1818_v31, %v1622_v8 }
  0xfb   : > { %v1566_v14 = vpop.permute.xlu1 %1565  ;;  %1579 = vrot.lane.b32.xlu0 %v1289_v45, %s3247_s18  ;;  %v1301_v37 = vsel %vm1157_vm3, %v1296_v53, %v1300_v30  ;;  %v2820_v53 = vld [vmem:[%s4344_s24 + $0x49] sm:$0xff] }
  0xfc   : > { %v1794_v34 = vsel %vm1788_vm8, %v1761_v5, %v1566_v14  ;;  %v2818_v14 = vld [vmem:[%s4344_s24 + $0x31] sm:$0xff]  ;;  %v2822_v5 = vld [vmem:[%s4344_s24 + $0x61] sm:$0xff] }
  0xfd   : > { %1547 = vrot.lane.b32.xlu1 %v4211_v12, %s3244_s23  ;;  %v1654_v6 = vpop.permute.xlu0 %1653 }
  0xfe   : > { %v1884_v41 = vsel %vm1854_vm10, %v1851_v32, %v1654_v6  ;;  %v4720_v6 = vld [vmem:[#allocation3_spill] sm:$0xff]  ;;  %v2258_v32 = vpack.c.bf16 %v2819_v2, %v2818_v14 }
  0xff   : > { %v1598_v13 = vpop.permute.xlu1 %1597  ;;  %1643 = vrot.lane.b32.xlu0 %v4275_v26, %s3245_s26 }
 0x100   : > { %v1827_v42 = vsel %vm1821_vm9, %v1794_v34, %v1598_v13 }
 0x101   : > { %1611 = vrot.lane.b32.xlu1 %v4297_v7, %s3246_s16  ;;  %v1686_v0 = vpop.permute.xlu0 %1685 }
 0x102   : > { %v1931_v46 = vsel %vm1887_vm11, %v1884_v41, %v1686_v0 }
 0x103   : > { %v1630_v16 = vpop.permute.xlu1 %1629  ;;  %1485 = vrot.lane.b32.xlu0 %v1289_v45, %s3243_s10  ;;  %2208 = vmatmul.mubr.bf16.gmra.mrb[8].mxu1 %v1931_v46 }
 0x104   : > { %2815 = vmatprep.mubr.msk.bf16.mxu1 %vm1689_vm4, %v3313_v1  ;;  %v1860_v28 = vsel %vm1854_vm10, %v1827_v42, %v1630_v16  ;;  %v2825_v42 = vld [vmem:[%s4344_s24 + $0x81] sm:$0xff] }
 0x105   : > { %1675 = vrot.lane.b32.xlu1 %v1301_v37, %s3248_s19  ;;  %v1496_v59 = vpop.permute.xlu0 %1495 }
 0x106   : > { %v1721_v10 = vsel %vm1689_vm4, %v3532_v21, %v1496_v59  ;;  %v2824_v59 = vld [vmem:[%s4344_s24 + $0x79] sm:$0xff] }
 0x107   : > { %v1662_v50 = vpop.permute.xlu1 %1661  ;;  %1549 = vrot.lane.b32.xlu0 %v4275_v26, %s3244_s23 }
 0x108   : > { %v1895_v51 = vsel %vm1887_vm11, %v1860_v28, %v1662_v50 }
 0x109   : > { %2112 = vmatmul.mubr.bf16.gmra.mrb[8].mxu0 %v1895_v51  ;;  %1517 = vrot.lane.b32.xlu1 %v4297_v7, %s3242_s9  ;;  %v1528_v1 = vpop.permute.xlu0 %1527  ;;  %v2261_v51 = vpack.c.bf16 %v2825_v42, %v2824_v59  ;;  %v2838_v59 = vld [vmem:[%s4344_s24 + $0x121] sm:$0xff]  ;;  %v2839_v42 = vld [vmem:[%s4344_s24 + $0x129] sm:$0xff] }
 0x10a   : > { %2803 = vmatprep.mubr.msk.bf16.mxu0 %vm1689_vm4, %v4017_v55  ;;  %v1754_v43 = vsel %vm1722_vm6, %v1721_v10, %v1528_v1  ;;  %v2828_v10 = vld [vmem:[%s4344_s24 + $0xa9] sm:$0xff] }
 0x10b   : > { %v1472_v35 = vpop.permute.xlu1 %1471  ;;  %1613 = vrot.lane.b32.xlu0 %v4324_v61, %s3246_s16 }
 0x10c   : > { %v1697_v40 = vsel %vm1689_vm4, %v3545_v38, %v1472_v35  ;;  %v2821_v38 = vld [vmem:[%s4344_s24 + $0x51] sm:$0xff] }
 0x10d   : > { %1581 = vrot.lane.b32.xlu1 %v1301_v37, %s3247_s18  ;;  %v1560_v58 = vpop.permute.xlu0 %1559  ;;  %v2259_v0 = vpack.c.bf16 %v2821_v38, %v2820_v53 }
 0x10e   : > { %v1787_v3 = vsel %vm1755_vm7, %v1754_v43, %v1560_v58  ;;  %v2829_v43 = vld [vmem:[%s4344_s24 + $0xb1] sm:$0xff] }
 0x10f   : > { %v1504_v62 = vpop.permute.xlu1 %1503  ;;  %1677 = vrot.lane.b32.xlu0 %v3674_v19, %s3248_s19 }
 0x110   : > { %v1730_v17 = vsel %vm1722_vm6, %v1697_v40, %v1504_v62  ;;  %v2831_v40 = vld [vmem:[%s4344_s24 + $0xc9] sm:$0xff] }
 0x111   : > { %1645 = vrot.lane.b32.xlu1 %v3612_v29, %s3245_s26  ;;  %v1592_v54 = vpop.permute.xlu0 %1591 }
 0x112   : > { %v1820_v11 = vsel %vm1788_vm8, %v1787_v3, %v1592_v54  ;;  %v2826_v54 = vld [vmem:[%s4344_s24 + $0x91] sm:$0xff] }
 0x113   : > { %v1536_v27 = vpop.permute.xlu1 %1535  ;;  %1519 = vrot.lane.b32.xlu0 %v4324_v61, %s3242_s9 }
 0x114   : > { %v1763_v15 = vsel %vm1755_vm7, %v1730_v17, %v1536_v27  ;;  %v2827_v27 = vld [vmem:[%s4344_s24 + $0x99] sm:$0xff] }
 0x115   : > { %1487 = vrot.lane.b32.xlu1 %v1301_v37, %s3243_s10  ;;  %v1624_v55 = vpop.permute.xlu0 %1623  ;;  %v2832_v17 = vld [vmem:[%s4344_s24 + $0xd9] sm:$0xff] }
 0x116   : > { %v1853_v21 = vsel %vm1821_vm9, %v1820_v11, %v1624_v55  ;;  %v2263_v11 = vpack.c.bf16 %v2829_v43, %v2828_v10  ;;  %v2843_v10 = vld [vmem:[%s4344_s24 + $0x159] sm:$0xff] }
 0x117   : > { %v1568_v45 = vpop.permute.xlu1 %1567  ;;  %1583 = vrot.lane.b32.xlu0 %v3674_v19, %s3247_s18  ;;  %v2257_v19 = vpack.c.bf16 %v2817_v57, %v2816_v44  ;;  %v2262_v44 = vpack.c.bf16 %v2827_v27, %v2826_v54  ;;  %v4722_v57 = vld [vmem:[#allocation5_spill] sm:$0xff] }
 0x118   : > { %v1796_v60 = vsel %vm1788_vm8, %v1763_v15, %v1568_v45 }
 0x119   : > { %1551 = vrot.lane.b32.xlu1 %v3612_v29, %s3244_s23  ;;  %v1656_v24 = vpop.permute.xlu0 %1655 }
 0x11a   : > { %v1886_v29 = vsel %vm1854_vm10, %v1853_v21, %v1656_v24 }
 0x11b   : > { %v1600_v8 = vpop.permute.xlu1 %1599  ;;  %1647 = vrot.lane.b32.xlu0 %v3465_v36, %s3245_s26 }
 0x11c   : > { %v1829_v30 = vsel %vm1821_vm9, %v1796_v60, %v1600_v8 }
 0x11d   : > { %1615 = vrot.lane.b32.xlu1 %v3645_v49, %s3246_s16  ;;  %v1688_v22 = vpop.permute.xlu0 %1687  ;;  %s2867_s16 = sshll.u32 %s4730_s27, 8 }
 0x11e   : > { %v1934_v56 = vsel %vm1887_vm11, %v1886_v29, %v1688_v22  ;;  %v2830_v22 = vld [vmem:[%s4344_s24 + $0xc1] sm:$0xff]  ;;  %s4533_s12 = scalar_lea.vmem %s4709_s8, %s2867_s16 }
 0x11f   : > { %v1632_v36 = vpop.permute.xlu1 %1631  ;;  %2216 = vmatmul.mubr.bf16.gmra.mrb[12].mxu1 %v1934_v56  ;;  %v2264_v14 = vpack.c.bf16 %v2831_v40, %v2830_v22  ;;  %v2846_v22 = vld [vmem:[%s4344_s24 + $0x181] sm:$0xff]  ;;  %v2847_v40 = vld [vmem:[%s4344_s24 + $0x189] sm:$0xff] }
 0x120   : > { %2927 = vmatprep.mubr.msk.bf16.mxu1 %vm2281_vm12, %v2257_v19  ;;  %v1862_v31 = vsel %vm1854_vm10, %v1829_v30, %v1632_v36  ;;  %v2833_v36 = vld [vmem:[%s4344_s24 + $0xe1] sm:$0xff]  ;;  %v2834_v30 = vld [vmem:[%s4344_s24 + $0xf1] sm:$0xff] }
 0x121   : > { %1679 = vrot.lane.b32.xlu1 %v4720_v6, %s3248_s19  ;;  %v1474_v39 = vpop.permute.xlu0 %1473  ;;  %v2265_v60 = vpack.c.bf16 %v2833_v36, %v2832_v17  ;;  %v2272_v36 = vpack.c.bf16 %v2847_v40, %v2846_v22 }
 0x122   : > { %v1699_v37 = vsel %vm1689_vm4, %v4721_v52, %v1474_v39  ;;  %v2837_v52 = vld [vmem:[%s4344_s24 + $0x111] sm:$0xff] }
 0x123   : > { %v1664_v13 = vpop.permute.xlu1 %1663 }
 0x124   : > { %v1898_v41 = vsel %vm1887_vm11, %v1862_v31, %v1664_v13  ;;  %v2835_v31 = vld [vmem:[%s4344_s24 + $0xf9] sm:$0xff] }
 0x125   : > { %2120 = vmatmul.mubr.bf16.gmra.mrb[12].mxu0 %v1898_v41  ;;  %v1538_v46 = vpop.permute.xlu0 %1537  ;;  %v4723_v13 = vld [vmem:[#allocation6_spill] sm:$0xff] }
 0x126   : > { %2804 = vmatprep.mubr.msk.bf16.mxu0 %vm1689_vm4, %v4092_v9  ;;  %v2260_v9 = vpack.c.bf16 %v2823_v63, %v2822_v5 }
 0x127   : > { %v1506_v25 = vpop.permute.xlu1 %1505  ;;  %2928 = vmatmul.mubr.msk.bf16.vlgmr.msra.gmra.mrb[16].mxu1 %vm2281_vm12, %v2258_v32 }
 0x128   : > { %v1732_v16 = vsel %vm1722_vm6, %v1699_v37, %v1506_v25  ;;  %2931 = vmatprep.mubr.msk.bf16.mxu1 %vm2281_vm12, %v2259_v0  ;;  %v2836_v0 = vld [vmem:[%s4344_s24 + $0x109] sm:$0xff] }
 0x129   : > { %v1765_v47 = vsel %vm1755_vm7, %v1732_v16, %v1538_v46  ;;  %v1602_v34 = vpop.permute.xlu0 %1601  ;;  %v2266_v46 = vpack.c.bf16 %v2835_v31, %v2834_v30  ;;  %v2267_v16 = vpack.c.bf16 %v2837_v52, %v2836_v0 }
 0x12b   : > { %v1570_v28 = vpop.permute.xlu1 %1569 }
 0x12c   : > { %v1798_v50 = vsel %vm1788_vm8, %v1765_v47, %v1570_v28 }
 0x12d   : > { %v1831_v1 = vsel %vm1821_vm9, %v1798_v50, %v1602_v34  ;;  %v1666_v35 = vpop.permute.xlu0 %1665  ;;  %v2841_v50 = vld [vmem:[%s4344_s24 + $0x141] sm:$0xff] }
 0x12f   : > { %v1634_v58 = vpop.permute.xlu1 %1633  ;;  %2932 = vmatmul.mubr.msk.bf16.gmra.mrb[20].mxu1 %vm2281_vm12, %v2260_v9  ;;  %v2840_v9 = vld [vmem:[%s4344_s24 + $0x139] sm:$0xff] }
 0x130   : > { %v1864_v62 = vsel %vm1854_vm10, %v1831_v1, %v1634_v58  ;;  %2935 = vmatprep.mubr.msk.bf16.mxu1 %vm2281_vm12, %v2261_v51  ;;  %v2268_v1 = vpack.c.bf16 %v2839_v42, %v2838_v59  ;;  %v2269_v58 = vpack.c.bf16 %v2841_v50, %v2840_v9 }
 0x131   : > { %v1901_v55 = vsel %vm1887_vm11, %v1864_v62, %v1666_v35  ;;  %v1508_v45 = vpop.permute.xlu0 %1507 }
 0x132   : > { %2128 = vmatmul.mubr.bf16.gmra.mrb[16].mxu0 %v1901_v55 }
 0x133   : > { %v1476_v24 = vpop.permute.xlu1 %1475  ;;  %2805 = vmatprep.mubr.msk.bf16.mxu0 %vm1689_vm4, %v4133_v4 }
 0x134   : > { %v1701_v3 = vsel %vm1689_vm4, %v4722_v57, %v1476_v24  ;;  %v2845_v57 = vld [vmem:[%s4344_s24 + $0x171] sm:$0xff] }
 0x135   : > { %v1734_v8 = vsel %vm1722_vm6, %v1701_v3, %v1508_v45  ;;  %v1572_v21 = vpop.permute.xlu0 %1571  ;;  %v2842_v45 = vld [vmem:[%s4344_s24 + $0x151] sm:$0xff] }
 0x137   : > { %v1540_v19 = vpop.permute.xlu1 %1539  ;;  %2936 = vmatmul.mubr.msk.bf16.gmra.mrb[24].mxu1 %vm2281_vm12, %v2262_v44  ;;  %v2844_v44 = vld [vmem:[%s4344_s24 + $0x169] sm:$0xff] }
 0x138   : > { %v1767_v29 = vsel %vm1755_vm7, %v1734_v8, %v1540_v19  ;;  %2939 = vmatprep.mubr.msk.bf16.mxu1 %vm2281_vm12, %v2263_v11  ;;  %v2270_v11 = vpack.c.bf16 %v2843_v10, %v2842_v45  ;;  %v4724_v10 = vld [vmem:[#allocation2_spill] sm:$0xff] }
 0x139   : > { %v1800_v4 = vsel %vm1788_vm8, %v1767_v29, %v1572_v21  ;;  %v1636_v56 = vpop.permute.xlu0 %1635  ;;  %v2271_v21 = vpack.c.bf16 %v2845_v57, %v2844_v44 }
 0x13b   : > { %v1604_v15 = vpop.permute.xlu1 %1603 }
 0x13c   : > { %v1833_v2 = vsel %vm1821_vm9, %v1800_v4, %v1604_v15 }
 0x13d   : > { %v1866_v6 = vsel %vm1854_vm10, %v1833_v2, %v1636_v56  ;;  %v1478_v39 = vpop.permute.xlu0 %1477 }
 0x13e   : > { %v1703_v32 = vsel %vm1689_vm4, %v4723_v13, %v1478_v39 }
 0x13f   : > { %v1668_v53 = vpop.permute.xlu1 %1667  ;;  %2940 = vmatmul.mubr.msk.bf16.gmra.mrb[28].mxu1 %vm2281_vm12, %v2264_v14 }
 0x140   : > { %v1904_v38 = vsel %vm1887_vm11, %v1866_v6, %v1668_v53  ;;  %2943 = vmatprep.mubr.msk.bf16.mxu1 %vm2281_vm12, %v2265_v60 }
 0x141   : > { %2136 = vmatmul.mubr.bf16.gmra.mrb[20].mxu0 %v1904_v38  ;;  %v1542_v41 = vpop.permute.xlu0 %1541 }
 0x142   : > { %2806 = vmatprep.mubr.msk.bf16.mxu0 %vm1689_vm4, %v4216_v33 }
 0x143   : > { %v1510_v37 = vpop.permute.xlu1 %1509 }
 0x144   : > { %v1736_v25 = vsel %vm1722_vm6, %v1703_v32, %v1510_v37 }
 0x145   : > { %v1769_v5 = vsel %vm1755_vm7, %v1736_v25, %v1542_v41  ;;  %v1606_v63 = vpop.permute.xlu0 %1605 }
 0x147   : > { %v1574_v47 = vpop.permute.xlu1 %1573  ;;  %2944 = vmatmul.mubr.msk.bf16.gmra.mrb[32].mxu1 %vm2281_vm12, %v2266_v46 }
 0x148   : > { %v1802_v34 = vsel %vm1788_vm8, %v1769_v5, %v1574_v47  ;;  %2947 = vmatprep.mubr.msk.bf16.mxu1 %vm2281_vm12, %v2267_v16 }
 0x149   : > { %v1835_v33 = vsel %vm1821_vm9, %v1802_v34, %v1606_v63  ;;  %v1670_v28 = vpop.permute.xlu0 %1669 }
 0x14b   : > { %v1638_v51 = vpop.permute.xlu1 %1637 }
 0x14c   : > { %v1868_v35 = vsel %vm1854_vm10, %v1835_v33, %v1638_v51 }
 0x14d   : > { %v1907_v62 = vsel %vm1887_vm11, %v1868_v35, %v1670_v28  ;;  %v1512_v54 = vpop.permute.xlu0 %1511 }
 0x14e   : > { %2144 = vmatmul.mubr.bf16.gmra.mrb[24].mxu0 %v1907_v62 }
 0x14f   : > { %v1480_v27 = vpop.permute.xlu1 %1479  ;;  %2948 = vmatmul.mubr.msk.bf16.gmra.mrb[36].mxu1 %vm2281_vm12, %v2268_v1  ;;  %2807 = vmatprep.mubr.msk.bf16.mxu0 %vm1689_vm4, %v4261_v20 }
 0x150   : > { %v1705_v55 = vsel %vm1689_vm4, %v4045_v23, %v1480_v27  ;;  %2951 = vmatprep.mubr.msk.bf16.mxu1 %vm2281_vm12, %v2269_v58 }
 0x151   : > { %v1738_v43 = vsel %vm1722_vm6, %v1705_v55, %v1512_v54  ;;  %v1576_v24 = vpop.permute.xlu0 %1575 }
 0x153   : > { %v1544_v3 = vpop.permute.xlu1 %1543 }
 0x154   : > { %v1771_v8 = vsel %vm1755_vm7, %v1738_v43, %v1544_v3 }
 0x155   : > { %v1804_v20 = vsel %vm1788_vm8, %v1771_v8, %v1576_v24  ;;  %v1640_v19 = vpop.permute.xlu0 %1639 }
 0x157   : > { %v1608_v23 = vpop.permute.xlu1 %1607  ;;  %2952 = vmatmul.mubr.msk.bf16.gmra.mrb[40].mxu1 %vm2281_vm12, %v2270_v11 }
 0x158   : > { %v1837_v29 = vsel %vm1821_vm9, %v1804_v20, %v1608_v23  ;;  %2955 = vmatprep.mubr.msk.bf16.mxu1 %vm2281_vm12, %v2271_v21 }
 0x159   : > { %v1870_v4 = vsel %vm1854_vm10, %v1837_v29, %v1640_v19  ;;  %v1482_v56 = vpop.permute.xlu0 %1481 }
 0x15a   : > { %v1707_v14 = vsel %vm1689_vm4, %v4085_v18, %v1482_v56 }
 0x15b   : > { %v1672_v17 = vpop.permute.xlu1 %1671 }
 0x15c   : > { %v1910_v15 = vsel %vm1887_vm11, %v1870_v4, %v1672_v17 }
 0x15d   : > { %2152 = vmatmul.mubr.bf16.gmra.mrb[28].mxu0 %v1910_v15  ;;  %v1546_v2 = vpop.permute.xlu0 %1545 }
 0x15e   : > { %2808 = vmatprep.mubr.msk.bf16.mxu0 %vm1689_vm4, %v4297_v7 }
 0x15f   : > { %v1514_v60 = vpop.permute.xlu1 %1513  ;;  %2956 = vmatmul.mubr.msk.bf16.gmra.mrb[44].mxu1 %vm2281_vm12, %v2272_v36 }
 0x160   : > { %v1740_v6 = vsel %vm1722_vm6, %v1707_v14, %v1514_v60 }
 0x161   : > { %v1773_v39 = vsel %vm1755_vm7, %v1740_v6, %v1546_v2  ;;  %v1610_v53 = vpop.permute.xlu0 %1609 }
 0x163   : > { %v1578_v38 = vpop.permute.xlu1 %1577 }
 0x164   : > { %v1806_v30 = vsel %vm1788_vm8, %v1773_v39, %v1578_v38 }
 0x165   : > { %v1839_v31 = vsel %vm1821_vm9, %v1806_v30, %v1610_v53  ;;  %v1674_v13 = vpop.permute.xlu0 %1673 }
 0x167   : > { %v1642_v32 = vpop.permute.xlu1 %1641 }
 0x168   : > { %v1872_v18 = vsel %vm1854_vm10, %v1839_v31, %v1642_v32 }
 0x169   : > { %v1913_v41 = vsel %vm1887_vm11, %v1872_v18, %v1674_v13  ;;  %v1516_v7 = vpop.permute.xlu0 %1515 }
 0x16a   : > { %2160 = vmatmul.mubr.bf16.gmra.mrb[32].mxu0 %v1913_v41 }
 0x16b   : > { %v1484_v0 = vpop.permute.xlu1 %1483  ;;  %2809 = vmatprep.mubr.msk.bf16.mxu0 %vm1689_vm4, %v4324_v61 }
 0x16c   : > { %v1709_v52 = vsel %vm1689_vm4, %v4156_v48, %v1484_v0 }
 0x16d   : > { %v1742_v37 = vsel %vm1722_vm6, %v1709_v52, %v1516_v7  ;;  %v1580_v46 = vpop.permute.xlu0 %1579 }
 0x16f   : > { %v1548_v25 = vpop.permute.xlu1 %1547 }
 0x170   : > { %v1775_v16 = vsel %vm1755_vm7, %v1742_v37, %v1548_v25 }
 0x171   : > { %v1808_v5 = vsel %vm1788_vm8, %v1775_v16, %v1580_v46  ;;  %v1644_v63 = vpop.permute.xlu0 %1643 }
 0x173   : > { %v1612_v47 = vpop.permute.xlu1 %1611 }
 0x174   : > { %v1841_v34 = vsel %vm1821_vm9, %v1808_v5, %v1612_v47  ;;  %v4524_v47 = vld [vmem:[%s4705_s4] ss:$0 sm:$0xff] }
 0x175   : > { %v1874_v59 = vsel %vm1854_vm10, %v1841_v34, %v1644_v63  ;;  %v1486_v42 = vpop.permute.xlu0 %1485  ;;  %v4519_v63 = vld [vmem:[%s4708_s7] ss:$0 sm:$0xff] }
 0x176   : > { %v1711_v48 = vsel %vm1689_vm4, %v4211_v12, %v1486_v42 }
 0x177   : > { %v1676_v33 = vpop.permute.xlu1 %1675 }
 0x178   : > { %v1916_v61 = vsel %vm1887_vm11, %v1874_v59, %v1676_v33 }
 0x179   : > { %2168 = vmatmul.mubr.bf16.gmra.mrb[36].mxu0 %v1916_v61  ;;  %v1550_v28 = vpop.permute.xlu0 %1549 }
 0x17a   : > { %2810 = vmatprep.mubr.msk.bf16.mxu0 %vm1689_vm4, %v3645_v49 }
 0x17b   : > { %v1518_v9 = vpop.permute.xlu1 %1517 }
 0x17c   : > { %v1744_v50 = vsel %vm1722_vm6, %v1711_v48, %v1518_v9 }
 0x17d   : > { %v1777_v51 = vsel %vm1755_vm7, %v1744_v50, %v1550_v28  ;;  %v1614_v1 = vpop.permute.xlu0 %1613 }
 0x17f   : > { %v1582_v35 = vpop.permute.xlu1 %1581 }
 0x180   : > { %v1810_v58 = vsel %vm1788_vm8, %v1777_v51, %v1582_v35 }
 0x181   : > { %v1843_v62 = vsel %vm1821_vm9, %v1810_v58, %v1614_v1  ;;  %v1678_v54 = vpop.permute.xlu0 %1677 }
 0x183   : > { %v1646_v27 = vpop.permute.xlu1 %1645 }
 0x184   : > { %v1876_v55 = vsel %vm1854_vm10, %v1843_v62, %v1646_v27 }
 0x185   : > { %v1919_v12 = vsel %vm1887_vm11, %v1876_v55, %v1678_v54  ;;  %v1520_v45 = vpop.permute.xlu0 %1519 }
 0x186   : > { %2176 = vmatmul.mubr.bf16.gmra.mrb[40].mxu0 %v1919_v12 }
 0x187   : > { %v1488_v49 = vpop.permute.xlu1 %1487  ;;  %2811 = vmatprep.mubr.msk.bf16.mxu0 %vm1689_vm4, %v4724_v10 }
 0x188   : > { %v1713_v43 = vsel %vm1689_vm4, %v4275_v26, %v1488_v49 }
 0x189   : > { %v1746_v24 = vsel %vm1722_vm6, %v1713_v43, %v1520_v45  ;;  %v1584_v44 = vpop.permute.xlu0 %1583 }
 0x18b   : > { %v1552_v57 = vpop.permute.xlu1 %1551 }
 0x18c   : > { %v1779_v3 = vsel %vm1755_vm7, %v1746_v24, %v1552_v57 }
 0x18d   : > { %v1812_v11 = vsel %vm1788_vm8, %v1779_v3, %v1584_v44  ;;  %v1648_v8 = vpop.permute.xlu0 %1647 }
 0x18f   : > { %v1616_v21 = vpop.permute.xlu1 %1615 }
 0x190   : > { %v1845_v20 = vsel %vm1821_vm9, %v1812_v11, %v1616_v21 }
 0x191   : > { %v1878_v19 = vsel %vm1854_vm10, %v1845_v20, %v1648_v8 }
 0x193   : > { %v1680_v23 = vpop.permute.xlu1 %1679 }
 0x194   : > { %v1922_v29 = vsel %vm1887_vm11, %v1878_v19, %v1680_v23 }
 0x195   : > { %2184 = vmatmul.mubr.bf16.gmra.mrb[44].mxu0 %v1922_v29 }
 0x1ae   : > { %v4500_v22 = vpop.f32.mrb[0].mxu1 }
 0x1af   : > { %v2195_v26 = vpop.f32.mrb[1].mxu1 }
 0x1b0   : > { %v4502_v40 = vpop.f32.mrb[2].mxu1 }
 0x1b1   : > { %v2198_v4 = vpop.f32.mrb[3].mxu1 }
 0x1b4   : > { %v2097_v56 = vpop.f32.mrb[0].mxu0 }
 0x1b5   : > { %v2099_v17 = vpop.f32.mrb[1].mxu0  ;;  %v2098_v9 = vadd.f32 %v4524_v47, %v2097_v56 }
 0x1b6   : > { %v2100_v36 = vpop.f32.mrb[2].mxu0 }
 0x1b7   : > { %v2102_v15 = vpop.f32.mrb[3].mxu0  ;;  %v2101_v54 = vadd.f32 %v4524_v47, %v2100_v36 }
 0x1ba   : > { %v4504_v14 = vpop.f32.mrb[4].mxu1 }
 0x1bb   : > { %v2203_v2 = vpop.f32.mrb[5].mxu1 }
 0x1bc   : > { %v4506_v60 = vpop.f32.mrb[6].mxu1 }
 0x1bd   : > { %v2206_v6 = vpop.f32.mrb[7].mxu1 }
 0x1c0   : > { %v2105_v39 = vpop.f32.mrb[4].mxu0 }
 0x1c1   : > { %v2107_v53 = vpop.f32.mrb[5].mxu0  ;;  %v2106_v33 = vadd.f32 %v4524_v47, %v2105_v39 }
 0x1c2   : > { %v2108_v38 = vpop.f32.mrb[6].mxu0 }
 0x1c3   : > { %v2110_v30 = vpop.f32.mrb[7].mxu0  ;;  %v2109_v1 = vadd.f32 %v4524_v47, %v2108_v38 }
 0x1d6   : > { %v4508_v31 = vpop.f32.mrb[8].mxu1 }
 0x1d7   : > { %v2211_v13 = vpop.f32.mrb[9].mxu1 }
 0x1d8   : > { %v4510_v32 = vpop.f32.mrb[10].mxu1 }
 0x1d9   : > { %v2214_v18 = vpop.f32.mrb[11].mxu1 }
 0x1dc   : > { %v2113_v41 = vpop.f32.mrb[8].mxu0 }
 0x1dd   : > { %v2115_v7 = vpop.f32.mrb[9].mxu0  ;;  %v2114_v44 = vadd.f32 %v4524_v47, %v2113_v41 }
 0x1de   : > { %v2116_v0 = vpop.f32.mrb[10].mxu0 }
 0x1df   : > { %v2118_v52 = vpop.f32.mrb[11].mxu0  ;;  %v2117_v23 = vadd.f32 %v4524_v47, %v2116_v0 }
 0x1f2   : > { %v4512_v37 = vpop.f32.mrb[12].mxu1 }
 0x1f3   : > { %v2219_v46 = vpop.f32.mrb[13].mxu1 }
 0x1f4   : > { %v4514_v25 = vpop.f32.mrb[14].mxu1 }
 0x1f5   : > { %v2222_v16 = vpop.f32.mrb[15].mxu1 }
 0x1f8   : > { %v2121_v5 = vpop.f32.mrb[12].mxu0 }
 0x1f9   : > { %v2123_v34 = vpop.f32.mrb[13].mxu0  ;;  %v2122_v10 = vadd.f32 %v4524_v47, %v2121_v5 }
 0x1fa   : > { %v2124_v59 = vpop.f32.mrb[14].mxu0  ;;  %v2929_v42 = vpop.f32.mrb[16].mxu1 }
 0x1fb   : > { %v2126_v61 = vpop.f32.mrb[15].mxu0  ;;  %v2377_v48 = vadd.f32 %v2929_v42, %v4519_v63  ;;  %v2368_v28 = vpop.f32.mrb[17].mxu1  ;;  %v2125_v11 = vadd.f32 %v4524_v47, %v2124_v59 }
 0x1fc   : > { %v2369_v50 = vadd.f32 %v4519_v63, %v2368_v28  ;;  %v2930_v51 = vpop.f32.mrb[18].mxu1 }
 0x1fd   : > { %v2497_v35 = vadd.f32 %v2377_v48, %v2106_v33  ;;  %v2380_v58 = vadd.f32 %v2930_v51, %v4519_v63  ;;  %v2371_v62 = vpop.f32.mrb[19].mxu1 }
 0x1fe   : > { %v2495_v27 = vadd.f32 %v2369_v50, %v2098_v9  ;;  %v2372_v55 = vadd.f32 %v4519_v63, %v2371_v62 }
 0x1ff   : > { %2529 = vst.msk [vmem:[%s4533_s12 + $0x10] sm:$0xff] %vm1689_vm4, %v2497_v35  ;;  %v2498_v12 = vadd.f32 %v2380_v58, %v2109_v1 }
 0x200   : > { %2527 = vst.msk [vmem:[%s4533_s12] sm:$0xff] %vm1689_vm4, %v2495_v27  ;;  %v2496_v45 = vadd.f32 %v2372_v55, %v2101_v54 }
 0x201   : > { %2530 = vst.msk [vmem:[%s4533_s12 + $0x18] sm:$0xff] %vm1689_vm4, %v2498_v12 }
 0x202   : > { %2528 = vst.msk [vmem:[%s4533_s12 + $0x8] sm:$0xff] %vm1689_vm4, %v2496_v45  ;;  %v2933_v49 = vpop.f32.mrb[20].mxu1 }
 0x203   : > { %v2393_v43 = vadd.f32 %v2933_v49, %v4519_v63  ;;  %v2384_v24 = vpop.f32.mrb[21].mxu1 }
 0x204   : > { %v2385_v57 = vadd.f32 %v4519_v63, %v2384_v24  ;;  %v2934_v3 = vpop.f32.mrb[22].mxu1 }
 0x205   : > { %v2129_v8 = vpop.f32.mrb[16].mxu0  ;;  %v2501_v21 = vadd.f32 %v2393_v43, %v2122_v10  ;;  %v2396_v20 = vadd.f32 %v2934_v3, %v4519_v63  ;;  %v2387_v19 = vpop.f32.mrb[23].mxu1 }
 0x206   : > { %v2131_v29 = vpop.f32.mrb[17].mxu0  ;;  %v2499_v26 = vadd.f32 %v2385_v57, %v2114_v44  ;;  %v2388_v4 = vadd.f32 %v4519_v63, %v2387_v19  ;;  %v2130_v39 = vadd.f32 %v4524_v47, %v2129_v8 }
 0x207   : > { %2533 = vst.msk [vmem:[%s4533_s12 + $0x30] sm:$0xff] %vm1689_vm4, %v2501_v21  ;;  %v2132_v56 = vpop.f32.mrb[18].mxu0  ;;  %v2502_v17 = vadd.f32 %v2396_v20, %v2125_v11 }
 0x208   : > { %2531 = vst.msk [vmem:[%s4533_s12 + $0x20] sm:$0xff] %vm1689_vm4, %v2499_v26  ;;  %v2134_v36 = vpop.f32.mrb[19].mxu0  ;;  %v2500_v15 = vadd.f32 %v2388_v4, %v2117_v23  ;;  %v2133_v13 = vadd.f32 %v4524_v47, %v2132_v56 }
 0x209   : > { %2534 = vst.msk [vmem:[%s4533_s12 + $0x38] sm:$0xff] %vm1689_vm4, %v2502_v17  ;;  %v2202_v17 = vadd.f32 %v4524_v47, %v4504_v14  ;;  %v2197_v14 = vadd.f32 %v4524_v47, %v4502_v40 }
 0x20a   : > { %2532 = vst.msk [vmem:[%s4533_s12 + $0x28] sm:$0xff] %vm1689_vm4, %v2500_v15  ;;  %v2937_v2 = vpop.f32.mrb[24].mxu1 }
 0x20b   : > { %v2400_v6 = vpop.f32.mrb[25].mxu1  ;;  %v2409_v52 = vadd.f32 %v2937_v2, %v4519_v63  ;;  %v2194_v2 = vadd.f32 %v4524_v47, %v4500_v22 }
 0x20c   : > { %v2401_v53 = vadd.f32 %v4519_v63, %v2400_v6  ;;  %v2938_v38 = vpop.f32.mrb[26].mxu1 }
 0x20d   : > { %v2403_v30 = vpop.f32.mrb[27].mxu1  ;;  %v2412_v34 = vadd.f32 %v2938_v38, %v4519_v63 }
 0x20e   : > { %v2503_v18 = vadd.f32 %v2401_v53, %v2130_v39  ;;  %v2404_v41 = vadd.f32 %v4519_v63, %v2403_v30  ;;  %v2205_v53 = vadd.f32 %v4524_v47, %v4506_v60 }
 0x210   : > { %2535 = vst.msk [vmem:[%s4533_s12 + $0x40] sm:$0xff] %vm1689_vm4, %v2503_v18  ;;  %v2504_v7 = vadd.f32 %v2404_v41, %v2133_v13 }
 0x212   : > { %2536 = vst.msk [vmem:[%s4533_s12 + $0x48] sm:$0xff] %vm1689_vm4, %v2504_v7  ;;  %v2941_v0 = vpop.f32.mrb[28].mxu1 }
 0x213   : > { %v2416_v46 = vpop.f32.mrb[29].mxu1  ;;  %v2425_v22 = vadd.f32 %v2941_v0, %v4519_v63  ;;  %v2218_v0 = vadd.f32 %v4524_v47, %v4512_v37  ;;  %v2221_v37 = vadd.f32 %v4524_v47, %v4514_v25 }
 0x214   : > { %v2137_v16 = vpop.f32.mrb[20].mxu0  ;;  %v2942_v5 = vpop.f32.mrb[30].mxu1  ;;  %v2417_v12 = vadd.f32 %v4519_v63, %v2416_v46 }
 0x215   : > { %v2138_v59 = vadd.f32 %v4524_v47, %v2137_v16  ;;  %v2139_v42 = vpop.f32.mrb[21].mxu0  ;;  %v2419_v33 = vpop.f32.mrb[31].mxu1  ;;  %v2428_v46 = vadd.f32 %v2942_v5, %v4519_v63 }
 0x216   : > { %v2140_v61 = vpop.f32.mrb[22].mxu0  ;;  %v2420_v43 = vadd.f32 %v4519_v63, %v2419_v33 }
 0x217   : > { %v2505_v48 = vadd.f32 %v2409_v52, %v2138_v59  ;;  %v2141_v28 = vadd.f32 %v4524_v47, %v2140_v61  ;;  %v2142_v9 = vpop.f32.mrb[23].mxu0 }
 0x219   : > { %2537 = vst.msk [vmem:[%s4533_s12 + $0x50] sm:$0xff] %vm1689_vm4, %v2505_v48  ;;  %v2506_v50 = vadd.f32 %v2412_v34, %v2141_v28  ;;  %v2210_v28 = vadd.f32 %v4524_v47, %v4508_v31 }
 0x21a   : > { %v2945_v51 = vpop.f32.mrb[32].mxu1 }
 0x21b   : > { %2538 = vst.msk [vmem:[%s4533_s12 + $0x58] sm:$0xff] %vm1689_vm4, %v2506_v50  ;;  %v4581_v1 = vadd.f32 %v2945_v51, %v4519_v63  ;;  %v2432_v35 = vpop.f32.mrb[33].mxu1 }
 0x21c   : > { %v4584_v58 = vadd.f32 %v4519_v63, %v2432_v35  ;;  %v2946_v62 = vpop.f32.mrb[34].mxu1 }
 0x21d   : > { %v4587_v54 = vadd.f32 %v2946_v62, %v4519_v63  ;;  %v2435_v27 = vpop.f32.mrb[35].mxu1 }
 0x21e   : > { %v4590_v55 = vadd.f32 %v4519_v63, %v2435_v27 }
 0x221   : > { %v2145_v45 = vpop.f32.mrb[24].mxu0 }
 0x222   : > { %v2146_v49 = vadd.f32 %v4524_v47, %v2145_v45  ;;  %v2147_v10 = vpop.f32.mrb[25].mxu0  ;;  %v2949_v24 = vpop.f32.mrb[36].mxu1 }
 0x223   : > { %v2148_v44 = vpop.f32.mrb[26].mxu0  ;;  %v4596_v57 = vadd.f32 %v2949_v24, %v4519_v63  ;;  %v2448_v3 = vpop.f32.mrb[37].mxu1 }
 0x224   : > { %v2507_v11 = vadd.f32 %v2417_v12, %v2146_v49  ;;  %v2149_v8 = vadd.f32 %v4524_v47, %v2148_v44  ;;  %v2150_v21 = vpop.f32.mrb[27].mxu0  ;;  %v4600_v20 = vadd.f32 %v4519_v63, %v2448_v3  ;;  %v2950_v19 = vpop.f32.mrb[38].mxu1  ;;  %v2213_v12 = vadd.f32 %v4524_v47, %v4510_v32 }
 0x225   : > { %v4603_v23 = vadd.f32 %v2950_v19, %v4519_v63  ;;  %v2451_v29 = vpop.f32.mrb[39].mxu1 }
 0x226   : > { %2539 = vst.msk [vmem:[%s4533_s12 + $0x60] sm:$0xff] %vm1689_vm4, %v2507_v11  ;;  %v2508_v26 = vadd.f32 %v2420_v43, %v2149_v8  ;;  %v4608_v4 = vadd.f32 %v4519_v63, %v2451_v29 }
 0x228   : > { %2540 = vst.msk [vmem:[%s4533_s12 + $0x68] sm:$0xff] %vm1689_vm4, %v2508_v26 }
 0x22a   : > { %v2953_v56 = vpop.f32.mrb[40].mxu1 }
 0x22b   : > { %v2473_v36 = vadd.f32 %v2953_v56, %v4519_v63  ;;  %v2464_v15 = vpop.f32.mrb[41].mxu1 }
 0x22c   : > { %v2465_v6 = vadd.f32 %v4519_v63, %v2464_v15  ;;  %v2954_v39 = vpop.f32.mrb[42].mxu1 }
 0x22d   : > { %v2521_v38 = vadd.f32 %v2473_v36, %v2202_v17  ;;  %v2476_v30 = vadd.f32 %v2954_v39, %v4519_v63  ;;  %v2467_v13 = vpop.f32.mrb[43].mxu1 }
 0x22e   : > { %v2519_v18 = vadd.f32 %v2465_v6, %v2194_v2  ;;  %v2468_v41 = vadd.f32 %v4519_v63, %v2467_v13 }
 0x22f   : > { %2553 = vst.msk [vmem:[%s4533_s12 + $0xd0] sm:$0xff] %vm1689_vm4, %v2521_v38  ;;  %v2522_v7 = vadd.f32 %v2476_v30, %v2205_v53 }
 0x230   : > { %v2153_v52 = vpop.f32.mrb[28].mxu0  ;;  %2551 = vst.msk [vmem:[%s4533_s12 + $0xc0] sm:$0xff] %vm1689_vm4, %v2519_v18  ;;  %v2520_v60 = vadd.f32 %v2468_v41, %v2197_v14 }
 0x231   : > { %v2154_v16 = vadd.f32 %v4524_v47, %v2153_v52  ;;  %v2155_v34 = vpop.f32.mrb[29].mxu0  ;;  %2554 = vst.msk [vmem:[%s4533_s12 + $0xd8] sm:$0xff] %vm1689_vm4, %v2522_v7 }
 0x232   : > { %v2156_v40 = vpop.f32.mrb[30].mxu0  ;;  %2552 = vst.msk [vmem:[%s4533_s12 + $0xc8] sm:$0xff] %vm1689_vm4, %v2520_v60  ;;  %v2957_v59 = vpop.f32.mrb[44].mxu1 }
 0x233   : > { %v2509_v42 = vadd.f32 %v2425_v22, %v2154_v16  ;;  %v2157_v33 = vadd.f32 %v4524_v47, %v2156_v40  ;;  %v2158_v61 = vpop.f32.mrb[31].mxu0  ;;  %v2489_v5 = vadd.f32 %v2957_v59, %v4519_v63  ;;  %v2480_v48 = vpop.f32.mrb[45].mxu1 }
 0x234   : > { %v2481_v9 = vadd.f32 %v4519_v63, %v2480_v48  ;;  %v2958_v50 = vpop.f32.mrb[46].mxu1 }
 0x235   : > { %2541 = vst.msk [vmem:[%s4533_s12 + $0x70] sm:$0xff] %vm1689_vm4, %v2509_v42  ;;  %v2510_v51 = vadd.f32 %v2428_v46, %v2157_v33  ;;  %v2525_v35 = vadd.f32 %v2489_v5, %v2218_v0  ;;  %v2492_v62 = vadd.f32 %v2958_v50, %v4519_v63  ;;  %v2483_v27 = vpop.f32.mrb[47].mxu1 }
 0x236   : > { %v2523_v45 = vadd.f32 %v2481_v9, %v2210_v28  ;;  %v2484_v31 = vadd.f32 %v4519_v63, %v2483_v27 }
 0x237   : > { %2542 = vst.msk [vmem:[%s4533_s12 + $0x78] sm:$0xff] %vm1689_vm4, %v2510_v51  ;;  %2557 = vst.msk [vmem:[%s4533_s12 + $0xf0] sm:$0xff] %vm1689_vm4, %v2525_v35  ;;  %v2526_v25 = vadd.f32 %v2492_v62, %v2221_v37 }
 0x238   : > { %2555 = vst.msk [vmem:[%s4533_s12 + $0xe0] sm:$0xff] %vm1689_vm4, %v2523_v45  ;;  %v2524_v49 = vadd.f32 %v2484_v31, %v2213_v12 }
 0x239   : > { %2558 = vst.msk [vmem:[%s4533_s12 + $0xf8] sm:$0xff] %vm1689_vm4, %v2526_v25 }
 0x23a   : > { %2556 = vst.msk [vmem:[%s4533_s12 + $0xe8] sm:$0xff] %vm1689_vm4, %v2524_v49 }
 0x23d   : > { %v2161_v10 = vpop.f32.mrb[32].mxu0 }
 0x23e   : > { %v2162_v32 = vadd.f32 %v4524_v47, %v2161_v10  ;;  %v2163_v43 = vpop.f32.mrb[33].mxu0 }
 0x23f   : > { %v2164_v24 = vpop.f32.mrb[34].mxu0 }
 0x240   : > { %v2511_v63 = vadd.f32 %v4584_v58, %v2162_v32  ;;  %v2165_v44 = vadd.f32 %v4524_v47, %v2164_v24  ;;  %v2166_v3 = vpop.f32.mrb[35].mxu0 }
 0x242   : > { %2543 = vst.msk [vmem:[%s4533_s12 + $0x80] sm:$0xff] %vm1689_vm4, %v2511_v63  ;;  %v2512_v11 = vadd.f32 %v4590_v55, %v2165_v44 }
 0x244   : > { %2544 = vst.msk [vmem:[%s4533_s12 + $0x88] sm:$0xff] %vm1689_vm4, %v2512_v11 }
 0x24c   : > { %v2169_v8 = vpop.f32.mrb[36].mxu0 }
 0x24d   : > { %v2170_v21 = vadd.f32 %v4524_v47, %v2169_v8  ;;  %v2171_v19 = vpop.f32.mrb[37].mxu0 }
 0x24e   : > { %v2172_v29 = vpop.f32.mrb[38].mxu0 }
 0x24f   : > { %v2513_v26 = vadd.f32 %v4581_v1, %v2170_v21  ;;  %v2173_v58 = vadd.f32 %v4524_v47, %v2172_v29  ;;  %v2174_v56 = vpop.f32.mrb[39].mxu0 }
 0x251   : > { %2545 = vst.msk [vmem:[%s4533_s12 + $0x90] sm:$0xff] %vm1689_vm4, %v2513_v26  ;;  %v2514_v17 = vadd.f32 %v4587_v54, %v2173_v58 }
 0x253   : > { %2546 = vst.msk [vmem:[%s4533_s12 + $0x98] sm:$0xff] %vm1689_vm4, %v2514_v17 }
 0x259   : > { %v2177_v55 = vpop.f32.mrb[40].mxu0 }
 0x25a   : > { %v2178_v36 = vadd.f32 %v4524_v47, %v2177_v55  ;;  %v2179_v15 = vpop.f32.mrb[41].mxu0 }
 0x25b   : > { %v2180_v2 = vpop.f32.mrb[42].mxu0 }
 0x25c   : > { %v2515_v6 = vadd.f32 %v4600_v20, %v2178_v36  ;;  %v2181_v1 = vadd.f32 %v4524_v47, %v2180_v2  ;;  %v2182_v39 = vpop.f32.mrb[43].mxu0 }
 0x25e   : > { %2547 = vst.msk [vmem:[%s4533_s12 + $0xa0] sm:$0xff] %vm1689_vm4, %v2515_v6  ;;  %v2516_v53 = vadd.f32 %v4608_v4, %v2181_v1 }
 0x260   : > { %2548 = vst.msk [vmem:[%s4533_s12 + $0xa8] sm:$0xff] %vm1689_vm4, %v2516_v53 }
 0x268   : > { %v2185_v54 = vpop.f32.mrb[44].mxu0 }
 0x269   : > { %v2186_v38 = vadd.f32 %v4524_v47, %v2185_v54  ;;  %v2187_v30 = vpop.f32.mrb[45].mxu0 }
 0x26a   : > { %v2188_v13 = vpop.f32.mrb[46].mxu0 }
 0x26b   : > { %v2517_v14 = vadd.f32 %v4596_v57, %v2186_v38  ;;  %v2189_v18 = vadd.f32 %v4524_v47, %v2188_v13  ;;  %v2190_v41 = vpop.f32.mrb[47].mxu0 }
 0x26d   : > { %2549 = vst.msk [vmem:[%s4533_s12 + $0xb0] sm:$0xff] %vm1689_vm4, %v2517_v14  ;;  %v2518_v20 = vadd.f32 %v4603_v23, %v2189_v18 }
 0x26f   : > { %2550 = vst.msk [vmem:[%s4533_s12 + $0xb8] sm:$0xff] %vm1689_vm4, %v2518_v20 }
 0x270 PF: > { %s18_s29 = sadd.s32 1, %s3238_s29   ;;  %s4725_s27 = smov %s3234_s28 }
 0x271   : > { %p15_p5 = scmp.ge.s32.totalorder %s18_s29, 4   ;;  %s4726_s28 = smov %s4728_s30 }
 0x273   :  { %17 = sbr.rel (!%p15_p5) target bundleno = 2 (0x2), region = 104 }

// kernel: resnet_block_forward.4
= control target key start
LH: loop header
LB: loop body
LE: loop exit
PB: predicated region body
PF: predicated region fallthrough
CT: control target
= control target key end

     0   :  { %s3465_s24 = smov 0   ;;  %s3467_s25 = smov 0   ;;  %s4897_s0 = inlined_call_operand.vmem [shape: f32[2,18,18,8], index: 0, kind: input, shape index: {}]   ;;  %s4898_s1 = inlined_call_operand.vmem [shape: f32[2,1,8], index: 1, kind: input, shape index: {}]   ;;  %s4899_s2 = inlined_call_operand.vmem [shape: f32[2,1,8], index: 2, kind: input, shape index: {}]   ;;  %s4900_s3 = inlined_call_operand.vmem [shape: bf16[72,16], index: 3, kind: input, shape index: {}]   ;;  %s4901_s4 = inlined_call_operand.vmem [shape: f32[1,16], index: 4, kind: input, shape index: {}]   ;;  %s4902_s5 = inlined_call_operand.vmem [shape: bf16[2,18,18,16], index: 5, kind: output, shape index: {0}]   ;;  %s4903_s6 = inlined_call_operand.vmem [shape: f32[2,1,16], index: 6, kind: output, shape index: {1}]   ;;  %s4904_s7 = inlined_call_operand.vmem [shape: f32[2,1,16], index: 7, kind: output, shape index: {2}]  }
   0x1   :  { %s3469_s26 = smov 0  }
   0x2 LB: > { %s30_s27 = sadd.s32 1, %s3409_s25  ;;  %p2947_p0 = scmp.ge.s32.totalorder %s3413_s26, 1  ;;  %s3413_s26 = sphi %s3469_s26, %s18_s26   ;;  %s3409_s25 = sphi %s3467_s25, %s4920_s25   ;;  %s3405_s24 = sphi %s3465_s24, %s4919_s24  }
   0x3   : > { %p32_p1 = scmp.ge.s32.totalorder %s30_s27, 2  ;;  %p293_p2 = scmp.lt.s32.totalorder %s3413_s26, 3 }
   0x5   : > { %s4922_s27 = smov (%p32_p1, %s30_s27), 0  ;;  %p294_p3 = pnand %p2947_p0, %p293_p2 }
   0x7   : > { %297 = sbr.rel (%p294_p3) target bundleno = 663 (0x297), region = 40 }
   0xe   : > { %vm2469_vm0 = vcmask 1040384   ;;  %v4905_v0 = vmov 0.0|0.0   ;;  %v3416_v2 = vmov 0   ;;  %vm2470_vm1 = vsmask.f32 256  ;;  %p353_p4 = scmp.lt.s32.totalorder %s3405_s24, 1 }
   0xf   : > { %v3484_v1 = vrot.slane %v4905_v0, 1  ;;  %v3486_v3 = vrot.slane %v3416_v2, 1  ;;  %v2319_v4 = vrot.slane %v3416_v2, 7  ;;  %vm3488_vm2 = vmand %vm2469_vm0, %vm2470_vm1  ;;  %v4910_v5 = vmov 0  ;;  %s3417_s28 = smov 16   ;;  %s3418_s29 = smov 8  }
  0x10   : > { %v4911_v5 = vsel %vm3488_vm2, 4294967295, %v4910_v5  ;;  %s4924_s24 = smov (!%p353_p4, %s3405_s24), 1  ;;  %vm2196_vm3 = vcmask 122880   ;;  %vm2693_vm4 = vcmask 125952   ;;  %s3419_s21 = smov 24   ;;  %vm1283_vm7 = vcmask 1046528  }
  0x11   : > { %4912 = vst [vmem:[#allocation2_spill] sm:$0xff] %v4911_v5  ;;  %1398 = vrot.lane.b32.xlu1 %v3484_v1, %s3417_s28  ;;  %v2472_v6 = vsel %vm3488_vm2, 0, %v2319_v4  ;;  %v2489_v7 = vsel %vm3488_vm2, %v2319_v4, 0  ;;  %1366 = vrot.lane.b32.xlu0 %v3486_v3, %s3418_s29  ;;  %s3157_s30 = smul.u32 216, %s4924_s24  ;;  %s3507_s10 = scalar_lea.vmem %s4898_s1, %s4924_s24  ;;  %vm1058_vm8 = vsmask.f32 7424 }
  0x12   : > { %v3028_v8 = vcombine.low %v2472_v6, %v2472_v6  ;;  %v3029_v9 = vcombine.high %v2472_v6, %v2472_v6  ;;  %v3030_v10 = vcombine.low %v2489_v7, %v2489_v7  ;;  %s3156_s11 = smul.u32 432, %s4924_s24  ;;  %s3514_s14 = scalar_lea.vmem %s4899_s2, %s4924_s24  ;;  %v3522_v11 = vld [vmem:[%s3507_s10] ss:$0 sm:$0xff]  ;;  %vm1962_vm9 = vcmask 1043456  }
  0x13   : > { %s3519_s17 = scalar_lea.vmem %s4902_s5, %s3157_s30  ;;  %v3542_v12 = vld [vmem:[%s3514_s14] ss:$0 sm:$0xff]  ;;  %s3420_s22 = smov 48   ;;  %vm1622_vm10 = vcmask 64512   ;;  %vm1655_vm11 = vcmask 130048   ;;  %vm1688_vm12 = vcmask 195584  }
  0x14   : > { %2694 = vst.msk [vmem:[%s3519_s17] sm:$0xf] %vm2693_vm4, %v3028_v8  ;;  %2695 = vst.msk [vmem:[%s3519_s17 + $0x4] sm:$0xf] %vm2693_vm4, %v3029_v9  ;;  %s3539_s20 = scalar_lea.vmem %s4897_s0, %s3156_s11  ;;  %s3421_s8 = smov 40   ;;  %vm1721_vm13 = vcmask 261120  }
  0x15   : > { %2696 = vst.msk [vmem:[%s3519_s17 + $0x8] sm:$0x1] %vm2196_vm3, %v3030_v10  ;;  %2747 = vst.msk [vmem:[%s3519_s17 + $0xd4] sm:$0x1] %vm2196_vm3, %v3030_v10  ;;  %v398_v13 = vld [vmem:[%s3539_s20 + $0x30] sm:$0xff]  ;;  %v399_v14 = vld [vmem:[%s3539_s20 + $0x38] sm:$0xff] }
  0x16   : > { %2745 = vst.msk [vmem:[%s3519_s17 + $0xcc] sm:$0xf] %vm2693_vm4, %v3028_v8  ;;  %2746 = vst.msk [vmem:[%s3519_s17 + $0xd0] sm:$0xf] %vm2693_vm4, %v3029_v9  ;;  %v395_v15 = vld [vmem:[%s3539_s20 + $0x18] sm:$0xff]  ;;  %v460_v16 = vmul.f32 %v3522_v11, %v398_v13  ;;  %v461_v17 = vmul.f32 %v3522_v11, %v399_v14  ;;  %v396_v18 = vld [vmem:[%s3539_s20 + $0x20] sm:$0xff] }
  0x17   : > { %v457_v19 = vmul.f32 %v3522_v11, %v395_v15  ;;  %v401_v20 = vld [vmem:[%s3539_s20 + $0x48] sm:$0xff]  ;;  %v402_v21 = vld [vmem:[%s3539_s20 + $0x50] sm:$0xff]  ;;  %v458_v22 = vmul.f32 %v3522_v11, %v396_v18  ;;  %v404_v25 = vld [vmem:[%s3539_s20 + $0x60] sm:$0xff]  ;;  %s3422_s12 = smov 64   ;;  %s3423_s30 = smov 32   ;;  %vm1754_vm14 = vcmask 326656  }
  0x18   : > { %v463_v23 = vmul.f32 %v3522_v11, %v401_v20  ;;  %v464_v24 = vmul.f32 %v3522_v11, %v402_v21  ;;  %v405_v26 = vld [vmem:[%s3539_s20 + $0x68] sm:$0xff]  ;;  %v3559_v27 = vadd.f32 %v3542_v12, %v460_v16  ;;  %v3562_v28 = vadd.f32 %v3542_v12, %v461_v17  ;;  %v400_v36 = vld [vmem:[%s3539_s20 + $0x40] sm:$0x3]  ;;  %v403_v37 = vld [vmem:[%s3539_s20 + $0x58] sm:$0x3]  ;;  %s3424_s9 = smov 56  }
  0x19   : > { %v3565_v29 = vadd.f32 %v3542_v12, %v457_v19  ;;  %v466_v30 = vmul.f32 %v3522_v11, %v404_v25  ;;  %v397_v31 = vld [vmem:[%s3539_s20 + $0x28] sm:$0x3]  ;;  %v3570_v32 = vadd.f32 %v3542_v12, %v458_v22  ;;  %v467_v35 = vmul.f32 %v3522_v11, %v405_v26  ;;  %v406_v38 = vld [vmem:[%s3539_s20 + $0x70] sm:$0x3]  ;;  %v407_v46 = vld [vmem:[%s3539_s20 + $0x78] sm:$0xff] }
  0x1a   : > { %v3573_v33 = vadd.f32 %v3542_v12, %v463_v23  ;;  %v3576_v34 = vadd.f32 %v3542_v12, %v464_v24  ;;  %v2958_v39 = vmul.f32 -1.442695, %v3559_v27  ;;  %v2959_v40 = vmul.f32 -1.442695, %v3562_v28  ;;  %v408_v19 = vld [vmem:[%s3539_s20 + $0x80] sm:$0xff]  ;;  %v438_v5 = vld [vmem:[%s3539_s20 + $0x170] sm:$0xff] }
  0x1b   : > { %v2955_v41 = vmul.f32 -1.442695, %v3565_v29  ;;  %v3586_v42 = vadd.f32 %v3542_v12, %v466_v30  ;;  %v2956_v43 = vmul.f32 -1.442695, %v3570_v32  ;;  %v3591_v45 = vadd.f32 %v3542_v12, %v467_v35  ;;  %v409_v22 = vld [vmem:[%s3539_s20 + $0x88] sm:$0x3] }
  0x1c   : > { %v2961_v44 = vmul.f32 -1.442695, %v3573_v33  ;;  %3197 = vpow2.f32 %v2958_v39  ;;  %v2962_v47 = vmul.f32 -1.442695, %v3576_v34  ;;  %v459_v48 = vmul.f32 %v3522_v11, %v397_v31 }
  0x1d   : > { %v462_v49 = vmul.f32 %v3522_v11, %v400_v36  ;;  %3199 = vpow2.f32 %v2959_v40  ;;  %v2964_v50 = vmul.f32 -1.442695, %v3586_v42  ;;  %v465_v51 = vmul.f32 %v3522_v11, %v403_v37 }
  0x1e   : > { %v468_v52 = vmul.f32 %v3522_v11, %v406_v38  ;;  %3201 = vpow2.f32 %v2955_v41  ;;  %v3601_v53 = vadd.f32 %v3542_v12, %v459_v48  ;;  %v469_v55 = vmul.f32 %v3522_v11, %v407_v46 }
  0x1f   : > { %v3604_v54 = vadd.f32 %v3542_v12, %v462_v49  ;;  %3203 = vpow2.f32 %v2956_v43  ;;  %v2965_v56 = vmul.f32 -1.442695, %v3591_v45  ;;  %v3609_v57 = vadd.f32 %v3542_v12, %v465_v51 }
  0x20   : > { %v3612_v58 = vadd.f32 %v3542_v12, %v468_v52  ;;  %3205 = vpow2.f32 %v2961_v44  ;;  %v2957_v59 = vmul.f32 -1.442695, %v3601_v53  ;;  %v3616_v60 = vadd.f32 %v3542_v12, %v469_v55 }
  0x21   : > { %3207 = vpow2.f32 %v2962_v47  ;;  %v2960_v61 = vmul.f32 -1.442695, %v3604_v54  ;;  %v2963_v62 = vmul.f32 -1.442695, %v3609_v57  ;;  %v946_v17 = vlaneseq }
  0x22   : > { %3209 = vpow2.f32 %v2964_v50  ;;  %v2966_v63 = vmul.f32 -1.442695, %v3612_v58  ;;  %v2967_v2 = vmul.f32 -1.442695, %v3616_v60  ;;  %v470_v30 = vmul.f32 %v3522_v11, %v408_v19 }
  0x23   : > { %3211 = vpow2.f32 %v2965_v56  ;;  %v3625_v35 = vshrl.u32 %v946_v17, 7  ;;  %v471_v37 = vmul.f32 %v3522_v11, %v409_v22  ;;  %v412_v22 = vld [vmem:[%s3539_s20 + $0xa0] sm:$0x3]  ;;  %vm1787_vm15 = vcmask 392192  }
  0x24   : > { %3213 = vpow2.f32 %v2957_v59  ;;  %v3631_v46 = vadd.f32 %v3542_v12, %v470_v30  ;;  %vm1820_vm0 = vcmask 457728   ;;  %vm1853_vm1 = vcmask 523264  }
  0x25   : > { %3215 = vpow2.f32 %v2960_v61  ;;  %vm950_vm5 = vcmp.ge.s32.totalorder %v3625_v35, 1  ;;  %v3635_v48 = vadd.f32 %v3542_v12, %v471_v37 }
  0x26   : > { %v3198_v4 = vpop.eup %3197  ;;  %3217 = vpow2.f32 %v2963_v62  ;;  %v2968_v61 = vmul.f32 -1.442695, %v3631_v46 }
  0x27   : > { %v3200_v6 = vpop.eup %3199  ;;  %v736_v7 = vadd.f32 1.0, %v3198_v4  ;;  %3219 = vpow2.f32 %v2966_v63  ;;  %v2969_v4 = vmul.f32 -1.442695, %v3635_v48 }
  0x28   : > { %v3202_v8 = vpop.eup %3201  ;;  %v737_v9 = vadd.f32 1.0, %v3200_v6  ;;  %3221 = vpow2.f32 %v2967_v2 }
  0x29   : > { %v3204_v10 = vpop.eup %3203  ;;  %3223 = vrcp.f32 %v736_v7  ;;  %v733_v13 = vadd.f32 1.0, %v3202_v8 }
  0x2a   : > { %v3206_v14 = vpop.eup %3205  ;;  %3225 = vrcp.f32 %v737_v9  ;;  %v734_v15 = vadd.f32 1.0, %v3204_v10  ;;  %v410_v9 = vld [vmem:[%s3539_s20 + $0x90] sm:$0xff] }
  0x2b   : > { %v3208_v16 = vpop.eup %3207  ;;  %3227 = vrcp.f32 %v733_v13  ;;  %v739_v18 = vadd.f32 1.0, %v3206_v14  ;;  %v472_v19 = vmul.f32 %v3522_v11, %v410_v9 }
  0x2c   : > { %v3210_v20 = vpop.eup %3209  ;;  %3229 = vrcp.f32 %v734_v15  ;;  %v740_v21 = vadd.f32 1.0, %v3208_v16 }
  0x2d   : > { %v3212_v23 = vpop.eup %3211  ;;  %3231 = vrcp.f32 %v739_v18  ;;  %v742_v24 = vadd.f32 1.0, %v3210_v20 }
  0x2e   : > { %v3214_v25 = vpop.eup %3213  ;;  %3233 = vrcp.f32 %v740_v21  ;;  %v743_v26 = vadd.f32 1.0, %v3212_v23 }
  0x2f   : > { %v3216_v31 = vpop.eup %3215  ;;  %3235 = vrcp.f32 %v742_v24  ;;  %v735_v36 = vadd.f32 1.0, %v3214_v25 }
  0x30   : > { %v3218_v38 = vpop.eup %3217  ;;  %3237 = vrcp.f32 %v743_v26  ;;  %v738_v39 = vadd.f32 1.0, %v3216_v31 }
  0x31   : > { %v3220_v40 = vpop.eup %3219  ;;  %3239 = vrcp.f32 %v735_v36  ;;  %v741_v41 = vadd.f32 1.0, %v3218_v38  ;;  %v474_v38 = vmul.f32 %v3522_v11, %v412_v22 }
  0x32   : > { %v3628_v43 = vpop.eup %3221  ;;  %3241 = vrcp.f32 %v738_v39  ;;  %v744_v44 = vadd.f32 1.0, %v3220_v40 }
  0x33   : > { %v3224_v47 = vpop.eup %3223  ;;  %3243 = vrcp.f32 %v741_v41  ;;  %v745_v40 = vadd.f32 1.0, %v3628_v43  ;;  %v3192_v43 = vld [vmem:[%s4900_s3] sm:$0xff]  }
  0x34   : > { %v3226_v49 = vpop.eup %3225  ;;  %v898_v50 = vmul.f32 %v3224_v47, %v3559_v27  ;;  %3245 = vrcp.f32 %v744_v44  ;;  %v3647_v27 = vadd.s32 16, %v3625_v35  ;;  %3102 = vmatprep.subr.bf16.mxu0 %v3192_v43  ;;  %3144 = vmatprep.subr.bf16.mxu1 %v3192_v43 }
  0x35   : > { %v3228_v51 = vpop.eup %3227  ;;  %v899_v52 = vmul.f32 %v3226_v49, %v3562_v28  ;;  %3247 = vpow2.f32 %v2968_v61  ;;  %3103 = vmatpush3.bf16.msra.mxu0 %v3192_v43  ;;  %3149 = vmatpush3.bf16.msra.mxu1 %v3192_v43 }
  0x36   : > { %v3230_v55 = vpop.eup %3229  ;;  %v974_v56 = vsel %vm950_vm5, %v898_v50, 0.0  ;;  %v895_v59 = vmul.f32 %v3228_v51, %v3565_v29  ;;  %vm961_vm6 = vcmp.le.s32.totalorder %v3647_v27, 16  ;;  %3249 = vpow2.f32 %v2969_v4 }
  0x37   : > { %v3232_v62 = vpop.eup %3231  ;;  %v3643_v63 = vpack.c.bf16 %v899_v52, %v974_v56  ;;  %v896_v2 = vmul.f32 %v3230_v55, %v3570_v32  ;;  %v3720_v55 = vadd.f32 %v3542_v12, %v474_v38  ;;  %v413_v56 = vld [vmem:[%s3539_s20 + $0xa8] sm:$0xff]  ;;  %3251 = vrcp.f32 %v745_v40  ;;  %v3195_v38 = vld [vmem:[%s4900_s3 + $0x18] sm:$0xff]  }
  0x38   : > { %v3234_v28 = vpop.eup %3233  ;;  %v971_v6 = vsel %vm950_vm5, %v895_v59, 0.0  ;;  %v901_v7 = vmul.f32 %v3232_v62, %v3573_v33 }
  0x39   : > { %v3236_v8 = vpop.eup %3235  ;;  %1432 = vrot.lane.b32.xlu1 %v3643_v63, %s3419_s21  ;;  %v3655_v29 = vpack.c.bf16 %v896_v2, %v971_v6  ;;  %v902_v32 = vmul.f32 %v3234_v28, %v3576_v34  ;;  %v411_v34 = vld [vmem:[%s3539_s20 + $0x98] sm:$0xff]  ;;  %v1086_v61 = vshll.u32 %v3643_v63, 16  ;;  %v1084_v9 = vshrl.u32 %v3643_v63, 16 }
  0x3a   : > { %v3238_v10 = vpop.eup %3237  ;;  %v977_v13 = vsel %vm950_vm5, %v901_v7, 0.0  ;;  %v904_v14 = vmul.f32 %v3236_v8, %v3586_v42  ;;  %v475_v8 = vmul.f32 %v3522_v11, %v413_v56 }
  0x3b   : > { %v3240_v15 = vpop.eup %3239  ;;  %1430 = vrot.lane.b32.xlu0 %v3655_v29, %s3419_s21  ;;  %v3664_v33 = vpack.c.bf16 %v902_v32, %v977_v13  ;;  %v905_v16 = vmul.f32 %v3238_v10, %v3591_v45  ;;  %v1287_v30 = vrot.slane %v3655_v29, 1  ;;  %v3193_v32 = vld [vmem:[%s4900_s3 + $0x8] sm:$0xff]   ;;  %v2972_v13 = vmul.f32 -1.442695, %v3720_v55 }
  0x3c   : > { %v3242_v17 = vpop.eup %3241  ;;  %v980_v18 = vsel %vm950_vm5, %v904_v14, 0.0  ;;  %v897_v42 = vmul.f32 %v3240_v15, %v3601_v53  ;;  %v473_v53 = vmul.f32 %v3522_v11, %v411_v34  ;;  %v1088_v15 = vrot.slane %v1086_v61, 1  ;;  %v414_v34 = vld [vmem:[%s3539_s20 + $0xb0] sm:$0xff]  ;;  %3104 = vmatprep.subr.bf16.mxu0 %v3193_v32  ;;  %3145 = vmatprep.subr.bf16.mxu1 %v3193_v32 }
  0x3d   : > { %v3244_v20 = vpop.eup %3243  ;;  %1528 = vrot.lane.b32.xlu1 %v3664_v33, %s3420_s22  ;;  %v3675_v21 = vpack.c.bf16 %v905_v16, %v980_v18  ;;  %v900_v45 = vmul.f32 %v3242_v17, %v3604_v54  ;;  %v1293_v2 = vrot.slane %v3664_v33, 1  ;;  %v1098_v16 = vshll.u32 %v3664_v33, 16  ;;  %3105 = vmatpush3.bf16.msra.mxu0 %v3193_v32 }
  0x3e   : > { %v3246_v23 = vpop.eup %3245  ;;  %v973_v24 = vsel %vm961_vm6, %v897_v42, 0.0  ;;  %v903_v25 = vmul.f32 %v3244_v20, %v3609_v57  ;;  %v3696_v57 = vadd.f32 %v3542_v12, %v472_v19  ;;  %v3713_v50 = vadd.f32 %v3542_v12, %v473_v53  ;;  %v415_v19 = vld [vmem:[%s3539_s20 + $0xb8] sm:$0x3]  ;;  %v3194_v20 = vld [vmem:[%s4900_s3 + $0x10] sm:$0xff]   ;;  %3150 = vmatpush3.bf16.msra.mxu1 %v3193_v32 }
  0x3f   : > { %1526 = vrot.lane.b32.xlu0 %v3643_v63, %s3420_s22  ;;  %v3685_v26 = vpack.c.bf16 %v973_v24, %v973_v24  ;;  %v976_v54 = vsel %vm961_vm6, %v900_v45, 0.0  ;;  %v906_v31 = vmul.f32 %v3246_v23, %v3612_v58  ;;  %v1290_v58 = vrot.slane %v3643_v63, 1  ;;  %v3248_v51 = vpop.eup %3247  ;;  %3106 = vmatprep.subr.bf16.mxu0 %v3194_v20 }
  0x40   : > { %v3691_v36 = vpack.c.bf16 %v976_v54, %v976_v54  ;;  %v979_v37 = vsel %vm961_vm6, %v903_v25, 0.0  ;;  %v2970_v52 = vmul.f32 -1.442695, %v3696_v57  ;;  %v3250_v59 = vpop.eup %3249  ;;  %v746_v6 = vadd.f32 1.0, %v3248_v51  ;;  %3146 = vmatprep.subr.bf16.mxu1 %v3194_v20 }
  0x41   : > { %1436 = vrot.lane.b32.xlu1 %v3675_v21, %s3419_s21  ;;  %v1288_v39 = vrot.slane %v3685_v26, 1  ;;  %v3705_v44 = vpack.c.bf16 %v979_v37, %v979_v37  ;;  %v982_v49 = vsel %vm961_vm6, %v906_v31, 0.0  ;;  %v2971_v7 = vmul.f32 -1.442695, %v3713_v50  ;;  %3107 = vmatpush3.bf16.msra.mxu0 %v3194_v20  ;;  %v3252_v37 = vpop.eup %3251 }
  0x42   : > { %v1291_v41 = vrot.slane %v3691_v36, 1  ;;  %v3730_v28 = vpack.c.bf16 %v982_v49, %v982_v49  ;;  %v747_v10 = vadd.f32 1.0, %v3250_v59  ;;  %3253 = vpow2.f32 %v2970_v52  ;;  %3151 = vmatpush3.bf16.msra.mxu1 %v3194_v20  ;;  %3108 = vmatprep.subr.bf16.mxu0 %v3195_v38  ;;  %v3196_v59 = vld [vmem:[%s4900_s3 + $0x20] ss:$0 sps:$4 sm:$0xff]  }
  0x43   : > { %1434 = vrot.lane.b32.xlu0 %v3664_v33, %s3419_s21  ;;  %v1289_v47 = vsel %vm1283_vm7, %v1287_v30, %v1288_v39  ;;  %v1294_v4 = vrot.slane %v3705_v44, 1  ;;  %v1296_v14 = vrot.slane %v3675_v21, 1  ;;  %3255 = vrcp.f32 %v746_v6  ;;  %3147 = vmatprep.subr.bf16.mxu1 %v3195_v38 }
  0x44   : > { %v3726_v62 = vsel %vm1283_vm7, %v1290_v58, %v1291_v41  ;;  %v1297_v18 = vrot.slane %v3730_v28, 1  ;;  %v1091_v42 = vshll.u32 %v3691_v36, 16  ;;  %3257 = vrcp.f32 %v747_v10 }
  0x45   : > { %1400 = vrot.lane.b32.xlu1 %v1289_v47, %s3417_s28  ;;  %v3746_v17 = vsel %vm1283_vm7, %v1293_v2, %v1294_v4  ;;  %v1074_v45 = vshll.u32 %v3655_v29, 16  ;;  %3259 = vpow2.f32 %v2971_v7  ;;  %v476_v22 = vmul.f32 %v3522_v11, %v414_v34  ;;  %3109 = vmatpush3.bf16.msra.mxu0 %v3195_v38 }
  0x46   : > { %v3759_v23 = vadd.f32 %v3542_v12, %v475_v8  ;;  %v1089_v24 = vor.u32 %v1088_v15, %v1084_v9  ;;  %v1096_v25 = vshrl.u32 %v3664_v33, 16  ;;  %3261 = vpow2.f32 %v2972_v13  ;;  %3152 = vmatpush3.bf16.msra.mxu1 %v3195_v38  ;;  %3154 = vmatprep.subr.msk.bf16.mxu0 %vm1962_vm9, %v3196_v59 }
  0x47   : > { %1494 = vrot.lane.b32.xlu0 %v1289_v47, %s3421_s8  ;;  %v477_v53 = vmul.f32 %v3522_v11, %v415_v19  ;;  %v3766_v30 = vsel %vm1283_vm7, %v1296_v14, %v1297_v18  ;;  %v1093_v54 = vrot.slane %v1091_v42, 1  ;;  %v1100_v31 = vrot.slane %v1098_v16, 1  ;;  %3155 = vmatprep.subr.msk.bf16.mxu1 %vm1962_vm9, %v3196_v59  ;;  %v416_v42 = vld [vmem:[%s3539_s20 + $0xc0] sm:$0xff] }
  0x48   : > { %v1103_v36 = vshll.u32 %v3705_v44, 16  ;;  %v1072_v39 = vshrl.u32 %v3655_v29, 16  ;;  %v1076_v40 = vrot.slane %v1074_v45, 1  ;;  %v1079_v58 = vshll.u32 %v3685_v26, 16  ;;  %v417_v45 = vld [vmem:[%s3539_s20 + $0xc8] sm:$0xff] }
  0x49   : > { %1496 = vrot.lane.b32.xlu1 %v3726_v62, %s3421_s8  ;;  %v3777_v41 = vadd.f32 %v3542_v12, %v476_v22  ;;  %v2973_v44 = vmul.f32 -1.442695, %v3759_v23  ;;  %v3783_v47 = vadd.f32 %v3542_v12, %v477_v53  ;;  %v3786_v43 = vsel %vm1058_vm8, %v1089_v24, %v1093_v54 }
  0x4a   : > { %v1101_v51 = vor.u32 %v1100_v31, %v1096_v25  ;;  %v1105_v52 = vrot.slane %v1103_v36, 1  ;;  %v907_v56 = vmul.f32 %v3252_v37, %v3616_v60  ;;  %v1077_v2 = vor.u32 %v1076_v40, %v1072_v39  ;;  %v418_v25 = vld [vmem:[%s3539_s20 + $0xd0] sm:$0x3] }
  0x4b   : > { %1590 = vrot.lane.b32.xlu0 %v3726_v62, %s3422_s12  ;;  %v1081_v4 = vrot.slane %v1079_v58, 1  ;;  %v2974_v6 = vmul.f32 -1.442695, %v3777_v41  ;;  %v1110_v7 = vshll.u32 %v3675_v21, 16  ;;  %3263 = vpow2.f32 %v2973_v44 }
  0x4c   : > { %v3254_v49 = vpop.eup %3253  ;;  %v2975_v60 = vmul.f32 -1.442695, %v3783_v47  ;;  %v1106_v32 = vsel %vm1058_vm8, %v1101_v51, %v1105_v52  ;;  %v983_v14 = vsel %vm950_vm5, %v907_v56, 0.0  ;;  %v1115_v18 = vshll.u32 %v3730_v28, 16 }
  0x4d   : > { %1404 = vrot.lane.b32.xlu1 %v3746_v17, %s3417_s28  ;;  %v3256_v26 = vpop.eup %3255  ;;  %v748_v10 = vadd.f32 1.0, %v3254_v49  ;;  %v1082_v16 = vsel %vm1058_vm8, %v1077_v2, %v1081_v4  ;;  %3265 = vpow2.f32 %v2974_v6  ;;  %v1112_v34 = vrot.slane %v1110_v7, 1  ;;  %v419_v4 = vld [vmem:[%s3539_s20 + $0xd8] sm:$0xff] }
  0x4e   : > { %v3258_v61 = vpop.eup %3257  ;;  %v908_v9 = vmul.f32 %v3256_v26, %v3631_v46  ;;  %v1108_v46 = vshrl.u32 %v3675_v21, 16  ;;  %3267 = vpow2.f32 %v2975_v60  ;;  %v478_v22 = vmul.f32 %v3522_v11, %v416_v42 }
  0x4f   : > { %1592 = vrot.lane.b32.xlu0 %v3746_v17, %s3422_s12  ;;  %v3260_v8 = vpop.eup %3259  ;;  %v909_v15 = vmul.f32 %v3258_v61, %v3635_v48  ;;  %3269 = vrcp.f32 %v748_v10  ;;  %v1117_v28 = vrot.slane %v1115_v18, 1  ;;  %v479_v36 = vmul.f32 %v3522_v11, %v417_v45 }
  0x50   : > { %v3262_v13 = vpop.eup %3261  ;;  %v3814_v19 = vpack.c.bf16 %v908_v9, %v983_v14  ;;  %v1113_v24 = vor.u32 %v1112_v34, %v1108_v46  ;;  %v3830_v37 = vadd.f32 %v3542_v12, %v478_v22  ;;  %v480_v38 = vmul.f32 %v3522_v11, %v418_v25  ;;  %v420_v14 = vld [vmem:[%s3539_s20 + $0xe0] sm:$0xff] }
  0x51   : > { %1500 = vrot.lane.b32.xlu1 %v3766_v30, %s3421_s8  ;;  %v750_v48 = vadd.f32 1.0, %v3262_v13  ;;  %v985_v20 = vsel %vm961_vm6, %v909_v15, 0.0  ;;  %v3840_v26 = vadd.f32 %v3542_v12, %v479_v36  ;;  %v481_v13 = vmul.f32 %v3522_v11, %v419_v4 }
  0x52   : > { %v3824_v53 = vpack.c.bf16 %v985_v20, %v985_v20  ;;  %v1122_v54 = vshll.u32 %v3814_v19, 16  ;;  %v1118_v39 = vsel %vm1058_vm8, %v1113_v24, %v1117_v28  ;;  %v1120_v58 = vshrl.u32 %v3814_v19, 16 }
  0x53   : > { %1402 = vrot.lane.b32.xlu0 %v3726_v62, %s3417_s28  ;;  %v1964_v62 = vsel %vm1962_vm9, %v3196_v59, 0  ;;  %v2976_v59 = vmul.f32 -1.442695, %v3830_v37  ;;  %v3844_v61 = vadd.f32 %v3542_v12, %v480_v38  ;;  %v482_v34 = vmul.f32 %v3522_v11, %v420_v14 }
  0x54   : > { %3111 = vmatpush3.bf16.msra.mxu0 %v1964_v62  ;;  %3153 = vmatpush3.bf16.msra.mxu1 %v1964_v62  ;;  %v1124_v44 = vrot.slane %v1122_v54, 1  ;;  %v1127_v49 = vshll.u32 %v3824_v53, 16  ;;  %v3868_v18 = vadd.f32 %v3542_v12, %v481_v13  ;;  %v1300_v20 = vrot.slane %v3824_v53, 1 }
  0x55   : > { %1464 = vrot.lane.b32.xlu1 %v3786_v43, %s3423_s30  ;;  %v3264_v31 = vpop.eup %3263  ;;  %v2978_v10 = vmul.f32 -1.442695, %v3844_v61  ;;  %v3881_v45 = vadd.f32 %v3542_v12, %v482_v34  ;;  %vm1929_vm9 = vcmask 588800  }
  0x56   : > { %v751_v51 = vadd.f32 1.0, %v3264_v31  ;;  %v1125_v6 = vor.u32 %v1124_v44, %v1120_v58  ;;  %v1129_v7 = vrot.slane %v1127_v49, 1  ;;  %v2979_v22 = vmul.f32 -1.442695, %v3868_v18 }
  0x57   : > { %1498 = vrot.lane.b32.xlu0 %v3746_v17, %s3421_s8  ;;  %v749_v17 = vadd.f32 1.0, %v3260_v8  ;;  %v3266_v40 = vpop.eup %3265  ;;  %v2977_v8 = vmul.f32 -1.442695, %v3840_v26 }
  0x58   : > { %v3268_v52 = vpop.eup %3267  ;;  %v752_v2 = vadd.f32 1.0, %v3266_v40  ;;  %v3857_v15 = vsel %vm1058_vm8, %v1125_v6, %v1129_v7  ;;  %v422_v6 = vld [vmem:[%s3539_s20 + $0xf0] sm:$0xff] }
  0x59   : > { %1560 = vrot.lane.b32.xlu1 %v1106_v32, %s3424_s9  ;;  %3271 = vrcp.f32 %v749_v17  ;;  %v3270_v56 = vpop.eup %3269  ;;  %v753_v60 = vadd.f32 1.0, %v3268_v52 }
  0x5a   : > { %3273 = vrcp.f32 %v750_v48  ;;  %v910_v62 = vmul.f32 %v3270_v56, %v3696_v57  ;;  %v421_v57 = vld [vmem:[%s3539_s20 + $0xe8] sm:$0x3]  ;;  %v1299_v48 = vrot.slane %v3814_v19, 1 }
  0x5b   : > { %1368 = vrot.lane.b32.xlu0 %v1082_v16, %s3418_s29  ;;  %3275 = vrcp.f32 %v751_v51 }
  0x5c   : > { %3277 = vpow2.f32 %v2976_v59  ;;  %v3893_v38 = vsel %vm1283_vm7, %v1299_v48, %v1300_v20 }
  0x5d   : > { %1370 = vrot.lane.b32.xlu1 %v3786_v43, %s3418_s29  ;;  %3279 = vrcp.f32 %v752_v2 }
  0x5e   : > { %3281 = vrcp.f32 %v753_v60 }
  0x5f   : > { %1462 = vrot.lane.b32.xlu0 %v1082_v16, %s3423_s30  ;;  %v986_v16 = vsel %vm950_vm5, %v910_v62, 0.0  ;;  %3283 = vpow2.f32 %v2977_v8  ;;  %v484_v62 = vmul.f32 %v3522_v11, %v422_v6  ;;  %v423_v8 = vld [vmem:[%s3539_s20 + $0xf8] sm:$0xff] }
  0x60   : > { %3285 = vpow2.f32 %v2978_v10 }
  0x61   : > { %1372 = vrot.lane.b32.xlu1 %v1106_v32, %s3418_s29  ;;  %3287 = vpow2.f32 %v2979_v22 }
  0x63   : > { %1558 = vrot.lane.b32.xlu0 %v3786_v43, %s3424_s9  ;;  %v3272_v43 = vpop.eup %3271 }
  0x64   : > { %v3274_v9 = vpop.eup %3273 }
  0x65   : > { %1468 = vrot.lane.b32.xlu1 %v1118_v39, %s3423_s30  ;;  %v912_v46 = vmul.f32 %v3274_v9, %v3720_v55  ;;  %v3276_v55 = vpop.eup %3275 }
  0x66   : > { %v3278_v28 = vpop.eup %3277  ;;  %v913_v53 = vmul.f32 %v3276_v55, %v3759_v23 }
  0x67   : > { %1466 = vrot.lane.b32.xlu0 %v1106_v32, %s3423_s30  ;;  %v911_v32 = vmul.f32 %v3272_v43, %v3713_v50  ;;  %v483_v50 = vmul.f32 %v3522_v11, %v421_v57  ;;  %v988_v42 = vsel %vm961_vm6, %v912_v46, 0.0  ;;  %v3280_v31 = vpop.eup %3279  ;;  %v754_v56 = vadd.f32 1.0, %v3278_v28  ;;  %v424_v57 = vld [vmem:[%s3539_s20 + $0x100] sm:$0x3] }
  0x68   : > { %v1035_v25 = vpack.c.bf16 %v988_v42, %v988_v42  ;;  %v3282_v36 = vpop.eup %3281  ;;  %v914_v23 = vmul.f32 %v3280_v31, %v3777_v41  ;;  %v989_v59 = vsel %vm950_vm5, %v913_v53, 0.0  ;;  %v3929_v46 = vadd.f32 %v3542_v12, %v484_v62 }
  0x69   : > { %1532 = vrot.lane.b32.xlu1 %v3814_v19, %s3420_s22  ;;  %v3873_v17 = vpack.c.bf16 %v911_v32, %v986_v16  ;;  %v3886_v24 = vadd.f32 %v3542_v12, %v483_v50  ;;  %v3284_v40 = vpop.eup %3283  ;;  %v915_v2 = vmul.f32 %v3282_v36, %v3783_v47  ;;  %v485_v16 = vmul.f32 %v3522_v11, %v423_v8 }
  0x6a   : > { %v3286_v49 = vpop.eup %3285  ;;  %v1139_v52 = vshll.u32 %v1035_v25, 16  ;;  %v755_v4 = vadd.f32 1.0, %v3284_v40  ;;  %v3909_v43 = vpack.c.bf16 %v914_v23, %v989_v59  ;;  %v1303_v14 = vrot.slane %v1035_v25, 1  ;;  %v426_v23 = vld [vmem:[%s3539_s20 + $0x110] sm:$0xff] }
  0x6b   : > { %1530 = vrot.lane.b32.xlu0 %v3675_v21, %s3420_s22  ;;  %v1134_v54 = vshll.u32 %v3873_v17, 16  ;;  %v1132_v58 = vshrl.u32 %v3873_v17, 16  ;;  %v2981_v44 = vmul.f32 -1.442695, %v3886_v24  ;;  %v756_v7 = vadd.f32 1.0, %v3286_v49  ;;  %v3288_v10 = vpop.eup %3287 }
  0x6c   : > { %v1141_v41 = vrot.slane %v1139_v52, 1  ;;  %v991_v47 = vsel %vm961_vm6, %v915_v2, 0.0  ;;  %v1302_v9 = vrot.slane %v3873_v17, 1  ;;  %v757_v34 = vadd.f32 1.0, %v3288_v10 }
  0x6d   : > { %1564 = vrot.lane.b32.xlu1 %v3857_v15, %s3424_s9  ;;  %v1136_v51 = vrot.slane %v1134_v54, 1  ;;  %v3921_v32 = vpack.c.bf16 %v991_v47, %v991_v47  ;;  %v486_v50 = vmul.f32 %v3522_v11, %v424_v57  ;;  %v1144_v48 = vshrl.u32 %v3909_v43, 16 }
  0x6e   : > { %v3934_v55 = vsel %vm1283_vm7, %v1302_v9, %v1303_v14  ;;  %v3941_v25 = vadd.f32 %v3542_v12, %v485_v16  ;;  %v2982_v54 = vmul.f32 -1.442695, %v3929_v46  ;;  %v1305_v8 = vrot.slane %v3909_v43, 1 }
  0x6f   : > { %1562 = vrot.lane.b32.xlu0 %v1118_v39, %s3424_s9  ;;  %v1137_v60 = vor.u32 %v1136_v51, %v1132_v58  ;;  %v1151_v22 = vshll.u32 %v3921_v32, 16  ;;  %v3947_v36 = vadd.f32 %v3542_v12, %v486_v50  ;;  %v1306_v9 = vrot.slane %v3921_v32, 1 }
  0x70   : > { %v2983_v52 = vmul.f32 -1.442695, %v3941_v25 }
  0x71   : > { %1374 = vrot.lane.b32.xlu1 %v1118_v39, %s3418_s29  ;;  %v2980_v39 = vmul.f32 -1.442695, %v3881_v45  ;;  %v1142_v13 = vsel %vm1058_vm8, %v1137_v60, %v1141_v41  ;;  %v1153_v58 = vrot.slane %v1151_v22, 1 }
  0x73   : > { %1594 = vrot.lane.b32.xlu0 %v3766_v30, %s3422_s12  ;;  %3289 = vpow2.f32 %v2980_v39 }
  0x74   : > { %3291 = vpow2.f32 %v2981_v44  ;;  %v425_v44 = vld [vmem:[%s3539_s20 + $0x108] sm:$0xff] }
  0x75   : > { %1376 = vrot.lane.b32.xlu1 %v3857_v15, %s3418_s29  ;;  %3293 = vrcp.f32 %v754_v56  ;;  %v2984_v56 = vmul.f32 -1.442695, %v3947_v36  ;;  %v487_v59 = vmul.f32 %v3522_v11, %v425_v44  ;;  %v428_v44 = vld [vmem:[%s3539_s20 + $0x120] sm:$0xff] }
  0x76   : > { %3295 = vrcp.f32 %v755_v4 }
  0x77   : > { %1596 = vrot.lane.b32.xlu0 %v3893_v38, %s3422_s12  ;;  %3297 = vrcp.f32 %v756_v7  ;;  %v488_v7 = vmul.f32 %v3522_v11, %v426_v23  ;;  %v3973_v60 = vadd.f32 %v3542_v12, %v487_v59  ;;  %v4023_v23 = vld [vmem:[%s3507_s10] ss:$0 sm:$0xff] }
  0x78   : > { %3299 = vrcp.f32 %v757_v34 }
  0x79   : > { %1408 = vrot.lane.b32.xlu1 %v3893_v38, %s3417_s28  ;;  %3301 = vpow2.f32 %v2982_v54 }
  0x7b   : > { %1406 = vrot.lane.b32.xlu0 %v3766_v30, %s3417_s28  ;;  %v1146_v30 = vshll.u32 %v3909_v43, 16 }
  0x7d   : > { %1440 = vrot.lane.b32.xlu1 %v3873_v17, %s3419_s21  ;;  %v3290_v42 = vpop.eup %3289  ;;  %v1148_v20 = vrot.slane %v1146_v30, 1 }
  0x7e   : > { %v3292_v28 = vpop.eup %3291  ;;  %v758_v53 = vadd.f32 1.0, %v3290_v42  ;;  %v3997_v42 = vsel %vm1283_vm7, %v1305_v8, %v1306_v9 }
  0x7f   : > { %1438 = vrot.lane.b32.xlu0 %v3814_v19, %s3419_s21  ;;  %v3294_v31 = vpop.eup %3293  ;;  %v1149_v40 = vor.u32 %v1148_v20, %v1144_v48 }
  0x80   : > { %v3296_v39 = vpop.eup %3295  ;;  %v916_v51 = vmul.f32 %v3294_v31, %v3830_v37  ;;  %3303 = vrcp.f32 %v758_v53 }
  0x81   : > { %1472 = vrot.lane.b32.xlu1 %v1142_v13, %s3423_s30  ;;  %v3298_v49 = vpop.eup %3297  ;;  %v3960_v2 = vsel %vm1058_vm8, %v1149_v40, %v1153_v58  ;;  %v917_v4 = vmul.f32 %v3296_v39, %v3840_v26 }
  0x82   : > { %v992_v37 = vsel %vm950_vm5, %v916_v51, 0.0  ;;  %v918_v6 = vmul.f32 %v3298_v49, %v3844_v61  ;;  %v3982_v61 = vadd.f32 %v3542_v12, %v488_v7  ;;  %v3300_v62 = vpop.eup %3299 }
  0x83   : > { %1470 = vrot.lane.b32.xlu0 %v3857_v15, %s3423_s30  ;;  %v759_v15 = vadd.f32 1.0, %v3292_v28  ;;  %v3976_v41 = vpack.c.bf16 %v917_v4, %v992_v37  ;;  %v3302_v10 = vpop.eup %3301  ;;  %v919_v34 = vmul.f32 %v3300_v62, %v3868_v18 }
  0x84   : > { %v994_v47 = vsel %vm961_vm6, %v918_v6, 0.0  ;;  %v2986_v50 = vmul.f32 -1.442695, %v3982_v61 }
  0x85   : > { %1504 = vrot.lane.b32.xlu1 %v3934_v55, %s3421_s8  ;;  %3305 = vrcp.f32 %v759_v15  ;;  %4913 = vst [vmem:[#allocation3_spill] sm:$0xff] %v3976_v41  ;;  %v1039_v30 = vpack.c.bf16 %v994_v47, %v994_v47  ;;  %v1158_v57 = vshll.u32 %v3976_v41, 16  ;;  %v1156_v20 = vshrl.u32 %v3976_v41, 16  ;;  %v4042_v47 = vld [vmem:[%s3514_s14] ss:$0 sm:$0xff] }
  0x86   : > { %3307 = vpow2.f32 %v2983_v52  ;;  %v995_v31 = vsel %vm950_vm5, %v919_v34, 0.0  ;;  %v1308_v49 = vrot.slane %v3976_v41, 1  ;;  %v429_v52 = vld [vmem:[%s3539_s20 + $0x128] sm:$0xff] }
  0x87   : > { %1502 = vrot.lane.b32.xlu0 %v3893_v38, %s3421_s8  ;;  %v427_v38 = vld [vmem:[%s3539_s20 + $0x118] sm:$0x3]  ;;  %3309 = vpow2.f32 %v2984_v56  ;;  %v1160_v22 = vrot.slane %v1158_v57, 1  ;;  %v1163_v28 = vshll.u32 %v1039_v30, 16  ;;  %v1309_v51 = vrot.slane %v1039_v30, 1 }
  0x88   : > { %v489_v26 = vmul.f32 %v3522_v11, %v427_v38  ;;  %v2985_v11 = vmul.f32 -1.442695, %v3973_v60  ;;  %v490_v56 = vmul.f32 %v4023_v23, %v428_v44  ;;  %v430_v38 = vld [vmem:[%s3539_s20 + $0x130] sm:$0x3]  ;;  %v491_v6 = vmul.f32 %v4023_v23, %v429_v52  ;;  %v433_v44 = vld [vmem:[%s3539_s20 + $0x148] sm:$0x3] }
  0x89   : > { %1536 = vrot.lane.b32.xlu1 %v3909_v43, %s3420_s22  ;;  %v1161_v40 = vor.u32 %v1160_v22, %v1156_v20  ;;  %v492_v8 = vmul.f32 %v4023_v23, %v430_v38 }
  0x8a   : > { %v3989_v14 = vadd.f32 %v3542_v12, %v489_v26  ;;  %v3304_v16 = vpop.eup %3303  ;;  %3311 = vpow2.f32 %v2985_v11  ;;  %v4039_v26 = vsel %vm1283_vm7, %v1308_v49, %v1309_v51  ;;  %v4045_v62 = vadd.f32 %v4042_v47, %v490_v56 }
  0x8b   : > { %1534 = vrot.lane.b32.xlu0 %v3873_v17, %s3420_s22  ;;  %v920_v18 = vmul.f32 %v3304_v16, %v3881_v45  ;;  %3313 = vpow2.f32 %v2986_v50  ;;  %v1165_v45 = vrot.slane %v1163_v28, 1  ;;  %v4053_v50 = vadd.f32 %v4042_v47, %v491_v6 }
  0x8c   : > { %v2987_v12 = vmul.f32 -1.442695, %v3989_v14 }
  0x8d   : > { %1568 = vrot.lane.b32.xlu1 %v3960_v2, %s3424_s9  ;;  %v4011_v58 = vpack.c.bf16 %v920_v18, %v995_v31  ;;  %v4027_v59 = vsel %vm1058_vm8, %v1161_v40, %v1165_v45  ;;  %v431_v18 = vld [vmem:[%s3539_s20 + $0x138] sm:$0xff]  ;;  %v432_v40 = vld [vmem:[%s3539_s20 + $0x140] sm:$0xff] }
  0x8e   : > { %v493_v45 = vmul.f32 %v4023_v23, %v431_v18  ;;  %v494_v49 = vmul.f32 %v4023_v23, %v432_v40 }
  0x8f   : > { %1566 = vrot.lane.b32.xlu0 %v1142_v13, %s3424_s9  ;;  %v3306_v32 = vpop.eup %3305  ;;  %4914 = vst [vmem:[#allocation4_spill] sm:$0xff] %v4011_v58  ;;  %v1170_v4 = vshll.u32 %v4011_v58, 16  ;;  %v1311_v6 = vrot.slane %v4011_v58, 1 }
  0x90   : > { %v3308_v48 = vpop.eup %3307  ;;  %v921_v53 = vmul.f32 %v3306_v32, %v3886_v24  ;;  %v4057_v32 = vpop.permute.xlu1 %1398  ;;  %v4095_v56 = vadd.f32 %v4042_v47, %v493_v45 }
  0x91   : > { %1378 = vrot.lane.b32.xlu1 %v1142_v13, %s3418_s29  ;;  %v760_v13 = vadd.f32 1.0, %v3302_v10  ;;  %v3310_v54 = vpop.eup %3309  ;;  %v761_v39 = vadd.f32 1.0, %v3308_v48  ;;  %v1168_v10 = vshrl.u32 %v4011_v58, 16  ;;  %v1172_v11 = vrot.slane %v1170_v4, 1 }
  0x92   : > { %v762_v15 = vadd.f32 1.0, %v3310_v54  ;;  %v997_v24 = vsel %vm961_vm6, %v921_v53, 0.0  ;;  %v2988_v48 = vmul.f32 -1.442695, %v4045_v62  ;;  %v4067_v54 = vpop.permute.xlu0 %1366  ;;  %v495_v4 = vmul.f32 %v4023_v23, %v433_v44 }
  0x93   : > { %1598 = vrot.lane.b32.xlu0 %v3934_v55, %s3422_s12  ;;  %3315 = vrcp.f32 %v760_v13  ;;  %v1173_v22 = vor.u32 %v1172_v11, %v1168_v10  ;;  %v2991_v11 = vmul.f32 -1.442695, %v4095_v56 }
  0x94   : > { %3317 = vpow2.f32 %v2987_v12  ;;  %v3312_v37 = vpop.eup %3311  ;;  %v4062_v12 = vadd.f32 %v4042_v47, %v492_v8  ;;  %v4107_v8 = vadd.f32 %v4042_v47, %v494_v49  ;;  %v434_v49 = vld [vmem:[%s3539_s20 + $0x150] sm:$0xff] }
  0x95   : > { %1380 = vrot.lane.b32.xlu1 %v3960_v2, %s3418_s29  ;;  %3319 = vrcp.f32 %v761_v39  ;;  %v3314_v7 = vpop.eup %3313  ;;  %v763_v57 = vadd.f32 1.0, %v3312_v37 }
  0x96   : > { %3321 = vrcp.f32 %v762_v15  ;;  %v764_v34 = vadd.f32 1.0, %v3314_v7  ;;  %v2990_v39 = vmul.f32 -1.442695, %v4062_v12 }
  0x97   : > { %1600 = vrot.lane.b32.xlu0 %v3997_v42, %s3422_s12  ;;  %3323 = vrcp.f32 %v763_v57 }
  0x98   : > { %3325 = vrcp.f32 %v764_v34 }
  0x99   : > { %1412 = vrot.lane.b32.xlu1 %v3997_v42, %s3417_s28  ;;  %3327 = vpow2.f32 %v2988_v48 }
  0x9b   : > { %1410 = vrot.lane.b32.xlu0 %v3934_v55, %s3417_s28  ;;  %v4029_v55 = vpack.c.bf16 %v997_v24, %v997_v24 }
  0x9d   : > { %1444 = vrot.lane.b32.xlu1 %v3976_v41, %s3419_s21  ;;  %v3316_v9 = vpop.eup %3315  ;;  %v1175_v30 = vshll.u32 %v4029_v55, 16  ;;  %v1312_v7 = vrot.slane %v4029_v55, 1 }
  0x9e   : > { %v3318_v16 = vpop.eup %3317  ;;  %v922_v13 = vmul.f32 %v3316_v9, %v3929_v46  ;;  %v2989_v46 = vmul.f32 -1.442695, %v4053_v50 }
  0x9f   : > { %1442 = vrot.lane.b32.xlu0 %v3909_v43, %s3419_s21  ;;  %v3320_v20 = vpop.eup %3319  ;;  %v765_v28 = vadd.f32 1.0, %v3318_v16 }
  0xa0   : > { %v3322_v31 = vpop.eup %3321  ;;  %v923_v53 = vmul.f32 %v3320_v20, %v3941_v25  ;;  %v2992_v20 = vmul.f32 -1.442695, %v4107_v8 }
  0xa1   : > { %1476 = vrot.lane.b32.xlu1 %v4027_v59, %s3423_s30  ;;  %3329 = vrcp.f32 %v765_v28  ;;  %v924_v25 = vmul.f32 %v3322_v31, %v3947_v36  ;;  %v3324_v37 = vpop.eup %3323 }
  0xa2   : > { %3331 = vpow2.f32 %v2989_v46  ;;  %v3326_v57 = vpop.eup %3325 }
  0xa3   : > { %1474 = vrot.lane.b32.xlu0 %v3960_v2, %s3423_s30  ;;  %v1177_v2 = vrot.slane %v1175_v30, 1  ;;  %3333 = vpow2.f32 %v2990_v39  ;;  %v1000_v38 = vsel %vm961_vm6, %v924_v25, 0.0  ;;  %v4116_v30 = vadd.f32 %v4042_v47, %v495_v4  ;;  %v3328_v34 = vpop.eup %3327 }
  0xa4   : > { %v1043_v16 = vpack.c.bf16 %v1000_v38, %v1000_v38  ;;  %3335 = vpow2.f32 %v2991_v11  ;;  %v926_v46 = vmul.f32 %v3326_v57, %v3982_v61 }
  0xa5   : > { %1508 = vrot.lane.b32.xlu1 %v4039_v26, %s3421_s8  ;;  %v4077_v15 = vsel %vm1058_vm8, %v1173_v22, %v1177_v2  ;;  %v2993_v18 = vmul.f32 -1.442695, %v4116_v30  ;;  %3337 = vpow2.f32 %v2992_v20 }
  0xa7   : > { %1506 = vrot.lane.b32.xlu0 %v3997_v42, %s3421_s8  ;;  %v998_v42 = vsel %vm950_vm5, %v922_v13, 0.0  ;;  %v925_v13 = vmul.f32 %v3324_v37, %v3973_v60  ;;  %v1187_v60 = vshll.u32 %v1043_v16, 16  ;;  %3339 = vpow2.f32 %v2993_v18 }
  0xa8   : > { %v4092_v52 = vpack.c.bf16 %v923_v53, %v998_v42  ;;  %v766_v53 = vadd.f32 1.0, %v3328_v34  ;;  %v1315_v34 = vrot.slane %v1043_v16, 1 }
  0xa9   : > { %1540 = vrot.lane.b32.xlu1 %v4011_v58, %s3420_s22  ;;  %v1001_v45 = vsel %vm950_vm5, %v925_v13, 0.0  ;;  %v1189_v4 = vrot.slane %v1187_v60, 1  ;;  %v436_v13 = vld [vmem:[%s3539_s20 + $0x160] sm:$0x3] }
  0xaa   : > { %v1182_v10 = vshll.u32 %v4092_v52, 16  ;;  %v1180_v2 = vshrl.u32 %v4092_v52, 16  ;;  %v4146_v38 = vpack.c.bf16 %v926_v46, %v1001_v45  ;;  %3341 = vrcp.f32 %v766_v53 }
  0xab   : > { %1538 = vrot.lane.b32.xlu0 %v3976_v41, %s3420_s22  ;;  %v4084_v24 = vpop.permute.xlu1 %1432  ;;  %v3330_v48 = vpop.eup %3329  ;;  %v1314_v57 = vrot.slane %v4092_v52, 1 }
  0xac   : > { %v1184_v28 = vrot.slane %v1182_v10, 1  ;;  %v3332_v31 = vpop.eup %3331  ;;  %v927_v42 = vmul.f32 %v3330_v48, %v3989_v14  ;;  %v496_v10 = vmul.f32 %v4023_v23, %v434_v49  ;;  %v1194_v20 = vshll.u32 %v4146_v38, 16 }
  0xad   : > { %v4088_v51 = vpop.permute.xlu0 %1430  ;;  %1572 = vrot.lane.b32.xlu1 %v4077_v15, %s3424_s9  ;;  %v3334_v39 = vpop.eup %3333  ;;  %v767_v25 = vadd.f32 1.0, %v3332_v31  ;;  %v498_v31 = vmul.f32 %v4023_v23, %v436_v13  ;;  %v1192_v46 = vshrl.u32 %v4146_v38, 16 }
  0xae   : > { %v1185_v61 = vor.u32 %v1184_v28, %v1180_v2  ;;  %v768_v37 = vadd.f32 1.0, %v3334_v39  ;;  %v3336_v2 = vpop.eup %3335  ;;  %v4174_v16 = vadd.f32 %v4042_v47, %v496_v10  ;;  %v4183_v39 = vsel %vm1283_vm7, %v1314_v57, %v1315_v34  ;;  %v437_v10 = vld [vmem:[%s3539_s20 + $0x168] sm:$0xff] }
  0xaf   : > { %1570 = vrot.lane.b32.xlu0 %v4027_v59, %s3424_s9  ;;  %v4100_v36 = vpop.permute.xlu1 %1528  ;;  %3343 = vrcp.f32 %v767_v25  ;;  %v3338_v53 = vpop.eup %3337  ;;  %v1196_v45 = vrot.slane %v1194_v20, 1 }
  0xb0   : > { %3345 = vrcp.f32 %v768_v37  ;;  %v770_v34 = vadd.f32 1.0, %v3338_v53 }
  0xb1   : > { %v4109_v9 = vpop.permute.xlu0 %1526  ;;  %1382 = vrot.lane.b32.xlu1 %v4027_v59, %s3418_s29  ;;  %v4124_v59 = vsel %vm1283_vm7, %v1311_v6, %v1312_v7  ;;  %v1003_v6 = vsel %vm961_vm6, %v927_v42, 0.0  ;;  %v435_v7 = vld [vmem:[%s3539_s20 + $0x158] sm:$0xff]  ;;  %v3340_v25 = vpop.eup %3339 }
  0xb2   : > { %v4165_v48 = vpack.c.bf16 %v1003_v6, %v1003_v6  ;;  %v497_v18 = vmul.f32 %v4023_v23, %v435_v7  ;;  %v2994_v6 = vmul.f32 -1.442695, %v4174_v16  ;;  %v4195_v7 = vadd.f32 %v4042_v47, %v498_v31 }
  0xb3   : > { %1602 = vrot.lane.b32.xlu0 %v4039_v26, %s3422_s12  ;;  %v4120_v55 = vpop.permute.xlu1 %1436  ;;  %v771_v20 = vadd.f32 1.0, %v3340_v25 }
  0xb4   : > { %v1199_v42 = vshll.u32 %v4165_v48, 16  ;;  %v3342_v37 = vpop.eup %3341 }
  0xb5   : > { %v4127_v22 = vpop.permute.xlu0 %1434  ;;  %1384 = vrot.lane.b32.xlu1 %v4077_v15, %s3418_s29  ;;  %v928_v31 = vmul.f32 %v3342_v37, %v4045_v62 }
  0xb6   : > { %v1201_v13 = vrot.slane %v1199_v42, 1  ;;  %v439_v42 = vld [vmem:[%s3539_s20 + $0x178] sm:$0x3] }
  0xb7   : > { %1604 = vrot.lane.b32.xlu0 %v4124_v59, %s3422_s12  ;;  %v4136_v40 = vpop.permute.xlu1 %1400  ;;  %v1004_v25 = vsel %vm950_vm5, %v928_v31, 0.0 }
  0xb9   : > { %v4141_v44 = vpop.permute.xlu0 %1494  ;;  %1416 = vrot.lane.b32.xlu1 %v4124_v59, %s3417_s28 }
  0xbb   : > { %1414 = vrot.lane.b32.xlu0 %v4039_v26, %s3417_s28  ;;  %v4150_v14 = vpop.permute.xlu1 %1496  ;;  %v4163_v26 = vsel %vm1058_vm8, %v1185_v61, %v1189_v4  ;;  %v769_v61 = vadd.f32 1.0, %v3336_v2  ;;  %v4191_v4 = vadd.f32 %v4042_v47, %v497_v18  ;;  %v3344_v2 = vpop.eup %3343 }
  0xbc   : > { %v3346_v41 = vpop.eup %3345  ;;  %v929_v62 = vmul.f32 %v3344_v2, %v4053_v50  ;;  %v1318_v2 = vrot.slane %v4165_v48, 1 }
  0xbd   : > { %v4156_v11 = vpop.permute.xlu0 %1590  ;;  %1448 = vrot.lane.b32.xlu1 %v4092_v52, %s3419_s21  ;;  %3347 = vrcp.f32 %v769_v61  ;;  %v2995_v0 = vmul.f32 -1.442695, %v4191_v4  ;;  %v930_v37 = vmul.f32 %v3346_v41, %v4062_v12 }
  0xbe   : > { %3349 = vpow2.f32 %v2994_v6  ;;  %v4234_v41 = vpack.c.bf16 %v929_v62, %v1004_v25 }
  0xbf   : > { %1446 = vrot.lane.b32.xlu0 %v4011_v58, %s3419_s21  ;;  %v4170_v28 = vpop.permute.xlu1 %1404  ;;  %v499_v58 = vmul.f32 %v4023_v23, %v437_v10  ;;  %3351 = vrcp.f32 %v770_v34  ;;  %v501_v10 = vmul.f32 %v4023_v23, %v439_v42 }
  0xc0   : > { %3353 = vrcp.f32 %v771_v20 }
  0xc1   : > { %v4177_v60 = vpop.permute.xlu0 %1592  ;;  %1480 = vrot.lane.b32.xlu1 %v4163_v26, %s3423_s30  ;;  %3355 = vpow2.f32 %v2995_v0  ;;  %v4225_v6 = vadd.f32 %v4042_v47, %v499_v58 }
  0xc3   : > { %1478 = vrot.lane.b32.xlu0 %v4077_v15, %s3423_s30  ;;  %v4188_v49 = vpop.permute.xlu1 %1500  ;;  %v1197_v15 = vor.u32 %v1196_v45, %v1192_v46  ;;  %v2996_v46 = vmul.f32 -1.442695, %v4195_v7  ;;  %v500_v45 = vmul.f32 %v4023_v23, %v438_v5  ;;  %v1624_v5 = vsel %vm1622_vm10, 0.0|0.0, %v4067_v54 }
  0xc4   : > { %v1006_v54 = vsel %vm961_vm6, %v930_v37, 0.0 }
  0xc5   : > { %v4198_v57 = vpop.permute.xlu0 %1402  ;;  %1512 = vrot.lane.b32.xlu1 %v4183_v39, %s3421_s8  ;;  %3357 = vpow2.f32 %v2996_v46  ;;  %v4243_v34 = vadd.f32 %v4042_v47, %v500_v45  ;;  %v4258_v45 = vadd.f32 %v4042_v47, %v501_v10  ;;  %v4263_v48 = vpack.c.bf16 %v1006_v54, %v1006_v54 }
  0xc7   : > { %1510 = vrot.lane.b32.xlu0 %v4124_v59, %s3421_s8  ;;  %v1465_v18 = vpop.permute.xlu1 %1464  ;;  %v4214_v59 = vsel %vm1058_vm8, %v1197_v15, %v1201_v13  ;;  %v2997_v15 = vmul.f32 -1.442695, %v4225_v6  ;;  %v1657_v13 = vsel %vm1655_vm11, %v1624_v5, %v4057_v32 }
  0xc8   : > { %v1690_v31 = vsel %vm1688_vm12, %v1657_v13, %v4088_v51  ;;  %v1206_v51 = vshll.u32 %v4234_v41, 16 }
  0xc9   : > { %v4209_v53 = vpop.permute.xlu0 %1498  ;;  %1544 = vrot.lane.b32.xlu1 %v4146_v38, %s3420_s22  ;;  %3359 = vpow2.f32 %v2997_v15 }
  0xcb   : > { %1542 = vrot.lane.b32.xlu0 %v4092_v52, %s3420_s22  ;;  %v1561_v61 = vpop.permute.xlu1 %1560 }
  0xcd   : > { %v1369_v50 = vpop.permute.xlu0 %1368  ;;  %1576 = vrot.lane.b32.xlu1 %v4214_v59, %s3424_s9 }
  0xce   : > { %v1626_v0 = vsel %vm1622_vm10, %v3655_v29, %v1369_v50  ;;  %v3348_v29 = vpop.eup %3347  ;;  %v2998_v50 = vmul.f32 -1.442695, %v4243_v34 }
  0xcf   : > { %v1659_v58 = vsel %vm1655_vm11, %v1626_v0, %v4136_v40  ;;  %1574 = vrot.lane.b32.xlu0 %v4163_v26, %s3424_s9  ;;  %v1371_v12 = vpop.permute.xlu1 %1370  ;;  %v1317_v40 = vrot.slane %v4146_v38, 1  ;;  %v3350_v32 = vpop.eup %3349  ;;  %v931_v5 = vmul.f32 %v3348_v29, %v4095_v56  ;;  %v1204_v56 = vshrl.u32 %v4234_v41, 16 }
  0xd0   : > { %v1692_v20 = vsel %vm1688_vm12, %v1659_v58, %v4084_v24  ;;  %v3352_v25 = vpop.eup %3351  ;;  %v772_v54 = vadd.f32 1.0, %v3350_v32  ;;  %v2999_v29 = vmul.f32 -1.442695, %v4258_v45  ;;  %3361 = vpow2.f32 %v2998_v50 }
  0xd1   : > { %v1725_v46 = vsel %vm1721_vm13, %v1692_v20, %v1465_v18  ;;  %v1463_v62 = vpop.permute.xlu0 %1462  ;;  %1386 = vrot.lane.b32.xlu1 %v4163_v26, %s3418_s29  ;;  %v4277_v0 = vsel %vm1283_vm7, %v1317_v40, %v1318_v2  ;;  %v1208_v20 = vrot.slane %v1206_v51, 1  ;;  %v1211_v40 = vshll.u32 %v4263_v48, 16 }
  0xd2   : > { %v1723_v24 = vsel %vm1721_vm13, %v1690_v31, %v1463_v62  ;;  %v1758_v42 = vsel %vm1754_vm14, %v1725_v46, %v4150_v14  ;;  %v3354_v14 = vpop.eup %3353  ;;  %v932_v15 = vmul.f32 %v3352_v25, %v4107_v8  ;;  %v1007_v31 = vsel %vm950_vm5, %v931_v5, 0.0  ;;  %v440_v25 = vld [vmem:[%s3539_s20 + $0x180] sm:$0xff] }
  0xd3   : > { %v1756_v18 = vsel %vm1754_vm14, %v1723_v24, %v4141_v44  ;;  %1606 = vrot.lane.b32.xlu0 %v4183_v39, %s3422_s12  ;;  %v1373_v26 = vpop.permute.xlu1 %1372  ;;  %v1791_v37 = vsel %vm1787_vm15, %v1758_v42, %v4100_v36  ;;  %v3356_v44 = vpop.eup %3355  ;;  %v933_v46 = vmul.f32 %v3354_v14, %v4116_v30  ;;  %v1628_v32 = vsel %vm1622_vm10, %v3643_v63, %v1371_v12 }
  0xd4   : > { %v1789_v10 = vsel %vm1787_vm15, %v1756_v18, %v4109_v9  ;;  %v1824_v36 = vsel %vm1820_vm0, %v1791_v37, %v1561_v61  ;;  %v3358_v13 = vpop.eup %3357  ;;  %v773_v8 = vadd.f32 1.0, %v3356_v44  ;;  %3363 = vpow2.f32 %v2999_v29 }
  0xd5   : > { %v1559_v58 = vpop.permute.xlu0 %1558  ;;  %1388 = vrot.lane.b32.xlu1 %v4214_v59, %s3418_s29  ;;  %v1857_v62 = vsel %vm1853_vm1, %v1824_v36, %v4177_v60  ;;  %v774_v24 = vadd.f32 1.0, %v3358_v13  ;;  %v1209_v42 = vor.u32 %v1208_v20, %v1204_v56  ;;  %v1213_v30 = vrot.slane %v1211_v40, 1  ;;  %v3360_v50 = vpop.eup %3359 }
  0xd6   : > { %v1822_v9 = vsel %vm1820_vm0, %v1789_v10, %v1559_v58  ;;  %v4302_v51 = vpack.c.bf16 %v932_v15, %v1007_v31  ;;  %3365 = vrcp.f32 %v772_v54  ;;  %v1630_v60 = vsel %vm1622_vm10, %v3664_v33, %v1373_v26  ;;  %v441_v26 = vld [vmem:[%s3539_s20 + $0x188] sm:$0xff]  ;;  %v442_v58 = vld [vmem:[%s3539_s20 + $0x190] sm:$0x3]  ;;  %s384_s20 = scalar_lea.vmem %s4903_s6, %s4924_s24 }
  0xd7   : > { %1608 = vrot.lane.b32.xlu0 %v4277_v0, %s3422_s12  ;;  %v1855_v2 = vsel %vm1853_vm1, %v1822_v9, %v4156_v11  ;;  %v1469_v61 = vpop.permute.xlu1 %1468  ;;  %v1009_v12 = vsel %vm961_vm6, %v933_v46, 0.0  ;;  %v1661_v18 = vsel %vm1655_vm11, %v1628_v32, %v4198_v57  ;;  %3367 = vrcp.f32 %v773_v8 }
  0xd8   : > { %3112 = vmatprep.mubr.msk.bf16.mxu0 %vm1929_vm9, %v1855_v2  ;;  %v1320_v5 = vrot.slane %v4234_v41, 1  ;;  %v1321_v33 = vrot.slane %v4263_v48, 1  ;;  %3369 = vrcp.f32 %v774_v24  ;;  %v1663_v14 = vsel %vm1655_vm11, %v1630_v60, %v4170_v28 }
  0xd9   : > { %3113 = vmatmul.mubr.msk.bf16.vlgmr.msra.gmra.mrb[0].mxu0 %vm1929_vm9, %v1857_v62  ;;  %v1467_v11 = vpop.permute.xlu0 %1466  ;;  %1420 = vrot.lane.b32.xlu1 %v4277_v0, %s3417_s28  ;;  %v4322_v10 = vsel %vm1058_vm8, %v1209_v42, %v1213_v30  ;;  %v4324_v57 = vpack.c.bf16 %v1009_v12, %v1009_v12  ;;  %v1218_v44 = vshll.u32 %v4302_v51, 16  ;;  %v1694_v36 = vsel %vm1688_vm12, %v1661_v18, %v4127_v22 }
  0xda   : > { %v1727_v56 = vsel %vm1721_vm13, %v1694_v36, %v1467_v11  ;;  %v503_v54 = vmul.f32 %v4023_v23, %v441_v26  ;;  %v3362_v28 = vpop.eup %3361  ;;  %v1696_v29 = vsel %vm1688_vm12, %v1663_v14, %v4120_v55  ;;  %v775_v9 = vadd.f32 1.0, %v3360_v50 }
  0xdb   : > { %1418 = vrot.lane.b32.xlu0 %v4183_v39, %s3417_s28  ;;  %v1533_v63 = vpop.permute.xlu1 %1532  ;;  %v502_v39 = vmul.f32 %v4023_v23, %v440_v25  ;;  %v504_v22 = vmul.f32 %v4023_v23, %v442_v58  ;;  %v4343_v40 = vsel %vm1283_vm7, %v1320_v5, %v1321_v33  ;;  %v1216_v15 = vshrl.u32 %v4302_v51, 16 }
  0xdc   : > { %v1220_v2 = vrot.slane %v1218_v44, 1  ;;  %v1223_v31 = vshll.u32 %v4324_v57, 16  ;;  %v1760_v55 = vsel %vm1754_vm14, %v1727_v56, %v4209_v53  ;;  %v1729_v23 = vsel %vm1721_vm13, %v1696_v29, %v1469_v61 }
  0xdd   : > { %v1531_v37 = vpop.permute.xlu0 %1530  ;;  %1452 = vrot.lane.b32.xlu1 %v4234_v41, %s3419_s21  ;;  %v4339_v20 = vadd.f32 %v4042_v47, %v502_v39  ;;  %v776_v11 = vadd.f32 1.0, %v3362_v28  ;;  %v4356_v24 = vadd.f32 %v4042_v47, %v503_v54  ;;  %3371 = vrcp.f32 %v775_v9 }
  0xde   : > { %v3364_v46 = vpop.eup %3363  ;;  %v1793_v32 = vsel %vm1787_vm15, %v1760_v55, %v1531_v37  ;;  %v1221_v60 = vor.u32 %v1220_v2, %v1216_v15  ;;  %v1225_v12 = vrot.slane %v1223_v31, 1  ;;  %v1762_v5 = vsel %vm1754_vm14, %v1729_v23, %v4188_v49 }
  0xdf   : > { %1450 = vrot.lane.b32.xlu0 %v4146_v38, %s3419_s21  ;;  %v1565_v48 = vpop.permute.xlu1 %1564  ;;  %v3000_v53 = vmul.f32 -1.442695, %v4339_v20  ;;  %v777_v18 = vadd.f32 1.0, %v3364_v46  ;;  %v1795_v26 = vsel %vm1787_vm15, %v1762_v5, %v1533_v63  ;;  %3373 = vrcp.f32 %v776_v11 }
  0xe0   : > { %v3366_v8 = vpop.eup %3365  ;;  %v3001_v39 = vmul.f32 -1.442695, %v4356_v24  ;;  %v1828_v50 = vsel %vm1820_vm0, %v1795_v26, %v1565_v48  ;;  %v4382_v44 = vsel %vm1058_vm8, %v1221_v60, %v1225_v12  ;;  %v1323_v29 = vrot.slane %v4302_v51, 1 }
  0xe1   : > { %v1563_v13 = vpop.permute.xlu0 %1562  ;;  %1484 = vrot.lane.b32.xlu1 %v4322_v10, %s3423_s30  ;;  %v3368_v25 = vpop.eup %3367  ;;  %3375 = vpow2.f32 %v3000_v53 }
  0xe2   : > { %v1826_v42 = vsel %vm1820_vm0, %v1793_v32, %v1563_v13  ;;  %v3370_v37 = vpop.eup %3369  ;;  %3377 = vrcp.f32 %v777_v18 }
  0xe3   : > { %1482 = vrot.lane.b32.xlu0 %v4214_v59, %s3423_s30  ;;  %v4351_v62 = vpop.permute.xlu1 %1374  ;;  %v4363_v59 = vadd.f32 %v4042_v47, %v504_v22  ;;  %v934_v47 = vmul.f32 %v3366_v8, %v4174_v16  ;;  %v935_v16 = vmul.f32 %v3368_v25, %v4191_v4  ;;  %v936_v36 = vmul.f32 %v3370_v37, %v4195_v7 }
  0xe4   : > { %3379 = vpow2.f32 %v3001_v39  ;;  %v1324_v7 = vrot.slane %v4324_v57, 1 }
  0xe5   : > { %v1595_v30 = vpop.permute.xlu0 %1594  ;;  %1516 = vrot.lane.b32.xlu1 %v4343_v40, %s3421_s8  ;;  %v3002_v49 = vmul.f32 -1.442695, %v4363_v59  ;;  %v1010_v58 = vsel %vm950_vm5, %v934_v47, 0.0  ;;  %v1012_v28 = vsel %vm961_vm6, %v936_v36, 0.0 }
  0xe6   : > { %v1859_v61 = vsel %vm1853_vm1, %v1826_v42, %v1595_v30  ;;  %v4395_v4 = vpack.c.bf16 %v935_v16, %v1010_v58  ;;  %v1051_v22 = vpack.c.bf16 %v1012_v28, %v1012_v28  ;;  %v4412_v8 = vsel %vm1283_vm7, %v1323_v29, %v1324_v7 }
  0xe7   : > { %1514 = vrot.lane.b32.xlu0 %v4277_v0, %s3421_s8  ;;  %3116 = vmatprep.mubr.msk.bf16.mxu0 %vm1929_vm9, %v1859_v61  ;;  %v4371_v33 = vpop.permute.xlu1 %1376  ;;  %3381 = vpow2.f32 %v3002_v49  ;;  %v3372_v56 = vpop.eup %3371 }
  0xe8   : > { %v1230_v15 = vshll.u32 %v4395_v4, 16  ;;  %v937_v2 = vmul.f32 %v3372_v56, %v4225_v6  ;;  %v1235_v6 = vshll.u32 %v1051_v22, 16 }
  0xe9   : > { %v1597_v14 = vpop.permute.xlu0 %1596  ;;  %1548 = vrot.lane.b32.xlu1 %v4302_v51, %s3420_s22  ;;  %v3374_v9 = vpop.eup %3373 }
  0xea   : > { %v1861_v0 = vsel %vm1853_vm1, %v1828_v50, %v1597_v14  ;;  %v938_v23 = vmul.f32 %v3374_v9, %v4243_v34  ;;  %v1232_v11 = vrot.slane %v1230_v15, 1  ;;  %v1013_v42 = vsel %vm950_vm5, %v937_v2, 0.0 }
  0xeb   : > { %1546 = vrot.lane.b32.xlu0 %v4234_v41, %s3420_s22  ;;  %3117 = vmatmul.mubr.msk.bf16.gmra.mrb[4].mxu0 %vm1929_vm9, %v1861_v0  ;;  %v4388_v63 = vpop.permute.xlu1 %1408  ;;  %v3376_v31 = vpop.eup %3375  ;;  %v1237_v37 = vrot.slane %v1235_v6, 1  ;;  %v1327_v50 = vrot.slane %v1051_v22, 1 }
  0xec   : > { %v3378_v55 = vpop.eup %3377  ;;  %v778_v30 = vadd.f32 1.0, %v3376_v31  ;;  %v4425_v12 = vpack.c.bf16 %v938_v23, %v1013_v42 }
  0xed   : > { %v1407_v48 = vpop.permute.xlu0 %1406  ;;  %1580 = vrot.lane.b32.xlu1 %v4382_v44, %s3424_s9  ;;  %v939_v61 = vmul.f32 %v3378_v55, %v4258_v45  ;;  %v1326_v45 = vrot.slane %v4395_v4, 1 }
  0xee   : > { %v3380_v32 = vpop.eup %3379  ;;  %3383 = vrcp.f32 %v778_v30  ;;  %v1242_v0 = vshll.u32 %v4425_v12, 16  ;;  %v1240_v28 = vshrl.u32 %v4425_v12, 16 }
  0xef   : > { %1578 = vrot.lane.b32.xlu0 %v4322_v10, %s3424_s9  ;;  %v4399_v54 = vpop.permute.xlu1 %1440  ;;  %v779_v34 = vadd.f32 1.0, %v3380_v32  ;;  %v1015_v26 = vsel %vm961_vm6, %v939_v61, 0.0  ;;  %v1328_v7 = vsel %vm1283_vm7, %v1326_v45, %v1327_v50 }
  0xf0   : > { %v4435_v49 = vpack.c.bf16 %v1015_v26, %v1015_v26  ;;  %v1244_v9 = vrot.slane %v1242_v0, 1 }
  0xf1   : > { %v1439_v13 = vpop.permute.xlu0 %1438  ;;  %1390 = vrot.lane.b32.xlu1 %v4322_v10, %s3418_s29  ;;  %v1228_v10 = vshrl.u32 %v4395_v4, 16  ;;  %v3382_v53 = vpop.eup %3381  ;;  %3385 = vrcp.f32 %v779_v34 }
  0xf2   : > { %v780_v5 = vadd.f32 1.0, %v3382_v53 }
  0xf3   : > { %1610 = vrot.lane.b32.xlu0 %v4343_v40, %s3422_s12  ;;  %v1473_v46 = vpop.permute.xlu1 %1472  ;;  %v1233_v18 = vor.u32 %v1232_v11, %v1228_v10 }
  0xf4   : > { %3387 = vrcp.f32 %v780_v5  ;;  %v1330_v5 = vrot.slane %v4435_v49, 1 }
  0xf5   : > { %v1471_v57 = vpop.permute.xlu0 %1470  ;;  %1392 = vrot.lane.b32.xlu1 %v4382_v44, %s3418_s29  ;;  %v1238_v14 = vsel %vm1058_vm8, %v1233_v18, %v1237_v37  ;;  %v1329_v37 = vrot.slane %v4425_v12, 1 }
  0xf7   : > { %1612 = vrot.lane.b32.xlu0 %v4412_v8, %s3422_s12  ;;  %v1505_v25 = vpop.permute.xlu1 %1504 }
  0xf8   : > { %v3384_v22 = vpop.eup %3383 }
  0xf9   : > { %v1503_v60 = vpop.permute.xlu0 %1502  ;;  %1424 = vrot.lane.b32.xlu1 %v4412_v8, %s3417_s28 }
  0xfb   : > { %1422 = vrot.lane.b32.xlu0 %v4343_v40, %s3417_s28  ;;  %v1537_v47 = vpop.permute.xlu1 %1536  ;;  %v1632_v40 = vsel %vm1622_vm10, %v3675_v21, %v4351_v62  ;;  %v1247_v21 = vshll.u32 %v4435_v49, 16  ;;  %v1634_v62 = vsel %vm1622_vm10, %v3814_v19, %v4371_v33  ;;  %v3386_v23 = vpop.eup %3385 }
  0xfc   : > { %v1665_v58 = vsel %vm1655_vm11, %v1632_v40, %v1407_v48  ;;  %v1667_v15 = vsel %vm1655_vm11, %v1634_v62, %v4388_v63 }
  0xfd   : > { %v1535_v39 = vpop.permute.xlu0 %1534  ;;  %1456 = vrot.lane.b32.xlu1 %v4395_v4, %s3419_s21  ;;  %v1698_v36 = vsel %vm1688_vm12, %v1665_v58, %v1439_v13  ;;  %v1700_v31 = vsel %vm1688_vm12, %v1667_v15, %v4399_v54  ;;  %v1249_v10 = vrot.slane %v1247_v21, 1  ;;  %v940_v54 = vmul.f32 %v3384_v22, %v4339_v20 }
  0xfe   : > { %v1731_v29 = vsel %vm1721_vm13, %v1698_v36, %v1471_v57  ;;  %v1733_v19 = vsel %vm1721_vm13, %v1700_v31, %v1473_v46  ;;  %v3388_v11 = vpop.eup %3387 }
  0xff   : > { %1454 = vrot.lane.b32.xlu0 %v4302_v51, %s3419_s21  ;;  %v1569_v16 = vpop.permute.xlu1 %1568  ;;  %v1764_v48 = vsel %vm1754_vm14, %v1731_v29, %v1503_v60  ;;  %v1766_v32 = vsel %vm1754_vm14, %v1733_v19, %v1505_v25  ;;  %v1016_v25 = vsel %vm950_vm5, %v940_v54, 0.0  ;;  %v942_v61 = vmul.f32 %v3388_v11, %v4363_v59 }
 0x100   : > { %v1797_v2 = vsel %vm1787_vm15, %v1764_v48, %v1535_v39  ;;  %v1799_v6 = vsel %vm1787_vm15, %v1766_v32, %v1537_v47  ;;  %v1331_v39 = vsel %vm1283_vm7, %v1329_v37, %v1330_v5  ;;  %v4915_v11 = vmov 0.0|0.0  }
 0x101   : > { %v1567_v56 = vpop.permute.xlu0 %1566  ;;  %1488 = vrot.lane.b32.xlu1 %v1238_v14, %s3423_s30  ;;  %v1832_v46 = vsel %vm1820_vm0, %v1799_v6, %v1569_v16 }
 0x102   : > { %v1830_v55 = vsel %vm1820_vm0, %v1797_v2, %v1567_v56 }
 0x103   : > { %1486 = vrot.lane.b32.xlu0 %v4382_v44, %s3423_s30  ;;  %v4456_v13 = vpop.permute.xlu1 %1378  ;;  %v1245_v44 = vor.u32 %v1244_v9, %v1240_v28 }
 0x104   : > { %v1636_v9 = vsel %vm1622_vm10, %v3873_v17, %v4456_v13 }
 0x105   : > { %v1599_v57 = vpop.permute.xlu0 %1598  ;;  %1520 = vrot.lane.b32.xlu1 %v1328_v7, %s3421_s8  ;;  %v1250_v53 = vsel %vm1058_vm8, %v1245_v44, %v1249_v10 }
 0x106   : > { %v1863_v33 = vsel %vm1853_vm1, %v1830_v55, %v1599_v57 }
 0x107   : > { %1518 = vrot.lane.b32.xlu0 %v4412_v8, %s3421_s8  ;;  %3120 = vmatprep.mubr.msk.bf16.mxu0 %vm1929_vm9, %v1863_v33  ;;  %v1381_v63 = vpop.permute.xlu1 %1380  ;;  %v941_v8 = vmul.f32 %v3386_v23, %v4356_v24  ;;  %v1018_v24 = vsel %vm961_vm6, %v942_v61, 0.0 }
 0x108   : > { %v1055_v35 = vpack.c.bf16 %v1018_v24, %v1018_v24  ;;  %v1638_v2 = vsel %vm1622_vm10, %v3909_v43, %v1381_v63 }
 0x109   : > { %v1601_v42 = vpop.permute.xlu0 %1600  ;;  %1552 = vrot.lane.b32.xlu1 %v4425_v12, %s3420_s22  ;;  %v1054_v34 = vpack.c.bf16 %v941_v8, %v1016_v25 }
 0x10a   : > { %v1865_v30 = vsel %vm1853_vm1, %v1832_v46, %v1601_v42  ;;  %v1340_v0 = vshll.u32 %v1055_v35, 16  ;;  %v1347_v29 = vrot.slane %v1055_v35, 1 }
 0x10b   : > { %1550 = vrot.lane.b32.xlu0 %v4395_v4, %s3420_s22  ;;  %3121 = vmatmul.mubr.msk.bf16.gmra.mrb[8].mxu0 %vm1929_vm9, %v1865_v30  ;;  %v1413_v20 = vpop.permute.xlu1 %1412  ;;  %v1335_v26 = vshll.u32 %v1054_v34, 16  ;;  %v1333_v50 = vshrl.u32 %v1054_v34, 16  ;;  %v1346_v28 = vrot.slane %v1054_v34, 1 }
 0x10c   : > { %v1342_v16 = vrot.slane %v1340_v0, 1  ;;  %v1671_v31 = vsel %vm1655_vm11, %v1638_v2, %v1413_v20 }
 0x10d   : > { %v1411_v60 = vpop.permute.xlu0 %1410  ;;  %1584 = vrot.lane.b32.xlu1 %v1250_v53, %s3424_s9  ;;  %v1337_v27 = vrot.slane %v1335_v26, 1  ;;  %v1348_v15 = vsel %vm1283_vm7, %v1346_v28, %v1347_v29 }
 0x10e   : > { %v1669_v62 = vsel %vm1655_vm11, %v1636_v9, %v1411_v60 }
 0x10f   : > { %1582 = vrot.lane.b32.xlu0 %v1238_v14, %s3424_s9  ;;  %v1445_v18 = vpop.permute.xlu1 %1444 }
 0x110   : > { %v1704_v57 = vsel %vm1688_vm12, %v1671_v31, %v1445_v18  ;;  %v4916_v18 = vld [vmem:[#allocation3_spill] sm:$0xff] }
 0x111   : > { %v1443_v47 = vpop.permute.xlu0 %1442  ;;  %1394 = vrot.lane.b32.xlu1 %v1238_v14, %s3418_s29  ;;  %v1338_v14 = vor.u32 %v1337_v27, %v1333_v50 }
 0x113   : > { %1614 = vrot.lane.b32.xlu0 %v1328_v7, %s3422_s12  ;;  %v1477_v59 = vpop.permute.xlu1 %1476  ;;  %v1343_v56 = vsel %vm1058_vm8, %v1338_v14, %v1342_v16 }
 0x114   : > { %v1737_v44 = vsel %vm1721_vm13, %v1704_v57, %v1477_v59 }
 0x115   : > { %v1475_v45 = vpop.permute.xlu0 %1474  ;;  %1396 = vrot.lane.b32.xlu1 %v1250_v53, %s3418_s29 }
 0x117   : > { %1616 = vrot.lane.b32.xlu0 %v1331_v39, %s3422_s12  ;;  %v1509_v40 = vpop.permute.xlu1 %1508 }
 0x118   : > { %v1770_v10 = vsel %vm1754_vm14, %v1737_v44, %v1509_v40 }
 0x119   : > { %v1507_v49 = vpop.permute.xlu0 %1506  ;;  %1428 = vrot.lane.b32.xlu1 %v1331_v39, %s3417_s28 }
 0x11b   : > { %1426 = vrot.lane.b32.xlu0 %v1328_v7, %s3417_s28  ;;  %v1541_v58 = vpop.permute.xlu1 %1540  ;;  %v1702_v7 = vsel %vm1688_vm12, %v1669_v62, %v1443_v47 }
 0x11c   : > { %v1735_v22 = vsel %vm1721_vm13, %v1702_v7, %v1475_v45  ;;  %v1803_v32 = vsel %vm1787_vm15, %v1770_v10, %v1541_v58 }
 0x11d   : > { %v1539_v36 = vpop.permute.xlu0 %1538  ;;  %1460 = vrot.lane.b32.xlu1 %v1054_v34, %s3419_s21  ;;  %v1768_v17 = vsel %vm1754_vm14, %v1735_v22, %v1507_v49 }
 0x11e   : > { %v1801_v55 = vsel %vm1787_vm15, %v1768_v17, %v1539_v36 }
 0x11f   : > { %1458 = vrot.lane.b32.xlu0 %v4425_v12, %s3419_s21  ;;  %v1573_v21 = vpop.permute.xlu1 %1572 }
 0x120   : > { %v1836_v63 = vsel %vm1820_vm0, %v1803_v32, %v1573_v21 }
 0x121   : > { %v1571_v48 = vpop.permute.xlu0 %1570  ;;  %1492 = vrot.lane.b32.xlu1 %v1343_v56, %s3423_s30 }
 0x122   : > { %v1834_v19 = vsel %vm1820_vm0, %v1801_v55, %v1571_v48 }
 0x123   : > { %1490 = vrot.lane.b32.xlu0 %v1250_v53, %s3423_s30  ;;  %v1383_v13 = vpop.permute.xlu1 %1382 }
 0x124   : > { %v1640_v24 = vsel %vm1622_vm10, %v4916_v18, %v1383_v13 }
 0x125   : > { %v1603_v33 = vpop.permute.xlu0 %1602  ;;  %1524 = vrot.lane.b32.xlu1 %v1348_v15, %s3421_s8 }
 0x126   : > { %v1867_v43 = vsel %vm1853_vm1, %v1834_v19, %v1603_v33 }
 0x127   : > { %1522 = vrot.lane.b32.xlu0 %v1331_v39, %s3421_s8  ;;  %3124 = vmatprep.mubr.msk.bf16.mxu0 %vm1929_vm9, %v1867_v43  ;;  %v1385_v23 = vpop.permute.xlu1 %1384  ;;  %s390_s8 = scalar_lea.vmem %s4904_s7, %s4924_s24 }
 0x129   : > { %v1605_v54 = vpop.permute.xlu0 %1604  ;;  %1556 = vrot.lane.b32.xlu1 %v4915_v11, %s3420_s22 }
 0x12a   : > { %v1869_v6 = vsel %vm1853_vm1, %v1836_v63, %v1605_v54 }
 0x12b   : > { %1554 = vrot.lane.b32.xlu0 %v1054_v34, %s3420_s22  ;;  %3125 = vmatmul.mubr.msk.bf16.gmra.mrb[12].mxu0 %vm1929_vm9, %v1869_v6  ;;  %v1417_v46 = vpop.permute.xlu1 %1416 }
 0x12d   : > { %v1415_v42 = vpop.permute.xlu0 %1414  ;;  %1588 = vrot.lane.b32.xlu1 %v3486_v3, %s3424_s9 }
 0x12e   : > { %v1673_v3 = vsel %vm1655_vm11, %v1640_v24, %v1415_v42 }
 0x12f   : > { %1586 = vrot.lane.b32.xlu0 %v1343_v56, %s3424_s9  ;;  %v1449_v30 = vpop.permute.xlu1 %1448 }
 0x131   : > { %v1447_v53 = vpop.permute.xlu0 %1446  ;;  %1620 = vrot.lane.b32.xlu1 %v3484_v1, %s3422_s12  ;;  %v4917_v1 = vld [vmem:[#allocation4_spill] sm:$0xff] }
 0x132   : > { %v1706_v5 = vsel %vm1688_vm12, %v1673_v3, %v1447_v53  ;;  %v1642_v26 = vsel %vm1622_vm10, %v4917_v1, %v1385_v23 }
 0x133   : > { %1618 = vrot.lane.b32.xlu0 %v1348_v15, %s3422_s12  ;;  %v1481_v8 = vpop.permute.xlu1 %1480  ;;  %v1675_v45 = vsel %vm1655_vm11, %v1642_v26, %v1417_v46 }
 0x134   : > { %v1708_v27 = vsel %vm1688_vm12, %v1675_v45, %v1449_v30 }
 0x135   : > { %v1479_v20 = vpop.permute.xlu0 %1478  ;;  %v1741_v49 = vsel %vm1721_vm13, %v1708_v27, %v1481_v8 }
 0x136   : > { %v1739_v35 = vsel %vm1721_vm13, %v1706_v5, %v1479_v20 }
 0x137   : > { %v1513_v25 = vpop.permute.xlu1 %1512 }
 0x138   : > { %v1774_v16 = vsel %vm1754_vm14, %v1741_v49, %v1513_v25 }
 0x139   : > { %v1511_v61 = vpop.permute.xlu0 %1510 }
 0x13a   : > { %v1772_v59 = vsel %vm1754_vm14, %v1739_v35, %v1511_v61 }
 0x13b   : > { %v1545_v60 = vpop.permute.xlu1 %1544 }
 0x13c   : > { %v1807_v36 = vsel %vm1787_vm15, %v1774_v16, %v1545_v60 }
 0x13d   : > { %v1543_v34 = vpop.permute.xlu0 %1542 }
 0x13e   : > { %v1805_v50 = vsel %vm1787_vm15, %v1772_v59, %v1543_v34 }
 0x13f   : > { %v1577_v37 = vpop.permute.xlu1 %1576 }
 0x140   : > { %v1840_v56 = vsel %vm1820_vm0, %v1807_v36, %v1577_v37 }
 0x141   : > { %v1575_v47 = vpop.permute.xlu0 %1574 }
 0x142   : > { %v1838_v0 = vsel %vm1820_vm0, %v1805_v50, %v1575_v47 }
 0x143   : > { %v1387_v39 = vpop.permute.xlu1 %1386 }
 0x144   : > { %v1644_v31 = vsel %vm1622_vm10, %v4092_v52, %v1387_v39 }
 0x145   : > { %v1607_v40 = vpop.permute.xlu0 %1606 }
 0x146   : > { %v1871_v14 = vsel %vm1853_vm1, %v1838_v0, %v1607_v40 }
 0x147   : > { %3128 = vmatprep.mubr.msk.bf16.mxu1 %vm1929_vm9, %v1871_v14  ;;  %v1389_v58 = vpop.permute.xlu1 %1388 }
 0x148   : > { %v1646_v43 = vsel %vm1622_vm10, %v4146_v38, %v1389_v58 }
 0x149   : > { %v1609_v28 = vpop.permute.xlu0 %1608 }
 0x14a   : > { %v1873_v29 = vsel %vm1853_vm1, %v1840_v56, %v1609_v28 }
 0x14b   : > { %3129 = vmatmul.mubr.msk.bf16.vlgmr.msra.gmra.mrb[0].mxu1 %vm1929_vm9, %v1873_v29  ;;  %v1421_v9 = vpop.permute.xlu1 %1420 }
 0x14c   : > { %v1679_v32 = vsel %vm1655_vm11, %v1646_v43, %v1421_v9 }
 0x14d   : > { %v1419_v21 = vpop.permute.xlu0 %1418 }
 0x14e   : > { %v1677_v57 = vsel %vm1655_vm11, %v1644_v31, %v1419_v21 }
 0x14f   : > { %v1453_v62 = vpop.permute.xlu1 %1452 }
 0x150   : > { %v1712_v52 = vsel %vm1688_vm12, %v1679_v32, %v1453_v62 }
 0x151   : > { %v1451_v7 = vpop.permute.xlu0 %1450 }
 0x152   : > { %v1710_v19 = vsel %vm1688_vm12, %v1677_v57, %v1451_v7 }
 0x153   : > { %v1485_v48 = vpop.permute.xlu1 %1484 }
 0x154   : > { %v1745_v6 = vsel %vm1721_vm13, %v1712_v52, %v1485_v48 }
 0x155   : > { %v1483_v22 = vpop.permute.xlu0 %1482 }
 0x156   : > { %v1743_v44 = vsel %vm1721_vm13, %v1710_v19, %v1483_v22 }
 0x157   : > { %v1517_v15 = vpop.permute.xlu1 %1516 }
 0x158   : > { %v1778_v42 = vsel %vm1754_vm14, %v1745_v6, %v1517_v15 }
 0x159   : > { %v1515_v2 = vpop.permute.xlu0 %1514 }
 0x15a   : > { %v1776_v10 = vsel %vm1754_vm14, %v1743_v44, %v1515_v2 }
 0x15b   : > { %v1549_v17 = vpop.permute.xlu1 %1548 }
 0x15c   : > { %v1811_v30 = vsel %vm1787_vm15, %v1778_v42, %v1549_v17 }
 0x15d   : > { %v1547_v13 = vpop.permute.xlu0 %1546 }
 0x15e   : > { %v1809_v63 = vsel %vm1787_vm15, %v1776_v10, %v1547_v13 }
 0x15f   : > { %v1581_v55 = vpop.permute.xlu1 %1580 }
 0x160   : > { %v1844_v53 = vsel %vm1820_vm0, %v1811_v30, %v1581_v55 }
 0x161   : > { %v1579_v33 = vpop.permute.xlu0 %1578 }
 0x162   : > { %v1842_v54 = vsel %vm1820_vm0, %v1809_v63, %v1579_v33 }
 0x163   : > { %v1391_v23 = vpop.permute.xlu1 %1390 }
 0x164   : > { %v1648_v35 = vsel %vm1622_vm10, %v4234_v41, %v1391_v23 }
 0x165   : > { %v1611_v11 = vpop.permute.xlu0 %1610 }
 0x166   : > { %v1875_v46 = vsel %vm1853_vm1, %v1842_v54, %v1611_v11 }
 0x167   : > { %3132 = vmatprep.mubr.msk.bf16.mxu1 %vm1929_vm9, %v1875_v46  ;;  %v1393_v38 = vpop.permute.xlu1 %1392 }
 0x168   : > { %v1650_v50 = vsel %vm1622_vm10, %v4302_v51, %v1393_v38 }
 0x169   : > { %v1613_v8 = vpop.permute.xlu0 %1612 }
 0x16a   : > { %v1877_v20 = vsel %vm1853_vm1, %v1844_v53, %v1613_v8  ;;  %v4620_v8 = vld [vmem:[%s4901_s4] ss:$0 sm:$0xff] }
 0x16b   : > { %3133 = vmatmul.mubr.msk.bf16.gmra.mrb[4].mxu1 %vm1929_vm9, %v1877_v20  ;;  %v1425_v25 = vpop.permute.xlu1 %1424 }
 0x16c   : > { %v1683_v40 = vsel %vm1655_vm11, %v1650_v50, %v1425_v25 }
 0x16d   : > { %v1423_v61 = vpop.permute.xlu0 %1422 }
 0x16e   : > { %v1681_v26 = vsel %vm1655_vm11, %v1648_v35, %v1423_v61 }
 0x16f   : > { %v1457_v60 = vpop.permute.xlu1 %1456 }
 0x170   : > { %v1716_v41 = vsel %vm1688_vm12, %v1683_v40, %v1457_v60 }
 0x171   : > { %v1455_v34 = vpop.permute.xlu0 %1454 }
 0x172   : > { %v1714_v59 = vsel %vm1688_vm12, %v1681_v26, %v1455_v34 }
 0x173   : > { %v1489_v18 = vpop.permute.xlu1 %1488 }
 0x174   : > { %v1749_v58 = vsel %vm1721_vm13, %v1716_v41, %v1489_v18 }
 0x175   : > { %v1487_v24 = vpop.permute.xlu0 %1486 }
 0x176   : > { %v1747_v45 = vsel %vm1721_vm13, %v1714_v59, %v1487_v24 }
 0x177   : > { %v1521_v37 = vpop.permute.xlu1 %1520 }
 0x178   : > { %v1782_v56 = vsel %vm1754_vm14, %v1749_v58, %v1521_v37 }
 0x179   : > { %v1519_v3 = vpop.permute.xlu0 %1518 }
 0x17a   : > { %v1780_v27 = vsel %vm1754_vm14, %v1747_v45, %v1519_v3 }
 0x17b   : > { %v1553_v5 = vpop.permute.xlu1 %1552 }
 0x17c   : > { %v1815_v28 = vsel %vm1787_vm15, %v1782_v56, %v1553_v5 }
 0x17d   : > { %v1551_v47 = vpop.permute.xlu0 %1550 }
 0x17e   : > { %v1813_v49 = vsel %vm1787_vm15, %v1780_v27, %v1551_v47 }
 0x17f   : > { %v1585_v1 = vpop.permute.xlu1 %1584 }
 0x180   : > { %v1848_v29 = vsel %vm1820_vm0, %v1815_v28, %v1585_v1 }
 0x181   : > { %v1583_v39 = vpop.permute.xlu0 %1582 }
 0x182   : > { %v1846_v14 = vsel %vm1820_vm0, %v1813_v49, %v1583_v39 }
 0x183   : > { %v1395_v0 = vpop.permute.xlu1 %1394 }
 0x184   : > { %v1652_v19 = vsel %vm1622_vm10, %v4395_v4, %v1395_v0 }
 0x185   : > { %v1615_v16 = vpop.permute.xlu0 %1614 }
 0x186   : > { %v1879_v36 = vsel %vm1853_vm1, %v1846_v14, %v1615_v16 }
 0x187   : > { %3136 = vmatprep.mubr.msk.bf16.mxu1 %vm1929_vm9, %v1879_v36  ;;  %v1397_v51 = vpop.permute.xlu1 %1396 }
 0x188   : > { %v1654_v57 = vsel %vm1622_vm10, %v4425_v12, %v1397_v51 }
 0x189   : > { %v1617_v9 = vpop.permute.xlu0 %1616 }
 0x18a   : > { %v1881_v21 = vsel %vm1853_vm1, %v1848_v29, %v1617_v9 }
 0x18b   : > { %3137 = vmatmul.mubr.msk.bf16.gmra.mrb[8].mxu1 %vm1929_vm9, %v1881_v21  ;;  %v1429_v62 = vpop.permute.xlu1 %1428 }
 0x18c   : > { %v1687_v33 = vsel %vm1655_vm11, %v1654_v57, %v1429_v62 }
 0x18d   : > { %v1427_v7 = vpop.permute.xlu0 %1426 }
 0x18e   : > { %v1685_v43 = vsel %vm1655_vm11, %v1652_v19, %v1427_v7 }
 0x18f   : > { %v1461_v48 = vpop.permute.xlu1 %1460 }
 0x190   : > { %v1720_v10 = vsel %vm1688_vm12, %v1687_v33, %v1461_v48 }
 0x191   : > { %v1459_v22 = vpop.permute.xlu0 %1458 }
 0x192   : > { %v1718_v23 = vsel %vm1688_vm12, %v1685_v43, %v1459_v22 }
 0x193   : > { %v1493_v15 = vpop.permute.xlu1 %1492 }
 0x194   : > { %v1753_v32 = vsel %vm1721_vm13, %v1720_v10, %v1493_v15 }
 0x195   : > { %v1491_v2 = vpop.permute.xlu0 %1490 }
 0x196   : > { %v1751_v52 = vsel %vm1721_vm13, %v1718_v23, %v1491_v2 }
 0x197   : > { %v1525_v17 = vpop.permute.xlu1 %1524 }
 0x198   : > { %v1786_v54 = vsel %vm1754_vm14, %v1753_v32, %v1525_v17 }
 0x199   : > { %v1523_v13 = vpop.permute.xlu0 %1522 }
 0x19a   : > { %v1784_v12 = vsel %vm1754_vm14, %v1751_v52, %v1523_v13 }
 0x19b   : > { %v1557_v31 = vpop.permute.xlu1 %1556 }
 0x19c   : > { %v1819_v4 = vsel %vm1787_vm15, %v1786_v54, %v1557_v31 }
 0x19d   : > { %v1555_v55 = vpop.permute.xlu0 %1554 }
 0x19e   : > { %v1817_v6 = vsel %vm1787_vm15, %v1784_v12, %v1555_v55 }
 0x19f   : > { %v1589_v44 = vpop.permute.xlu1 %1588 }
 0x1a0   : > { %v1852_v46 = vsel %vm1820_vm0, %v1819_v4, %v1589_v44 }
 0x1a1   : > { %v1587_v63 = vpop.permute.xlu0 %1586 }
 0x1a2   : > { %v1850_v42 = vsel %vm1820_vm0, %v1817_v6, %v1587_v63 }
 0x1a3   : > { %v1621_v11 = vpop.permute.xlu1 %1620 }
 0x1a4   : > { %v1885_v38 = vsel %vm1853_vm1, %v1852_v46, %v1621_v11 }
 0x1a5   : > { %v1619_v30 = vpop.permute.xlu0 %1618 }
 0x1a6   : > { %v1883_v53 = vsel %vm1853_vm1, %v1850_v42, %v1619_v30 }
 0x1a7   : > { %3140 = vmatprep.mubr.msk.bf16.mxu1 %vm1929_vm9, %v1883_v53 }
 0x1a8   : > { %3141 = vmatmul.mubr.msk.bf16.gmra.mrb[12].mxu1 %vm1929_vm9, %v1885_v38 }
 0x1ac   : > { %v3114_v20 = vpop.f32.mrb[0].mxu0 }
 0x1ad   : > { %v2009_v25 = vadd.f32 %v3114_v20, %v4620_v8  ;;  %v2000_v61 = vpop.f32.mrb[1].mxu0 }
 0x1ae   : > { %v2001_v60 = vadd.f32 %v4620_v8, %v2000_v61  ;;  %v3115_v34 = vpop.f32.mrb[2].mxu0 }
 0x1af   : > { %v2012_v18 = vadd.f32 %v3115_v34, %v4620_v8  ;;  %v2003_v24 = vpop.f32.mrb[3].mxu0  ;;  %v2200_v5 = vmul.f32 %v2009_v25, %v2009_v25  ;;  %v2130_v39 = vsel %vm1655_vm11, %v2009_v25, 0.0 }
 0x1b0   : > { %v2198_v37 = vmul.f32 %v2001_v60, %v2001_v60  ;;  %v2004_v3 = vadd.f32 %v4620_v8, %v2003_v24  ;;  %v2127_v35 = vsel %vm1655_vm11, %v2001_v60, 0.0 }
 0x1b1   : > { %v2301_v47 = vpack.c.bf16 %v2012_v18, %v2009_v25  ;;  %v2201_v0 = vmul.f32 %v2012_v18, %v2012_v18  ;;  %v2233_v36 = vsel %vm1655_vm11, %v2200_v5, 0.0  ;;  %v2132_v56 = vsel %vm1655_vm11, %v2012_v18, 0.0 }
 0x1b2   : > { %v2128_v1 = vsel %vm1655_vm11, %v2004_v3, 0.0  ;;  %v2199_v26 = vmul.f32 %v2004_v3, %v2004_v3  ;;  %v2300_v59 = vpack.c.bf16 %v2004_v3, %v2001_v60  ;;  %v2230_v27 = vsel %vm1655_vm11, %v2198_v37, 0.0 }
 0x1b3   : > { %v2331_v45 = vshrl.u32 %v2301_v47, 16  ;;  %v2129_v50 = vadd.f32 %v2128_v1, %v2127_v35  ;;  %v2334_v14 = vshll.u32 %v2301_v47, 16  ;;  %v2235_v48 = vsel %vm1655_vm11, %v2201_v0, 0.0 }
 0x1b4   : > { %v2231_v40 = vsel %vm1655_vm11, %v2199_v26, 0.0  ;;  %v2324_v49 = vshrl.u32 %v2300_v59, 16  ;;  %v2327_v28 = vshll.u32 %v2300_v59, 16 }
 0x1b5   : > { %v2333_v41 = vrot.slane %v2331_v45, 7  ;;  %v2131_v16 = vadd.f32 %v2130_v39, %v2129_v50  ;;  %v2232_v58 = vadd.f32 %v2231_v40, %v2230_v27 }
 0x1b6   : > { %v2326_v51 = vrot.slane %v2324_v49, 7 }
 0x1b7   : > { %v2336_v29 = vor.u32 %v2334_v14, %v2333_v41  ;;  %v2491_v21 = vsel %vm3488_vm2, %v2333_v41, 0  ;;  %v2234_v62 = vadd.f32 %v2233_v36, %v2232_v58  ;;  %v2133_v7 = vadd.f32 %v2132_v56, %v2131_v16 }
 0x1b8   : > { %v3036_v22 = vcombine.low %v2491_v21, %v2491_v21  ;;  %v2329_v15 = vor.u32 %v2327_v28, %v2326_v51  ;;  %v2490_v2 = vsel %vm3488_vm2, %v2326_v51, 0 }
 0x1b9   : > { %v2474_v17 = vsel %vm3488_vm2, 0, %v2336_v29  ;;  %v3033_v13 = vcombine.low %v2490_v2, %v2490_v2  ;;  %v2236_v31 = vadd.f32 %v2235_v48, %v2234_v62 }
 0x1ba   : > { %v3034_v55 = vcombine.low %v2474_v17, %v2474_v17  ;;  %v3035_v57 = vcombine.high %v2474_v17, %v2474_v17  ;;  %2702 = vst.msk [vmem:[%s3519_s17 + $0x20] sm:$0x1] %vm2196_vm3, %v3036_v22  ;;  %v2473_v19 = vsel %vm3488_vm2, 0, %v2329_v15 }
 0x1bb   : > { %v3031_v33 = vcombine.low %v2473_v19, %v2473_v19  ;;  %v3032_v44 = vcombine.high %v2473_v19, %v2473_v19  ;;  %2699 = vst.msk [vmem:[%s3519_s17 + $0x14] sm:$0x1] %vm2196_vm3, %v3033_v13 }
 0x1bc   : > { %2700 = vst.msk [vmem:[%s3519_s17 + $0x18] sm:$0xf] %vm2693_vm4, %v3034_v55  ;;  %2701 = vst.msk [vmem:[%s3519_s17 + $0x1c] sm:$0xf] %vm2693_vm4, %v3035_v57 }
 0x1bd   : > { %2697 = vst.msk [vmem:[%s3519_s17 + $0xc] sm:$0xf] %vm2693_vm4, %v3031_v33  ;;  %2698 = vst.msk [vmem:[%s3519_s17 + $0x10] sm:$0xf] %vm2693_vm4, %v3032_v44 }
 0x1be   : > { %v3118_v43 = vpop.f32.mrb[4].mxu0 }
 0x1bf   : > { %v2025_v10 = vadd.f32 %v3118_v43, %v4620_v8  ;;  %v2016_v23 = vpop.f32.mrb[5].mxu0 }
 0x1c0   : > { %v2017_v32 = vadd.f32 %v4620_v8, %v2016_v23  ;;  %v3119_v63 = vpop.f32.mrb[6].mxu0 }
 0x1c1   : > { %v2028_v52 = vadd.f32 %v3119_v63, %v4620_v8  ;;  %v2019_v54 = vpop.f32.mrb[7].mxu0  ;;  %v2204_v6 = vmul.f32 %v2025_v10, %v2025_v10  ;;  %v2138_v60 = vsel %vm1655_vm11, %v2025_v10, 0.0 }
 0x1c2   : > { %v2134_v12 = vsel %vm1655_vm11, %v2017_v32, 0.0  ;;  %v2202_v4 = vmul.f32 %v2017_v32, %v2017_v32  ;;  %v2020_v11 = vadd.f32 %v4620_v8, %v2019_v54 }
 0x1c3   : > { %v2135_v46 = vadd.f32 %v2134_v12, %v2133_v7  ;;  %v2303_v38 = vpack.c.bf16 %v2028_v52, %v2025_v10  ;;  %v2205_v34 = vmul.f32 %v2028_v52, %v2028_v52  ;;  %v2241_v47 = vsel %vm1655_vm11, %v2204_v6, 0.0 }
 0x1c4   : > { %v2237_v42 = vsel %vm1655_vm11, %v2202_v4, 0.0  ;;  %v2136_v30 = vsel %vm1655_vm11, %v2020_v11, 0.0  ;;  %v2203_v53 = vmul.f32 %v2020_v11, %v2020_v11  ;;  %v2302_v61 = vpack.c.bf16 %v2020_v11, %v2017_v32 }
 0x1c5   : > { %v2238_v20 = vadd.f32 %v2237_v42, %v2236_v31  ;;  %v2137_v25 = vadd.f32 %v2136_v30, %v2135_v46  ;;  %v2345_v18 = vshrl.u32 %v2303_v38, 16  ;;  %v2140_v35 = vsel %vm1655_vm11, %v2028_v52, 0.0 }
 0x1c6   : > { %v2239_v24 = vsel %vm1655_vm11, %v2203_v53, 0.0  ;;  %v2338_v5 = vshrl.u32 %v2302_v61, 16  ;;  %v2348_v26 = vshll.u32 %v2303_v38, 16  ;;  %v2341_v45 = vshll.u32 %v2302_v61, 16 }
 0x1c7   : > { %v2139_v37 = vadd.f32 %v2138_v60, %v2137_v25  ;;  %v2240_v3 = vadd.f32 %v2239_v24, %v2238_v20  ;;  %v2347_v1 = vrot.slane %v2345_v18, 7  ;;  %v2243_v27 = vsel %vm1655_vm11, %v2205_v34, 0.0 }
 0x1c8   : > { %v2340_v39 = vrot.slane %v2338_v5, 7 }
 0x1c9   : > { %v2242_v59 = vadd.f32 %v2241_v47, %v2240_v3  ;;  %v2141_v50 = vadd.f32 %v2140_v35, %v2139_v37  ;;  %v2350_v0 = vor.u32 %v2348_v26, %v2347_v1  ;;  %v2493_v40 = vsel %vm3488_vm2, %v2347_v1, 0 }
 0x1ca   : > { %v3042_v49 = vcombine.low %v2493_v40, %v2493_v40  ;;  %v2343_v41 = vor.u32 %v2341_v45, %v2340_v39  ;;  %v2492_v14 = vsel %vm3488_vm2, %v2340_v39, 0 }
 0x1cb   : > { %v2244_v16 = vadd.f32 %v2243_v27, %v2242_v59  ;;  %v2476_v58 = vsel %vm3488_vm2, 0, %v2350_v0  ;;  %v3039_v36 = vcombine.low %v2492_v14, %v2492_v14 }
 0x1cc   : > { %v3040_v56 = vcombine.low %v2476_v58, %v2476_v58  ;;  %v3041_v51 = vcombine.high %v2476_v58, %v2476_v58  ;;  %2708 = vst.msk [vmem:[%s3519_s17 + $0x38] sm:$0x1] %vm2196_vm3, %v3042_v49  ;;  %v2475_v28 = vsel %vm3488_vm2, 0, %v2343_v41 }
 0x1cd   : > { %v3037_v29 = vcombine.low %v2475_v28, %v2475_v28  ;;  %v3038_v21 = vcombine.high %v2475_v28, %v2475_v28  ;;  %2705 = vst.msk [vmem:[%s3519_s17 + $0x2c] sm:$0x1] %vm2196_vm3, %v3039_v36 }
 0x1ce   : > { %2706 = vst.msk [vmem:[%s3519_s17 + $0x30] sm:$0xf] %vm2693_vm4, %v3040_v56  ;;  %2707 = vst.msk [vmem:[%s3519_s17 + $0x34] sm:$0xf] %vm2693_vm4, %v3041_v51 }
 0x1cf   : > { %2703 = vst.msk [vmem:[%s3519_s17 + $0x24] sm:$0xf] %vm2693_vm4, %v3037_v29  ;;  %2704 = vst.msk [vmem:[%s3519_s17 + $0x28] sm:$0xf] %vm2693_vm4, %v3038_v21 }
 0x1de   : > { %v3122_v62 = vpop.f32.mrb[8].mxu0 }
 0x1df   : > { %v2041_v7 = vadd.f32 %v3122_v62, %v4620_v8  ;;  %v2032_v48 = vpop.f32.mrb[9].mxu0 }
 0x1e0   : > { %v2033_v22 = vadd.f32 %v4620_v8, %v2032_v48  ;;  %v3123_v15 = vpop.f32.mrb[10].mxu0 }
 0x1e1   : > { %v2044_v2 = vadd.f32 %v3123_v15, %v4620_v8  ;;  %v2035_v17 = vpop.f32.mrb[11].mxu0  ;;  %v2208_v57 = vmul.f32 %v2041_v7, %v2041_v7  ;;  %v2146_v52 = vsel %vm1655_vm11, %v2041_v7, 0.0 }
 0x1e2   : > { %v2142_v13 = vsel %vm1655_vm11, %v2033_v22, 0.0  ;;  %v2206_v31 = vmul.f32 %v2033_v22, %v2033_v22  ;;  %v2036_v55 = vadd.f32 %v4620_v8, %v2035_v17 }
 0x1e3   : > { %v2143_v19 = vadd.f32 %v2142_v13, %v2141_v50  ;;  %v2305_v44 = vpack.c.bf16 %v2044_v2, %v2041_v7  ;;  %v2209_v54 = vmul.f32 %v2044_v2, %v2044_v2  ;;  %v2249_v42 = vsel %vm1655_vm11, %v2208_v57, 0.0 }
 0x1e4   : > { %v2245_v33 = vsel %vm1655_vm11, %v2206_v31, 0.0  ;;  %v2144_v43 = vsel %vm1655_vm11, %v2036_v55, 0.0  ;;  %v2207_v10 = vmul.f32 %v2036_v55, %v2036_v55  ;;  %v2304_v63 = vpack.c.bf16 %v2036_v55, %v2033_v22 }
 0x1e5   : > { %v2246_v23 = vadd.f32 %v2245_v33, %v2244_v16  ;;  %v2145_v32 = vadd.f32 %v2144_v43, %v2143_v19  ;;  %v2359_v12 = vshrl.u32 %v2305_v44, 16  ;;  %v2148_v38 = vsel %vm1655_vm11, %v2044_v2, 0.0 }
 0x1e6   : > { %v2247_v4 = vsel %vm1655_vm11, %v2207_v10, 0.0  ;;  %v2352_v46 = vshrl.u32 %v2304_v63, 16  ;;  %v2362_v53 = vshll.u32 %v2305_v44, 16  ;;  %v2355_v61 = vshll.u32 %v2304_v63, 16 }
 0x1e7   : > { %v2147_v11 = vadd.f32 %v2146_v52, %v2145_v32  ;;  %v2248_v6 = vadd.f32 %v2247_v4, %v2246_v23  ;;  %v2361_v30 = vrot.slane %v2359_v12, 7  ;;  %v2251_v34 = vsel %vm1655_vm11, %v2209_v54, 0.0 }
 0x1e8   : > { %v2354_v25 = vrot.slane %v2352_v46, 7 }
 0x1e9   : > { %v2250_v20 = vadd.f32 %v2249_v42, %v2248_v6  ;;  %v2149_v60 = vadd.f32 %v2148_v38, %v2147_v11  ;;  %v2364_v18 = vor.u32 %v2362_v53, %v2361_v30  ;;  %v2495_v24 = vsel %vm3488_vm2, %v2361_v30, 0 }
 0x1ea   : > { %v3048_v37 = vcombine.low %v2495_v24, %v2495_v24  ;;  %v2357_v3 = vor.u32 %v2355_v61, %v2354_v25  ;;  %v2494_v5 = vsel %vm3488_vm2, %v2354_v25, 0 }
 0x1eb   : > { %v2252_v47 = vadd.f32 %v2251_v34, %v2250_v20  ;;  %v2478_v35 = vsel %vm3488_vm2, 0, %v2364_v18  ;;  %v3045_v1 = vcombine.low %v2494_v5, %v2494_v5 }
 0x1ec   : > { %v3046_v26 = vcombine.low %v2478_v35, %v2478_v35  ;;  %v3047_v59 = vcombine.high %v2478_v35, %v2478_v35  ;;  %2714 = vst.msk [vmem:[%s3519_s17 + $0x50] sm:$0x1] %vm2196_vm3, %v3048_v37  ;;  %v2477_v39 = vsel %vm3488_vm2, 0, %v2357_v3 }
 0x1ed   : > { %v3043_v45 = vcombine.low %v2477_v39, %v2477_v39  ;;  %v3044_v50 = vcombine.high %v2477_v39, %v2477_v39  ;;  %2711 = vst.msk [vmem:[%s3519_s17 + $0x44] sm:$0x1] %vm2196_vm3, %v3045_v1 }
 0x1ee   : > { %2712 = vst.msk [vmem:[%s3519_s17 + $0x48] sm:$0xf] %vm2693_vm4, %v3046_v26  ;;  %2713 = vst.msk [vmem:[%s3519_s17 + $0x4c] sm:$0xf] %vm2693_vm4, %v3047_v59 }
 0x1ef   : > { %2709 = vst.msk [vmem:[%s3519_s17 + $0x3c] sm:$0xf] %vm2693_vm4, %v3043_v45  ;;  %2710 = vst.msk [vmem:[%s3519_s17 + $0x40] sm:$0xf] %vm2693_vm4, %v3044_v50 }
 0x1fe   : > { %v3126_v27 = vpop.f32.mrb[12].mxu0 }
 0x1ff   : > { %v2057_v0 = vadd.f32 %v3126_v27, %v4620_v8  ;;  %v2048_v40 = vpop.f32.mrb[13].mxu0 }
 0x200   : > { %v2049_v49 = vadd.f32 %v4620_v8, %v2048_v40  ;;  %v3127_v41 = vpop.f32.mrb[14].mxu0 }
 0x201   : > { %v2060_v14 = vadd.f32 %v3127_v41, %v4620_v8  ;;  %v2051_v16 = vpop.f32.mrb[15].mxu0  ;;  %v2212_v51 = vmul.f32 %v2057_v0, %v2057_v0  ;;  %v2154_v2 = vsel %vm1655_vm11, %v2057_v0, 0.0 }
 0x202   : > { %v2150_v58 = vsel %vm1655_vm11, %v2049_v49, 0.0  ;;  %v2210_v36 = vmul.f32 %v2049_v49, %v2049_v49  ;;  %v2052_v56 = vadd.f32 %v4620_v8, %v2051_v16 }
 0x203   : > { %v2151_v28 = vadd.f32 %v2150_v58, %v2149_v60  ;;  %v2307_v21 = vpack.c.bf16 %v2060_v14, %v2057_v0  ;;  %v2213_v17 = vmul.f32 %v2060_v14, %v2060_v14  ;;  %v2257_v33 = vsel %vm1655_vm11, %v2212_v51, 0.0 }
 0x204   : > { %v2253_v29 = vsel %vm1655_vm11, %v2210_v36, 0.0  ;;  %v2152_v62 = vsel %vm1655_vm11, %v2052_v56, 0.0  ;;  %v2211_v7 = vmul.f32 %v2052_v56, %v2052_v56  ;;  %v2306_v15 = vpack.c.bf16 %v2052_v56, %v2049_v49 }
 0x205   : > { %v2254_v48 = vadd.f32 %v2253_v29, %v2252_v47  ;;  %v2153_v22 = vadd.f32 %v2152_v62, %v2151_v28  ;;  %v2373_v13 = vshrl.u32 %v2307_v21, 16  ;;  %v2156_v44 = vsel %vm1655_vm11, %v2060_v14, 0.0 }
 0x206   : > { %v2255_v31 = vsel %vm1655_vm11, %v2211_v7, 0.0  ;;  %v2366_v19 = vshrl.u32 %v2306_v15, 16  ;;  %v2376_v10 = vshll.u32 %v2307_v21, 16  ;;  %v2369_v63 = vshll.u32 %v2306_v15, 16 }
 0x207   : > { %v2155_v55 = vadd.f32 %v2154_v2, %v2153_v22  ;;  %v2256_v57 = vadd.f32 %v2255_v31, %v2254_v48  ;;  %v2375_v43 = vrot.slane %v2373_v13, 7  ;;  %v2259_v54 = vsel %vm1655_vm11, %v2213_v17, 0.0 }
 0x208   : > { %v2368_v32 = vrot.slane %v2366_v19, 7 }
 0x209   : > { %v2258_v23 = vadd.f32 %v2257_v33, %v2256_v57  ;;  %v2157_v52 = vadd.f32 %v2156_v44, %v2155_v55  ;;  %v2378_v12 = vor.u32 %v2376_v10, %v2375_v43  ;;  %v2497_v4 = vsel %vm3488_vm2, %v2375_v43, 0 }
 0x20a   : > { %v3054_v11 = vcombine.low %v2497_v4, %v2497_v4  ;;  %v2371_v6 = vor.u32 %v2369_v63, %v2368_v32  ;;  %v2496_v46 = vsel %vm3488_vm2, %v2368_v32, 0 }
 0x20b   : > { %v2260_v42 = vadd.f32 %v2259_v54, %v2258_v23  ;;  %v2480_v38 = vsel %vm3488_vm2, 0, %v2378_v12  ;;  %v3051_v30 = vcombine.low %v2496_v46, %v2496_v46 }
 0x20c   : > { %v3052_v53 = vcombine.low %v2480_v38, %v2480_v38  ;;  %v3053_v20 = vcombine.high %v2480_v38, %v2480_v38  ;;  %2720 = vst.msk [vmem:[%s3519_s17 + $0x68] sm:$0x1] %vm2196_vm3, %v3054_v11  ;;  %v2479_v25 = vsel %vm3488_vm2, 0, %v2371_v6 }
 0x20d   : > { %v3049_v61 = vcombine.low %v2479_v25, %v2479_v25  ;;  %v3050_v60 = vcombine.high %v2479_v25, %v2479_v25  ;;  %2717 = vst.msk [vmem:[%s3519_s17 + $0x5c] sm:$0x1] %vm2196_vm3, %v3051_v30 }
 0x20e   : > { %2718 = vst.msk [vmem:[%s3519_s17 + $0x60] sm:$0xf] %vm2693_vm4, %v3052_v53  ;;  %2719 = vst.msk [vmem:[%s3519_s17 + $0x64] sm:$0xf] %vm2693_vm4, %v3053_v20 }
 0x20f   : > { %2715 = vst.msk [vmem:[%s3519_s17 + $0x54] sm:$0xf] %vm2693_vm4, %v3049_v61  ;;  %2716 = vst.msk [vmem:[%s3519_s17 + $0x58] sm:$0xf] %vm2693_vm4, %v3050_v60 }
 0x21e   : > { %v3130_v34 = vpop.f32.mrb[0].mxu1 }
 0x21f   : > { %v2073_v18 = vadd.f32 %v3130_v34, %v4620_v8  ;;  %v2064_v24 = vpop.f32.mrb[1].mxu1 }
 0x220   : > { %v2065_v37 = vadd.f32 %v4620_v8, %v2064_v24  ;;  %v3131_v3 = vpop.f32.mrb[2].mxu1 }
 0x221   : > { %v2076_v5 = vadd.f32 %v3131_v3, %v4620_v8  ;;  %v2067_v47 = vpop.f32.mrb[3].mxu1  ;;  %v2216_v59 = vmul.f32 %v2073_v18, %v2073_v18  ;;  %v2162_v14 = vsel %vm1655_vm11, %v2073_v18, 0.0 }
 0x222   : > { %v2158_v35 = vsel %vm1655_vm11, %v2065_v37, 0.0  ;;  %v2214_v1 = vmul.f32 %v2065_v37, %v2065_v37  ;;  %v2068_v26 = vadd.f32 %v4620_v8, %v2067_v47 }
 0x223   : > { %v2159_v39 = vadd.f32 %v2158_v35, %v2157_v52  ;;  %v2309_v50 = vpack.c.bf16 %v2076_v5, %v2073_v18  ;;  %v2217_v16 = vmul.f32 %v2076_v5, %v2076_v5  ;;  %v2265_v29 = vsel %vm1655_vm11, %v2216_v59, 0.0 }
 0x224   : > { %v2261_v45 = vsel %vm1655_vm11, %v2214_v1, 0.0  ;;  %v2160_v27 = vsel %vm1655_vm11, %v2068_v26, 0.0  ;;  %v2215_v0 = vmul.f32 %v2068_v26, %v2068_v26  ;;  %v2308_v41 = vpack.c.bf16 %v2068_v26, %v2065_v37 }
 0x225   : > { %v2262_v40 = vadd.f32 %v2261_v45, %v2260_v42  ;;  %v2161_v49 = vadd.f32 %v2160_v27, %v2159_v39  ;;  %v2387_v58 = vshrl.u32 %v2309_v50, 16  ;;  %v2164_v21 = vsel %vm1655_vm11, %v2076_v5, 0.0 }
 0x226   : > { %v2263_v36 = vsel %vm1655_vm11, %v2215_v0, 0.0  ;;  %v2380_v28 = vshrl.u32 %v2308_v41, 16  ;;  %v2390_v7 = vshll.u32 %v2309_v50, 16  ;;  %v2383_v15 = vshll.u32 %v2308_v41, 16 }
 0x227   : > { %v2163_v56 = vadd.f32 %v2162_v14, %v2161_v49  ;;  %v2264_v51 = vadd.f32 %v2263_v36, %v2262_v40  ;;  %v2389_v62 = vrot.slane %v2387_v58, 7  ;;  %v2267_v17 = vsel %vm1655_vm11, %v2217_v16, 0.0 }
 0x228   : > { %v2382_v22 = vrot.slane %v2380_v28, 7 }
 0x229   : > { %v2266_v48 = vadd.f32 %v2265_v29, %v2264_v51  ;;  %v2165_v2 = vadd.f32 %v2164_v21, %v2163_v56  ;;  %v2392_v13 = vor.u32 %v2390_v7, %v2389_v62  ;;  %v2499_v31 = vsel %vm3488_vm2, %v2389_v62, 0 }
 0x22a   : > { %v3060_v55 = vcombine.low %v2499_v31, %v2499_v31  ;;  %v2385_v57 = vor.u32 %v2383_v15, %v2382_v22  ;;  %v2498_v19 = vsel %vm3488_vm2, %v2382_v22, 0 }
 0x22b   : > { %v2268_v33 = vadd.f32 %v2267_v17, %v2266_v48  ;;  %v2482_v44 = vsel %vm3488_vm2, 0, %v2392_v13  ;;  %v3057_v43 = vcombine.low %v2498_v19, %v2498_v19 }
 0x22c   : > { %v3058_v10 = vcombine.low %v2482_v44, %v2482_v44  ;;  %v3059_v23 = vcombine.high %v2482_v44, %v2482_v44  ;;  %2726 = vst.msk [vmem:[%s3519_s17 + $0x80] sm:$0x1] %vm2196_vm3, %v3060_v55  ;;  %v2481_v32 = vsel %vm3488_vm2, 0, %v2385_v57 }
 0x22d   : > { %v3055_v63 = vcombine.low %v2481_v32, %v2481_v32  ;;  %v3056_v52 = vcombine.high %v2481_v32, %v2481_v32  ;;  %2723 = vst.msk [vmem:[%s3519_s17 + $0x74] sm:$0x1] %vm2196_vm3, %v3057_v43 }
 0x22e   : > { %2724 = vst.msk [vmem:[%s3519_s17 + $0x78] sm:$0xf] %vm2693_vm4, %v3058_v10  ;;  %2725 = vst.msk [vmem:[%s3519_s17 + $0x7c] sm:$0xf] %vm2693_vm4, %v3059_v23 }
 0x22f   : > { %2721 = vst.msk [vmem:[%s3519_s17 + $0x6c] sm:$0xf] %vm2693_vm4, %v3055_v63  ;;  %2722 = vst.msk [vmem:[%s3519_s17 + $0x70] sm:$0xf] %vm2693_vm4, %v3056_v52 }
 0x23e   : > { %v3134_v54 = vpop.f32.mrb[4].mxu1 }
 0x23f   : > { %v2089_v12 = vadd.f32 %v3134_v54, %v4620_v8  ;;  %v2080_v4 = vpop.f32.mrb[5].mxu1 }
 0x240   : > { %v2081_v11 = vadd.f32 %v4620_v8, %v2080_v4  ;;  %v3135_v6 = vpop.f32.mrb[6].mxu1 }
 0x241   : > { %v2092_v46 = vadd.f32 %v3135_v6, %v4620_v8  ;;  %v2083_v42 = vpop.f32.mrb[7].mxu1  ;;  %v2220_v20 = vmul.f32 %v2089_v12, %v2089_v12  ;;  %v2170_v5 = vsel %vm1655_vm11, %v2089_v12, 0.0 }
 0x242   : > { %v2166_v38 = vsel %vm1655_vm11, %v2081_v11, 0.0  ;;  %v2218_v30 = vmul.f32 %v2081_v11, %v2081_v11  ;;  %v2084_v53 = vadd.f32 %v4620_v8, %v2083_v42 }
 0x243   : > { %v2167_v25 = vadd.f32 %v2166_v38, %v2165_v2  ;;  %v2311_v60 = vpack.c.bf16 %v2092_v46, %v2089_v12  ;;  %v2221_v47 = vmul.f32 %v2092_v46, %v2092_v46  ;;  %v2273_v45 = vsel %vm1655_vm11, %v2220_v20, 0.0 }
 0x244   : > { %v2269_v61 = vsel %vm1655_vm11, %v2218_v30, 0.0  ;;  %v2168_v34 = vsel %vm1655_vm11, %v2084_v53, 0.0  ;;  %v2219_v18 = vmul.f32 %v2084_v53, %v2084_v53  ;;  %v2310_v3 = vpack.c.bf16 %v2084_v53, %v2081_v11 }
 0x245   : > { %v2270_v24 = vadd.f32 %v2269_v61, %v2268_v33  ;;  %v2169_v37 = vadd.f32 %v2168_v34, %v2167_v25  ;;  %v2401_v35 = vshrl.u32 %v2311_v60, 16  ;;  %v2172_v50 = vsel %vm1655_vm11, %v2092_v46, 0.0 }
 0x246   : > { %v2271_v1 = vsel %vm1655_vm11, %v2219_v18, 0.0  ;;  %v2394_v39 = vshrl.u32 %v2310_v3, 16  ;;  %v2404_v0 = vshll.u32 %v2311_v60, 16  ;;  %v2397_v41 = vshll.u32 %v2310_v3, 16 }
 0x247   : > { %v2171_v26 = vadd.f32 %v2170_v5, %v2169_v37  ;;  %v2272_v59 = vadd.f32 %v2271_v1, %v2270_v24  ;;  %v2403_v27 = vrot.slane %v2401_v35, 7  ;;  %v2275_v16 = vsel %vm1655_vm11, %v2221_v47, 0.0 }
 0x248   : > { %v2396_v49 = vrot.slane %v2394_v39, 7 }
 0x249   : > { %v2274_v40 = vadd.f32 %v2273_v45, %v2272_v59  ;;  %v2173_v14 = vadd.f32 %v2172_v50, %v2171_v26  ;;  %v2406_v58 = vor.u32 %v2404_v0, %v2403_v27  ;;  %v2501_v36 = vsel %vm3488_vm2, %v2403_v27, 0 }
 0x24a   : > { %v3066_v56 = vcombine.low %v2501_v36, %v2501_v36  ;;  %v2399_v51 = vor.u32 %v2397_v41, %v2396_v49  ;;  %v2500_v28 = vsel %vm3488_vm2, %v2396_v49, 0 }
 0x24b   : > { %v2276_v29 = vadd.f32 %v2275_v16, %v2274_v40  ;;  %v2484_v21 = vsel %vm3488_vm2, 0, %v2406_v58  ;;  %v3063_v62 = vcombine.low %v2500_v28, %v2500_v28 }
 0x24c   : > { %v3064_v7 = vcombine.low %v2484_v21, %v2484_v21  ;;  %v3065_v48 = vcombine.high %v2484_v21, %v2484_v21  ;;  %2732 = vst.msk [vmem:[%s3519_s17 + $0x98] sm:$0x1] %vm2196_vm3, %v3066_v56  ;;  %v2483_v22 = vsel %vm3488_vm2, 0, %v2399_v51 }
 0x24d   : > { %v3061_v15 = vcombine.low %v2483_v22, %v2483_v22  ;;  %v3062_v2 = vcombine.high %v2483_v22, %v2483_v22  ;;  %2729 = vst.msk [vmem:[%s3519_s17 + $0x8c] sm:$0x1] %vm2196_vm3, %v3063_v62 }
 0x24e   : > { %2730 = vst.msk [vmem:[%s3519_s17 + $0x90] sm:$0xf] %vm2693_vm4, %v3064_v7  ;;  %2731 = vst.msk [vmem:[%s3519_s17 + $0x94] sm:$0xf] %vm2693_vm4, %v3065_v48 }
 0x24f   : > { %2727 = vst.msk [vmem:[%s3519_s17 + $0x84] sm:$0xf] %vm2693_vm4, %v3061_v15  ;;  %2728 = vst.msk [vmem:[%s3519_s17 + $0x88] sm:$0xf] %vm2693_vm4, %v3062_v2 }
 0x25e   : > { %v3138_v17 = vpop.f32.mrb[8].mxu1 }
 0x25f   : > { %v2105_v13 = vadd.f32 %v3138_v17, %v4620_v8  ;;  %v2096_v31 = vpop.f32.mrb[9].mxu1 }
 0x260   : > { %v2097_v55 = vadd.f32 %v4620_v8, %v2096_v31  ;;  %v3139_v57 = vpop.f32.mrb[10].mxu1 }
 0x261   : > { %v2108_v19 = vadd.f32 %v3139_v57, %v4620_v8  ;;  %v2099_v33 = vpop.f32.mrb[11].mxu1  ;;  %v2224_v23 = vmul.f32 %v2105_v13, %v2105_v13  ;;  %v2178_v46 = vsel %vm1655_vm11, %v2105_v13, 0.0 }
 0x262   : > { %v2174_v44 = vsel %vm1655_vm11, %v2097_v55, 0.0  ;;  %v2222_v43 = vmul.f32 %v2097_v55, %v2097_v55  ;;  %v2100_v10 = vadd.f32 %v4620_v8, %v2099_v33 }
 0x263   : > { %v2175_v32 = vadd.f32 %v2174_v44, %v2173_v14  ;;  %v2313_v52 = vpack.c.bf16 %v2108_v19, %v2105_v13  ;;  %v2225_v42 = vmul.f32 %v2108_v19, %v2108_v19  ;;  %v2281_v61 = vsel %vm1655_vm11, %v2224_v23, 0.0 }
 0x264   : > { %v2277_v63 = vsel %vm1655_vm11, %v2222_v43, 0.0  ;;  %v2176_v54 = vsel %vm1655_vm11, %v2100_v10, 0.0  ;;  %v2223_v12 = vmul.f32 %v2100_v10, %v2100_v10  ;;  %v2312_v6 = vpack.c.bf16 %v2100_v10, %v2097_v55 }
 0x265   : > { %v2278_v4 = vadd.f32 %v2277_v63, %v2276_v29  ;;  %v2177_v11 = vadd.f32 %v2176_v54, %v2175_v32  ;;  %v2415_v38 = vshrl.u32 %v2313_v52, 16  ;;  %v2180_v60 = vsel %vm1655_vm11, %v2108_v19, 0.0 }
 0x266   : > { %v2279_v30 = vsel %vm1655_vm11, %v2223_v12, 0.0  ;;  %v2408_v25 = vshrl.u32 %v2312_v6, 16  ;;  %v2418_v18 = vshll.u32 %v2313_v52, 16  ;;  %v2411_v3 = vshll.u32 %v2312_v6, 16 }
 0x267   : > { %v2179_v53 = vadd.f32 %v2178_v46, %v2177_v11  ;;  %v2280_v20 = vadd.f32 %v2279_v30, %v2278_v4  ;;  %v2417_v34 = vrot.slane %v2415_v38, 7  ;;  %v2283_v47 = vsel %vm1655_vm11, %v2225_v42, 0.0 }
 0x268   : > { %v2410_v37 = vrot.slane %v2408_v25, 7 }
 0x269   : > { %v2282_v24 = vadd.f32 %v2281_v61, %v2280_v20  ;;  %v2181_v5 = vadd.f32 %v2180_v60, %v2179_v53  ;;  %v2420_v35 = vor.u32 %v2418_v18, %v2417_v34  ;;  %v2503_v1 = vsel %vm3488_vm2, %v2417_v34, 0 }
 0x26a   : > { %v3072_v26 = vcombine.low %v2503_v1, %v2503_v1  ;;  %v2413_v59 = vor.u32 %v2411_v3, %v2410_v37  ;;  %v2502_v39 = vsel %vm3488_vm2, %v2410_v37, 0 }
 0x26b   : > { %v2284_v45 = vadd.f32 %v2283_v47, %v2282_v24  ;;  %v2486_v50 = vsel %vm3488_vm2, 0, %v2420_v35  ;;  %v3069_v27 = vcombine.low %v2502_v39, %v2502_v39 }
 0x26c   : > { %v3070_v0 = vcombine.low %v2486_v50, %v2486_v50  ;;  %v3071_v40 = vcombine.high %v2486_v50, %v2486_v50  ;;  %2738 = vst.msk [vmem:[%s3519_s17 + $0xb0] sm:$0x1] %vm2196_vm3, %v3072_v26  ;;  %v2485_v49 = vsel %vm3488_vm2, 0, %v2413_v59 }
 0x26d   : > { %v3067_v41 = vcombine.low %v2485_v49, %v2485_v49  ;;  %v3068_v14 = vcombine.high %v2485_v49, %v2485_v49  ;;  %2735 = vst.msk [vmem:[%s3519_s17 + $0xa4] sm:$0x1] %vm2196_vm3, %v3069_v27 }
 0x26e   : > { %2736 = vst.msk [vmem:[%s3519_s17 + $0xa8] sm:$0xf] %vm2693_vm4, %v3070_v0  ;;  %2737 = vst.msk [vmem:[%s3519_s17 + $0xac] sm:$0xf] %vm2693_vm4, %v3071_v40 }
 0x26f   : > { %2733 = vst.msk [vmem:[%s3519_s17 + $0x9c] sm:$0xf] %vm2693_vm4, %v3067_v41  ;;  %2734 = vst.msk [vmem:[%s3519_s17 + $0xa0] sm:$0xf] %vm2693_vm4, %v3068_v14 }
 0x27b   : > { %v3142_v16 = vpop.f32.mrb[12].mxu1 }
 0x27c   : > { %v2121_v58 = vadd.f32 %v3142_v16, %v4620_v8  ;;  %v2112_v36 = vpop.f32.mrb[13].mxu1 }
 0x27d   : > { %v2113_v56 = vadd.f32 %v4620_v8, %v2112_v36  ;;  %v3143_v51 = vpop.f32.mrb[14].mxu1 }
 0x27e   : > { %v2124_v28 = vadd.f32 %v3143_v51, %v4620_v8  ;;  %v2115_v29 = vpop.f32.mrb[15].mxu1  ;;  %v2228_v48 = vmul.f32 %v2121_v58, %v2121_v58  ;;  %v2186_v19 = vsel %vm1655_vm11, %v2121_v58, 0.0 }
 0x27f   : > { %v2182_v21 = vsel %vm1655_vm11, %v2113_v56, 0.0  ;;  %v2226_v62 = vmul.f32 %v2113_v56, %v2113_v56  ;;  %v2116_v7 = vadd.f32 %v4620_v8, %v2115_v29 }
 0x280   : > { %v2183_v22 = vadd.f32 %v2182_v21, %v2181_v5  ;;  %v2315_v2 = vpack.c.bf16 %v2124_v28, %v2121_v58  ;;  %v2229_v33 = vmul.f32 %v2124_v28, %v2124_v28  ;;  %v2289_v32 = vsel %vm1655_vm11, %v2228_v48, 0.0 }
 0x281   : > { %v2285_v15 = vsel %vm1655_vm11, %v2226_v62, 0.0  ;;  %v2184_v17 = vsel %vm1655_vm11, %v2116_v7, 0.0  ;;  %v2227_v13 = vmul.f32 %v2116_v7, %v2116_v7  ;;  %v2314_v57 = vpack.c.bf16 %v2116_v7, %v2113_v56 }
 0x282   : > { %v2286_v31 = vadd.f32 %v2285_v15, %v2284_v45  ;;  %v2185_v55 = vadd.f32 %v2184_v17, %v2183_v22  ;;  %v2429_v44 = vshrl.u32 %v2315_v2, 16  ;;  %v2188_v63 = vsel %vm1655_vm11, %v2124_v28, 0.0 }
 0x283   : > { %v2287_v43 = vsel %vm1655_vm11, %v2227_v13, 0.0  ;;  %v2422_v8 = vshrl.u32 %v2314_v57, 16  ;;  %v2432_v54 = vshll.u32 %v2315_v2, 16  ;;  %v2425_v6 = vshll.u32 %v2314_v57, 16 }
 0x284   : > { %v2187_v10 = vadd.f32 %v2186_v19, %v2185_v55  ;;  %v2288_v23 = vadd.f32 %v2287_v43, %v2286_v31  ;;  %v2431_v52 = vrot.slane %v2429_v44, 7  ;;  %v2291_v46 = vsel %vm1655_vm11, %v2229_v33, 0.0 }
 0x285   : > { %v2424_v11 = vrot.slane %v2422_v8, 7 }
 0x286   : > { %v2189_v12 = vadd.f32 %v2188_v63, %v2187_v10  ;;  %v2290_v4 = vadd.f32 %v2289_v32, %v2288_v23  ;;  %v2434_v42 = vor.u32 %v2432_v54, %v2431_v52  ;;  %v2505_v38 = vsel %vm3488_vm2, %v2431_v52, 0 }
 0x287   : > { %v3078_v30 = vcombine.low %v2505_v38, %v2505_v38  ;;  %v2427_v25 = vor.u32 %v2425_v6, %v2424_v11  ;;  %v2504_v60 = vsel %vm3488_vm2, %v2424_v11, 0 }
 0x288   : > { %v2190_v53 = vrot.slane %v2189_v12, 4  ;;  %v2292_v20 = vadd.f32 %v2291_v46, %v2290_v4  ;;  %v2488_v61 = vsel %vm3488_vm2, 0, %v2434_v42  ;;  %v3075_v5 = vcombine.low %v2504_v60, %v2504_v60 }
 0x289   : > { %v3076_v34 = vcombine.low %v2488_v61, %v2488_v61  ;;  %v3077_v18 = vcombine.high %v2488_v61, %v2488_v61  ;;  %2744 = vst.msk [vmem:[%s3519_s17 + $0xc8] sm:$0x1] %vm2196_vm3, %v3078_v30  ;;  %v2487_v3 = vsel %vm3488_vm2, 0, %v2427_v25 }
 0x28a   : > { %v2191_v24 = vadd.f32 %v2190_v53, %v2189_v12  ;;  %v2293_v37 = vrot.slane %v2292_v20, 4  ;;  %v3073_v1 = vcombine.low %v2487_v3, %v2487_v3  ;;  %v3074_v26 = vcombine.high %v2487_v3, %v2487_v3  ;;  %2741 = vst.msk [vmem:[%s3519_s17 + $0xbc] sm:$0x1] %vm2196_vm3, %v3075_v5 }
 0x28b   : > { %2742 = vst.msk [vmem:[%s3519_s17 + $0xc0] sm:$0xf] %vm2693_vm4, %v3076_v34  ;;  %2743 = vst.msk [vmem:[%s3519_s17 + $0xc4] sm:$0xf] %vm2693_vm4, %v3077_v18 }
 0x28c   : > { %v2192_v47 = vrot.slane %v2191_v24, 2  ;;  %v2294_v35 = vadd.f32 %v2293_v37, %v2292_v20  ;;  %2739 = vst.msk [vmem:[%s3519_s17 + $0xb4] sm:$0xf] %vm2693_vm4, %v3073_v1  ;;  %2740 = vst.msk [vmem:[%s3519_s17 + $0xb8] sm:$0xf] %vm2693_vm4, %v3074_v26 }
 0x28e   : > { %v2193_v59 = vadd.f32 %v2192_v47, %v2191_v24  ;;  %v2295_v39 = vrot.slane %v2294_v35, 2 }
 0x290   : > { %v2194_v9 = vrot.slane %v2193_v59, 1  ;;  %v2296_v45 = vadd.f32 %v2295_v39, %v2294_v35 }
 0x292   : > { %v2195_v50 = vadd.f32 %v2194_v9, %v2193_v59  ;;  %v2297_v27 = vrot.slane %v2296_v45, 1 }
 0x294   : > { %2197 = vst.msk [vmem:[%s384_s20] sm:$0x1] %vm2196_vm3, %v2195_v50  ;;  %v2298_v0 = vadd.f32 %v2297_v27, %v2296_v45 }
 0x296   : > { %2299 = vst.msk [vmem:[%s390_s8] sm:$0x1] %vm2196_vm3, %v2298_v0 }
 0x297 PF: > { %s18_s26 = sadd.s32 1, %s3413_s26   ;;  %s4919_s24 = smov %s3409_s25 }
 0x298   : > { %p15_p5 = scmp.ge.s32.totalorder %s18_s26, 4   ;;  %s4920_s25 = smov %s4922_s27 }
 0x29a   :  { %17 = sbr.rel (!%p15_p5) target bundleno = 2 (0x2), region = 106 }

</bundles_post_ra>
